<compile_context>
chip_gen: v6e
topology: v6e:2x2x1
jax: 0.10.0
libtpu: 0.0.40
codegen_flags: <defaults>
</compile_context>

<pallas_src>
import jax
import jax.numpy as jnp
from jax import lax
from jax.experimental import pallas as pl
from jax.experimental.pallas import tpu as pltpu


_TAPS = tuple((dy, dx) for dy in range(3) for dx in range(3))


def _im2col_3x3(pad_ref, H, W):
    """pad_ref: (H+2, W+2, Cp) zero-padded bf16 tile -> (H*W, 9*Cp) matrix."""
    xp = pad_ref[...]
    Cp = xp.shape[-1]
    cols = [xp[dy:dy + H, dx:dx + W, :].reshape(H * W, Cp) for dy, dx in _TAPS]
    return jnp.concatenate(cols, axis=-1)


def _zero_halo(pad_ref, H, W):
    """Zero only the 1-px halo strips of a (H+2, W+2, Cp) pad scratch."""
    Cp = pad_ref.shape[-1]
    zrow = jnp.zeros((1, W + 2, Cp), pad_ref.dtype)
    zcol = jnp.zeros((H + 2, 1, Cp), pad_ref.dtype)
    pad_ref[pl.ds(0, 1), :, :] = zrow
    pad_ref[pl.ds(H + 1, 1), :, :] = zrow
    pad_ref[:, pl.ds(0, 1), :] = zcol
    pad_ref[:, pl.ds(W + 1, 1), :] = zcol


def resnest_decoder_kernel(x_ref, w1_ref, v1_ref, wsp_ref, v2_ref,
                           wfc1t_ref, v3_ref, wfc2_ref,
                           out_ref, xpad_ref, ypad_ref):
    _, Cin, HW = x_ref.shape
    H = xpad_ref.shape[0] - 2
    W = xpad_ref.shape[1] - 2
    C2 = w1_ref.shape[1]
    C = C2 // 2

    # ---- stage 1: one matmul for [3x3 main conv | 1x1 downsample] + BN -----
    _zero_halo(xpad_ref, H, W)
    # NCHW-native input: (Cin, H*W) lane-dense load, one small XLU relayout.
    xhwc = jnp.transpose(x_ref[0, :, :]).reshape(H, W, Cin)
    xpad_ref[pl.ds(1, H), pl.ds(1, W), :] = xhwc.astype(jnp.bfloat16)
    im1 = _im2col_3x3(xpad_ref, H, W)                         # (HW, 9*Cin) bf16
    v1 = v1_ref[...]
    z = jnp.dot(im1, w1_ref[...], preferred_element_type=jnp.float32)  # (HW, 2C)
    z = z * v1[0:1, :] + v1[1:2, :]                           # folded BN (main | ds)
    y1 = jnp.maximum(z[:, :C], 0.0)                           # main branch: +ReLU
    res = z[:, C:]                                            # residual: BN only

    # ---- stage 2: SplAtConv2d (radix=2, groups=2) + bn0 + ReLU -------------
    _zero_halo(ypad_ref, H, W)
    ypad_ref[pl.ds(1, H), pl.ds(1, W), :] = y1.reshape(H, W, C).astype(jnp.bfloat16)
    im2 = _im2col_3x3(ypad_ref, H, W)                         # (HW, 9*C) bf16
    v2 = v2_ref[...]
    u = jnp.dot(im2, wsp_ref[...], preferred_element_type=jnp.float32)  # (HW, 2C)
    u = jnp.maximum((u + v2[0:1, :]) * v2[1:2, :] + v2[2:3, :], 0.0)    # bias+bn0+ReLU
    u0 = u[:, :C]
    u1 = u[:, C:]

    # split attention: GAP -> fc1+bn1+ReLU -> fc2 -> softmax over radix.
    # M=1 matvecs stay on the VPU (broadcast-mul + reduce), off the MXU.
    gap = jnp.mean(u0 + u1, axis=0, keepdims=True)            # (1, C)
    v3 = v3_ref[...]
    g = jnp.sum(wfc1t_ref[...] * gap, axis=1, keepdims=True)  # (inter, 1)
    g = jnp.maximum((g + v3[:, 0:1]) * v3[:, 1:2] + v3[:, 2:3], 0.0)
    att = jnp.sum(wfc2_ref[...] * g, axis=0, keepdims=True) + v2[3:4, :]  # (1, 2C)
    a0, a1 = att[:, :C], att[:, C:]
    m = jnp.maximum(a0, a1)
    e0 = jnp.exp(a0 - m)
    e1 = jnp.exp(a1 - m)
    inv = pl.reciprocal(e0 + e1, approx=True)                 # EUP slot
    splat = jnp.maximum((e0 * inv) * u0 + (e1 * inv) * u1, 0.0)

    out = jnp.maximum(res + splat, 0.0)                       # (HW, C)
    # lane-dense NCHW store: (C, H*W) with 256 lanes -> unmasked vst
    out_ref[...] = jnp.transpose(out).reshape(1, C, HW)


# ---------------------------------------------------------------------------
# Wrapper: weight folding / packing, pallas_call (no layout transposes)
# ---------------------------------------------------------------------------
def resnest_decoder(x_nchw, P):
    x = x_nchw.astype(jnp.float32)
    B, Cin, H, W = x.shape
    HW = H * W
    C = P['w1'].shape[-1]
    C2 = 2 * C
    inter = P['wfc1'].shape[-1]

    # stage-1 fused weight: cols [0:C] = 3x3 main conv, [C:2C] = 1x1 downsample
    # placed only on the centre-tap (k=4) rows of the im2col K axis.
    w1 = jnp.zeros((9 * Cin, C2), jnp.float32)
    w1 = w1.at[:, :C].set(P['w1'].reshape(9 * Cin, C))
    w1 = w1.at[4 * Cin:5 * Cin, C:].set(P['wds'])
    w1 = w1.astype(jnp.bfloat16)
    wsp = P['wsp'].reshape(9 * C, C2).astype(jnp.bfloat16)
    wfc1t = P['wfc1'].T                                        # (inter, C) f32
    wfc2 = P['wfc2']                                           # (inter, 2C) f32

    # packed per-channel vectors (few input DMA descriptors)
    v1 = jnp.concatenate([jnp.concatenate([P['s1'], P['sds']], axis=1),
                          jnp.concatenate([P['b1'], P['bds']], axis=1)], axis=0)  # (2, 2C)
    v2 = jnp.concatenate([P['bsp'], P['s0'], P['b0'], P['bfc2']], axis=0)         # (4, 2C)
    v3 = jnp.stack([P['bfc1'][0], P['sbn1'][0], P['bbn1'][0]], axis=1)            # (inter, 3)

    x_flat = x.reshape(B, Cin, HW)       # free reshape of NCHW (no transpose)

    def full(shape):
        return pl.BlockSpec(shape, lambda b: (0,) * len(shape))

    out = pl.pallas_call(
        resnest_decoder_kernel,
        out_shape=jax.ShapeDtypeStruct((B, C, HW), jnp.float32),
        grid=(B,),
        in_specs=[pl.BlockSpec((1, Cin, HW), lambda b: (b, 0, 0)),
                  full((9 * Cin, C2)), full((2, C2)),
                  full((9 * C, C2)), full((4, C2)),
                  full((inter, C)), full((inter, 3)),
                  full((inter, C2))],
        out_specs=pl.BlockSpec((1, C, HW), lambda b: (b, 0, 0)),
        scratch_shapes=[pltpu.VMEM((H + 2, W + 2, Cin), jnp.bfloat16),
                        pltpu.VMEM((H + 2, W + 2, C), jnp.bfloat16)],
        compiler_params=pltpu.CompilerParams(
            dimension_semantics=("parallel",),
            vmem_limit_bytes=32 * 1024 * 1024),
    )(x_flat, w1, v1, wsp, v2, wfc1t, v3, wfc2)

    return out.reshape(B, C, H, W)       # NCHW already; free reshape only


# ---------------------------------------------------------------------------
# Deterministic parameter construction (BN folded to inference-mode affine).
# Conv weights are bf16-rounded so the f32 reference uses the exact same
# numerical weights the kernel feeds to the MXU.
# ---------------------------------------------------------------------------
def make_params(key, cin, c):
    c2 = 2 * c
    inter = max(c * 2 // 4, 32)
    ks = iter(jax.random.split(key, 32))
    nk = lambda: next(ks)

    def rnd(shape, scale=0.2):
        return jax.random.normal(nk(), shape, jnp.float32) * scale

    def bn(n):
        gamma = 1.0 + 0.1 * jax.random.normal(nk(), (n,), jnp.float32)
        beta = 0.1 * jax.random.normal(nk(), (n,), jnp.float32)
        mean = 0.1 * jax.random.normal(nk(), (n,), jnp.float32)
        var = jnp.abs(jax.random.normal(nk(), (n,), jnp.float32)) + 0.5
        s = gamma / jnp.sqrt(var + 1e-5)
        b = beta - mean * s
        return s.reshape(1, n), b.reshape(1, n)

    def bd_conv(kh, kw, ci, co, groups, scale=0.2):
        # block-diagonal HWIO weight, equivalent to PyTorch grouped Conv2d
        w = jnp.zeros((kh, kw, ci, co), jnp.float32)
        cig, cog = ci // groups, co // groups
        for g in range(groups):
            blk = jax.random.normal(nk(), (kh, kw, cig, cog), jnp.float32) * scale
            w = w.at[:, :, g * cig:(g + 1) * cig, g * cog:(g + 1) * cog].set(blk)
        return w

    bf16r = lambda w: w.astype(jnp.bfloat16).astype(jnp.float32)

    P = {}
    P['w1'] = bf16r(rnd((3, 3, cin, c)))                  # Conv2d(in,out,3,bias=False)
    P['s1'], P['b1'] = bn(c)                              # BatchNorm2d(out)
    P['wds'] = bf16r(rnd((cin, c)))                       # Conv2d(in,out,1,bias=False)
    P['sds'], P['bds'] = bn(c)                            # BatchNorm2d(out)
    P['wsp'] = bf16r(bd_conv(3, 3, c, c2, 4))             # SplAt conv, groups=2*radix=4
    P['bsp'] = rnd((1, c2), 0.1)                          # its bias
    P['s0'], P['b0'] = bn(c2)                             # bn0
    P['wfc1'] = bd_conv(1, 1, c, inter, 2).reshape(c, inter)    # fc1, groups=2
    P['bfc1'] = rnd((1, inter), 0.1)
    P['sbn1'], P['bbn1'] = bn(inter)                      # bn1
    P['wfc2'] = bd_conv(1, 1, inter, c2, 2).reshape(inter, c2)  # fc2, groups=2
    P['bfc2'] = rnd((1, c2), 0.1)
    return P


# ---------------------------------------------------------------------------
# Pure-JAX f32 reference (for correctness check)
# ---------------------------------------------------------------------------
def ref_forward(x_nhwc, P):
    C = P['w1'].shape[-1]
    dn = ('NHWC', 'HWIO', 'NHWC')
    conv = lambda inp, w: lax.conv_general_dilated(inp, w, (1, 1), 'SAME',
                                                   dimension_numbers=dn)
    B = x_nhwc.shape[0]
    res = jnp.einsum('bhwc,cd->bhwd', x_nhwc, P['wds']) * P['sds'] + P['bds']
    y1 = jnp.maximum(conv(x_nhwc, P['w1']) * P['s1'] + P['b1'], 0.0)
    u = conv(y1, P['wsp']) + P['bsp']
    u = jnp.maximum(u * P['s0'] + P['b0'], 0.0)
    u0, u1 = u[..., :C], u[..., C:]
    gap = jnp.mean(u0 + u1, axis=(1, 2))                  # (B, C)
    g = jnp.maximum((gap @ P['wfc1'] + P['bfc1']) * P['sbn1'] + P['bbn1'], 0.0)
    att = (g @ P['wfc2'] + P['bfc2']).reshape(B, 2, C)
    att = jax.nn.softmax(att, axis=1)
    splat = att[:, 0][:, None, None, :] * u0 + att[:, 1][:, None, None, :] * u1
    splat = jnp.maximum(splat, 0.0)
    return jnp.maximum(res + splat, 0.0)


if __name__ == "__main__":
    key = jax.random.PRNGKey(0)
    kx, kp = jax.random.split(key)

    B, Cin, Cout, H, W = 2, 8, 16, 16, 16
    x = jax.random.normal(kx, (B, Cin, H, W), jnp.float32)    # NCHW like PyTorch
    params = make_params(kp, Cin, Cout)

    out = resnest_decoder(x, params)
    out = jax.block_until_ready(out)

    ref = ref_forward(jnp.transpose(x, (0, 2, 3, 1)), params)
    ref = jnp.transpose(ref, (0, 3, 1, 2))
    err_max = float(jnp.max(jnp.abs(out - ref)))
    err_mean = float(jnp.mean(jnp.abs(out - ref)))
    assert out.shape == (B, Cout, H, W), out.shape
    # Conv matmuls use bf16 operands (f32 accumulation) and the softmax uses
    # an EUP approx reciprocal; expected max deviation from the pure-f32
    # reference is ~3e-2 at these magnitudes.
    assert err_max < 1e-1 and err_mean < 2e-2, (err_max, err_mean)

    print("KERNEL_OK")
</pallas_src>

<mosaic_0001>
module attributes {stable_mosaic.version = 11 : i64} {
  func.func @resnest_decoder_kernel(%arg0: i32, %arg1: memref<1x8x256xf32, #tpu.memory_space<vmem>>, %arg2: memref<72x32xbf16, #tpu.memory_space<vmem>>, %arg3: memref<2x32xf32, #tpu.memory_space<vmem>>, %arg4: memref<144x32xbf16, #tpu.memory_space<vmem>>, %arg5: memref<4x32xf32, #tpu.memory_space<vmem>>, %arg6: memref<32x16xf32, #tpu.memory_space<vmem>>, %arg7: memref<32x3xf32, #tpu.memory_space<vmem>>, %arg8: memref<32x32xf32, #tpu.memory_space<vmem>>, %arg9: memref<1x16x256xf32, #tpu.memory_space<vmem>>, %arg10: memref<18x18x8xbf16, #tpu.memory_space<vmem>>, %arg11: memref<18x18x16xbf16, #tpu.memory_space<vmem>>) attributes {dimension_semantics = [#tpu.dimension_semantics<parallel>], iteration_bounds = array<i64: 2>, scalar_prefetch = 0 : i64, scratch_operands = 2 : i64, tpu.core_type = #tpu.core_type<tc>, window_params = [{transform_indices = @transform_0, window_bounds = array<i64: 1, 8, 256>}, {pipeline_mode = #tpu.pipeline_mode<synchronous>, transform_indices = @transform_1, window_bounds = array<i64: 72, 32>}, {pipeline_mode = #tpu.pipeline_mode<synchronous>, transform_indices = @transform_2, window_bounds = array<i64: 2, 32>}, {pipeline_mode = #tpu.pipeline_mode<synchronous>, transform_indices = @transform_3, window_bounds = array<i64: 144, 32>}, {pipeline_mode = #tpu.pipeline_mode<synchronous>, transform_indices = @transform_4, window_bounds = array<i64: 4, 32>}, {pipeline_mode = #tpu.pipeline_mode<synchronous>, transform_indices = @transform_5, window_bounds = array<i64: 32, 16>}, {pipeline_mode = #tpu.pipeline_mode<synchronous>, transform_indices = @transform_6, window_bounds = array<i64: 32, 3>}, {pipeline_mode = #tpu.pipeline_mode<synchronous>, transform_indices = @transform_7, window_bounds = array<i64: 32, 32>}, {transform_indices = @transform_8, window_bounds = array<i64: 1, 16, 256>}]} {
    %cst = arith.constant 0.000000e+00 : bf16
    %0 = vector.broadcast %cst : bf16 to vector<1x18x8xbf16>
    %cst_0 = arith.constant 0.000000e+00 : bf16
    %1 = vector.broadcast %cst_0 : bf16 to vector<18x1x8xbf16>
    %c0 = arith.constant 0 : index
    %c0_1 = arith.constant 0 : index
    %c0_2 = arith.constant 0 : index
    %2 = vector.load %arg10[%c0, %c0_1, %c0_2] : memref<18x18x8xbf16, #tpu.memory_space<vmem>>, vector<1x18x8xbf16>
    tpu.vector_store %arg10[%c0, %c0_1, %c0_2], %0 {strides = array<i32>} : memref<18x18x8xbf16, #tpu.memory_space<vmem>>, vector<1x18x8xbf16>,
    %c17 = arith.constant 17 : index
    %c0_3 = arith.constant 0 : index
    %c0_4 = arith.constant 0 : index
    %3 = vector.load %arg10[%c17, %c0_3, %c0_4] : memref<18x18x8xbf16, #tpu.memory_space<vmem>>, vector<1x18x8xbf16>
    tpu.vector_store %arg10[%c17, %c0_3, %c0_4], %0 {strides = array<i32>} : memref<18x18x8xbf16, #tpu.memory_space<vmem>>, vector<1x18x8xbf16>,
    %c0_5 = arith.constant 0 : index
    %c0_6 = arith.constant 0 : index
    %c0_7 = arith.constant 0 : index
    %4 = vector.load %arg10[%c0_5, %c0_6, %c0_7] : memref<18x18x8xbf16, #tpu.memory_space<vmem>>, vector<18x1x8xbf16>
    tpu.vector_store %arg10[%c0_5, %c0_6, %c0_7], %1 {strides = array<i32>} : memref<18x18x8xbf16, #tpu.memory_space<vmem>>, vector<18x1x8xbf16>,
    %c0_8 = arith.constant 0 : index
    %c17_9 = arith.constant 17 : index
    %c0_10 = arith.constant 0 : index
    %5 = vector.load %arg10[%c0_8, %c17_9, %c0_10] : memref<18x18x8xbf16, #tpu.memory_space<vmem>>, vector<18x1x8xbf16>
    tpu.vector_store %arg10[%c0_8, %c17_9, %c0_10], %1 {strides = array<i32>} : memref<18x18x8xbf16, #tpu.memory_space<vmem>>, vector<18x1x8xbf16>,
    %c0_11 = arith.constant 0 : index
    %c0_12 = arith.constant 0 : index
    %c0_13 = arith.constant 0 : index
    %6 = vector.load %arg1[%c0_11, %c0_12, %c0_13] : memref<1x8x256xf32, #tpu.memory_space<vmem>>, vector<1x8x256xf32>
    %7 = vector.shape_cast %6 : vector<1x8x256xf32> to vector<8x256xf32>
    %8 = tpu.transpose %7, [1, 0] : vector<8x256xf32> -> vector<256x8xf32>
    %9 = vector.shape_cast %8 : vector<256x8xf32> to vector<16x16x8xf32>
    %10 = arith.truncf %9 : vector<16x16x8xf32> to vector<16x16x8xbf16>
    %c1 = arith.constant 1 : index
    %c1_14 = arith.constant 1 : index
    %c0_15 = arith.constant 0 : index
    %11 = vector.load %arg10[%c1, %c1_14, %c0_15] : memref<18x18x8xbf16, #tpu.memory_space<vmem>>, vector<16x16x8xbf16>
    tpu.vector_store %arg10[%c1, %c1_14, %c0_15], %10 {strides = array<i32>} : memref<18x18x8xbf16, #tpu.memory_space<vmem>>, vector<16x16x8xbf16>,
    %c0_16 = arith.constant 0 : index
    %c0_17 = arith.constant 0 : index
    %c0_18 = arith.constant 0 : index
    %12 = vector.load %arg10[%c0_16, %c0_17, %c0_18] : memref<18x18x8xbf16, #tpu.memory_space<vmem>>, vector<18x18x8xbf16>
    %13 = vector.extract_strided_slice %12 {offsets = [0, 0, 0], sizes = [16, 16, 8], strides = [1, 1, 1]} : vector<18x18x8xbf16> to vector<16x16x8xbf16>
    %14 = vector.shape_cast %13 : vector<16x16x8xbf16> to vector<256x8xbf16>
    %15 = vector.extract_strided_slice %12 {offsets = [0, 1, 0], sizes = [16, 16, 8], strides = [1, 1, 1]} : vector<18x18x8xbf16> to vector<16x16x8xbf16>
    %16 = vector.shape_cast %15 : vector<16x16x8xbf16> to vector<256x8xbf16>
    %17 = vector.extract_strided_slice %12 {offsets = [0, 2, 0], sizes = [16, 16, 8], strides = [1, 1, 1]} : vector<18x18x8xbf16> to vector<16x16x8xbf16>
    %18 = vector.shape_cast %17 : vector<16x16x8xbf16> to vector<256x8xbf16>
    %19 = vector.extract_strided_slice %12 {offsets = [1, 0, 0], sizes = [16, 16, 8], strides = [1, 1, 1]} : vector<18x18x8xbf16> to vector<16x16x8xbf16>
    %20 = vector.shape_cast %19 : vector<16x16x8xbf16> to vector<256x8xbf16>
    %21 = vector.extract_strided_slice %12 {offsets = [1, 1, 0], sizes = [16, 16, 8], strides = [1, 1, 1]} : vector<18x18x8xbf16> to vector<16x16x8xbf16>
    %22 = vector.shape_cast %21 : vector<16x16x8xbf16> to vector<256x8xbf16>
    %23 = vector.extract_strided_slice %12 {offsets = [1, 2, 0], sizes = [16, 16, 8], strides = [1, 1, 1]} : vector<18x18x8xbf16> to vector<16x16x8xbf16>
    %24 = vector.shape_cast %23 : vector<16x16x8xbf16> to vector<256x8xbf16>
    %25 = vector.extract_strided_slice %12 {offsets = [2, 0, 0], sizes = [16, 16, 8], strides = [1, 1, 1]} : vector<18x18x8xbf16> to vector<16x16x8xbf16>
    %26 = vector.shape_cast %25 : vector<16x16x8xbf16> to vector<256x8xbf16>
    %27 = vector.extract_strided_slice %12 {offsets = [2, 1, 0], sizes = [16, 16, 8], strides = [1, 1, 1]} : vector<18x18x8xbf16> to vector<16x16x8xbf16>
    %28 = vector.shape_cast %27 : vector<16x16x8xbf16> to vector<256x8xbf16>
    %29 = vector.extract_strided_slice %12 {offsets = [2, 2, 0], sizes = [16, 16, 8], strides = [1, 1, 1]} : vector<18x18x8xbf16> to vector<16x16x8xbf16>
    %30 = vector.shape_cast %29 : vector<16x16x8xbf16> to vector<256x8xbf16>
    %31 = tpu.concatenate %14, %16, %18, %20, %22, %24, %26, %28, %30 in 1 : vector<256x8xbf16>, vector<256x8xbf16>, vector<256x8xbf16>, vector<256x8xbf16>, vector<256x8xbf16>, vector<256x8xbf16>, vector<256x8xbf16>, vector<256x8xbf16>, vector<256x8xbf16> -> vector<256x72xbf16>
    %c0_19 = arith.constant 0 : index
    %c0_20 = arith.constant 0 : index
    %32 = vector.load %arg3[%c0_19, %c0_20] : memref<2x32xf32, #tpu.memory_space<vmem>>, vector<2x32xf32>
    %c0_21 = arith.constant 0 : index
    %c0_22 = arith.constant 0 : index
    %33 = vector.load %arg2[%c0_21, %c0_22] : memref<72x32xbf16, #tpu.memory_space<vmem>>, vector<72x32xbf16>
    %cst_23 = arith.constant dense<0.000000e+00> : vector<256x32xf32>
    %34 = tpu.matmul %31, %33, %cst_23 {dimension_numbers = #tpu.dot_dimension_numbers<[1], [0], [0], [1], [0, 0, 1, 1], [], []>} : vector<256x72xbf16>, vector<72x32xbf16>, vector<256x32xf32> -> vector<256x32xf32>
    %35 = vector.extract_strided_slice %32 {offsets = [0, 0], sizes = [1, 32], strides = [1, 1]} : vector<2x32xf32> to vector<1x32xf32>
    %36 = vector.broadcast %35 : vector<1x32xf32> to vector<256x32xf32>
    %37 = arith.mulf %34, %36 : vector<256x32xf32>
    %38 = vector.extract_strided_slice %32 {offsets = [1, 0], sizes = [1, 32], strides = [1, 1]} : vector<2x32xf32> to vector<1x32xf32>
    %39 = vector.broadcast %38 : vector<1x32xf32> to vector<256x32xf32>
    %40 = arith.addf %37, %39 : vector<256x32xf32>
    %41 = vector.extract_strided_slice %40 {offsets = [0, 0], sizes = [256, 16], strides = [1, 1]} : vector<256x32xf32> to vector<256x16xf32>
    %cst_24 = arith.constant 0.000000e+00 : f32
    %42 = vector.broadcast %cst_24 : f32 to vector<256x16xf32>
    %43 = arith.maximumf %41, %42 : vector<256x16xf32>
    %44 = vector.extract_strided_slice %40 {offsets = [0, 16], sizes = [256, 16], strides = [1, 1]} : vector<256x32xf32> to vector<256x16xf32>
    %cst_25 = arith.constant 0.000000e+00 : bf16
    %45 = vector.broadcast %cst_25 : bf16 to vector<1x18x16xbf16>
    %cst_26 = arith.constant 0.000000e+00 : bf16
    %46 = vector.broadcast %cst_26 : bf16 to vector<18x1x16xbf16>
    %c0_27 = arith.constant 0 : index
    %c0_28 = arith.constant 0 : index
    %c0_29 = arith.constant 0 : index
    %47 = vector.load %arg11[%c0_27, %c0_28, %c0_29] : memref<18x18x16xbf16, #tpu.memory_space<vmem>>, vector<1x18x16xbf16>
    tpu.vector_store %arg11[%c0_27, %c0_28, %c0_29], %45 {strides = array<i32>} : memref<18x18x16xbf16, #tpu.memory_space<vmem>>, vector<1x18x16xbf16>,
    %c17_30 = arith.constant 17 : index
    %c0_31 = arith.constant 0 : index
    %c0_32 = arith.constant 0 : index
    %48 = vector.load %arg11[%c17_30, %c0_31, %c0_32] : memref<18x18x16xbf16, #tpu.memory_space<vmem>>, vector<1x18x16xbf16>
    tpu.vector_store %arg11[%c17_30, %c0_31, %c0_32], %45 {strides = array<i32>} : memref<18x18x16xbf16, #tpu.memory_space<vmem>>, vector<1x18x16xbf16>,
    %c0_33 = arith.constant 0 : index
    %c0_34 = arith.constant 0 : index
    %c0_35 = arith.constant 0 : index
    %49 = vector.load %arg11[%c0_33, %c0_34, %c0_35] : memref<18x18x16xbf16, #tpu.memory_space<vmem>>, vector<18x1x16xbf16>
    tpu.vector_store %arg11[%c0_33, %c0_34, %c0_35], %46 {strides = array<i32>} : memref<18x18x16xbf16, #tpu.memory_space<vmem>>, vector<18x1x16xbf16>,
    %c0_36 = arith.constant 0 : index
    %c17_37 = arith.constant 17 : index
    %c0_38 = arith.constant 0 : index
    %50 = vector.load %arg11[%c0_36, %c17_37, %c0_38] : memref<18x18x16xbf16, #tpu.memory_space<vmem>>, vector<18x1x16xbf16>
    tpu.vector_store %arg11[%c0_36, %c17_37, %c0_38], %46 {strides = array<i32>} : memref<18x18x16xbf16, #tpu.memory_space<vmem>>, vector<18x1x16xbf16>,
    %51 = vector.shape_cast %43 : vector<256x16xf32> to vector<16x16x16xf32>
    %52 = arith.truncf %51 : vector<16x16x16xf32> to vector<16x16x16xbf16>
    %c1_39 = arith.constant 1 : index
    %c1_40 = arith.constant 1 : index
    %c0_41 = arith.constant 0 : index
    %53 = vector.load %arg11[%c1_39, %c1_40, %c0_41] : memref<18x18x16xbf16, #tpu.memory_space<vmem>>, vector<16x16x16xbf16>
    tpu.vector_store %arg11[%c1_39, %c1_40, %c0_41], %52 {strides = array<i32>} : memref<18x18x16xbf16, #tpu.memory_space<vmem>>, vector<16x16x16xbf16>,
    %c0_42 = arith.constant 0 : index
    %c0_43 = arith.constant 0 : index
    %c0_44 = arith.constant 0 : index
    %54 = vector.load %arg11[%c0_42, %c0_43, %c0_44] : memref<18x18x16xbf16, #tpu.memory_space<vmem>>, vector<18x18x16xbf16>
    %55 = vector.extract_strided_slice %54 {offsets = [0, 0, 0], sizes = [16, 16, 16], strides = [1, 1, 1]} : vector<18x18x16xbf16> to vector<16x16x16xbf16>
    %56 = vector.shape_cast %55 : vector<16x16x16xbf16> to vector<256x16xbf16>
    %57 = vector.extract_strided_slice %54 {offsets = [0, 1, 0], sizes = [16, 16, 16], strides = [1, 1, 1]} : vector<18x18x16xbf16> to vector<16x16x16xbf16>
    %58 = vector.shape_cast %57 : vector<16x16x16xbf16> to vector<256x16xbf16>
    %59 = vector.extract_strided_slice %54 {offsets = [0, 2, 0], sizes = [16, 16, 16], strides = [1, 1, 1]} : vector<18x18x16xbf16> to vector<16x16x16xbf16>
    %60 = vector.shape_cast %59 : vector<16x16x16xbf16> to vector<256x16xbf16>
    %61 = vector.extract_strided_slice %54 {offsets = [1, 0, 0], sizes = [16, 16, 16], strides = [1, 1, 1]} : vector<18x18x16xbf16> to vector<16x16x16xbf16>
    %62 = vector.shape_cast %61 : vector<16x16x16xbf16> to vector<256x16xbf16>
    %63 = vector.extract_strided_slice %54 {offsets = [1, 1, 0], sizes = [16, 16, 16], strides = [1, 1, 1]} : vector<18x18x16xbf16> to vector<16x16x16xbf16>
    %64 = vector.shape_cast %63 : vector<16x16x16xbf16> to vector<256x16xbf16>
    %65 = vector.extract_strided_slice %54 {offsets = [1, 2, 0], sizes = [16, 16, 16], strides = [1, 1, 1]} : vector<18x18x16xbf16> to vector<16x16x16xbf16>
    %66 = vector.shape_cast %65 : vector<16x16x16xbf16> to vector<256x16xbf16>
    %67 = vector.extract_strided_slice %54 {offsets = [2, 0, 0], sizes = [16, 16, 16], strides = [1, 1, 1]} : vector<18x18x16xbf16> to vector<16x16x16xbf16>
    %68 = vector.shape_cast %67 : vector<16x16x16xbf16> to vector<256x16xbf16>
    %69 = vector.extract_strided_slice %54 {offsets = [2, 1, 0], sizes = [16, 16, 16], strides = [1, 1, 1]} : vector<18x18x16xbf16> to vector<16x16x16xbf16>
    %70 = vector.shape_cast %69 : vector<16x16x16xbf16> to vector<256x16xbf16>
    %71 = vector.extract_strided_slice %54 {offsets = [2, 2, 0], sizes = [16, 16, 16], strides = [1, 1, 1]} : vector<18x18x16xbf16> to vector<16x16x16xbf16>
    %72 = vector.shape_cast %71 : vector<16x16x16xbf16> to vector<256x16xbf16>
    %73 = tpu.concatenate %56, %58, %60, %62, %64, %66, %68, %70, %72 in 1 : vector<256x16xbf16>, vector<256x16xbf16>, vector<256x16xbf16>, vector<256x16xbf16>, vector<256x16xbf16>, vector<256x16xbf16>, vector<256x16xbf16>, vector<256x16xbf16>, vector<256x16xbf16> -> vector<256x144xbf16>
    %c0_45 = arith.constant 0 : index
    %c0_46 = arith.constant 0 : index
    %74 = vector.load %arg5[%c0_45, %c0_46] : memref<4x32xf32, #tpu.memory_space<vmem>>, vector<4x32xf32>
    %c0_47 = arith.constant 0 : index
    %c0_48 = arith.constant 0 : index
    %75 = vector.load %arg4[%c0_47, %c0_48] : memref<144x32xbf16, #tpu.memory_space<vmem>>, vector<144x32xbf16>
    %cst_49 = arith.constant dense<0.000000e+00> : vector<256x32xf32>
    %76 = tpu.matmul %73, %75, %cst_49 {dimension_numbers = #tpu.dot_dimension_numbers<[1], [0], [0], [1], [0, 0, 1, 1], [], []>} : vector<256x144xbf16>, vector<144x32xbf16>, vector<256x32xf32> -> vector<256x32xf32>
    %77 = vector.extract_strided_slice %74 {offsets = [0, 0], sizes = [1, 32], strides = [1, 1]} : vector<4x32xf32> to vector<1x32xf32>
    %78 = vector.broadcast %77 : vector<1x32xf32> to vector<256x32xf32>
    %79 = arith.addf %76, %78 : vector<256x32xf32>
    %80 = vector.extract_strided_slice %74 {offsets = [1, 0], sizes = [1, 32], strides = [1, 1]} : vector<4x32xf32> to vector<1x32xf32>
    %81 = vector.broadcast %80 : vector<1x32xf32> to vector<256x32xf32>
    %82 = arith.mulf %79, %81 : vector<256x32xf32>
    %83 = vector.extract_strided_slice %74 {offsets = [2, 0], sizes = [1, 32], strides = [1, 1]} : vector<4x32xf32> to vector<1x32xf32>
    %84 = vector.broadcast %83 : vector<1x32xf32> to vector<256x32xf32>
    %85 = arith.addf %82, %84 : vector<256x32xf32>
    %cst_50 = arith.constant 0.000000e+00 : f32
    %86 = vector.broadcast %cst_50 : f32 to vector<256x32xf32>
    %87 = arith.maximumf %85, %86 : vector<256x32xf32>
    %88 = vector.extract_strided_slice %87 {offsets = [0, 0], sizes = [256, 16], strides = [1, 1]} : vector<256x32xf32> to vector<256x16xf32>
    %89 = vector.extract_strided_slice %87 {offsets = [0, 16], sizes = [256, 16], strides = [1, 1]} : vector<256x32xf32> to vector<256x16xf32>
    %90 = arith.addf %88, %89 : vector<256x16xf32>
    %cst_51 = arith.constant dense<0.000000e+00> : vector<16xf32>
    %91 = vector.multi_reduction <add>, %90, %cst_51 [0] : vector<256x16xf32> to vector<16xf32>
    %92 = vector.shape_cast %91 : vector<16xf32> to vector<1x16xf32>
    %cst_52 = arith.constant 2.560000e+02 : f32
    %93 = vector.broadcast %cst_52 : f32 to vector<1x16xf32>
    %94 = arith.divf %92, %93 : vector<1x16xf32>
    %c0_53 = arith.constant 0 : index
    %c0_54 = arith.constant 0 : index
    %95 = vector.load %arg7[%c0_53, %c0_54] : memref<32x3xf32, #tpu.memory_space<vmem>>, vector<32x3xf32>
    %c0_55 = arith.constant 0 : index
    %c0_56 = arith.constant 0 : index
    %96 = vector.load %arg6[%c0_55, %c0_56] : memref<32x16xf32, #tpu.memory_space<vmem>>, vector<32x16xf32>
    %97 = vector.broadcast %94 : vector<1x16xf32> to vector<32x16xf32>
    %98 = arith.mulf %96, %97 : vector<32x16xf32>
    %cst_57 = arith.constant dense<0.000000e+00> : vector<32xf32>
    %99 = vector.multi_reduction <add>, %98, %cst_57 [1] : vector<32x16xf32> to vector<32xf32>
    %100 = vector.shape_cast %99 : vector<32xf32> to vector<32x1xf32>
    %101 = vector.extract_strided_slice %95 {offsets = [0, 0], sizes = [32, 1], strides = [1, 1]} : vector<32x3xf32> to vector<32x1xf32>
    %102 = arith.addf %100, %101 : vector<32x1xf32>
    %103 = vector.extract_strided_slice %95 {offsets = [0, 1], sizes = [32, 1], strides = [1, 1]} : vector<32x3xf32> to vector<32x1xf32>
    %104 = arith.mulf %102, %103 : vector<32x1xf32>
    %105 = vector.extract_strided_slice %95 {offsets = [0, 2], sizes = [32, 1], strides = [1, 1]} : vector<32x3xf32> to vector<32x1xf32>
    %106 = arith.addf %104, %105 : vector<32x1xf32>
    %cst_58 = arith.constant 0.000000e+00 : f32
    %107 = vector.broadcast %cst_58 : f32 to vector<32x1xf32>
    %108 = arith.maximumf %106, %107 : vector<32x1xf32>
    %c0_59 = arith.constant 0 : index
    %c0_60 = arith.constant 0 : index
    %109 = vector.load %arg8[%c0_59, %c0_60] : memref<32x32xf32, #tpu.memory_space<vmem>>, vector<32x32xf32>
    %110 = vector.broadcast %108 : vector<32x1xf32> to vector<32x32xf32>
    %111 = arith.mulf %109, %110 : vector<32x32xf32>
    %cst_61 = arith.constant dense<0.000000e+00> : vector<32xf32>
    %112 = vector.multi_reduction <add>, %111, %cst_61 [0] : vector<32x32xf32> to vector<32xf32>
    %113 = vector.shape_cast %112 : vector<32xf32> to vector<1x32xf32>
    %114 = vector.extract_strided_slice %74 {offsets = [3, 0], sizes = [1, 32], strides = [1, 1]} : vector<4x32xf32> to vector<1x32xf32>
    %115 = arith.addf %113, %114 : vector<1x32xf32>
    %116 = vector.extract_strided_slice %115 {offsets = [0, 0], sizes = [1, 16], strides = [1, 1]} : vector<1x32xf32> to vector<1x16xf32>
    %117 = vector.extract_strided_slice %115 {offsets = [0, 16], sizes = [1, 16], strides = [1, 1]} : vector<1x32xf32> to vector<1x16xf32>
    %118 = arith.maximumf %116, %117 : vector<1x16xf32>
    %119 = arith.subf %116, %118 : vector<1x16xf32>
    %120 = math.exp %119 : vector<1x16xf32>
    %121 = arith.subf %117, %118 : vector<1x16xf32>
    %122 = math.exp %121 : vector<1x16xf32>
    %123 = arith.addf %120, %122 : vector<1x16xf32>
    %124 = tpu.reciprocal %123 {approx = true} : vector<1x16xf32> -> vector<1x16xf32>
    %125 = arith.mulf %120, %124 : vector<1x16xf32>
    %126 = vector.broadcast %125 : vector<1x16xf32> to vector<256x16xf32>
    %127 = arith.mulf %126, %88 : vector<256x16xf32>
    %128 = arith.mulf %122, %124 : vector<1x16xf32>
    %129 = vector.broadcast %128 : vector<1x16xf32> to vector<256x16xf32>
    %130 = arith.mulf %129, %89 : vector<256x16xf32>
    %131 = arith.addf %127, %130 : vector<256x16xf32>
    %cst_62 = arith.constant 0.000000e+00 : f32
    %132 = vector.broadcast %cst_62 : f32 to vector<256x16xf32>
    %133 = arith.maximumf %131, %132 : vector<256x16xf32>
    %134 = arith.addf %44, %133 : vector<256x16xf32>
    %cst_63 = arith.constant 0.000000e+00 : f32
    %135 = vector.broadcast %cst_63 : f32 to vector<256x16xf32>
    %136 = arith.maximumf %134, %135 : vector<256x16xf32>
    %137 = tpu.transpose %136, [1, 0] : vector<256x16xf32> -> vector<16x256xf32>
    %138 = vector.shape_cast %137 : vector<16x256xf32> to vector<1x16x256xf32>
    %c0_64 = arith.constant 0 : index
    %c0_65 = arith.constant 0 : index
    %c0_66 = arith.constant 0 : index
    %139 = vector.load %arg9[%c0_64, %c0_65, %c0_66] : memref<1x16x256xf32, #tpu.memory_space<vmem>>, vector<1x16x256xf32>
    tpu.vector_store %arg9[%c0_64, %c0_65, %c0_66], %138 {strides = array<i32>} : memref<1x16x256xf32, #tpu.memory_space<vmem>>, vector<1x16x256xf32>,
    return
  }
  func.func @transform_0(%arg0: i32) -> (i32, i32, i32) {
    %c0_i32 = arith.constant 0 : i32
    %c0_i32_0 = arith.constant 0 : i32
    %c0_i32_1 = arith.constant 0 : i32
    return %arg0, %c0_i32, %c0_i32_0 : i32, i32, i32
  }
  func.func @transform_1(%arg0: i32) -> (i32, i32) {
    %c0_i32 = arith.constant 0 : i32
    %c0_i32_0 = arith.constant 0 : i32
    %c0_i32_1 = arith.constant 0 : i32
    return %c0_i32, %c0_i32_0 : i32, i32
  }
  func.func @transform_2(%arg0: i32) -> (i32, i32) {
    %c0_i32 = arith.constant 0 : i32
    %c0_i32_0 = arith.constant 0 : i32
    %c0_i32_1 = arith.constant 0 : i32
    return %c0_i32, %c0_i32_0 : i32, i32
  }
  func.func @transform_3(%arg0: i32) -> (i32, i32) {
    %c0_i32 = arith.constant 0 : i32
    %c0_i32_0 = arith.constant 0 : i32
    %c0_i32_1 = arith.constant 0 : i32
    return %c0_i32, %c0_i32_0 : i32, i32
  }
  func.func @transform_4(%arg0: i32) -> (i32, i32) {
    %c0_i32 = arith.constant 0 : i32
    %c0_i32_0 = arith.constant 0 : i32
    %c0_i32_1 = arith.constant 0 : i32
    return %c0_i32, %c0_i32_0 : i32, i32
  }
  func.func @transform_5(%arg0: i32) -> (i32, i32) {
    %c0_i32 = arith.constant 0 : i32
    %c0_i32_0 = arith.constant 0 : i32
    %c0_i32_1 = arith.constant 0 : i32
    return %c0_i32, %c0_i32_0 : i32, i32
  }
  func.func @transform_6(%arg0: i32) -> (i32, i32) {
    %c0_i32 = arith.constant 0 : i32
    %c0_i32_0 = arith.constant 0 : i32
    %c0_i32_1 = arith.constant 0 : i32
    return %c0_i32, %c0_i32_0 : i32, i32
  }
  func.func @transform_7(%arg0: i32) -> (i32, i32) {
    %c0_i32 = arith.constant 0 : i32
    %c0_i32_0 = arith.constant 0 : i32
    %c0_i32_1 = arith.constant 0 : i32
    return %c0_i32, %c0_i32_0 : i32, i32
  }
  func.func @transform_8(%arg0: i32) -> (i32, i32, i32) {
    %c0_i32 = arith.constant 0 : i32
    %c0_i32_0 = arith.constant 0 : i32
    %c0_i32_1 = arith.constant 0 : i32
    return %arg0, %c0_i32, %c0_i32_0 : i32, i32, i32
  }
}

</mosaic_0001>

<bundles_post_ra>
// kernel: tpu_custom_call.1
= control target key start
LH: loop header
LB: loop body
LE: loop exit
PB: predicated region body
PF: predicated region fallthrough
CT: control target
= control target key end

     0   :  { %13 = vsyncpa [#allocation5], 0  ;;  %s10477_s0 = inlined_call_operand.vmem [shape: f32[2,8,256], index: 0, kind: input, shape index: {}]   ;;  %s10478_s1 = inlined_call_operand.vmem [shape: bf16[72,32], index: 1, kind: input, shape index: {}]   ;;  %s10479_s2 = inlined_call_operand.vmem [shape: f32[2,32], index: 2, kind: input, shape index: {}]   ;;  %s10480_s3 = inlined_call_operand.vmem [shape: bf16[144,32], index: 3, kind: input, shape index: {}]   ;;  %s10481_s4 = inlined_call_operand.vmem [shape: f32[4,32], index: 4, kind: input, shape index: {}]   ;;  %s10482_s5 = inlined_call_operand.vmem [shape: f32[32,16], index: 5, kind: input, shape index: {}]   ;;  %s10483_s6 = inlined_call_operand.vmem [shape: f32[32,3], index: 6, kind: input, shape index: {}]   ;;  %s10484_s7 = inlined_call_operand.vmem [shape: f32[32,32], index: 7, kind: input, shape index: {}]   ;;  %s10485_s8 = inlined_call_operand.hbm [shape: f32[2,16,256], index: 8, kind: output, shape index: {}]  }
   0x1   :  { %15 = vsyncpa [#allocation5 + $0x1], 0  ;;  %s6914_s27 = smov 0   ;;  %s6916_s28 = smov 0  }
   0x2   :  { %s6918_s29 = smov 0   ;;  %s6920_s30 = smov 0  }
   0x3 LB: > { %s6935_s9 = sadd.s32 4294967295, %s6851_s30   ;;  %s6183_s10 = sadd.s32 4294967294, %s6851_s30   ;;  %s6851_s30 = sphi %s6920_s30, %s10697_s30   ;;  %s6847_s29 = sphi %s6918_s29, %s10696_s29   ;;  %s6843_s28 = sphi %s6916_s28, %s10695_s28   ;;  %s6839_s27 = sphi %s6914_s27, %s10694_s27  }
   0x4   : > { %s6939_s11 = sadd.s32 1, %s6851_s30   ;;  %s201_s12 = sadd.s32 1, %s6847_s29 }
   0x5   : > { %s198_s13 = ssub.s32 %s6851_s30, %s6939_s11  ;;  %p211_p0 = scmp.ne.s32.totalorder %s6847_s29, %s6843_s28 }
   0x6   : > { %p199_p1 = scmp.eq.s32.totalorder %s198_s13, 0  ;;  %p212_p2 = scmp.eq.s32.totalorder %s6935_s9, 1 }
   0x7   : > { %p217_p3 = scmp.ne.s32.totalorder %s6843_s28, %s6839_s27  ;;  %p218_p4 = scmp.eq.s32.totalorder %s6183_s10, 1 }
   0x8   : > { %s6950_s14 = scalar_select %p199_p1, %s6847_s29, %s201_s12  }
   0x9   : > { %p6952_p5 = por %p212_p2, %p211_p0  ;;  %p6956_p6 = por %p218_p4, %p217_p3 }
   0xa   : > { %p6186_p7 = scmp.ge.s32.totalorder %s6851_s30, 1  ;;  %p265_p8 = scmp.lt.s32.totalorder %s6851_s30, 3 }
   0xc   : > { %p266_p9 = pnand %p6186_p7, %p265_p8 }
   0xe   : > { %269 = sbr.rel (%p266_p9) target bundleno = 2681 (0xa79), region = 52 }
  0x13   : > { %p299_p10 = scmp.lt.s32.totalorder %s6935_s9, 1  ;;  %vm308_vm0 = vcmask 57344   ;;  %vm315_vm1 = vsmask.f32 256  ;;  %vm305_vm2 = vcmask 60416   ;;  %v10486_v5 = vmov 0  }
  0x14   : > { %vm6965_vm3 = vmand %vm308_vm0, %vm315_vm1  ;;  %v320_v1 = vld [vmem:[#allocation2 + $0xc] sm:$0x1]  ;;  %306 = vst.msk [vmem:[#allocation2] sm:$0xf] %vm305_vm2, %v10486_v5  ;;  %6578 = vmatprep.subr.bf16.mxu1 %v10486_v5  ;;  %6735 = vset.pattern.permute.xlu1 %v10486_v5  ;;  %vm371_vm4 = vsmask.f32 7938 }
  0x15   : > { %v344_v2 = vld [vmem:[#allocation2 + $0x6c] sm:$0x1]  ;;  %s300_s17 = scalar_select %p299_p10, %s6935_s9, 1  ;;  %v321_v3 = vsel %vm6965_vm3, 0, %v320_v1  ;;  %307 = vst.msk [vmem:[#allocation2 + $0x4] sm:$0xf] %vm305_vm2, %v10486_v5  ;;  %vm6993_vm5 = vmand %vm308_vm0, %vm371_vm4 }
  0x16   : > { %v345_v4 = vsel %vm6965_vm3, 0, %v344_v2  ;;  %322 = vst [vmem:[#allocation2 + $0xc] sm:$0x1] %v321_v3  ;;  %309 = vst.msk [vmem:[#allocation2 + $0x8] sm:$0x1] %vm308_vm0, %v10486_v5  ;;  %vm1515_vm6 = vcmask 1042432  }
  0x17   : > { %346 = vst [vmem:[#allocation2 + $0x6c] sm:$0x1] %v345_v4  ;;  %s6449_s18 = sshll.u32 %s300_s17, 4  ;;  %311 = vst.msk [vmem:[#allocation2 + $0xcc] sm:$0xf] %vm305_vm2, %v10486_v5  ;;  %vm1516_vm7 = vcmask 1046532  }
  0x18   : > { %312 = vst.msk [vmem:[#allocation2 + $0xd0] sm:$0xf] %vm305_vm2, %v10486_v5  ;;  %s303_s21 = scalar_lea.vmem %s10477_s0, %s6449_s18  ;;  %v376_v10 = vld [vmem:[#allocation2 + $0x14] sm:$0x1]  ;;  %v323_v17 = vld [vmem:[#allocation2 + $0x18] sm:$0x1]  ;;  %vm7021_vm8 = vmor %vm1515_vm6, %vm1516_vm7 }
  0x19   : > { %313 = vst.msk [vmem:[#allocation2 + $0xd4] sm:$0x1] %vm308_vm0, %v10486_v5  ;;  %v427_v6 = vld [vmem:[%s303_s21] sm:$0xff]  ;;  %v428_v7 = vld [vmem:[%s303_s21 + $0x8] sm:$0xff]  ;;  %v400_v11 = vld [vmem:[#allocation2 + $0x74] sm:$0x1] }
  0x1a   : > { %v6652_v8 = vpack.i.bf16 %v428_v7, %v427_v6  ;;  %v377_v13 = vsel %vm6993_vm5, 0, %v376_v10  ;;  %v401_v14 = vsel %vm6993_vm5, 0, %v400_v11  ;;  %v347_v18 = vld [vmem:[#allocation2 + $0x78] sm:$0x1]  ;;  %v324_v20 = vsel %vm6965_vm3, 0, %v323_v17  ;;  %s6854_s22 = smov 16   ;;  %vm7096_vm12 = vmand %vm305_vm2, %vm371_vm4 }
  0x1b   : > { %v317_v12 = vld [vmem:[#allocation2] sm:$0x1]  ;;  %378 = vst [vmem:[#allocation2 + $0x14] sm:$0x1] %v377_v13  ;;  %402 = vst [vmem:[#allocation2 + $0x74] sm:$0x1] %v401_v14 }
  0x1c   : > { %6653 = vxpose.xlu0.b32.start.end [1/1] (short) %v6652_v8, 128  ;;  %v318_v15 = vsel %vm6965_vm3, 0, %v317_v12  ;;  %v348_v21 = vsel %vm6965_vm3, 0, %v347_v18  ;;  %325 = vst [vmem:[#allocation2 + $0x18] sm:$0x1] %v324_v20  ;;  %v379_v22 = vld [vmem:[#allocation2 + $0x20] sm:$0x1] }
  0x1d   : > { %319 = vst [vmem:[#allocation2] sm:$0x1] %v318_v15  ;;  %v373_v16 = vld [vmem:[#allocation2 + $0x8] sm:$0x1]  ;;  %349 = vst [vmem:[#allocation2 + $0x78] sm:$0x1] %v348_v21 }
  0x1e   : > { %v374_v19 = vsel %vm6993_vm5, 0, %v373_v16  ;;  %v403_v23 = vld [vmem:[#allocation2 + $0x80] sm:$0x1]  ;;  %v380_v24 = vsel %vm6993_vm5, 0, %v379_v22  ;;  %v7013_v26 = vld [vmem:[#allocation2 + $0x4] sm:$0xf] }
  0x1f   : > { %375 = vst [vmem:[#allocation2 + $0x8] sm:$0x1] %v374_v19  ;;  %v404_v25 = vsel %vm6993_vm5, 0, %v403_v23  ;;  %381 = vst [vmem:[#allocation2 + $0x20] sm:$0x1] %v380_v24  ;;  %v1520_v27 = vrot.slane %v7013_v26, 5 }
  0x20   : > { %405 = vst [vmem:[#allocation2 + $0x80] sm:$0x1] %v404_v25  ;;  %v326_v37 = vld [vmem:[#allocation2 + $0x24] sm:$0x1]  ;;  %v382_v41 = vld [vmem:[#allocation2 + $0x2c] sm:$0x1] }
  0x21   : > { %v1522_v31 = vrot.slane %v1520_v27, 4  ;;  %v350_v38 = vld [vmem:[#allocation2 + $0x84] sm:$0x1]  ;;  %v327_v39 = vsel %vm6965_vm3, 0, %v326_v37  ;;  %v406_v42 = vld [vmem:[#allocation2 + $0x8c] sm:$0x1] }
  0x22   : > { %v351_v40 = vsel %vm6965_vm3, 0, %v350_v38  ;;  %328 = vst [vmem:[#allocation2 + $0x24] sm:$0x1] %v327_v39  ;;  %v383_v43 = vsel %vm6993_vm5, 0, %v382_v41  ;;  %v407_v44 = vsel %vm6993_vm5, 0, %v406_v42  ;;  %v1093_v14 = vshll.u32 %v7013_v26, 16 }
  0x23   : > { %352 = vst [vmem:[#allocation2 + $0x84] sm:$0x1] %v351_v40  ;;  %384 = vst [vmem:[#allocation2 + $0x2c] sm:$0x1] %v383_v43  ;;  %v329_v45 = vld [vmem:[#allocation2 + $0x30] sm:$0x1] }
  0x24   : > { %v7016_v28 = vld [vmem:[#allocation2] sm:$0xf]  ;;  %408 = vst [vmem:[#allocation2 + $0x8c] sm:$0x1] %v407_v44  ;;  %v330_v46 = vsel %vm6965_vm3, 0, %v329_v45  ;;  %v1097_v15 = vshrl.u32 %v7013_v26, 16 }
  0x25   : > { %v6222_v30 = vrot.slane %v7016_v28, 9  ;;  %331 = vst [vmem:[#allocation2 + $0x30] sm:$0x1] %v330_v46  ;;  %v353_v47 = vld [vmem:[#allocation2 + $0x90] sm:$0x1]  ;;  %v1084_v12 = vshrl.u32 %v7016_v28, 16 }
  0x26   : > { %v7018_v29 = vld [vmem:[#allocation2 + $0x8] sm:$0x1]  ;;  %v354_v48 = vsel %vm6965_vm3, 0, %v353_v47  ;;  %v385_v49 = vld [vmem:[#allocation2 + $0x38] sm:$0x1]  ;;  %v1087_v13 = vshll.u32 %v7016_v28, 16 }
  0x27   : > { %v1523_v33 = vrot.slane %v7018_v29, 5  ;;  %v1521_v34 = vsel %vm7021_vm8, %v6222_v30, %v1520_v27  ;;  %355 = vst [vmem:[#allocation2 + $0x90] sm:$0x1] %v354_v48  ;;  %v409_v50 = vld [vmem:[#allocation2 + $0x98] sm:$0x1]  ;;  %v386_v51 = vsel %vm6993_vm5, 0, %v385_v49 }
  0x28   : > { %v410_v52 = vsel %vm6993_vm5, 0, %v409_v50  ;;  %387 = vst [vmem:[#allocation2 + $0x38] sm:$0x1] %v386_v51  ;;  %v332_v53 = vld [vmem:[#allocation2 + $0x3c] sm:$0x1]  ;;  %v1086_v16 = vrot.slane %v1084_v12, 4 }
  0x29   : > { %v1524_v35 = vsel %vm7021_vm8, %v1522_v31, %v1523_v33  ;;  %411 = vst [vmem:[#allocation2 + $0x98] sm:$0x1] %v410_v52  ;;  %v333_v54 = vsel %vm6965_vm3, 0, %v332_v53  ;;  %v356_v55 = vld [vmem:[#allocation2 + $0x9c] sm:$0x1]  ;;  %v1089_v17 = vrot.slane %v1087_v13, 5 }
  0x2a   : > { %v6272_v36 = vcombine.low %v1521_v34, %v1524_v35  ;;  %334 = vst [vmem:[#allocation2 + $0x3c] sm:$0x1] %v333_v54  ;;  %v357_v56 = vsel %vm6965_vm3, 0, %v356_v55  ;;  %v388_v57 = vld [vmem:[#allocation2 + $0x44] sm:$0x1]  ;;  %v1095_v18 = vrot.slane %v1093_v14, 5 }
  0x2b   : > { %358 = vst [vmem:[#allocation2 + $0x9c] sm:$0x1] %v357_v56  ;;  %v412_v58 = vld [vmem:[#allocation2 + $0xa4] sm:$0x1]  ;;  %v389_v59 = vsel %vm6993_vm5, 0, %v388_v57  ;;  %v1099_v19 = vrot.slane %v1097_v15, 4  ;;  %v1090_v24 = vor.u32 %v1089_v17, %v1086_v16 }
  0x2c   : > { %1874 = vrot.lane.b32.xlu1 %v6272_v36, %s6854_s22  ;;  %v413_v60 = vsel %vm6993_vm5, 0, %v412_v58  ;;  %390 = vst [vmem:[#allocation2 + $0x44] sm:$0x1] %v389_v59  ;;  %v335_v61 = vld [vmem:[#allocation2 + $0x48] sm:$0x1]  ;;  %v1103_v23 = vshll.u32 %v7018_v29, 16 }
  0x2d   : > { %414 = vst [vmem:[#allocation2 + $0xa4] sm:$0x1] %v413_v60  ;;  %v359_v62 = vld [vmem:[#allocation2 + $0xa8] sm:$0x1]  ;;  %v336_v63 = vsel %vm6965_vm3, 0, %v335_v61  ;;  %v1100_v25 = vor.u32 %v1099_v19, %v1095_v18  ;;  %v1091_v26 = vrot.slane %v1090_v24, 4 }
  0x2e   : > { %v360_v1 = vsel %vm6965_vm3, 0, %v359_v62  ;;  %337 = vst [vmem:[#allocation2 + $0x48] sm:$0x1] %v336_v63  ;;  %v391_v2 = vld [vmem:[#allocation2 + $0x50] sm:$0x1]  ;;  %v1105_v30 = vrot.slane %v1103_v23, 5 }
  0x2f   : > { %361 = vst [vmem:[#allocation2 + $0xa8] sm:$0x1] %v360_v1  ;;  %v415_v3 = vld [vmem:[#allocation2 + $0xb0] sm:$0x1]  ;;  %v392_v4 = vsel %vm6993_vm5, 0, %v391_v2  ;;  %v1101_v28 = vrot.slane %v1100_v25, 4 }
  0x30   : > { %v416_v6 = vsel %vm6993_vm5, 0, %v415_v3  ;;  %393 = vst [vmem:[#allocation2 + $0x50] sm:$0x1] %v392_v4  ;;  %v338_v7 = vld [vmem:[#allocation2 + $0x54] sm:$0x1]  ;;  %s6855_s23 = smov 8  }
  0x31   : > { %417 = vst [vmem:[#allocation2 + $0xb0] sm:$0x1] %v416_v6  ;;  %v362_v8 = vld [vmem:[#allocation2 + $0xb4] sm:$0x1]  ;;  %v339_v10 = vsel %vm6965_vm3, 0, %v338_v7  ;;  %v10554_v17 = vmov 0 }
  0x32   : > { %v363_v11 = vsel %vm6965_vm3, 0, %v362_v8  ;;  %340 = vst [vmem:[#allocation2 + $0x54] sm:$0x1] %v339_v10  ;;  %v394_v20 = vld [vmem:[#allocation2 + $0x5c] sm:$0x1]  ;;  %s6856_s24 = smov 24  }
  0x33   : > { %364 = vst [vmem:[#allocation2 + $0xb4] sm:$0x1] %v363_v11  ;;  %v395_v21 = vsel %vm6993_vm5, 0, %v394_v20  ;;  %v418_v22 = vld [vmem:[#allocation2 + $0xbc] sm:$0x1]  ;;  %s6857_s25 = smov 40  }
  0x34   : > { %396 = vst [vmem:[#allocation2 + $0x5c] sm:$0x1] %v395_v21  ;;  %v419_v27 = vsel %vm6993_vm5, 0, %v418_v22  ;;  %vm1080_vm9 = vsmask.f32 3328  ;;  %s6858_s26 = smov 48  }
  0x35   : > { %420 = vst [vmem:[#allocation2 + $0xbc] sm:$0x1] %v419_v27  ;;  %vm1081_vm10 = vsmask.f32 7440  ;;  %v341_v35 = vld [vmem:[#allocation2 + $0x60] sm:$0x1] }
  0x36   : > { %vm7077_vm11 = vmor %vm1080_vm9, %vm1081_vm10  ;;  %v365_v36 = vld [vmem:[#allocation2 + $0xc0] sm:$0x1]  ;;  %v342_v37 = vsel %vm6965_vm3, 0, %v341_v35  ;;  %v397_v39 = vld [vmem:[#allocation2 + $0x68] sm:$0x1]  ;;  %s6859_s10 = smov 32  }
  0x37   : > { %v1096_v33 = vsel %vm7077_vm11, %v1091_v26, %v1095_v18  ;;  %v1106_v29 = vsel %vm7077_vm11, %v1101_v28, %v1105_v30  ;;  %v366_v38 = vsel %vm6965_vm3, 0, %v365_v36  ;;  %343 = vst [vmem:[#allocation2 + $0x60] sm:$0x1] %v342_v37  ;;  %v421_v40 = vld [vmem:[#allocation2 + $0xc8] sm:$0x1]  ;;  %v398_v41 = vsel %vm6993_vm5, 0, %v397_v39 }
  0x38   : > { %v6256_v34 = vcombine.low %v1096_v33, %v1106_v29  ;;  %367 = vst [vmem:[#allocation2 + $0xc0] sm:$0x1] %v366_v38  ;;  %v422_v42 = vsel %vm6993_vm5, 0, %v421_v40  ;;  %399 = vst [vmem:[#allocation2 + $0x68] sm:$0x1] %v398_v41  ;;  %s6860_s12 = smov 64  }
  0x39   : > { %423 = vst [vmem:[#allocation2 + $0xc8] sm:$0x1] %v422_v42  ;;  %v914_v58 = vld [vmem:[#allocation2 + $0xc] sm:$0xf]  ;;  %vm589_vm13 = vsmask.f32 4368 }
  0x3a   : > { %v970_v59 = vld [vmem:[#allocation2 + $0x6c] sm:$0xf]  ;;  %vm7106_vm14 = vmor %vm315_vm1, %vm589_vm13  ;;  %v918_v18 = vld [vmem:[#allocation2 + $0x14] sm:$0x1]  ;;  %s6861_s13 = smov 56   ;;  %vm2466_vm15 = vcmask 1043456  }
  0x3b   : > { %v10555_v17 = vsel %vm7106_vm14, 4294967295, %v10554_v17  ;;  %v974_v19 = vld [vmem:[#allocation2 + $0x74] sm:$0x1]  ;;  %v977_v41 = vld [vmem:[#allocation2 + $0x78] sm:$0xf]  ;;  %vm2116_vm0 = vcmask 64512  }
  0x3c   : > { %10556 = vst [vmem:[#allocation7_spill] sm:$0xff] %v10555_v17  ;;  %vm2198_vm6 = vcmask 195584   ;;  %vm2231_vm7 = vcmask 261120   ;;  %vm2264_vm9 = vcmask 326656   ;;  %vm2297_vm10 = vcmask 392192   ;;  %s6862_s17 = smov 96  }
  0x3d   : > { %vm2363_vm13 = vcmask 523264   ;;  %s6863_s18 = smov 80   ;;  %s6864_s20 = smov 112  }
  0x45   : > { %6734 = vset.pattern.permute.xlu0 %v10486_v5 }
  0x81   : > { %1794 = vrot.lane.b32.xlu0 %v6256_v34, %s6855_s23 }
  0x98   : > { %v6654_v43 = vpop.trf.xlu0 }
  0x99   : > { %v6658_v44 = vunpack.i.h.bf16 %v6654_v43  ;;  %v6655_v45 = vunpack.i.l.bf16 %v6654_v43 }
  0x9b   : > { %v6466_v46 = vpack.c.bf16 %v6658_v44, %v6658_v44  ;;  %v6450_v47 = vpack.c.bf16 %v6655_v45, %v6655_v45 }
  0x9c   : > { %v6659_v48 = vpop.trf.xlu0 }
  0x9d   : > { %v728_v49 = vshrl.u32 %v6466_v46, 16  ;;  %v592_v50 = vshrl.u32 %v6450_v47, 16  ;;  %v6663_v51 = vunpack.i.h.bf16 %v6659_v48  ;;  %v6660_v52 = vunpack.i.l.bf16 %v6659_v48 }
  0x9e   : > { %v731_v54 = vshll.u32 %v6466_v46, 16  ;;  %v595_v56 = vshll.u32 %v6450_v47, 16 }
  0x9f   : > { %v730_v53 = vrot.slane %v728_v49, 7  ;;  %v594_v55 = vrot.slane %v592_v50, 7  ;;  %v6467_v60 = vpack.c.bf16 %v6663_v51, %v6663_v51  ;;  %v6451_v61 = vpack.c.bf16 %v6660_v52, %v6660_v52  ;;  %v921_v49 = vld [vmem:[#allocation2 + $0x18] sm:$0xf] }
  0xa0   : > { %v6664_v62 = vpop.trf.xlu0 }
  0xa1   : > { %v733_v63 = vor.u32 %v731_v54, %v730_v53  ;;  %v734_v1 = vrot.slane %v730_v53, 4  ;;  %v597_v2 = vor.u32 %v595_v56, %v594_v55  ;;  %v598_v3 = vrot.slane %v594_v55, 4 }
  0xa2   : > { %v736_v4 = vshrl.u32 %v6467_v60, 16  ;;  %v739_v6 = vshll.u32 %v6467_v60, 16  ;;  %v600_v7 = vshrl.u32 %v6451_v61, 16  ;;  %v603_v8 = vshll.u32 %v6451_v61, 16 }
  0xa3   : > { %v971_v10 = vsel %vm7096_vm12, %v733_v63, %v970_v59  ;;  %v915_v11 = vsel %vm7096_vm12, %v597_v2, %v914_v58  ;;  %v6668_v12 = vunpack.i.h.bf16 %v6664_v62  ;;  %v6665_v15 = vunpack.i.l.bf16 %v6664_v62  ;;  %v981_v58 = vld [vmem:[#allocation2 + $0x80] sm:$0x1] }
  0xa4   : > { %972 = vst [vmem:[#allocation2 + $0x6c] sm:$0xf] %v971_v10  ;;  %916 = vst [vmem:[#allocation2 + $0xc] sm:$0xf] %v915_v11  ;;  %v738_v13 = vrot.slane %v736_v4, 7  ;;  %v602_v14 = vrot.slane %v600_v7, 7  ;;  %v6669_v16 = vpop.trf.xlu0 }
  0xa5   : > { %v6468_v20 = vpack.c.bf16 %v6668_v12, %v6668_v12  ;;  %v6673_v21 = vunpack.i.h.bf16 %v6669_v16  ;;  %v6452_v28 = vpack.c.bf16 %v6665_v15, %v6665_v15  ;;  %v6670_v43 = vunpack.i.l.bf16 %v6669_v16  ;;  %v925_v11 = vld [vmem:[#allocation2 + $0x20] sm:$0x1]  ;;  %v984_v12 = vld [vmem:[#allocation2 + $0x84] sm:$0xf] }
  0xa6   : > { %v741_v22 = vor.u32 %v739_v6, %v738_v13  ;;  %v743_v23 = vrot.slane %v738_v13, 4  ;;  %v605_v24 = vor.u32 %v603_v8, %v602_v14  ;;  %v607_v25 = vrot.slane %v602_v14, 4 }
  0xa7   : > { %v745_v27 = vshrl.u32 %v6468_v20, 16  ;;  %v748_v26 = vshll.u32 %v6468_v20, 16  ;;  %v6469_v30 = vpack.c.bf16 %v6673_v21, %v6673_v21  ;;  %v609_v38 = vshrl.u32 %v6452_v28, 16 }
  0xa8   : > { %v975_v33 = vsel %vm6965_vm3, %v743_v23, %v974_v19  ;;  %v606_v29 = vsel %vm7106_vm14, %v598_v3, %v605_v24  ;;  %v742_v34 = vsel %vm7106_vm14, %v734_v1, %v741_v22  ;;  %v919_v35 = vsel %vm6965_vm3, %v607_v25, %v918_v18  ;;  %v6674_v36 = vpop.trf.xlu0 }
  0xa9   : > { %976 = vst [vmem:[#allocation2 + $0x74] sm:$0x1] %v975_v33  ;;  %917 = vst.msk [vmem:[#allocation2 + $0x10] sm:$0xf] %vm305_vm2, %v606_v29  ;;  %v747_v37 = vrot.slane %v745_v27, 7  ;;  %v612_v39 = vshll.u32 %v6452_v28, 16  ;;  %v6678_v44 = vunpack.i.h.bf16 %v6674_v36  ;;  %v6453_v50 = vpack.c.bf16 %v6670_v43, %v6670_v43 }
  0xaa   : > { %920 = vst [vmem:[#allocation2 + $0x14] sm:$0x1] %v919_v35  ;;  %973 = vst.msk [vmem:[#allocation2 + $0x70] sm:$0xf] %vm305_vm2, %v742_v34  ;;  %v753_v40 = vshrl.u32 %v6469_v30, 16  ;;  %v756_v42 = vshll.u32 %v6469_v30, 16  ;;  %v6675_v52 = vunpack.i.l.bf16 %v6674_v36 }
  0xab   : > { %v750_v45 = vor.u32 %v748_v26, %v747_v37  ;;  %v751_v46 = vrot.slane %v747_v37, 4  ;;  %v611_v47 = vrot.slane %v609_v38, 7  ;;  %v6470_v51 = vpack.c.bf16 %v6678_v44, %v6678_v44  ;;  %v928_v27 = vld [vmem:[#allocation2 + $0x24] sm:$0xf]  ;;  %v7138_v37 = vld [vmem:[#allocation2 + $0xc] sm:$0xf] }
  0xac   : > { %v755_v48 = vrot.slane %v753_v40, 7  ;;  %v6679_v53 = vpop.trf.xlu0  ;;  %v617_v61 = vshrl.u32 %v6453_v50, 16  ;;  %v620_v62 = vshll.u32 %v6453_v50, 16  ;;  %v6454_v4 = vpack.c.bf16 %v6675_v52, %v6675_v52 }
  0xad   : > { %v978_v54 = vsel %vm7096_vm12, %v750_v45, %v977_v41  ;;  %v614_v55 = vor.u32 %v612_v39, %v611_v47  ;;  %v615_v56 = vrot.slane %v611_v47, 4  ;;  %v762_v63 = vshrl.u32 %v6470_v51, 16 }
  0xae   : > { %v758_v59 = vor.u32 %v756_v42, %v755_v48  ;;  %979 = vst [vmem:[#allocation2 + $0x78] sm:$0xf] %v978_v54  ;;  %v760_v60 = vrot.slane %v755_v48, 4  ;;  %v765_v3 = vshll.u32 %v6470_v51, 16  ;;  %v619_v7 = vrot.slane %v617_v61, 7 }
  0xaf   : > { %v922_v1 = vsel %vm7096_vm12, %v614_v55, %v921_v49  ;;  %v764_v8 = vrot.slane %v762_v63, 7  ;;  %v6683_v10 = vunpack.i.h.bf16 %v6679_v53  ;;  %v626_v13 = vshrl.u32 %v6454_v4, 16  ;;  %v988_v42 = vld [vmem:[#allocation2 + $0x8c] sm:$0x1] }
  0xb0   : > { %v759_v2 = vsel %vm7106_vm14, %v751_v46, %v758_v59  ;;  %923 = vst [vmem:[#allocation2 + $0x18] sm:$0xf] %v922_v1  ;;  %v982_v6 = vsel %vm6965_vm3, %v760_v60, %v981_v58  ;;  %v629_v14 = vshll.u32 %v6454_v4, 16  ;;  %v622_v15 = vor.u32 %v620_v62, %v619_v7  ;;  %v6684_v19 = vpop.trf.xlu0  ;;  %v7135_v28 = vld [vmem:[#allocation2 + $0x10] sm:$0xf] }
  0xb1   : > { %980 = vst.msk [vmem:[#allocation2 + $0x7c] sm:$0xf] %vm305_vm2, %v759_v2  ;;  %983 = vst [vmem:[#allocation2 + $0x80] sm:$0x1] %v982_v6  ;;  %v624_v16 = vrot.slane %v619_v7, 4  ;;  %v767_v18 = vor.u32 %v765_v3, %v764_v8  ;;  %v628_v20 = vrot.slane %v626_v13, 7  ;;  %v6471_v21 = vpack.c.bf16 %v6683_v10, %v6683_v10 }
  0xb2   : > { %v6680_v22 = vunpack.i.l.bf16 %v6679_v53  ;;  %v6688_v23 = vunpack.i.h.bf16 %v6684_v19  ;;  %v623_v24 = vsel %vm7106_vm14, %v615_v56, %v622_v15  ;;  %v6685_v36 = vunpack.i.l.bf16 %v6684_v19  ;;  %v932_v56 = vld [vmem:[#allocation2 + $0x2c] sm:$0x1]  ;;  %v991_v60 = vld [vmem:[#allocation2 + $0x90] sm:$0xf] }
  0xb3   : > { %v926_v25 = vsel %vm6965_vm3, %v624_v16, %v925_v11  ;;  %v985_v26 = vsel %vm7096_vm12, %v767_v18, %v984_v12  ;;  %924 = vst.msk [vmem:[#allocation2 + $0x1c] sm:$0xf] %vm305_vm2, %v623_v24  ;;  %v631_v30 = vor.u32 %v629_v14, %v628_v20  ;;  %v770_v33 = vshrl.u32 %v6471_v21, 16  ;;  %v935_v10 = vld [vmem:[#allocation2 + $0x30] sm:$0xf] }
  0xb4   : > { %927 = vst [vmem:[#allocation2 + $0x20] sm:$0x1] %v926_v25  ;;  %986 = vst [vmem:[#allocation2 + $0x84] sm:$0xf] %v985_v26  ;;  %v773_v29 = vshll.u32 %v6471_v21, 16  ;;  %v6455_v34 = vpack.c.bf16 %v6680_v22, %v6680_v22  ;;  %v6472_v35 = vpack.c.bf16 %v6688_v23, %v6688_v23  ;;  %v768_v38 = vrot.slane %v764_v8, 4  ;;  %v6689_v51 = vpop.trf.xlu0 }
  0xb5   : > { %v929_v39 = vsel %vm7096_vm12, %v631_v30, %v928_v27  ;;  %v772_v40 = vrot.slane %v770_v33, 7  ;;  %v7144_v41 = vcombine.low %v7138_v37, %v7135_v28  ;;  %v632_v47 = vrot.slane %v628_v20, 4  ;;  %v7162_v18 = vld [vmem:[#allocation2 + $0x14] sm:$0x1]  ;;  %v995_v26 = vld [vmem:[#allocation2 + $0x98] sm:$0x1] }
  0xb6   : > { %930 = vst [vmem:[#allocation2 + $0x24] sm:$0xf] %v929_v39  ;;  %v634_v43 = vshrl.u32 %v6455_v34, 16  ;;  %v637_v44 = vshll.u32 %v6455_v34, 16  ;;  %v779_v45 = vshrl.u32 %v6472_v35, 16  ;;  %v782_v46 = vshll.u32 %v6472_v35, 16 }
  0xb7   : > { %v775_v48 = vor.u32 %v773_v29, %v772_v40  ;;  %v777_v49 = vrot.slane %v772_v40, 4  ;;  %v6456_v50 = vpack.c.bf16 %v6685_v36, %v6685_v36  ;;  %1909 = vrot.lane.b32.xlu1 %v7144_v41, %s6856_s24  ;;  %v1121_v54 = vshrl.u32 %v7135_v28, 16 }
  0xb8   : > { %v636_v52 = vrot.slane %v634_v43, 7  ;;  %v781_v53 = vrot.slane %v779_v45, 7  ;;  %v6693_v55 = vunpack.i.h.bf16 %v6689_v51  ;;  %v1108_v3 = vshrl.u32 %v7138_v37, 16  ;;  %v6694_v23 = vpop.trf.xlu0 }
  0xb9   : > { %v989_v58 = vsel %vm6965_vm3, %v777_v49, %v988_v42  ;;  %v776_v59 = vsel %vm7106_vm14, %v768_v38, %v775_v48  ;;  %v643_v61 = vshrl.u32 %v6456_v50, 16  ;;  %v646_v62 = vshll.u32 %v6456_v50, 16 }
  0xba   : > { %990 = vst [vmem:[#allocation2 + $0x8c] sm:$0x1] %v989_v58  ;;  %v639_v63 = vor.u32 %v637_v44, %v636_v52  ;;  %v641_v1 = vrot.slane %v636_v52, 4  ;;  %987 = vst.msk [vmem:[#allocation2 + $0x88] sm:$0xf] %vm305_vm2, %v776_v59  ;;  %v784_v2 = vor.u32 %v782_v46, %v781_v53  ;;  %v6473_v6 = vpack.c.bf16 %v6693_v55, %v6693_v55 }
  0xbb   : > { %v645_v4 = vrot.slane %v643_v61, 7  ;;  %v6690_v12 = vunpack.i.l.bf16 %v6689_v51  ;;  %v785_v13 = vrot.slane %v781_v53, 4  ;;  %v6223_v21 = vrot.slane %v7138_v37, 9  ;;  %v7173_v44 = vld [vmem:[#allocation2 + $0x18] sm:$0xf] }
  0xbc   : > { %v640_v7 = vsel %vm7106_vm14, %v632_v47, %v639_v63  ;;  %v933_v8 = vsel %vm6965_vm3, %v641_v1, %v932_v56  ;;  %v992_v11 = vsel %vm7096_vm12, %v784_v2, %v991_v60  ;;  %v787_v15 = vshrl.u32 %v6473_v6, 16  ;;  %v7175_v45 = vld [vmem:[#allocation2 + $0x1c] sm:$0xf]  ;;  %v939_v46 = vld [vmem:[#allocation2 + $0x38] sm:$0x1]  ;;  %v6699_v61 = vpop.trf.xlu0 }
  0xbd   : > { %931 = vst.msk [vmem:[#allocation2 + $0x28] sm:$0xf] %vm305_vm2, %v640_v7  ;;  %934 = vst [vmem:[#allocation2 + $0x2c] sm:$0x1] %v933_v8  ;;  %v648_v14 = vor.u32 %v646_v62, %v645_v4  ;;  %v790_v16 = vshll.u32 %v6473_v6, 16  ;;  %v649_v19 = vrot.slane %v645_v4, 4  ;;  %v6457_v20 = vpack.c.bf16 %v6690_v12, %v6690_v12 }
  0xbe   : > { %993 = vst [vmem:[#allocation2 + $0x90] sm:$0xf] %v992_v11  ;;  %v1527_v22 = vrot.slane %v7135_v28, 5  ;;  %v789_v25 = vrot.slane %v787_v15, 7  ;;  %v6698_v27 = vunpack.i.h.bf16 %v6694_v23  ;;  %v1530_v34 = vrot.slane %v7162_v18, 5 }
  0xbf   : > { %v936_v24 = vsel %vm7096_vm12, %v648_v14, %v935_v10  ;;  %v651_v30 = vshrl.u32 %v6457_v20, 16  ;;  %v654_v33 = vshll.u32 %v6457_v20, 16  ;;  %v6695_v43 = vunpack.i.l.bf16 %v6694_v23  ;;  %v998_v1 = vld [vmem:[#allocation2 + $0x9c] sm:$0xf] }
  0xc0   : > { %937 = vst [vmem:[#allocation2 + $0x30] sm:$0xf] %v936_v24  ;;  %v1529_v29 = vrot.slane %v1527_v22, 4  ;;  %v792_v35 = vor.u32 %v790_v16, %v789_v25  ;;  %v794_v36 = vrot.slane %v789_v25, 4  ;;  %v6474_v38 = vpack.c.bf16 %v6698_v27, %v6698_v27 }
  0xc1   : > { %v653_v39 = vrot.slane %v651_v30, 7  ;;  %v1528_v40 = vsel %vm7021_vm8, %v6223_v21, %v1527_v22  ;;  %v6458_v55 = vpack.c.bf16 %v6695_v43, %v6695_v43  ;;  %v1111_v56 = vshll.u32 %v7138_v37, 16 }
  0xc2   : > { %v1531_v42 = vsel %vm7021_vm8, %v1529_v29, %v1530_v34  ;;  %v996_v47 = vsel %vm6965_vm3, %v794_v36, %v995_v26  ;;  %v793_v48 = vsel %vm7106_vm14, %v785_v13, %v792_v35  ;;  %v796_v50 = vshrl.u32 %v6474_v38, 16  ;;  %v942_v13 = vld [vmem:[#allocation2 + $0x3c] sm:$0xf]  ;;  %v6704_v29 = vpop.trf.xlu0  ;;  %v1002_v36 = vld [vmem:[#allocation2 + $0xa4] sm:$0x1] }
  0xc3   : > { %v6273_v49 = vcombine.low %v1528_v40, %v1531_v42  ;;  %997 = vst [vmem:[#allocation2 + $0x98] sm:$0x1] %v996_v47  ;;  %v656_v51 = vor.u32 %v654_v33, %v653_v39  ;;  %v658_v52 = vrot.slane %v653_v39, 4  ;;  %994 = vst.msk [vmem:[#allocation2 + $0x94] sm:$0xf] %vm305_vm2, %v793_v48  ;;  %v799_v53 = vshll.u32 %v6474_v38, 16 }
  0xc4   : > { %v798_v58 = vrot.slane %v796_v50, 7  ;;  %v1132_v59 = vshrl.u32 %v7173_v44, 16  ;;  %v7187_v60 = vcombine.low %v7173_v44, %v7175_v45  ;;  %v660_v2 = vshrl.u32 %v6458_v55, 16  ;;  %v946_v42 = vld [vmem:[#allocation2 + $0x44] sm:$0x1] }
  0xc5   : > { %1876 = vrot.lane.b32.xlu1 %v6273_v49, %s6854_s22  ;;  %v657_v62 = vsel %vm7106_vm14, %v649_v19, %v656_v51  ;;  %v940_v63 = vsel %vm6965_vm3, %v658_v52, %v939_v46  ;;  %v663_v4 = vshll.u32 %v6458_v55, 16  ;;  %v6703_v8 = vunpack.i.h.bf16 %v6699_v61 }
  0xc6   : > { %938 = vst.msk [vmem:[#allocation2 + $0x34] sm:$0xf] %vm305_vm2, %v657_v62  ;;  %941 = vst [vmem:[#allocation2 + $0x38] sm:$0x1] %v940_v63  ;;  %v801_v6 = vor.u32 %v799_v53, %v798_v58  ;;  %v802_v7 = vrot.slane %v798_v58, 4  ;;  %v662_v10 = vrot.slane %v660_v2, 7  ;;  %v6700_v11 = vunpack.i.l.bf16 %v6699_v61 }
  0xc7   : > { %v1110_v12 = vrot.slane %v1108_v3, 4  ;;  %v6475_v15 = vpack.c.bf16 %v6703_v8, %v6703_v8  ;;  %v1113_v16 = vrot.slane %v1111_v56, 5  ;;  %v1117_v19 = vshll.u32 %v7135_v28, 16  ;;  %v7207_v40 = vld [vmem:[#allocation2 + $0x30] sm:$0xf] }
  0xc8   : > { %v999_v14 = vsel %vm7096_vm12, %v801_v6, %v998_v1  ;;  %v665_v20 = vor.u32 %v663_v4, %v662_v10  ;;  %v666_v21 = vrot.slane %v662_v10, 4  ;;  %v6459_v22 = vpack.c.bf16 %v6700_v11, %v6700_v11  ;;  %v7224_v62 = vld [vmem:[#allocation2 + $0x20] sm:$0x1] }
  0xc9   : > { %1979 = vrot.lane.b32.xlu1 %v6273_v49, %s6857_s25  ;;  %1000 = vst [vmem:[#allocation2 + $0x9c] sm:$0xf] %v999_v14  ;;  %v1123_v23 = vrot.slane %v1121_v54, 4  ;;  %v804_v37 = vshrl.u32 %v6475_v15, 16  ;;  %v807_v3 = vshll.u32 %v6475_v15, 16  ;;  %v1114_v24 = vor.u32 %v1113_v16, %v1110_v12 }
  0xca   : > { %v1119_v25 = vrot.slane %v1117_v19, 5  ;;  %v943_v27 = vsel %vm7096_vm12, %v665_v20, %v942_v13  ;;  %v668_v26 = vshrl.u32 %v6459_v22, 16  ;;  %v671_v30 = vshll.u32 %v6459_v22, 16  ;;  %v1005_v15 = vld [vmem:[#allocation2 + $0xa8] sm:$0xf]  ;;  %v6709_v22 = vpop.trf.xlu0 }
  0xcb   : > { %v1127_v33 = vshll.u32 %v7162_v18, 16  ;;  %944 = vst [vmem:[#allocation2 + $0x3c] sm:$0xf] %v943_v27  ;;  %v806_v34 = vrot.slane %v804_v37, 7  ;;  %v1115_v35 = vrot.slane %v1114_v24, 4  ;;  %v6708_v54 = vunpack.i.h.bf16 %v6704_v29 }
  0xcc   : > { %v1124_v28 = vor.u32 %v1123_v23, %v1119_v25  ;;  %v670_v38 = vrot.slane %v668_v26, 7  ;;  %v6705_v51 = vunpack.i.l.bf16 %v6704_v29  ;;  %v6226_v61 = vrot.slane %v7207_v40, 9 }
  0xcd   : > { %1911 = vrot.lane.b32.xlu1 %v7187_v60, %s6856_s24  ;;  %v1129_v39 = vrot.slane %v1127_v33, 5  ;;  %v809_v43 = vor.u32 %v807_v3, %v806_v34  ;;  %v811_v46 = vrot.slane %v806_v34, 4  ;;  %v1120_v18 = vsel %vm7077_vm11, %v1115_v35, %v1119_v25  ;;  %v7211_v52 = vld [vmem:[#allocation2 + $0x34] sm:$0xf]  ;;  %v7213_v53 = vld [vmem:[#allocation2 + $0x38] sm:$0x1] }
  0xce   : > { %v1125_v47 = vrot.slane %v1124_v28, 4  ;;  %v673_v48 = vor.u32 %v671_v30, %v670_v38  ;;  %v675_v49 = vrot.slane %v670_v38, 4  ;;  %v6476_v50 = vpack.c.bf16 %v6708_v54, %v6708_v54  ;;  %v949_v30 = vld [vmem:[#allocation2 + $0x48] sm:$0xf] }
  0xcf   : > { %v1003_v55 = vsel %vm6965_vm3, %v811_v46, %v1002_v36  ;;  %v810_v56 = vsel %vm7106_vm14, %v802_v7, %v809_v43  ;;  %v6460_v7 = vpack.c.bf16 %v6705_v51, %v6705_v51  ;;  %v1548_v8 = vrot.slane %v7211_v52, 5 }
  0xd0   : > { %v1130_v58 = vsel %vm7077_vm11, %v1125_v47, %v1129_v39  ;;  %1004 = vst [vmem:[#allocation2 + $0xa4] sm:$0x1] %v1003_v55  ;;  %v674_v63 = vsel %vm7106_vm14, %v666_v21, %v673_v48  ;;  %v947_v1 = vsel %vm6965_vm3, %v675_v49, %v946_v42  ;;  %1001 = vst.msk [vmem:[#allocation2 + $0xa0] sm:$0xf] %vm305_vm2, %v810_v56  ;;  %v813_v4 = vshrl.u32 %v6476_v50, 16  ;;  %v6714_v39 = vpop.trf.xlu0 }
  0xd1   : > { %2014 = vrot.lane.b32.xlu1 %v7187_v60, %s6858_s26  ;;  %v6257_v2 = vcombine.low %v1120_v18, %v1130_v58  ;;  %945 = vst.msk [vmem:[#allocation2 + $0x40] sm:$0xf] %vm305_vm2, %v674_v63  ;;  %948 = vst [vmem:[#allocation2 + $0x44] sm:$0x1] %v947_v1  ;;  %v816_v6 = vshll.u32 %v6476_v50, 16  ;;  %v1551_v10 = vrot.slane %v7213_v53, 5  ;;  %v1549_v20 = vsel %vm7021_vm8, %v6226_v61, %v1548_v8 }
  0xd2   : > { %v7234_v11 = vrot.slane %v813_v4, 7  ;;  %v6224_v12 = vrot.slane %v7173_v44, 9  ;;  %v1534_v13 = vrot.slane %v7175_v45, 5  ;;  %v1537_v14 = vrot.slane %v7224_v62, 5  ;;  %v7260_v38 = vld [vmem:[#allocation2 + $0x3c] sm:$0xf] }
  0xd3   : > { %v677_v16 = vshrl.u32 %v6460_v7, 16  ;;  %v680_v19 = vshll.u32 %v6460_v7, 16  ;;  %v1550_v21 = vrot.slane %v1548_v8, 4  ;;  %v1135_v23 = vshll.u32 %v7173_v44, 16  ;;  %v960_v44 = vld [vmem:[#allocation2 + $0x5c] sm:$0x1] }
  0xd4   : > { %v1145_v37 = vshrl.u32 %v7175_v45, 16  ;;  %v818_v3 = vor.u32 %v816_v6, %v7234_v11  ;;  %v1536_v24 = vrot.slane %v1534_v13, 4  ;;  %v6713_v26 = vunpack.i.h.bf16 %v6709_v22 }
  0xd5   : > { %1796 = vrot.lane.b32.xlu1 %v6257_v2, %s6855_s23  ;;  %v7245_v25 = vrot.slane %v677_v16, 7  ;;  %v1552_v27 = vsel %vm7021_vm8, %v1550_v21, %v1551_v10  ;;  %v819_v35 = vrot.slane %v7234_v11, 4  ;;  %v1535_v54 = vsel %vm7021_vm8, %v6224_v12, %v1534_v13 }
  0xd6   : > { %v1006_v33 = vsel %vm7096_vm12, %v818_v3, %v1005_v15  ;;  %v7251_v29 = vcombine.low %v1549_v20, %v1552_v27  ;;  %v1538_v34 = vsel %vm7021_vm8, %v1536_v24, %v1537_v14  ;;  %v6477_v36 = vpack.c.bf16 %v6713_v26, %v6713_v26  ;;  %v953_v20 = vld [vmem:[#allocation2 + $0x50] sm:$0x1]  ;;  %v1012_v3 = vld [vmem:[#allocation2 + $0xb4] sm:$0xf] }
  0xd7   : > { %1007 = vst [vmem:[#allocation2 + $0xa8] sm:$0xf] %v1006_v33  ;;  %v682_v28 = vor.u32 %v680_v19, %v7245_v25  ;;  %v683_v42 = vrot.slane %v7245_v25, 4  ;;  %v6274_v43 = vcombine.low %v1535_v54, %v1538_v34  ;;  %v6710_v46 = vunpack.i.l.bf16 %v6709_v22 }
  0xd8   : > { %2088 = vrot.lane.b32.xlu0 %v7251_v29, %s6860_s12  ;;  %v7265_v18 = vld [vmem:[#allocation2 + $0x40] sm:$0xf]  ;;  %v6718_v47 = vunpack.i.h.bf16 %v6714_v39  ;;  %v821_v49 = vshrl.u32 %v6477_v36, 16  ;;  %v824_v50 = vshll.u32 %v6477_v36, 16  ;;  %v1204_v51 = vshrl.u32 %v7260_v38, 16 }
  0xd9   : > { %1944 = vrot.lane.b32.xlu1 %v6257_v2, %s6859_s10  ;;  %v950_v48 = vsel %vm7096_vm12, %v682_v28, %v949_v30  ;;  %v6461_v55 = vpack.c.bf16 %v6710_v46, %v6710_v46  ;;  %v7272_v56 = vcombine.low %v7260_v38, %v7265_v18  ;;  %v6715_v63 = vunpack.i.l.bf16 %v6714_v39  ;;  %v1009_v2 = vld [vmem:[#allocation2 + $0xb0] sm:$0x1]  ;;  %v7295_v36 = vld [vmem:[#allocation2 + $0x24] sm:$0xf] }
  0xda   : > { %951 = vst [vmem:[#allocation2 + $0x48] sm:$0xf] %v950_v48  ;;  %v6478_v58 = vpack.c.bf16 %v6718_v47, %v6718_v47  ;;  %v823_v61 = vrot.slane %v821_v49, 7  ;;  %v1180_v1 = vshrl.u32 %v7207_v40, 16  ;;  %v1183_v16 = vshll.u32 %v7207_v40, 16 }
  0xdb   : > { %v685_v4 = vshrl.u32 %v6461_v55, 16  ;;  %v688_v6 = vshll.u32 %v6461_v55, 16  ;;  %v6462_v12 = vpack.c.bf16 %v6715_v63, %v6715_v63  ;;  %v1189_v19 = vshll.u32 %v7211_v52, 16  ;;  %v956_v47 = vld [vmem:[#allocation2 + $0x54] sm:$0xf] }
  0xdc   : > { %1882 = vrot.lane.b32.xlu0 %v7251_v29, %s6854_s22  ;;  %v830_v7 = vshrl.u32 %v6478_v58, 16  ;;  %v833_v8 = vshll.u32 %v6478_v58, 16  ;;  %v826_v10 = vor.u32 %v824_v50, %v823_v61  ;;  %v828_v11 = vrot.slane %v823_v61, 4  ;;  %v6719_v61 = vpop.trf.xlu0 }
  0xdd   : > { %1981 = vrot.lane.b32.xlu1 %v6274_v43, %s6857_s25  ;;  %v1182_v13 = vrot.slane %v1180_v1, 4  ;;  %v687_v14 = vrot.slane %v685_v4, 7  ;;  %v694_v24 = vshrl.u32 %v6462_v12, 16  ;;  %v697_v25 = vshll.u32 %v6462_v12, 16  ;;  %v7310_v4 = vld [vmem:[#allocation2 + $0x28] sm:$0xf] }
  0xde   : > { %v7278_v15 = vrot.slane %v830_v7, 7  ;;  %v1010_v21 = vsel %vm6965_vm3, %v828_v11, %v1009_v2  ;;  %v827_v22 = vsel %vm7106_vm14, %v819_v35, %v826_v10  ;;  %v1207_v30 = vshll.u32 %v7260_v38, 16  ;;  %v7319_v10 = vld [vmem:[#allocation2 + $0x44] sm:$0x1] }
  0xdf   : > { %1011 = vst [vmem:[#allocation2 + $0xb0] sm:$0x1] %v1010_v21  ;;  %v690_v27 = vor.u32 %v688_v6, %v687_v14  ;;  %v692_v26 = vrot.slane %v687_v14, 4  ;;  %1008 = vst.msk [vmem:[#allocation2 + $0xac] sm:$0xf] %vm305_vm2, %v827_v22  ;;  %v7292_v34 = vrot.slane %v694_v24, 7  ;;  %v6723_v11 = vunpack.i.h.bf16 %v6719_v61 }
  0xe0   : > { %1917 = vrot.lane.b32.xlu0 %v7272_v56, %s6856_s24  ;;  %v835_v33 = vor.u32 %v833_v8, %v7278_v15  ;;  %v1185_v35 = vrot.slane %v1183_v16, 5  ;;  %v1191_v28 = vrot.slane %v1189_v19, 5  ;;  %v1193_v54 = vshrl.u32 %v7211_v52, 16 }
  0xe1   : > { %2084 = vrot.lane.b32.xlu1 %v6274_v43, %s6860_s12  ;;  %v691_v39 = vsel %vm7106_vm14, %v683_v42, %v690_v27  ;;  %v954_v46 = vsel %vm6965_vm3, %v692_v26, %v953_v20  ;;  %v1199_v49 = vshll.u32 %v7213_v53, 16  ;;  %v1217_v50 = vshrl.u32 %v7265_v18, 16 }
  0xe2   : > { %v1013_v48 = vsel %vm7096_vm12, %v835_v33, %v1012_v3  ;;  %952 = vst.msk [vmem:[#allocation2 + $0x4c] sm:$0xf] %vm305_vm2, %v691_v39  ;;  %955 = vst [vmem:[#allocation2 + $0x50] sm:$0x1] %v954_v46  ;;  %v699_v55 = vor.u32 %v697_v25, %v7292_v34  ;;  %v1186_v42 = vor.u32 %v1185_v35, %v1182_v13  ;;  %v1195_v58 = vrot.slane %v1193_v54, 4 }
  0xe3   : > { %1014 = vst [vmem:[#allocation2 + $0xb4] sm:$0xf] %v1013_v48  ;;  %v836_v63 = vrot.slane %v7278_v15, 4  ;;  %v700_v1 = vrot.slane %v7292_v34, 4  ;;  %v1201_v2 = vrot.slane %v1199_v49, 5  ;;  %v1156_v53 = vshrl.u32 %v7295_v36, 16 }
  0xe4   : > { %v957_v6 = vsel %vm7096_vm12, %v699_v55, %v956_v47  ;;  %v1187_v7 = vrot.slane %v1186_v42, 4  ;;  %v7317_v8 = vcombine.low %v7295_v36, %v7310_v4  ;;  %v6720_v12 = vunpack.i.l.bf16 %v6719_v61  ;;  %v1016_v55 = vld [vmem:[#allocation2 + $0xbc] sm:$0x1] }
  0xe5   : > { %1878 = vrot.lane.b32.xlu1 %v6274_v43, %s6854_s22  ;;  %v1196_v43 = vor.u32 %v1195_v58, %v1191_v28  ;;  %958 = vst [vmem:[#allocation2 + $0x54] sm:$0xf] %v957_v6  ;;  %v6227_v15 = vrot.slane %v7260_v38, 9  ;;  %v1555_v16 = vrot.slane %v7265_v18, 5  ;;  %v6479_v19 = vpack.c.bf16 %v6723_v11, %v6723_v11  ;;  %v7351_v11 = vld [vmem:[#allocation2 + $0x48] sm:$0xf] }
  0xe6   : > { %v1192_v13 = vsel %vm7077_vm11, %v1187_v7, %v1191_v28  ;;  %v6463_v20 = vpack.c.bf16 %v6720_v12, %v6720_v12  ;;  %v1558_v21 = vrot.slane %v7319_v10, 5  ;;  %v1134_v22 = vrot.slane %v1132_v59, 4 }
  0xe7   : > { %v1197_v14 = vrot.slane %v1196_v43, 4  ;;  %v1556_v24 = vsel %vm7021_vm8, %v6227_v15, %v1555_v16  ;;  %v1557_v25 = vrot.slane %v1555_v16, 4  ;;  %v1137_v27 = vrot.slane %v1135_v23, 5 }
  0xe8   : > { %v838_v33 = vshrl.u32 %v6479_v19, 16  ;;  %v841_v34 = vshll.u32 %v6479_v19, 16  ;;  %v702_v35 = vshrl.u32 %v6463_v20, 16  ;;  %v705_v28 = vshll.u32 %v6463_v20, 16 }
  0xe9   : > { %2016 = vrot.lane.b32.xlu1 %v7317_v8, %s6858_s26  ;;  %v1202_v3 = vsel %vm7077_vm11, %v1197_v14, %v1201_v2  ;;  %v1559_v54 = vsel %vm7021_vm8, %v1557_v25, %v1558_v21  ;;  %v1138_v59 = vor.u32 %v1137_v27, %v1134_v22  ;;  %v1141_v39 = vshll.u32 %v7175_v45, 16  ;;  %v7353_v12 = vld [vmem:[#allocation2 + $0x4c] sm:$0xf]  ;;  %v6724_v27 = vpop.trf.xlu0 }
  0xea   : > { %v7336_v26 = vcombine.low %v1192_v13, %v1202_v3  ;;  %v840_v23 = vrot.slane %v838_v33, 7  ;;  %v704_v46 = vrot.slane %v702_v35, 7  ;;  %v7345_v47 = vcombine.low %v1556_v24, %v1559_v54  ;;  %v7385_v35 = vld [vmem:[#allocation2 + $0x50] sm:$0x1] }
  0xeb   : > { %v1147_v48 = vrot.slane %v1145_v37, 4  ;;  %v1159_v49 = vshll.u32 %v7295_v36, 16  ;;  %v1139_v42 = vrot.slane %v1138_v59, 4  ;;  %v1143_v58 = vrot.slane %v1141_v39, 5 }
  0xec   : > { %2053 = vrot.lane.b32.xlu0 %v7336_v26, %s6861_s13  ;;  %v1151_v61 = vshll.u32 %v7224_v62, 16  ;;  %v843_v2 = vor.u32 %v841_v34, %v840_v23  ;;  %v845_v6 = vrot.slane %v840_v23, 4  ;;  %v707_v7 = vor.u32 %v705_v28, %v704_v46  ;;  %v7393_v23 = vld [vmem:[#allocation2 + $0x2c] sm:$0x1] }
  0xed   : > { %1913 = vrot.lane.b32.xlu1 %v7317_v8, %s6856_s24  ;;  %v709_v43 = vrot.slane %v704_v46, 4  ;;  %v1144_v13 = vsel %vm7077_vm11, %v1139_v42, %v1143_v58  ;;  %v1148_v45 = vor.u32 %v1147_v48, %v1143_v58  ;;  %v1228_v14 = vshrl.u32 %v7351_v11, 16 }
  0xee   : > { %v1153_v37 = vrot.slane %v1151_v61, 5  ;;  %v1017_v15 = vsel %vm6965_vm3, %v845_v6, %v1016_v55  ;;  %v708_v62 = vsel %vm7106_vm14, %v700_v1, %v707_v7  ;;  %v844_v16 = vsel %vm7106_vm14, %v836_v63, %v843_v2 }
  0xef   : > { %v961_v19 = vsel %vm6965_vm3, %v709_v43, %v960_v44  ;;  %1018 = vst [vmem:[#allocation2 + $0xbc] sm:$0x1] %v1017_v15  ;;  %959 = vst.msk [vmem:[#allocation2 + $0x58] sm:$0xf] %vm305_vm2, %v708_v62  ;;  %v1149_v20 = vrot.slane %v1148_v45, 4  ;;  %v1231_v21 = vshll.u32 %v7351_v11, 16  ;;  %v7373_v1 = vcombine.low %v7351_v11, %v7353_v12 }
  0xf0   : > { %2090 = vrot.lane.b32.xlu0 %v7345_v47, %s6860_s12  ;;  %962 = vst [vmem:[#allocation2 + $0x5c] sm:$0x1] %v961_v19  ;;  %1015 = vst.msk [vmem:[#allocation2 + $0xb8] sm:$0xf] %vm305_vm2, %v844_v16  ;;  %v1206_v63 = vrot.slane %v1204_v51, 4  ;;  %v1209_v22 = vrot.slane %v1207_v30, 5  ;;  %v6728_v34 = vunpack.i.h.bf16 %v6724_v27  ;;  %v6725_v59 = vunpack.i.l.bf16 %v6724_v27 }
  0xf1   : > { %v1213_v3 = vshll.u32 %v7265_v18, 16  ;;  %v1219_v24 = vrot.slane %v1217_v50, 4  ;;  %v1223_v25 = vshll.u32 %v7319_v10, 16  ;;  %v1154_v33 = vsel %vm7077_vm11, %v1149_v20, %v1153_v37  ;;  %v1019_v62 = vld [vmem:[#allocation2 + $0xc0] sm:$0xf] }
  0xf2   : > { %v6258_v51 = vcombine.low %v1144_v13, %v1154_v33  ;;  %v1210_v38 = vor.u32 %v1209_v22, %v1206_v63  ;;  %v6480_v54 = vpack.c.bf16 %v6728_v34, %v6728_v34  ;;  %v6228_v18 = vrot.slane %v7351_v11, 9  ;;  %v963_v27 = vld [vmem:[#allocation2 + $0x60] sm:$0xf] }
  0xf3   : > { %v1215_v30 = vrot.slane %v1213_v3, 5  ;;  %v1225_v28 = vrot.slane %v1223_v25, 5  ;;  %v1562_v50 = vrot.slane %v7353_v12, 5  ;;  %v1565_v44 = vrot.slane %v7385_v35, 5  ;;  %v6729_v25 = vpop.trf.xlu0 }
  0xf4   : > { %1987 = vrot.lane.b32.xlu0 %v7345_v47, %s6857_s25  ;;  %1946 = vrot.lane.b32.xlu1 %v6258_v51, %s6859_s10  ;;  %v1211_v10 = vrot.slane %v1210_v38, 4  ;;  %v6225_v46 = vrot.slane %v7295_v36, 9  ;;  %v847_v48 = vshrl.u32 %v6480_v54, 16  ;;  %v850_v55 = vshll.u32 %v6480_v54, 16 }
  0xf5   : > { %v1220_v39 = vor.u32 %v1219_v24, %v1215_v30  ;;  %v6464_v42 = vpack.c.bf16 %v6725_v59, %v6725_v59  ;;  %v1563_v58 = vsel %vm7021_vm8, %v6228_v18, %v1562_v50  ;;  %v1564_v6 = vrot.slane %v1562_v50, 4 }
  0xf6   : > { %v1216_v61 = vsel %vm7077_vm11, %v1211_v10, %v1215_v30  ;;  %v1541_v7 = vrot.slane %v7310_v4, 5  ;;  %v7403_v43 = vrot.slane %v847_v48, 7  ;;  %v1544_v37 = vrot.slane %v7393_v23, 5 }
  0xf7   : > { %v1221_v2 = vrot.slane %v1220_v39, 4  ;;  %v711_v13 = vshrl.u32 %v6464_v42, 16  ;;  %v714_v45 = vshll.u32 %v6464_v42, 16  ;;  %v1566_v16 = vsel %vm7021_vm8, %v1564_v6, %v1565_v44  ;;  %v7434_v39 = vld [vmem:[#allocation2 + $0x54] sm:$0xf] }
  0xf8   : > { %2022 = vrot.lane.b32.xlu0 %v7373_v1, %s6858_s26  ;;  %2049 = vrot.lane.b32.xlu1 %v6258_v51, %s6861_s13  ;;  %v1542_v19 = vsel %vm7021_vm8, %v6225_v46, %v1541_v7  ;;  %v1543_v20 = vrot.slane %v1541_v7, 4  ;;  %v1241_v63 = vshrl.u32 %v7353_v12, 16  ;;  %v852_v3 = vor.u32 %v850_v55, %v7403_v43  ;;  %v7436_v44 = vld [vmem:[#allocation2 + $0x58] sm:$0xf]  ;;  %v7446_v7 = vld [vmem:[#allocation2 + $0x5c] sm:$0x1] }
  0xf9   : > { %v1226_v15 = vsel %vm7077_vm11, %v1221_v2, %v1225_v28  ;;  %v7417_v24 = vrot.slane %v711_v13, 7  ;;  %v853_v33 = vrot.slane %v7403_v43, 4  ;;  %v6733_v38 = vunpack.i.h.bf16 %v6729_v25 }
  0xfa   : > { %v7414_v22 = vcombine.low %v1216_v61, %v1226_v15  ;;  %v1545_v34 = vsel %vm7021_vm8, %v1543_v20, %v1544_v37  ;;  %v1020_v30 = vsel %vm7096_vm12, %v852_v3, %v1019_v62  ;;  %v7427_v54 = vcombine.low %v1563_v58, %v1566_v16 }
  0xfb   : > { %v716_v28 = vor.u32 %v714_v45, %v7417_v24  ;;  %v7429_v59 = vcombine.low %v1542_v19, %v1545_v34  ;;  %1021 = vst [vmem:[#allocation2 + $0xc0] sm:$0xf] %v1020_v30  ;;  %v6481_v18 = vpack.c.bf16 %v6733_v38, %v6733_v38  ;;  %v6730_v50 = vunpack.i.l.bf16 %v6729_v25  ;;  %v967_v25 = vld [vmem:[#allocation2 + $0x68] sm:$0x1] }
  0xfc   : > { %1952 = vrot.lane.b32.xlu0 %v7414_v22, %s6859_s10  ;;  %1798 = vrot.lane.b32.xlu1 %v6258_v51, %s6855_s23  ;;  %v1230_v10 = vrot.slane %v1228_v14, 4  ;;  %v1233_v48 = vrot.slane %v1231_v21, 5  ;;  %v1237_v55 = vshll.u32 %v7353_v12, 16  ;;  %v1243_v42 = vrot.slane %v1241_v63, 4 }
  0xfd   : > { %v964_v46 = vsel %vm7096_vm12, %v716_v28, %v963_v27  ;;  %v855_v51 = vshrl.u32 %v6481_v18, 16  ;;  %v858_v58 = vshll.u32 %v6481_v18, 16  ;;  %v6465_v61 = vpack.c.bf16 %v6730_v50, %v6730_v50 }
  0xfe   : > { %965 = vst [vmem:[#allocation2 + $0x60] sm:$0xf] %v964_v46  ;;  %v1247_v2 = vshll.u32 %v7385_v35, 16  ;;  %v1234_v14 = vor.u32 %v1233_v48, %v1230_v10  ;;  %v1239_v6 = vrot.slane %v1237_v55, 5  ;;  %v6229_v57 = vrot.slane %v7434_v39, 9 }
  0xff   : > { %v1569_v11 = vrot.slane %v7436_v44, 5  ;;  %v717_v12 = vrot.slane %v7417_v24, 4  ;;  %v857_v21 = vrot.slane %v855_v51, 7  ;;  %v719_v43 = vshrl.u32 %v6465_v61, 16  ;;  %v1023_v35 = vld [vmem:[#allocation2 + $0xc8] sm:$0x1] }
 0x100   : > { %2092 = vrot.lane.b32.xlu0 %v7427_v54, %s6860_s12  ;;  %2086 = vrot.lane.b32.xlu1 %v7429_v59, %s6860_s12  ;;  %v722_v13 = vshll.u32 %v6465_v61, 16  ;;  %v1235_v45 = vrot.slane %v1234_v14, 4  ;;  %v1244_v37 = vor.u32 %v1243_v42, %v1239_v6  ;;  %v1249_v15 = vrot.slane %v1247_v2, 5 }
 0x101   : > { %v1571_v62 = vrot.slane %v1569_v11, 4  ;;  %v860_v16 = vor.u32 %v858_v58, %v857_v21  ;;  %v862_v19 = vrot.slane %v857_v21, 4  ;;  %v721_v20 = vrot.slane %v719_v43, 7 }
 0x102   : > { %v1572_v63 = vrot.slane %v7446_v7, 5  ;;  %v1169_v3 = vshrl.u32 %v7310_v4, 16  ;;  %v1240_v24 = vsel %vm7077_vm11, %v1235_v45, %v1239_v6  ;;  %v1245_v27 = vrot.slane %v1244_v37, 4 }
 0x103   : > { %v1570_v34 = vsel %vm7021_vm8, %v6229_v57, %v1569_v11  ;;  %v1024_v38 = vsel %vm6965_vm3, %v862_v19, %v1023_v35  ;;  %v724_v30 = vor.u32 %v722_v13, %v721_v20  ;;  %v726_v28 = vrot.slane %v721_v20, 4 }
 0x104   : > { %v861_v18 = vsel %vm7106_vm14, %v853_v33, %v860_v16  ;;  %1880 = vrot.lane.b32.xlu1 %v7429_v59, %s6854_s22  ;;  %1025 = vst [vmem:[#allocation2 + $0xc8] sm:$0x1] %v1024_v38  ;;  %v1250_v50 = vsel %vm7077_vm11, %v1245_v27, %v1249_v15  ;;  %v1573_v10 = vsel %vm7021_vm8, %v1571_v62, %v1572_v63  ;;  %v1252_v46 = vshrl.u32 %v7434_v39, 16 }
 0x105   : > { %1022 = vst.msk [vmem:[#allocation2 + $0xc4] sm:$0xf] %vm305_vm2, %v861_v18  ;;  %v1255_v48 = vshll.u32 %v7434_v39, 16  ;;  %v725_v55 = vsel %vm7106_vm14, %v717_v12, %v724_v30  ;;  %v968_v33 = vsel %vm6965_vm3, %v726_v28, %v967_v25  ;;  %v7476_v42 = vcombine.low %v1240_v24, %v1250_v50  ;;  %v1050_v15 = vld [vmem:[#allocation2 + $0x60] sm:$0xf] }
 0x106   : > { %v7478_v51 = vcombine.low %v1570_v34, %v1573_v10  ;;  %966 = vst.msk [vmem:[#allocation2 + $0x64] sm:$0xf] %vm305_vm2, %v725_v55  ;;  %969 = vst [vmem:[#allocation2 + $0x68] sm:$0x1] %v968_v33  ;;  %v1254_v58 = vrot.slane %v1252_v46, 4  ;;  %v1261_v2 = vshll.u32 %v7436_v44, 16  ;;  %v7495_v45 = vcombine.low %v7207_v40, %v7211_v52 }
 0x107   : > { %v1257_v61 = vrot.slane %v1255_v48, 5  ;;  %v1265_v14 = vshrl.u32 %v7436_v44, 16  ;;  %2057 = vrot.lane.b32.xlu0 %v7476_v42, %s6861_s13  ;;  %v1271_v6 = vshll.u32 %v7446_v7, 16  ;;  %v1158_v57 = vrot.slane %v1156_v53, 4 }
 0x108   : > { %1983 = vrot.lane.b32.xlu1 %v7429_v59, %s6857_s25  ;;  %v1161_v11 = vrot.slane %v1159_v49, 5  ;;  %v1165_v12 = vshll.u32 %v7310_v4, 16  ;;  %v1263_v43 = vrot.slane %v1261_v2, 5  ;;  %v1171_v35 = vrot.slane %v1169_v3, 4 }
 0x109   : > { %v1258_v21 = vor.u32 %v1257_v61, %v1254_v58  ;;  %v1267_v13 = vrot.slane %v1265_v14, 4  ;;  %v1175_v7 = vshll.u32 %v7393_v23, 16  ;;  %v1273_v19 = vrot.slane %v1271_v6, 5 }
 0x10a   : > { %v1162_v37 = vor.u32 %v1161_v11, %v1158_v57  ;;  %v1167_v59 = vrot.slane %v1165_v12, 5  ;;  %v1276_v40 = vshrl.u32 %v1050_v15, 16  ;;  %v1279_v52 = vshll.u32 %v1050_v15, 16 }
 0x10b   : > { %v1268_v62 = vor.u32 %v1267_v13, %v1263_v43  ;;  %2094 = vrot.lane.b32.xlu0 %v7478_v51, %s6860_s12  ;;  %v1259_v36 = vrot.slane %v1258_v21, 4  ;;  %v1177_v49 = vrot.slane %v1175_v7, 5  ;;  %v7508_v25 = vcombine.low %v7434_v39, %v7436_v44  ;;  %v7541_v13 = vld [vmem:[#allocation2 + $0x70] sm:$0xf] }
 0x10c   : > { %1915 = vrot.lane.b32.xlu1 %v7495_v45, %s6856_s24  ;;  %v1163_v4 = vrot.slane %v1162_v37, 4  ;;  %v1172_v53 = vor.u32 %v1171_v35, %v1167_v59  ;;  %v1278_v30 = vrot.slane %v1276_v40, 4  ;;  %v1281_v28 = vrot.slane %v1279_v52, 5  ;;  %v1055_v40 = vld [vmem:[#allocation2 + $0x74] sm:$0x1] }
 0x10d   : > { %v1269_v16 = vrot.slane %v1268_v62, 4  ;;  %v1051_v63 = vld [vmem:[#allocation2 + $0x64] sm:$0xf]  ;;  %v1264_v24 = vsel %vm7077_vm11, %v1259_v36, %v1263_v43  ;;  %v1052_v10 = vld [vmem:[#allocation2 + $0x68] sm:$0x1]  ;;  %v6230_v6 = vrot.slane %v1050_v15, 9 }
 0x10e   : > { %v1173_v20 = vrot.slane %v1172_v53, 4  ;;  %v1168_v23 = vsel %vm7077_vm11, %v1163_v4, %v1167_v59  ;;  %v1289_v3 = vshrl.u32 %v1051_v63, 16  ;;  %v1285_v34 = vshll.u32 %v1051_v63, 16  ;;  %v7547_v59 = vld [vmem:[#allocation2 + $0x6c] sm:$0xf]  ;;  %v7559_v4 = vpop.permute.xlu1 %1874 }
 0x10f   : > { %1886 = vrot.lane.b32.xlu0 %v7427_v54, %s6854_s22  ;;  %v1274_v38 = vsel %vm7077_vm11, %v1269_v16, %v1273_v19  ;;  %v1282_v46 = vor.u32 %v1281_v28, %v1278_v30  ;;  %v1295_v55 = vshll.u32 %v1052_v10, 16  ;;  %v1576_v2 = vrot.slane %v1051_v63, 5  ;;  %v6748_v28 = vld [vmem:[%s10478_s1 + $0x20] ss:$0 sps:$4 sm:$0xff]  }
 0x110   : > { %2018 = vrot.lane.b32.xlu1 %v7495_v45, %s6858_s26  ;;  %v1178_v27 = vsel %vm7077_vm11, %v1173_v20, %v1177_v49  ;;  %v1291_v18 = vrot.slane %v1289_v3, 4  ;;  %v1287_v39 = vrot.slane %v1285_v34, 5  ;;  %v7520_v44 = vcombine.low %v1264_v24, %v1274_v38  ;;  %v7569_v20 = vld [vmem:[#allocation2 + $0x7c] sm:$0xf]  ;;  %6596 = vmatprep.subr.msk.bf16.mxu0 %vm2466_vm15, %v6748_v28 }
 0x111   : > { %v6259_v50 = vcombine.low %v1168_v23, %v1178_v27  ;;  %v1283_v33 = vrot.slane %v1282_v46, 4  ;;  %v1297_v61 = vrot.slane %v1295_v55, 5  ;;  %v7528_v14 = vcombine.low %v1050_v15, %v1051_v63  ;;  %v7574_v27 = vld [vmem:[#allocation2 + $0x78] sm:$0xf] }
 0x112   : > { %v1292_v48 = vor.u32 %v1291_v18, %v1287_v39  ;;  %v1578_v12 = vrot.slane %v1576_v2, 4  ;;  %v1579_v21 = vrot.slane %v1052_v10, 5  ;;  %v1577_v35 = vsel %vm7021_vm8, %v6230_v6, %v1576_v2 }
 0x113   : > { %1921 = vrot.lane.b32.xlu0 %v7508_v25, %s6856_s24  ;;  %v1288_v57 = vsel %vm7077_vm11, %v1283_v33, %v1287_v39  ;;  %v1313_v7 = vshrl.u32 %v7541_v13, 16  ;;  %v1309_v15 = vshll.u32 %v7541_v13, 16  ;;  %v1303_v36 = vshll.u32 %v7547_v59, 16 }
 0x114   : > { %2051 = vrot.lane.b32.xlu1 %v6259_v50, %s6861_s13  ;;  %v1293_v58 = vrot.slane %v1292_v48, 4  ;;  %v1580_v37 = vsel %vm7021_vm8, %v1578_v12, %v1579_v21  ;;  %v1319_v23 = vshll.u32 %v1055_v40, 16  ;;  %v1583_v24 = vrot.slane %v7541_v13, 5  ;;  %v6749_v48 = vld [vmem:[%s10478_s1 + $0x18] sm:$0xff]   ;;  %v1058_v21 = vld [vmem:[#allocation2 + $0x80] sm:$0x1] }
 0x115   : > { %v7553_v62 = vcombine.low %v1577_v35, %v1580_v37  ;;  %v1311_v53 = vrot.slane %v1309_v15, 5  ;;  %v1315_v49 = vrot.slane %v1313_v7, 4  ;;  %v1305_v19 = vrot.slane %v1303_v36, 5 }
 0x116   : > { %v1298_v11 = vsel %vm7077_vm11, %v1293_v58, %v1297_v61  ;;  %v1337_v38 = vshrl.u32 %v7569_v20, 16  ;;  %v1333_v30 = vshll.u32 %v7569_v20, 16  ;;  %v1321_v18 = vrot.slane %v1319_v23, 5 }
 0x117   : > { %1956 = vrot.lane.b32.xlu0 %v7520_v44, %s6859_s10  ;;  %v7537_v43 = vcombine.low %v1288_v57, %v1298_v11  ;;  %v1316_v52 = vor.u32 %v1315_v49, %v1311_v53  ;;  %v1327_v10 = vshll.u32 %v7574_v27, 16  ;;  %v7589_v39 = vcombine.low %v7547_v59, %v7541_v13  ;;  %v6751_v13 = vld [vmem:[%s10478_s1 + $0x10] sm:$0xff]  }
 0x118   : > { %1800 = vrot.lane.b32.xlu1 %v6259_v50, %s6855_s23  ;;  %v1585_v46 = vrot.slane %v1583_v24, 4  ;;  %v1335_v33 = vrot.slane %v1333_v30, 5  ;;  %v1339_v58 = vrot.slane %v1337_v38, 4  ;;  %v2468_v61 = vsel %vm2466_vm15, %v6748_v28, 0 }
 0x119   : > { %v1317_v34 = vrot.slane %v1316_v52, 4  ;;  %10557 = vst [vmem:[#allocation8_spill] sm:$0xff] %v7589_v39  ;;  %v1586_v6 = vrot.slane %v1055_v40, 5  ;;  %v1329_v11 = vrot.slane %v1327_v10, 5  ;;  %6537 = vmatpush3.bf16.msra.mxu0 %v2468_v61  ;;  %v6231_v35 = vrot.slane %v7547_v59, 9 }
 0x11a   : > { %6538 = vmatprep.subr.bf16.mxu0 %v6749_v48  ;;  %v1340_v15 = vor.u32 %v1339_v58, %v1335_v33  ;;  %v1590_v52 = vrot.slane %v7569_v20, 5  ;;  %v7634_v23 = vcombine.low %v7574_v27, %v7569_v20  ;;  %v1593_v30 = vrot.slane %v1058_v21, 5 }
 0x11b   : > { %1991 = vrot.lane.b32.xlu0 %v7478_v51, %s6857_s25  ;;  %v1322_v55 = vsel %vm7077_vm11, %v1317_v34, %v1321_v18  ;;  %v1587_v37 = vsel %vm7021_vm8, %v1585_v46, %v1586_v6  ;;  %v1584_v36 = vsel %vm7021_vm8, %v6231_v35, %v1583_v24  ;;  %v6753_v24 = vld [vmem:[%s10478_s1] sm:$0xff]   ;;  %v6232_v18 = vrot.slane %v7574_v27, 9 }
 0x11c   : > { %1948 = vrot.lane.b32.xlu1 %v6259_v50, %s6859_s10  ;;  %v1324_v50 = vshrl.u32 %v7574_v27, 16  ;;  %v7620_v49 = vcombine.low %v1584_v36, %v1587_v37  ;;  %10558 = vst [vmem:[#allocation9_spill] sm:$0xff] %v7634_v23  ;;  %v1592_v38 = vrot.slane %v1590_v52, 4  ;;  %vm2165_vm2 = vcmask 130048  }
 0x11d   : > { %6539 = vmatpush3.bf16.msra.mxu0 %v6749_v48  ;;  %v1591_v27 = vsel %vm7021_vm8, %v6232_v18, %v1590_v52  ;;  %vm10493_vm12 = vcmask 457728   ;;  %vm2433_vm15 = vcmask 588800  }
 0x11e   : > { %v1326_v57 = vrot.slane %v1324_v50, 4  ;;  %6540 = vmatprep.subr.bf16.mxu0 %v6751_v13  ;;  %v1594_v48 = vsel %vm7021_vm8, %v1592_v38, %v1593_v30 }
 0x11f   : > { %2026 = vrot.lane.b32.xlu0 %v7528_v14, %s6858_s26  ;;  %v7672_v61 = vcombine.low %v1591_v27, %v1594_v48 }
 0x120   : > { %1985 = vrot.lane.b32.xlu1 %v7251_v29, %s6857_s25  ;;  %v1300_v29 = vshrl.u32 %v7547_v59, 16  ;;  %v6752_v59 = vld [vmem:[%s10478_s1 + $0x8] sm:$0xff]  }
 0x121   : > { %6541 = vmatpush3.bf16.msra.mxu0 %v6751_v13  ;;  %v1061_v13 = vld [vmem:[#allocation2 + $0x8c] sm:$0x1] }
 0x122   : > { %v1302_v16 = vrot.slane %v1300_v29, 4  ;;  %v1343_v29 = vshll.u32 %v1058_v21, 16  ;;  %6542 = vmatprep.subr.bf16.mxu0 %v6752_v59 }
 0x123   : > { %2061 = vrot.lane.b32.xlu0 %v7537_v43, %s6861_s13 }
 0x124   : > { %2020 = vrot.lane.b32.xlu1 %v7272_v56, %s6858_s26  ;;  %v1306_v63 = vor.u32 %v1305_v19, %v1302_v16  ;;  %v1341_v16 = vrot.slane %v1340_v15, 4  ;;  %v1345_v19 = vrot.slane %v1343_v29, 5  ;;  %v1367_v15 = vshll.u32 %v1061_v13, 16 }
 0x125   : > { %6543 = vmatpush3.bf16.msra.mxu0 %v6752_v59  ;;  %v7691_v59 = vld [vmem:[#allocation2 + $0x94] sm:$0xf] }
 0x126   : > { %v1346_v34 = vsel %vm7077_vm11, %v1341_v16, %v1345_v19  ;;  %6544 = vmatprep.subr.bf16.mxu0 %v6753_v24  ;;  %v1369_v19 = vrot.slane %v1367_v15, 5  ;;  %v1381_v30 = vshll.u32 %v7691_v59, 16 }
 0x127   : > { %2096 = vrot.lane.b32.xlu0 %v7553_v62, %s6860_s12 }
 0x128   : > { %1950 = vrot.lane.b32.xlu1 %v7336_v26, %s6859_s10 }
 0x129   : > { %v7571_v3 = vpop.permute.xlu1 %1909  ;;  %6545 = vmatpush3.bf16.msra.mxu0 %v6753_v24 }
 0x12a   : > { %4822 = vmatprep.subr.bf16.mxu0 %v10486_v5 }
 0x12b   : > { %1810 = vrot.lane.b32.xlu0 %v7537_v43, %s6855_s23 }
 0x12c   : > { %1802 = vrot.lane.b32.xlu1 %v7336_v26, %s6855_s23  ;;  %v1307_v26 = vrot.slane %v1306_v63, 4 }
 0x12e   : > { %v1312_v2 = vsel %vm7077_vm11, %v1307_v26, %v1311_v53  ;;  %v1330_v53 = vor.u32 %v1329_v11, %v1326_v57  ;;  %v7643_v26 = vld [vmem:[#allocation2 + $0x84] sm:$0xf] }
 0x12f   : > { %1890 = vrot.lane.b32.xlu0 %v7553_v62, %s6854_s22  ;;  %v7604_v12 = vcombine.low %v1312_v2, %v1322_v55  ;;  %v1348_v10 = vshrl.u32 %v7643_v26, 16  ;;  %v1351_v46 = vshll.u32 %v7643_v26, 16 }
 0x130   : > { %1884 = vrot.lane.b32.xlu1 %v7345_v47, %s6854_s22  ;;  %v1331_v63 = vrot.slane %v1330_v53, 4  ;;  %v7685_v53 = vld [vmem:[#allocation2 + $0x90] sm:$0xf] }
 0x131   : > { %v1350_v2 = vrot.slane %v1348_v10, 4  ;;  %v1353_v6 = vrot.slane %v1351_v46, 5  ;;  %v1375_v38 = vshll.u32 %v7685_v53, 16  ;;  %v6233_v10 = vrot.slane %v7643_v26, 9 }
 0x132   : > { %v1336_v20 = vsel %vm7077_vm11, %v1331_v63, %v1335_v33  ;;  %v7670_v33 = vpop.permute.xlu0 %1794  ;;  %v1372_v63 = vshrl.u32 %v7685_v53, 16 }
 0x133   : > { %1925 = vrot.lane.b32.xlu0 %v7589_v39, %s6856_s24  ;;  %v7654_v50 = vcombine.low %v1336_v20, %v1346_v34  ;;  %v1354_v37 = vor.u32 %v1353_v6, %v1350_v2  ;;  %v1385_v20 = vshrl.u32 %v7691_v59, 16  ;;  %v1377_v2 = vrot.slane %v1375_v38, 5 }
 0x134   : > { %1919 = vrot.lane.b32.xlu1 %v7373_v1, %s6856_s24  ;;  %v1383_v6 = vrot.slane %v1381_v30, 5  ;;  %v1604_v30 = vrot.slane %v7691_v59, 5 }
 0x135   : > { %v1355_v16 = vrot.slane %v1354_v37, 4 }
 0x137   : > { %v7596_v47 = vpop.permute.xlu1 %1876  ;;  %1960 = vrot.lane.b32.xlu0 %v7604_v12, %s6859_s10 }
 0x138   : > { %2055 = vrot.lane.b32.xlu1 %v7414_v22, %s6861_s13 }
 0x13b   : > { %v7612_v7 = vpop.permute.xlu1 %1979  ;;  %1995 = vrot.lane.b32.xlu0 %v7620_v49, %s6857_s25 }
 0x13c   : > { %1804 = vrot.lane.b32.xlu1 %v7414_v22, %s6855_s23  ;;  %v7649_v22 = vld [vmem:[#allocation2 + $0x88] sm:$0xf] }
 0x13d   : > { %v1357_v58 = vshll.u32 %v7649_v22, 16  ;;  %v1597_v52 = vrot.slane %v7649_v22, 5  ;;  %v7708_v18 = vcombine.low %v7643_v26, %v7649_v22 }
 0x13f   : > { %v7625_v40 = vpop.permute.xlu1 %1911  ;;  %2030 = vrot.lane.b32.xlu0 %v7634_v23, %s6858_s26  ;;  %v1359_v11 = vrot.slane %v1357_v58, 5  ;;  %10559 = vst [vmem:[#allocation10_spill] sm:$0xff] %v7708_v18  ;;  %v1599_v48 = vrot.slane %v1597_v52, 4  ;;  %v1374_v58 = vrot.slane %v1372_v63, 4  ;;  %v6787_v63 = vld [vmem:[#allocation2] sm:$0xf] }
 0x140   : > { %1989 = vrot.lane.b32.xlu1 %v7427_v54, %s6857_s25  ;;  %v1361_v54 = vshrl.u32 %v7649_v22, 16 }
 0x141   : > { %v1360_v46 = vsel %vm7077_vm11, %v1355_v16, %v1359_v11  ;;  %v1378_v15 = vor.u32 %v1377_v2, %v1374_v58  ;;  %v7749_v58 = vcombine.low %v7685_v53, %v7691_v59  ;;  %v7765_v59 = vld [vmem:[#allocation2 + $0xa0] sm:$0xf] }
 0x142   : > { %v1363_v21 = vrot.slane %v1361_v54, 4  ;;  %v1600_v54 = vrot.slane %v1061_v13, 5  ;;  %v1064_v13 = vld [vmem:[#allocation2 + $0x98] sm:$0x1] }
 0x143   : > { %v7641_v28 = vpop.permute.xlu1 %2014  ;;  %2065 = vrot.lane.b32.xlu0 %v7654_v50, %s6861_s13  ;;  %v1391_v16 = vshll.u32 %v1064_v13, 16 }
 0x144   : > { %2024 = vrot.lane.b32.xlu1 %v7508_v25, %s6858_s26  ;;  %v1364_v36 = vor.u32 %v1363_v21, %v1359_v11  ;;  %v1598_v11 = vsel %vm7021_vm8, %v6233_v10, %v1597_v52  ;;  %v1601_v37 = vsel %vm7021_vm8, %v1599_v48, %v1600_v54  ;;  %v6234_v54 = vrot.slane %v7685_v53, 9 }
 0x145   : > { %v7733_v52 = vcombine.low %v1598_v11, %v1601_v37  ;;  %v1607_v11 = vrot.slane %v1064_v13, 5  ;;  %v7755_v37 = vld [vmem:[#allocation2 + $0x9c] sm:$0xf] }
 0x146   : > { %v1365_v24 = vrot.slane %v1364_v36, 4 }
 0x147   : > { %v7660_v55 = vpop.permute.xlu1 %1796  ;;  %2100 = vrot.lane.b32.xlu0 %v7672_v61, %s6860_s12 }
 0x148   : > { %1954 = vrot.lane.b32.xlu1 %v7476_v42, %s6859_s10  ;;  %v1370_v27 = vsel %vm7077_vm11, %v1365_v24, %v1369_v19  ;;  %v6786_v19 = vld [vmem:[#allocation2 + $0x4] sm:$0xf] }
 0x149   : > { %v7721_v26 = vcombine.low %v1360_v46, %v1370_v27  ;;  %v6240_v24 = vcombine.low %v6787_v63, %v6786_v19  ;;  %v1393_v46 = vrot.slane %v1391_v16, 5  ;;  %v1399_v19 = vshll.u32 %v7755_v37, 16 }
 0x14a   : > { %v7681_v35 = vpop.permute.xlu0 %2088  ;;  %v1409_v63 = vshrl.u32 %v7765_v59, 16 }
 0x14b   : > { %v7675_v57 = vpop.permute.xlu1 %1944  ;;  %1814 = vrot.lane.b32.xlu0 %v7654_v50, %s6855_s23  ;;  %v2119_v48 = vsel %vm2116_vm0, %v6240_v24, %v7670_v33 }
 0x14c   : > { %1806 = vrot.lane.b32.xlu1 %v7476_v42, %s6855_s23 }
 0x14e   : > { %v7704_v42 = vpop.permute.xlu0 %1882 }
 0x14f   : > { %v7683_v29 = vpop.permute.xlu1 %1981  ;;  %1894 = vrot.lane.b32.xlu0 %v7672_v61, %s6854_s22 }
 0x150   : > { %1888 = vrot.lane.b32.xlu1 %v7478_v51, %s6854_s22  ;;  %v1387_v51 = vrot.slane %v1385_v20, 4  ;;  %v1379_v20 = vrot.slane %v1378_v15, 4 }
 0x152   : > { %v7725_v21 = vpop.permute.xlu0 %1917  ;;  %v1388_v36 = vor.u32 %v1387_v51, %v1383_v6  ;;  %v1384_v27 = vsel %vm7077_vm11, %v1379_v20, %v1383_v6  ;;  %v1606_v51 = vrot.slane %v1604_v30, 4  ;;  %v2167_v6 = vsel %vm2165_vm2, %v2119_v48, %v7559_v4 }
 0x153   : > { %v7695_v34 = vpop.permute.xlu1 %2084  ;;  %1929 = vrot.lane.b32.xlu0 %v7708_v18, %s6856_s24  ;;  %v2200_v13 = vsel %vm2198_vm6, %v2167_v6, %v7571_v3  ;;  %v1405_v4 = vshll.u32 %v7765_v59, 16  ;;  %v1401_v48 = vrot.slane %v1399_v19, 5 }
 0x154   : > { %2059 = vrot.lane.b32.xlu1 %v7520_v44, %s6861_s13  ;;  %v1389_v10 = vrot.slane %v1388_v36, 4  ;;  %v1605_v36 = vsel %vm7021_vm8, %v6234_v54, %v1604_v30  ;;  %v1608_v16 = vsel %vm7021_vm8, %v1606_v51, %v1607_v11  ;;  %v2233_v3 = vsel %vm2231_vm7, %v2200_v13, %v7675_v57 }
 0x155   : > { %v7789_v30 = vcombine.low %v1605_v36, %v1608_v16  ;;  %v1407_v54 = vrot.slane %v1405_v4, 5  ;;  %v1411_v57 = vrot.slane %v1409_v63, 4  ;;  %v7804_v36 = vld [vmem:[#allocation2 + $0xa8] sm:$0xf] }
 0x156   : > { %v1394_v2 = vsel %vm7077_vm11, %v1389_v10, %v1393_v46  ;;  %v2266_v46 = vsel %vm2264_vm9, %v2233_v3, %v7612_v7 }
 0x157   : > { %v7719_v22 = vpop.permute.xlu1 %1878  ;;  %1964 = vrot.lane.b32.xlu0 %v7721_v26, %s6859_s10  ;;  %v7771_v15 = vcombine.low %v1384_v27, %v1394_v2  ;;  %v1067_v27 = vld [vmem:[#allocation2 + $0xa4] sm:$0x1]  ;;  %v2299_v2 = vsel %vm2297_vm10, %v2266_v46, %v7641_v28  ;;  %v1412_v13 = vor.u32 %v1411_v57, %v1407_v54  ;;  %v7812_v28 = vld [vmem:[#allocation2 + $0xac] sm:$0xf]  ;;  %v1420_v46 = vshrl.u32 %v7804_v36, 16 }
 0x158   : > { %1808 = vrot.lane.b32.xlu1 %v7520_v44, %s6855_s23  ;;  %v1415_v7 = vshll.u32 %v1067_v27, 16  ;;  %v1429_v0 = vshll.u32 %v7812_v28, 16 }
 0x159   : > { %v1413_v57 = vrot.slane %v1412_v13, 4 }
 0x15a   : > { %v1417_v3 = vrot.slane %v1415_v7, 5 }
 0x15b   : > { %v7735_v38 = vpop.permute.xlu1 %2016  ;;  %1999 = vrot.lane.b32.xlu0 %v7733_v52, %s6857_s25 }
 0x15c   : > { %1923 = vrot.lane.b32.xlu1 %v7528_v14, %s6856_s24  ;;  %v1418_v9 = vsel %vm7077_vm11, %v1413_v57, %v1417_v3 }
 0x15e   : > { %v7742_v44 = vpop.permute.xlu0 %2053 }
 0x15f   : > { %2034 = vrot.lane.b32.xlu0 %v7749_v58, %s6858_s26  ;;  %v7763_v53 = vpop.permute.xlu1 %1913 }
 0x160   : > { %1958 = vrot.lane.b32.xlu1 %v7537_v43, %s6859_s10  ;;  %v1396_v43 = vshrl.u32 %v7755_v37, 16 }
 0x162   : > { %v7761_v33 = vpop.permute.xlu0 %2090  ;;  %v1398_v10 = vrot.slane %v1396_v43, 4  ;;  %v368_v43 = vld [vmem:[#allocation2 + $0xcc] sm:$0x1] }
 0x163   : > { %2069 = vrot.lane.b32.xlu0 %v7771_v15, %s6861_s13  ;;  %v369_v19 = vsel %vm6965_vm3, 0, %v368_v43  ;;  %vm10494_vm3 = vcmask 125952  }
 0x164   : > { %1993 = vrot.lane.b32.xlu1 %v7553_v62, %s6857_s25  ;;  %v1402_v6 = vor.u32 %v1401_v48, %v1398_v10  ;;  %370 = vst [vmem:[#allocation2 + $0xcc] sm:$0x1] %v369_v19  ;;  %v1611_v10 = vrot.slane %v7765_v59, 5  ;;  %v1423_v48 = vshll.u32 %v7804_v36, 16  ;;  %v1422_v19 = vrot.slane %v1420_v46, 4 }
 0x165   : > { %v1070_v46 = vld [vmem:[#allocation2 + $0xb0] sm:$0x1] }
 0x166   : > { %v7787_v24 = vpop.permute.xlu0 %1987  ;;  %v7791_v20 = vpop.permute.xlu1 %1946  ;;  %v1613_v43 = vrot.slane %v1611_v10, 4  ;;  %v1425_v5 = vrot.slane %v1423_v48, 5  ;;  %v1439_v57 = vshll.u32 %v1070_v46, 16 }
 0x167   : > { %2104 = vrot.lane.b32.xlu0 %v7789_v30, %s6860_s12 }
 0x168   : > { %2028 = vrot.lane.b32.xlu1 %v7589_v39, %s6858_s26  ;;  %v1426_v48 = vor.u32 %v1425_v5, %v1422_v19 }
 0x16a   : > { %v7799_v62 = vpop.permute.xlu0 %2022  ;;  %v2050_v51 = vpop.permute.xlu1 %2049 }
 0x16b   : > { %v2332_v11 = vsel %vm10493_vm12, %v2299_v2, %v2050_v51  ;;  %1818 = vrot.lane.b32.xlu0 %v7771_v15, %s6855_s23  ;;  %v1433_v2 = vshrl.u32 %v7812_v28, 16  ;;  %v424_v51 = vld [vmem:[#allocation2 + $0xd4] sm:$0x1] }
 0x16c   : > { %2063 = vrot.lane.b32.xlu1 %v7604_v12, %s6861_s13  ;;  %v2365_v16 = vsel %vm2363_vm13, %v2332_v11, %v7695_v34  ;;  %v1403_v34 = vrot.slane %v1402_v6, 4  ;;  %v425_v7 = vsel %vm6993_vm5, 0, %v424_v51  ;;  %v7834_v11 = vcombine.low %v7755_v37, %v7765_v59 }
 0x16d   : > { %6546 = vmatprep.mubr.msk.bf16.mxu0 %vm2433_vm15, %v2365_v16  ;;  %v6235_v6 = vrot.slane %v7755_v37, 9  ;;  %426 = vst [vmem:[#allocation2 + $0xd4] sm:$0x1] %v425_v7  ;;  %v1614_v16 = vrot.slane %v1067_v27, 5  ;;  %v1431_v51 = vrot.slane %v1429_v0, 5  ;;  %v1435_v39 = vrot.slane %v1433_v2, 4 }
 0x16e   : > { %v7817_v63 = vpop.permute.xlu0 %1952  ;;  %v7819_v4 = vpop.permute.xlu1 %1798  ;;  %v1408_v17 = vsel %vm7077_vm11, %v1403_v34, %v1407_v54  ;;  %v1427_v0 = vrot.slane %v1426_v48, 4  ;;  %v1618_v7 = vrot.slane %v7812_v28, 5  ;;  %vm2738_vm5 = vcmask 122880  }
 0x16f   : > { %1898 = vrot.lane.b32.xlu0 %v7789_v30, %s6854_s22  ;;  %v7849_v37 = vcombine.low %v1408_v17, %v1418_v9  ;;  %v1612_v54 = vsel %vm7021_vm8, %v6235_v6, %v1611_v10  ;;  %v1615_v3 = vsel %vm7021_vm8, %v1613_v43, %v1614_v16  ;;  %v1436_v34 = vor.u32 %v1435_v39, %v1431_v51 }
 0x170   : > { %2098 = vrot.lane.b32.xlu1 %v7620_v49, %s6860_s12  ;;  %v2122_v17 = vsel %vm2116_vm0, %v7144_v41, %v7660_v55  ;;  %v7866_v10 = vcombine.low %v1612_v54, %v1615_v3  ;;  %v1441_v39 = vrot.slane %v1439_v57, 5  ;;  %v6236_v43 = vrot.slane %v7804_v36, 9  ;;  %v7892_v3 = vld [vmem:[#allocation2 + $0xb4] sm:$0xf] }
 0x171   : > { %v1437_v5 = vrot.slane %v1436_v34, 4  ;;  %v2169_v6 = vsel %vm2165_vm2, %v2122_v17, %v7596_v47  ;;  %v1621_v16 = vrot.slane %v1070_v46, 5  ;;  %v1432_v19 = vsel %vm7077_vm11, %v1427_v0, %v1431_v51 }
 0x172   : > { %v7837_v13 = vpop.permute.xlu1 %2086  ;;  %v7845_v59 = vpop.permute.xlu0 %2092  ;;  %v2202_v47 = vsel %vm2198_vm6, %v2169_v6, %v7625_v40  ;;  %v1620_v54 = vrot.slane %v1618_v7, 4  ;;  %v1619_v48 = vsel %vm7021_vm8, %v6236_v43, %v1618_v7  ;;  %v1444_v34 = vshrl.u32 %v7892_v3, 16 }
 0x173   : > { %1933 = vrot.lane.b32.xlu0 %v7834_v11, %s6856_s24  ;;  %v1442_v9 = vsel %vm7077_vm11, %v1437_v5, %v1441_v39 }
 0x174   : > { %1812 = vrot.lane.b32.xlu1 %v7604_v12, %s6855_s23  ;;  %v7904_v51 = vcombine.low %v1432_v19, %v1442_v9  ;;  %v1446_v6 = vrot.slane %v1444_v34, 4  ;;  %v2125_v9 = vsel %vm2116_vm0, %v7187_v60, %v7819_v4 }
 0x175   : > { %v2171_v60 = vsel %vm2165_vm2, %v2125_v9, %v7719_v22 }
 0x176   : > { %v7851_v27 = vpop.permute.xlu1 %1880 }
 0x177   : > { %1968 = vrot.lane.b32.xlu0 %v7849_v37, %s6859_s10 }
 0x178   : > { %1892 = vrot.lane.b32.xlu1 %v7620_v49, %s6854_s22  ;;  %v7881_v49 = vcombine.low %v7804_v36, %v7812_v28  ;;  %v2235_v28 = vsel %vm2231_vm7, %v2202_v47, %v7791_v20  ;;  %v7900_v36 = vld [vmem:[#allocation2 + $0xb8] sm:$0xf]  ;;  %v1447_v20 = vshll.u32 %v7892_v3, 16 }
 0x179   : > { %v7864_v12 = vpop.permute.xlu0 %2057  ;;  %v2268_v57 = vsel %vm2264_vm9, %v2235_v28, %v7683_v29  ;;  %v1457_v17 = vshrl.u32 %v7900_v36, 16  ;;  %v1453_v0 = vshll.u32 %v7900_v36, 16 }
 0x17a   : > { %v7868_v2 = vpop.permute.xlu1 %1983  ;;  %v2301_v29 = vsel %vm2297_vm10, %v2268_v57, %v7735_v38  ;;  %v1449_v43 = vrot.slane %v1447_v20, 5  ;;  %v1073_v38 = vld [vmem:[#allocation2 + $0xbc] sm:$0x1]  ;;  %v7941_v20 = vld [vmem:[#allocation2 + $0xc0] sm:$0xf] }
 0x17b   : > { %2003 = vrot.lane.b32.xlu0 %v7866_v10, %s6857_s25  ;;  %v1455_v47 = vrot.slane %v1453_v0, 5  ;;  %v1459_v19 = vrot.slane %v1457_v17, 4  ;;  %v2204_v0 = vsel %vm2198_vm6, %v2171_v60, %v7763_v53  ;;  %v7965_v53 = vcombine.low %v7892_v3, %v7900_v36 }
 0x17c   : > { %1927 = vrot.lane.b32.xlu1 %v7634_v23, %s6856_s24  ;;  %v1450_v34 = vor.u32 %v1449_v43, %v1446_v6  ;;  %v1634_v6 = vshll.u32 %v7941_v20, 16 }
 0x17d   : > { %v7877_v41 = vpop.permute.xlu0 %2094  ;;  %v1460_v4 = vor.u32 %v1459_v19, %v1455_v47 }
 0x17e   : > { %v7883_v55 = vpop.permute.xlu1 %1915 }
 0x17f   : > { %2038 = vrot.lane.b32.xlu0 %v7881_v49, %s6858_s26 }
 0x180   : > { %1962 = vrot.lane.b32.xlu1 %v7654_v50, %s6859_s10  ;;  %v1622_v50 = vsel %vm7021_vm8, %v1620_v54, %v1621_v16  ;;  %v1463_v54 = vshll.u32 %v1073_v38, 16 }
 0x181   : > { %v7902_v40 = vpop.permute.xlu0 %1886  ;;  %v7922_v39 = vcombine.low %v1619_v48, %v1622_v50  ;;  %v1625_v50 = vrot.slane %v7900_v36, 5 }
 0x182   : > { %v2019_v46 = vpop.permute.xlu1 %2018  ;;  %v1465_v57 = vrot.slane %v1463_v54, 5 }
 0x183   : > { %2073 = vrot.lane.b32.xlu0 %v7904_v51, %s6861_s13  ;;  %v1627_v60 = vrot.slane %v1625_v50, 4 }
 0x184   : > { %1997 = vrot.lane.b32.xlu1 %v7672_v61, %s6857_s25 }
 0x185   : > { %v7920_v5 = vpop.permute.xlu0 %1921 }
 0x186   : > { %v2052_v7 = vpop.permute.xlu1 %2051 }
 0x187   : > { %v2334_v16 = vsel %vm10493_vm12, %v2301_v29, %v2052_v7  ;;  %2108 = vrot.lane.b32.xlu0 %v7922_v39, %s6860_s12  ;;  %v1451_v29 = vrot.slane %v1450_v34, 4  ;;  %v1631_v7 = vshrl.u32 %v7941_v20, 16  ;;  %v6237_v34 = vrot.slane %v7892_v3, 9 }
 0x188   : > { %2032 = vrot.lane.b32.xlu1 %v7708_v18, %s6858_s26  ;;  %v2367_v61 = vsel %vm2363_vm13, %v2334_v16, %v7837_v13  ;;  %v7947_v13 = vld [vmem:[#allocation2 + $0xc4] sm:$0xf]  ;;  %v1461_v16 = vrot.slane %v1460_v4, 4  ;;  %v1628_v4 = vrot.slane %v1073_v38, 5 }
 0x189   : > { %6547 = vmatmul.mubr.msk.bf16.vlgmr.msra.gmra.mxu0 %vm2433_vm15, %v2367_v61  ;;  %v7937_v28 = vpop.permute.xlu0 %1956  ;;  %v1644_v19 = vshrl.u32 %v7947_v13, 16  ;;  %v1640_v9 = vshll.u32 %v7947_v13, 16  ;;  %v1456_v18 = vsel %vm7077_vm11, %v1451_v29, %v1455_v47  ;;  %v1633_v36 = vrot.slane %v1631_v7, 4  ;;  %v1076_v29 = vld [vmem:[#allocation2 + $0xc8] sm:$0x1] }
 0x18a   : > { %v1801_v48 = vpop.permute.xlu1 %1800  ;;  %v1466_v23 = vsel %vm7077_vm11, %v1461_v16, %v1465_v57  ;;  %v1626_v57 = vsel %vm7021_vm8, %v6237_v34, %v1625_v50  ;;  %v1650_v16 = vshll.u32 %v1076_v29, 16 }
 0x18b   : > { %1822 = vrot.lane.b32.xlu0 %v7904_v51, %s6855_s23  ;;  %v1642_v3 = vrot.slane %v1640_v9, 5  ;;  %v2128_v34 = vsel %vm2116_vm0, %v7317_v8, %v1801_v48 }
 0x18c   : > { %2067 = vrot.lane.b32.xlu1 %v7721_v26, %s6861_s13  ;;  %v1652_v9 = vrot.slane %v1650_v16, 5  ;;  %v2173_v48 = vsel %vm2165_vm2, %v2128_v34, %v7851_v27 }
 0x18d   : > { %v7950_v17 = vpop.permute.xlu0 %1991 }
 0x18e   : > { %v1949_v22 = vpop.permute.xlu1 %1948 }
 0x18f   : > { %v2237_v43 = vsel %vm2231_vm7, %v2204_v0, %v1949_v22  ;;  %1902 = vrot.lane.b32.xlu0 %v7922_v39, %s6854_s22 }
 0x190   : > { %v2270_v61 = vsel %vm2264_vm9, %v2237_v43, %v7868_v2  ;;  %2102 = vrot.lane.b32.xlu1 %v7733_v52, %s6860_s12  ;;  %v1636_v43 = vrot.slane %v1634_v6, 5 }
 0x191   : > { %v2303_v54 = vsel %vm2297_vm10, %v2270_v61, %v2019_v46  ;;  %v7971_v0 = vpop.permute.xlu0 %2026  ;;  %v1646_v61 = vrot.slane %v1644_v19, 4 }
 0x192   : > { %v1986_v22 = vpop.permute.xlu1 %1985  ;;  %v2336_v2 = vsel %vm10493_vm12, %v2303_v54, %v7742_v44  ;;  %v7988_v44 = vcombine.low %v1456_v18, %v1466_v23  ;;  %v1637_v7 = vor.u32 %v1636_v43, %v1633_v36  ;;  %v1659_v54 = vrot.slane %v7947_v13, 5 }
 0x193   : > { %v2369_v46 = vsel %vm2363_vm13, %v2336_v2, %v7681_v35  ;;  %1937 = vrot.lane.b32.xlu0 %v7965_v53, %s6856_s24  ;;  %v1629_v35 = vsel %vm7021_vm8, %v1627_v60, %v1628_v4  ;;  %v1647_v6 = vor.u32 %v1646_v61, %v1642_v3  ;;  %v8013_v60 = vcombine.low %v7941_v20, %v7947_v13 }
 0x194   : > { %1816 = vrot.lane.b32.xlu1 %v7721_v26, %s6855_s23  ;;  %6550 = vmatprep.mubr.msk.bf16.mxu0 %vm2433_vm15, %v2369_v46  ;;  %v8000_v23 = vcombine.low %v1626_v57, %v1629_v35  ;;  %v1638_v19 = vrot.slane %v1637_v7, 4  ;;  %v6238_v2 = vrot.slane %v7941_v20, 9  ;;  %v1662_v36 = vrot.slane %v1076_v29, 5 }
 0x195   : > { %v7986_v47 = vpop.permute.xlu0 %2061  ;;  %v1648_v50 = vrot.slane %v1647_v6, 4  ;;  %v1661_v8 = vrot.slane %v1659_v54, 4  ;;  %v2206_v29 = vsel %vm2198_vm6, %v2173_v48, %v7883_v55 }
 0x196   : > { %v2021_v38 = vpop.permute.xlu1 %2020  ;;  %v1643_v46 = vsel %vm7077_vm11, %v1638_v19, %v1642_v3 }
 0x197   : > { %1972 = vrot.lane.b32.xlu0 %v7988_v44, %s6859_s10  ;;  %v1653_v61 = vsel %vm7077_vm11, %v1648_v50, %v1652_v9 }
 0x198   : > { %1896 = vrot.lane.b32.xlu1 %v7733_v52, %s6854_s22  ;;  %v8036_v57 = vcombine.low %v1643_v46, %v1653_v61 }
 0x199   : > { %v7998_v26 = vpop.permute.xlu0 %2096 }
 0x19a   : > { %v1951_v18 = vpop.permute.xlu1 %1950 }
 0x19b   : > { %2007 = vrot.lane.b32.xlu0 %v8000_v23, %s6857_s25  ;;  %v2239_v35 = vsel %vm2231_vm7, %v2206_v29, %v1951_v18 }
 0x19c   : > { %1931 = vrot.lane.b32.xlu1 %v7749_v58, %s6856_s24  ;;  %v2272_v6 = vsel %vm2264_vm9, %v2239_v35, %v1986_v22 }
 0x19d   : > { %v8009_v52 = vpop.permute.xlu0 %1810 }
 0x19e   : > { %v1803_v4 = vpop.permute.xlu1 %1802 }
 0x19f   : > { %v2131_v43 = vsel %vm2116_vm0, %v7495_v45, %v1803_v4  ;;  %2042 = vrot.lane.b32.xlu0 %v8013_v60, %s6858_s26 }
 0x1a0   : > { %v2175_v20 = vsel %vm2165_vm2, %v2131_v43, %v7704_v42  ;;  %1966 = vrot.lane.b32.xlu1 %v7771_v15, %s6859_s10  ;;  %v1660_v42 = vsel %vm7021_vm8, %v6238_v2, %v1659_v54  ;;  %v1663_v15 = vsel %vm7021_vm8, %v1661_v8, %v1662_v36 }
 0x1a1   : > { %v2208_v45 = vsel %vm2198_vm6, %v2175_v20, %v7725_v21  ;;  %v8032_v13 = vpop.permute.xlu0 %1890  ;;  %v8053_v55 = vcombine.low %v1660_v42, %v1663_v15  ;;  %v2752_v15 = vld [vmem:[#allocation3 + $0x18] sm:$0x1] }
 0x1a2   : > { %v2241_v3 = vsel %vm2231_vm7, %v2208_v45, %v7817_v63  ;;  %v1885_v27 = vpop.permute.xlu1 %1884 }
 0x1a3   : > { %2077 = vrot.lane.b32.xlu0 %v8036_v57, %s6861_s13  ;;  %v2274_v21 = vsel %vm2264_vm9, %v2241_v3, %v7787_v24  ;;  %v2305_v24 = vsel %vm2297_vm10, %v2272_v6, %v2021_v38 }
 0x1a4   : > { %2001 = vrot.lane.b32.xlu1 %v7789_v30, %s6857_s25  ;;  %v2307_v16 = vsel %vm2297_vm10, %v2274_v21, %v7799_v62  ;;  %v10562_v21 = vmov 0  }
 0x1a5   : > { %v8051_v63 = vpop.permute.xlu0 %1925  ;;  %v2340_v19 = vsel %vm10493_vm12, %v2307_v16, %v7864_v12  ;;  %2736 = vst.msk [vmem:[#allocation3] sm:$0xf] %vm10494_vm3, %v10562_v21  ;;  %2737 = vst.msk [vmem:[#allocation3 + $0x4] sm:$0xf] %vm10494_vm3, %v10562_v21 }
 0x1a6   : > { %v1920_v7 = vpop.permute.xlu1 %1919  ;;  %v2373_v22 = vsel %vm2363_vm13, %v2340_v19, %v7845_v59  ;;  %2739 = vst.msk [vmem:[#allocation3 + $0x8] sm:$0x1] %vm2738_vm5, %v10562_v21  ;;  %2743 = vst.msk [vmem:[#allocation3 + $0xd4] sm:$0x1] %vm2738_vm5, %v10562_v21 }
 0x1a7   : > { %2112 = vrot.lane.b32.xlu0 %v8053_v55, %s6860_s12  ;;  %2741 = vst.msk [vmem:[#allocation3 + $0xcc] sm:$0xf] %vm10494_vm3, %v10562_v21  ;;  %2742 = vst.msk [vmem:[#allocation3 + $0xd0] sm:$0xf] %vm10494_vm3, %v10562_v21 }
 0x1a8   : > { %2036 = vrot.lane.b32.xlu1 %v7834_v11, %s6858_s26 }
 0x1a9   : > { %v8062_v30 = vpop.permute.xlu0 %1960 }
 0x1aa   : > { %v2056_v18 = vpop.permute.xlu1 %2055 }
 0x1ab   : > { %v2338_v50 = vsel %vm10493_vm12, %v2305_v24, %v2056_v18 }
 0x1ac   : > { %2071 = vrot.lane.b32.xlu1 %v7849_v37, %s6861_s13  ;;  %v2371_v62 = vsel %vm2363_vm13, %v2338_v50, %v7761_v33 }
 0x1ad   : > { %6551 = vmatmul.mubr.msk.bf16.gmra.mxu0 %vm2433_vm15, %v2371_v62  ;;  %v8075_v9 = vpop.permute.xlu0 %1995 }
 0x1ae   : > { %6554 = vmatprep.mubr.msk.bf16.mxu0 %vm2433_vm15, %v2373_v22  ;;  %v1805_v38 = vpop.permute.xlu1 %1804 }
 0x1af   : > { %v2134_v59 = vsel %vm2116_vm0, %v7272_v56, %v1805_v38 }
 0x1b0   : > { %2106 = vrot.lane.b32.xlu1 %v7866_v10, %s6860_s12  ;;  %v2177_v36 = vsel %vm2165_vm2, %v2134_v59, %v1885_v27 }
 0x1b1   : > { %v8080_v12 = vpop.permute.xlu0 %2030  ;;  %v2210_v46 = vsel %vm2198_vm6, %v2177_v36, %v1920_v7  ;;  %v8160_v7 = vld [vmem:[#allocation2 + $0xcc] sm:$0xf] }
 0x1b2   : > { %v1990_v54 = vpop.permute.xlu1 %1989  ;;  %v1665_v19 = vshrl.u32 %v8160_v7, 16  ;;  %v1668_v50 = vshll.u32 %v8160_v7, 16 }
 0x1b4   : > { %1820 = vrot.lane.b32.xlu1 %v7849_v37, %s6855_s23  ;;  %v1670_v59 = vrot.slane %v1668_v50, 5 }
 0x1b5   : > { %v8084_v33 = vpop.permute.xlu0 %2065 }
 0x1b6   : > { %v2025_v34 = vpop.permute.xlu1 %2024 }
 0x1b8   : > { %1900 = vrot.lane.b32.xlu1 %v7866_v10, %s6854_s22 }
 0x1b9   : > { %v8090_v4 = vpop.permute.xlu0 %2100 }
 0x1ba   : > { %v1955_v2 = vpop.permute.xlu1 %1954 }
 0x1bb   : > { %v2243_v10 = vsel %vm2231_vm7, %v2210_v46, %v1955_v2  ;;  %v8176_v2 = vld [vmem:[#allocation2 + $0xd4] sm:$0x1] }
 0x1bc   : > { %1935 = vrot.lane.b32.xlu1 %v7881_v49, %s6856_s24  ;;  %v2276_v3 = vsel %vm2264_vm9, %v2243_v10, %v1990_v54 }
 0x1bd   : > { %v8095_v43 = vpop.permute.xlu0 %1814 }
 0x1be   : > { %v1807_v37 = vpop.permute.xlu1 %1806 }
 0x1bf   : > { %v2137_v61 = vsel %vm2116_vm0, %v7373_v1, %v1807_v37  ;;  %v2749_v37 = vld [vmem:[#allocation3 + $0xc] sm:$0x1] }
 0x1c0   : > { %v2179_v56 = vsel %vm2165_vm2, %v2137_v61, %v7902_v40  ;;  %1970 = vrot.lane.b32.xlu1 %v7904_v51, %s6859_s10 }
 0x1c1   : > { %v2212_v8 = vsel %vm2198_vm6, %v2179_v56, %v7920_v5  ;;  %v8107_v48 = vpop.permute.xlu0 %1894  ;;  %v2309_v5 = vsel %vm2297_vm10, %v2276_v3, %v2025_v34  ;;  %v1667_v34 = vrot.slane %v1665_v19, 4 }
 0x1c2   : > { %v2245_v20 = vsel %vm2231_vm7, %v2212_v8, %v7937_v28  ;;  %v1889_v45 = vpop.permute.xlu1 %1888  ;;  %v1684_v8 = vshll.u32 %v8176_v2, 16 }
 0x1c3   : > { %v2278_v1 = vsel %vm2264_vm9, %v2245_v20, %v7950_v17  ;;  %v1671_v56 = vor.u32 %v1670_v59, %v1667_v34  ;;  %v2143_v20 = vsel %vm2116_vm0, %v7528_v14, %v8009_v52 }
 0x1c4   : > { %2005 = vrot.lane.b32.xlu1 %v7922_v39, %s6857_s25  ;;  %v2311_v40 = vsel %vm2297_vm10, %v2278_v1, %v7971_v0 }
 0x1c5   : > { %v8118_v51 = vpop.permute.xlu0 %1929  ;;  %v2344_v28 = vsel %vm10493_vm12, %v2311_v40, %v7986_v47  ;;  %v2183_v40 = vsel %vm2165_vm2, %v2143_v20, %v8032_v13 }
 0x1c6   : > { %v2060_v27 = vpop.permute.xlu1 %2059  ;;  %v2377_v39 = vsel %vm2363_vm13, %v2344_v28, %v7998_v26  ;;  %v2804_v28 = vld [vmem:[#allocation3 + $0x14] sm:$0x1]  ;;  %v2216_v14 = vsel %vm2198_vm6, %v2183_v40, %v8051_v63 }
 0x1c7   : > { %v2342_v29 = vsel %vm10493_vm12, %v2309_v5, %v2060_v27  ;;  %vm8142_vm12 = vmand %vm2738_vm5, %vm315_vm1 }
 0x1c8   : > { %2040 = vrot.lane.b32.xlu1 %v7965_v53, %s6858_s26  ;;  %v2375_v17 = vsel %vm2363_vm13, %v2342_v29, %v7877_v41  ;;  %v8138_v41 = vld [vmem:[#allocation2 + $0xd0] sm:$0xf]  ;;  %v2753_v6 = vsel %vm8142_vm12, 0, %v2752_v15  ;;  %v2750_v61 = vsel %vm8142_vm12, 0, %v2749_v37  ;;  %vm8188_vm1 = vmand %vm2738_vm5, %vm371_vm4  ;;  %v2746_v15 = vld [vmem:[#allocation3] sm:$0x1] }
 0x1c9   : > { %6555 = vmatmul.mubr.msk.bf16.gmra.mxu0 %vm2433_vm15, %v2375_v17  ;;  %v8131_v0 = vpop.permute.xlu0 %1964  ;;  %2754 = vst [vmem:[#allocation3 + $0x18] sm:$0x1] %v2753_v6  ;;  %v1678_v24 = vshrl.u32 %v8138_v41, 16  ;;  %v1674_v18 = vshll.u32 %v8138_v41, 16  ;;  %2751 = vst [vmem:[#allocation3 + $0xc] sm:$0x1] %v2750_v61  ;;  %v2249_v17 = vsel %vm2231_vm7, %v2216_v14, %v8062_v30 }
 0x1ca   : > { %6558 = vmatprep.mubr.msk.bf16.mxu0 %vm2433_vm15, %v2377_v39  ;;  %v1809_v42 = vpop.permute.xlu1 %1808  ;;  %v1693_v27 = vrot.slane %v8138_v41, 5  ;;  %v1672_v39 = vrot.slane %v1671_v56, 4  ;;  %v2801_v6 = vld [vmem:[#allocation3 + $0x8] sm:$0x1]  ;;  %v2747_v30 = vsel %vm8142_vm12, 0, %v2746_v15  ;;  %vm10565_vm5 = vcmask 457728  }
 0x1cb   : > { %v8172_v38 = vrot.slane %v1674_v18, 5  ;;  %v1680_v54 = vrot.slane %v1678_v24, 4  ;;  %v2140_v36 = vsel %vm2116_vm0, %v7508_v25, %v1809_v42  ;;  %v2807_v25 = vld [vmem:[#allocation3 + $0x20] sm:$0x1]  ;;  %v1686_v42 = vrot.slane %v1684_v8, 5  ;;  %vm10566_vm3 = vmmov %vm10565_vm5 }
 0x1cc   : > { %2075 = vrot.lane.b32.xlu1 %v7988_v44, %s6861_s13  ;;  %v2181_v3 = vsel %vm2165_vm2, %v2140_v36, %v1889_v45  ;;  %v2808_v1 = vsel %vm8188_vm1, 0, %v2807_v25  ;;  %v2802_v18 = vsel %vm8188_vm1, 0, %v2801_v6  ;;  %2748 = vst [vmem:[#allocation3] sm:$0x1] %v2747_v30  ;;  %v6239_v36 = vrot.slane %v8160_v7, 9 }
 0x1cd   : > { %v8136_v35 = vpop.permute.xlu0 %1999  ;;  %2809 = vst [vmem:[#allocation3 + $0x20] sm:$0x1] %v2808_v1  ;;  %2803 = vst [vmem:[#allocation3 + $0x8] sm:$0x1] %v2802_v18  ;;  %v1695_v37 = vrot.slane %v1693_v27, 4 }
 0x1ce   : > { %v1924_v47 = vpop.permute.xlu1 %1923  ;;  %v2758_v18 = vld [vmem:[#allocation3 + $0x30] sm:$0x1] }
 0x1cf   : > { %v2214_v5 = vsel %vm2198_vm6, %v2181_v3, %v1924_v47  ;;  %v2282_v47 = vsel %vm2264_vm9, %v2249_v17, %v8075_v9 }
 0x1d0   : > { %2110 = vrot.lane.b32.xlu1 %v8000_v23, %s6860_s12  ;;  %v2315_v9 = vsel %vm2297_vm10, %v2282_v47, %v8080_v12  ;;  %v1696_v12 = vrot.slane %v8176_v2, 5  ;;  %v1694_v2 = vsel %vm7021_vm8, %v6239_v36, %v1693_v27 }
 0x1d1   : > { %v8170_v62 = vpop.permute.xlu0 %2034  ;;  %v2348_v34 = vsel %vm10566_vm3, %v2315_v9, %v8084_v33  ;;  %v1677_v33 = vsel %vm7077_vm11, %v1672_v39, %v8172_v38  ;;  %v2759_v9 = vsel %vm8142_vm12, 0, %v2758_v18 }
 0x1d2   : > { %v1959_v16 = vpop.permute.xlu1 %1958  ;;  %v1697_v56 = vsel %vm7021_vm8, %v1695_v37, %v1696_v12  ;;  %2760 = vst [vmem:[#allocation3 + $0x30] sm:$0x1] %v2759_v9  ;;  %v10568_v37 = vld [vmem:[#allocation9_spill] sm:$0xff] }
 0x1d3   : > { %v2247_v52 = vsel %vm2231_vm7, %v2214_v5, %v1959_v16  ;;  %v3387_v16 = vld [vmem:[#allocation3 + $0x4] sm:$0xf]  ;;  %v3386_v25 = vld [vmem:[#allocation3] sm:$0xf] }
 0x1d4   : > { %1824 = vrot.lane.b32.xlu1 %v7988_v44, %s6855_s23  ;;  %v1681_v44 = vor.u32 %v1680_v54, %v8172_v38  ;;  %v3450_v19 = vshll.u32 %v3387_v16, 16  ;;  %v3454_v50 = vshrl.u32 %v3387_v16, 16  ;;  %v3388_v20 = vld [vmem:[#allocation3 + $0x8] sm:$0x1]  ;;  %v3441_v38 = vshrl.u32 %v3386_v25, 16 }
 0x1d5   : > { %v8183_v10 = vpop.permute.xlu0 %2069  ;;  %v3444_v1 = vshll.u32 %v3386_v25, 16  ;;  %v3460_v40 = vshll.u32 %v3388_v20, 16  ;;  %v3874_v5 = vrot.slane %v3387_v16, 5 }
 0x1d6   : > { %v1994_v22 = vpop.permute.xlu1 %1993  ;;  %v1682_v29 = vrot.slane %v1681_v44, 4  ;;  %v3456_v44 = vrot.slane %v3454_v50, 4  ;;  %v3443_v14 = vrot.slane %v3441_v38, 4 }
 0x1d7   : > { %v2280_v13 = vsel %vm2264_vm9, %v2247_v52, %v1994_v22  ;;  %v3446_v52 = vrot.slane %v3444_v1, 5  ;;  %v3876_v39 = vrot.slane %v3874_v5, 4 }
 0x1d8   : > { %1904 = vrot.lane.b32.xlu1 %v8000_v23, %s6854_s22 }
 0x1d9   : > { %v8217_v24 = vpop.permute.xlu0 %2104  ;;  %v3447_v17 = vor.u32 %v3446_v52, %v3443_v14 }
 0x1da   : > { %v2029_v46 = vpop.permute.xlu1 %2028 }
 0x1db   : > { %v2313_v63 = vsel %vm2297_vm10, %v2280_v13, %v2029_v46  ;;  %v2381_v46 = vsel %vm2363_vm13, %v2348_v34, %v8090_v4  ;;  %v6347_v13 = vrot.slane %v3386_v25, 9  ;;  %v3448_v47 = vrot.slane %v3447_v17, 4 }
 0x1dc   : > { %1939 = vrot.lane.b32.xlu1 %v8013_v60, %s6856_s24  ;;  %v2805_v60 = vsel %vm8188_vm1, 0, %v2804_v28  ;;  %v6293_v28 = vcombine.low %v1694_v2, %v1697_v56 }
 0x1dd   : > { %2806 = vst [vmem:[#allocation3 + $0x14] sm:$0x1] %v2805_v60  ;;  %v8244_v4 = vpop.permute.xlu0 %1818  ;;  %v3875_v16 = vsel %vm7021_vm8, %v6347_v13, %v3874_v5 }
 0x1de   : > { %v2064_v45 = vpop.permute.xlu1 %2063  ;;  %v2155_v18 = vsel %vm2116_vm0, %v7749_v58, %v8244_v4 }
 0x1df   : > { %v2346_v22 = vsel %vm10565_vm5, %v2313_v63, %v2064_v45  ;;  %vm10569_vm5 = vmmov %vm10566_vm3 }
 0x1e0   : > { %1974 = vrot.lane.b32.xlu1 %v8036_v57, %s6859_s10  ;;  %v6291_v57 = vcombine.low %v8160_v7, %v8138_v41  ;;  %v3452_v41 = vrot.slane %v3450_v19, 5  ;;  %v1687_v7 = vsel %vm7077_vm11, %v1682_v29, %v1686_v42  ;;  %v3462_v29 = vrot.slane %v3460_v40, 5 }
 0x1e1   : > { %v8252_v60 = vpop.permute.xlu0 %1898  ;;  %v3877_v42 = vrot.slane %v3388_v20, 5 }
 0x1e2   : > { %v2099_v54 = vpop.permute.xlu1 %2098  ;;  %v3457_v8 = vor.u32 %v3456_v44, %v3452_v41  ;;  %v3453_v6 = vsel %vm7077_vm11, %v3448_v47, %v3452_v41  ;;  %v2755_v41 = vld [vmem:[#allocation3 + $0x24] sm:$0x1]  ;;  %v2761_v47 = vld [vmem:[#allocation3 + $0x3c] sm:$0x1] }
 0x1e3   : > { %v2379_v59 = vsel %vm2363_vm13, %v2346_v22, %v2099_v54  ;;  %v3878_v30 = vsel %vm7021_vm8, %v3876_v39, %v3877_v42 }
 0x1e4   : > { %2009 = vrot.lane.b32.xlu1 %v8053_v55, %s6857_s25  ;;  %6559 = vmatmul.mubr.msk.bf16.gmra.mxu0 %vm2433_vm15, %v2379_v59  ;;  %v6292_v55 = vcombine.low %v1677_v33, %v1687_v7  ;;  %v3458_v45 = vrot.slane %v3457_v8, 4  ;;  %v6397_v22 = vcombine.low %v3875_v16, %v3878_v30  ;;  %v10567_v59 = vld [vmem:[#allocation8_spill] sm:$0xff] }
 0x1e5   : > { %6562 = vmatprep.mubr.msk.bf16.mxu0 %vm2433_vm15, %v2381_v46  ;;  %v8263_v19 = vpop.permute.xlu0 %1933  ;;  %v2149_v46 = vsel %vm2116_vm0, %v10568_v37, %v8095_v43  ;;  %v2813_v43 = vld [vmem:[#allocation3 + $0x38] sm:$0x1] }
 0x1e6   : > { %v1813_v61 = vpop.permute.xlu1 %1812  ;;  %v3463_v63 = vsel %vm7077_vm11, %v3458_v45, %v3462_v29  ;;  %v2187_v44 = vsel %vm2165_vm2, %v2149_v46, %v8107_v48  ;;  %v2814_v48 = vsel %vm8188_vm1, 0, %v2813_v43 }
 0x1e7   : > { %v6381_v50 = vcombine.low %v3453_v6, %v3463_v63  ;;  %v2146_v36 = vsel %vm2116_vm0, %v10567_v59, %v1813_v61  ;;  %v2220_v2 = vsel %vm2198_vm6, %v2187_v44, %v8118_v51  ;;  %2815 = vst [vmem:[#allocation3 + $0x38] sm:$0x1] %v2814_v48  ;;  %v2810_v51 = vld [vmem:[#allocation3 + $0x2c] sm:$0x1]  ;;  %v2762_v63 = vsel %vm8142_vm12, 0, %v2761_v47  ;;  %v10570_v6 = vld [vmem:[#allocation10_spill] sm:$0xff] }
 0x1e8   : > { %2044 = vrot.lane.b32.xlu1 %v6291_v57, %s6858_s26  ;;  %v2253_v8 = vsel %vm2231_vm7, %v2220_v2, %v8131_v0  ;;  %v2811_v0 = vsel %vm8188_vm1, 0, %v2810_v51  ;;  %2763 = vst [vmem:[#allocation3 + $0x3c] sm:$0x1] %v2762_v63 }
 0x1e9   : > { %4148 = vrot.lane.b32.xlu0 %v6381_v50, %s6854_s22  ;;  %v8268_v57 = vpop.permute.xlu0 %1968  ;;  %v2286_v20 = vsel %vm2264_vm9, %v2253_v8, %v8136_v35  ;;  %2812 = vst [vmem:[#allocation3 + $0x2c] sm:$0x1] %v2811_v0 }
 0x1ea   : > { %v1893_v3 = vpop.permute.xlu1 %1892  ;;  %v2319_v38 = vsel %vm2297_vm10, %v2286_v20, %v8170_v62 }
 0x1eb   : > { %v2185_v12 = vsel %vm2165_vm2, %v2146_v36, %v1893_v3  ;;  %v2352_v5 = vsel %vm10569_vm5, %v2319_v38, %v8183_v10  ;;  %vm10571_vm5 = vmmov %vm10566_vm3 }
 0x1ec   : > { %2079 = vrot.lane.b32.xlu1 %v6292_v55, %s6861_s13  ;;  %v2756_v55 = vsel %vm8142_vm12, 0, %v2755_v41  ;;  %v2385_v35 = vsel %vm2363_vm13, %v2352_v5, %v8217_v24  ;;  %v2822_v5 = vld [vmem:[#allocation3 + $0x5c] sm:$0x1]  ;;  %s6866_s13 = smov 126  }
 0x1ed   : > { %4228 = vrot.lane.b32.xlu0 %v6397_v22, %s6859_s10  ;;  %v2004_v61 = vpop.permute.xlu0 %2003  ;;  %2757 = vst [vmem:[#allocation3 + $0x24] sm:$0x1] %v2756_v55  ;;  %v2816_v22 = vld [vmem:[#allocation3 + $0x44] sm:$0x1] }
 0x1ee   : > { %v1928_v27 = vpop.permute.xlu1 %1927  ;;  %v2817_v36 = vsel %vm8188_vm1, 0, %v2816_v22 }
 0x1ef   : > { %v2218_v33 = vsel %vm2198_vm6, %v2185_v12, %v1928_v27  ;;  %v2764_v27 = vld [vmem:[#allocation3 + $0x48] sm:$0x1]  ;;  %2818 = vst [vmem:[#allocation3 + $0x44] sm:$0x1] %v2817_v36 }
 0x1f0   : > { %2114 = vrot.lane.b32.xlu1 %v6293_v28, %s6860_s12  ;;  %v2765_v17 = vsel %vm8142_vm12, 0, %v2764_v27 }
 0x1f1   : > { %v2039_v14 = vpop.permute.xlu0 %2038  ;;  %2766 = vst [vmem:[#allocation3 + $0x48] sm:$0x1] %v2765_v17 }
 0x1f2   : > { %v1963_v15 = vpop.permute.xlu1 %1962 }
 0x1f3   : > { %v2251_v56 = vsel %vm2231_vm7, %v2218_v33, %v1963_v15  ;;  %v2819_v15 = vld [vmem:[#allocation3 + $0x50] sm:$0x1] }
 0x1f4   : > { %v2820_v30 = vsel %vm8188_vm1, 0, %v2819_v15 }
 0x1f5   : > { %v2074_v45 = vpop.permute.xlu0 %2073  ;;  %2821 = vst [vmem:[#allocation3 + $0x50] sm:$0x1] %v2820_v30 }
 0x1f6   : > { %v1998_v54 = vpop.permute.xlu1 %1997 }
 0x1f7   : > { %v2284_v25 = vsel %vm2264_vm9, %v2251_v56, %v1998_v54  ;;  %v2191_v54 = vsel %vm2165_vm2, %v2155_v18, %v8252_v60  ;;  %v2770_v56 = vld [vmem:[#allocation3 + $0x60] sm:$0x1] }
 0x1f8   : > { %v2224_v37 = vsel %vm2198_vm6, %v2191_v54, %v8263_v19  ;;  %v2771_v8 = vsel %vm8142_vm12, 0, %v2770_v56 }
 0x1f9   : > { %v2109_v10 = vpop.permute.xlu0 %2108  ;;  %v2257_v58 = vsel %vm2231_vm7, %v2224_v37, %v8268_v57  ;;  %2772 = vst [vmem:[#allocation3 + $0x60] sm:$0x1] %v2771_v8 }
 0x1fa   : > { %v2033_v34 = vpop.permute.xlu1 %2032  ;;  %v2290_v12 = vsel %vm2264_vm9, %v2257_v58, %v2004_v61 }
 0x1fb   : > { %v2317_v3 = vsel %vm2297_vm10, %v2284_v25, %v2033_v34  ;;  %v2323_v41 = vsel %vm2297_vm10, %v2290_v12, %v2039_v14  ;;  %v2631_v14 = vlaneseq }
 0x1fd   : > { %v1823_v42 = vpop.permute.xlu0 %1822 }
 0x1fe   : > { %v2068_v7 = vpop.permute.xlu1 %2067 }
 0x1ff   : > { %v2350_v1 = vsel %vm10566_vm3, %v2317_v3, %v2068_v7  ;;  %v2356_v7 = vsel %vm10571_vm5, %v2323_v41, %v2074_v45  ;;  %v2767_v3 = vld [vmem:[#allocation3 + $0x54] sm:$0x1]  ;;  %v2161_v45 = vsel %vm2116_vm0, %v7881_v49, %v1823_v42  ;;  %vm10573_vm5 = vmmov %vm10566_vm3 }
 0x200   : > { %v2389_v2 = vsel %vm2363_vm13, %v2356_v7, %v2109_v10  ;;  %v2768_v38 = vsel %vm8142_vm12, 0, %v2767_v3 }
 0x201   : > { %v1903_v50 = vpop.permute.xlu0 %1902  ;;  %2769 = vst [vmem:[#allocation3 + $0x54] sm:$0x1] %v2768_v38 }
 0x202   : > { %v2103_v40 = vpop.permute.xlu1 %2102  ;;  %v2195_v27 = vsel %vm2165_vm2, %v2161_v45, %v1903_v50 }
 0x203   : > { %v2383_v28 = vsel %vm2363_vm13, %v2350_v1, %v2103_v40  ;;  %v2825_v40 = vld [vmem:[#allocation3 + $0x68] sm:$0x1] }
 0x204   : > { %6563 = vmatmul.mubr.msk.bf16.gmra.mxu0 %vm2433_vm15, %v2383_v28  ;;  %v2826_v0 = vsel %vm8188_vm1, 0, %v2825_v40  ;;  %v2823_v28 = vsel %vm8188_vm1, 0, %v2822_v5  ;;  %v2773_v5 = vld [vmem:[#allocation3 + $0x6c] sm:$0x1] }
 0x205   : > { %6566 = vmatprep.mubr.msk.bf16.mxu0 %vm2433_vm15, %v2385_v35  ;;  %v1938_v19 = vpop.permute.xlu0 %1937  ;;  %2827 = vst [vmem:[#allocation3 + $0x68] sm:$0x1] %v2826_v0  ;;  %2824 = vst [vmem:[#allocation3 + $0x5c] sm:$0x1] %v2823_v28 }
 0x206   : > { %v1817_v62 = vpop.permute.xlu1 %1816 }
 0x207   : > { %v2152_v16 = vsel %vm2116_vm0, %v10570_v6, %v1817_v62 }
 0x209   : > { %v1973_v61 = vpop.permute.xlu0 %1972 }
 0x20a   : > { %v1897_v52 = vpop.permute.xlu1 %1896 }
 0x20b   : > { %v2189_v9 = vsel %vm2165_vm2, %v2152_v16, %v1897_v52 }
 0x20d   : > { %v2008_v48 = vpop.permute.xlu0 %2007 }
 0x20e   : > { %v1932_v29 = vpop.permute.xlu1 %1931 }
 0x20f   : > { %v2222_v34 = vsel %vm2198_vm6, %v2189_v9, %v1932_v29  ;;  %v2396_v9 = vld [vmem:[%s10479_s2] sm:$0x3] }
 0x211   : > { %v2043_v51 = vpop.permute.xlu0 %2042 }
 0x212   : > { %v1967_v13 = vpop.permute.xlu1 %1966 }
 0x213   : > { %v2255_v46 = vsel %vm2231_vm7, %v2222_v34, %v1967_v13  ;;  %v8352_v13 = vshrl.u32 %v2631_v14, 7 }
 0x215   : > { %v2078_v62 = vpop.permute.xlu0 %2077  ;;  %10572 = vst [vmem:[#allocation8_spill] sm:$0xff] %v8352_v13  ;;  %v10496_v30 = vsub.s32 0, %v8352_v13  ;;  %v10495_v54 = vsub.s32 1, %v8352_v13 }
 0x216   : > { %v2002_v39 = vpop.permute.xlu1 %2001 }
 0x217   : > { %v2288_v4 = vsel %vm2264_vm9, %v2255_v46, %v2002_v39  ;;  %v2228_v39 = vsel %vm2198_vm6, %v2195_v27, %v1938_v19  ;;  %v8380_v36 = vrot.slane %v2396_v9, %v10495_v54  ;;  %v2776_v46 = vld [vmem:[#allocation3 + $0x78] sm:$0x1] }
 0x218   : > { %v2777_v12 = vsel %vm8142_vm12, 0, %v2776_v46 }
 0x219   : > { %v2113_v49 = vpop.permute.xlu0 %2112  ;;  %2778 = vst [vmem:[#allocation3 + $0x78] sm:$0x1] %v2777_v12 }
 0x21a   : > { %v2037_v24 = vpop.permute.xlu1 %2036 }
 0x21b   : > { %v2321_v60 = vsel %vm2297_vm10, %v2288_v4, %v2037_v24  ;;  %v2261_v24 = vsel %vm2231_vm7, %v2228_v39, %v1973_v61  ;;  %v3274_v39 = vld [vmem:[#allocation3 + $0xc] sm:$0xf] }
 0x21c   : > { %v2294_v63 = vsel %vm2264_vm9, %v2261_v24, %v2008_v48 }
 0x21d   : > { %v2327_v15 = vsel %vm2297_vm10, %v2294_v63, %v2043_v51 }
 0x21e   : > { %v2072_v59 = vpop.permute.xlu1 %2071  ;;  %v2360_v18 = vsel %vm10573_vm5, %v2327_v15, %v2078_v62  ;;  %v2774_v62 = vsel %vm8142_vm12, 0, %v2773_v5  ;;  %v2828_v15 = vld [vmem:[#allocation3 + $0x74] sm:$0x1] }
 0x21f   : > { %v2354_v44 = vsel %vm10566_vm3, %v2321_v60, %v2072_v59  ;;  %v2393_v22 = vsel %vm2363_vm13, %v2360_v18, %v2113_v49  ;;  %v8376_v59 = vrot.slane %v2396_v9, %v10496_v30  ;;  %2775 = vst [vmem:[#allocation3 + $0x6c] sm:$0x1] %v2774_v62  ;;  %v2829_v18 = vsel %vm8188_vm1, 0, %v2828_v15 }
 0x220   : > { %2830 = vst [vmem:[#allocation3 + $0x74] sm:$0x1] %v2829_v18 }
 0x222   : > { %v2107_v33 = vpop.permute.xlu1 %2106 }
 0x223   : > { %v2387_v55 = vsel %vm2363_vm13, %v2354_v44, %v2107_v33 }
 0x224   : > { %6567 = vmatmul.mubr.msk.bf16.gmra.mxu0 %vm2433_vm15, %v2387_v55 }
 0x225   : > { %6570 = vmatprep.mubr.msk.bf16.mxu0 %vm2433_vm15, %v2389_v2 }
 0x226   : > { %v1821_v57 = vpop.permute.xlu1 %1820 }
 0x227   : > { %v2158_v52 = vsel %vm2116_vm0, %v7834_v11, %v1821_v57 }
 0x22a   : > { %v1901_v43 = vpop.permute.xlu1 %1900 }
 0x22b   : > { %v2193_v29 = vsel %vm2165_vm2, %v2158_v52, %v1901_v43 }
 0x22e   : > { %v1936_v25 = vpop.permute.xlu1 %1935 }
 0x22f   : > { %v2226_v17 = vsel %vm2198_vm6, %v2193_v29, %v1936_v25 }
 0x232   : > { %v1971_v20 = vpop.permute.xlu1 %1970 }
 0x233   : > { %v2259_v47 = vsel %vm2231_vm7, %v2226_v17, %v1971_v20 }
 0x236   : > { %v2006_v1 = vpop.permute.xlu1 %2005 }
 0x237   : > { %v2292_v11 = vsel %vm2264_vm9, %v2259_v47, %v2006_v1 }
 0x23a   : > { %v2041_v35 = vpop.permute.xlu1 %2040 }
 0x23b   : > { %v2325_v42 = vsel %vm2297_vm10, %v2292_v11, %v2041_v35  ;;  %v3281_v35 = vld [vmem:[#allocation3 + $0x18] sm:$0xf] }
 0x23e   : > { %v2076_v10 = vpop.permute.xlu1 %2075 }
 0x23f   : > { %v2358_v6 = vsel %vm10566_vm3, %v2325_v42, %v2076_v10  ;;  %vm10578_vm3 = vcmask 125952   ;;  %v2831_v10 = vld [vmem:[#allocation3 + $0x80] sm:$0x1] }
 0x240   : > { %vm8407_vm5 = vmand %vm10578_vm3, %vm371_vm4  ;;  %v2832_v24 = vsel %vm8188_vm1, 0, %v2831_v10 }
 0x241   : > { %2833 = vst [vmem:[#allocation3 + $0x80] sm:$0x1] %v2832_v24  ;;  %vm10582_vm4 = vmmov %vm10578_vm3  ;;  %v2782_v24 = vld [vmem:[#allocation3 + $0x90] sm:$0x1] }
 0x242   : > { %v2111_v16 = vpop.permute.xlu1 %2110 }
 0x243   : > { %v2391_v50 = vsel %vm2363_vm13, %v2358_v6, %v2111_v16  ;;  %v3285_v6 = vld [vmem:[#allocation3 + $0x20] sm:$0x1] }
 0x244   : > { %6571 = vmatmul.mubr.msk.bf16.gmra.mxu0 %vm2433_vm15, %v2391_v50 }
 0x245   : > { %6574 = vmatprep.mubr.msk.bf16.mxu0 %vm2433_vm15, %v2393_v22 }
 0x246   : > { %v8372_v34 = vpop.permute.xlu1 %1824 }
 0x249   : > { %v6548_v37 = vpop.f32.mrf.mxu0 }
 0x24a   : > { %v2637_v58 = vmul.f32 %v6548_v37, %v8376_v59  ;;  %v8383_v4 = vpop.permute.xlu1 %1904 }
 0x24b   : > { %v2504_v60 = vpop.f32.mrf.mxu0 }
 0x24c   : > { %v8388_v41 = vadd.f32 %v8380_v36, %v2637_v58  ;;  %v2635_v44 = vmul.f32 %v8376_v59, %v2504_v60  ;;  %v2164_v60 = vsel %vm2116_vm0, %v7965_v53, %v8372_v34  ;;  %vm10583_vm0 = vmmov %vm10578_vm3  ;;  %vm10584_vm3 = vcmask 457728  }
 0x24d   : > { %v6549_v33 = vpop.f32.mrf.mxu0 }
 0x24e   : > { %10574 = vst [vmem:[#allocation9_spill] sm:$0xff] %v8388_v41  ;;  %v2705_v7 = vmax.f32 %v8388_v41, 0.0  ;;  %v8393_v19 = vadd.f32 %v8380_v36, %v2635_v44  ;;  %v2638_v55 = vmul.f32 %v6549_v33, %v8376_v59  ;;  %v1940_v2 = vpop.permute.xlu1 %1939 }
 0x24f   : > { %v2507_v57 = vpop.f32.mrf.mxu0 }
 0x250   : > { %10575 = vst [vmem:[#allocation10_spill] sm:$0xff] %v8393_v19  ;;  %v6484_v61 = vpack.c.bf16 %v2705_v7, %v2705_v7  ;;  %v2703_v56 = vmax.f32 %v8393_v19, 0.0  ;;  %v8398_v43 = vadd.f32 %v8380_v36, %v2638_v55  ;;  %v2636_v8 = vmul.f32 %v8376_v59, %v2507_v57  ;;  %v3278_v55 = vld [vmem:[#allocation3 + $0x14] sm:$0x1] }
 0x251   : > { %v2197_v57 = vsel %vm2165_vm2, %v2164_v60, %v8383_v4 }
 0x252   : > { %10576 = vst [vmem:[#allocation11_spill] sm:$0xff] %v8398_v43  ;;  %v2969_v25 = vshrl.u32 %v6484_v61, 16  ;;  %v6482_v48 = vpack.c.bf16 %v2703_v56, %v2703_v56  ;;  %v2706_v20 = vmax.f32 %v8398_v43, 0.0  ;;  %v1975_v3 = vpop.permute.xlu1 %1974  ;;  %v8403_v51 = vadd.f32 %v8380_v36, %v2636_v8 }
 0x253   : > { %v2972_v1 = vshll.u32 %v6484_v61, 16 }
 0x254   : > { %10577 = vst [vmem:[#allocation12_spill] sm:$0xff] %v8403_v51  ;;  %v2971_v38 = vrot.slane %v2969_v25, 7  ;;  %v2952_v40 = vshrl.u32 %v6482_v48, 16  ;;  %v6485_v0 = vpack.c.bf16 %v2706_v20, %v2706_v20  ;;  %v2704_v14 = vmax.f32 %v8403_v51, 0.0 }
 0x255   : > { %v2955_v29 = vshll.u32 %v6482_v48, 16  ;;  %v2230_v25 = vsel %vm2198_vm6, %v2197_v57, %v1940_v2  ;;  %v6764_v2 = vld [vmem:[%s10480_s3 + $0x38] sm:$0xff]   ;;  %vm10589_vm6 = vmmov %vm10583_vm0 }
 0x256   : > { %v2974_v52 = vor.u32 %v2972_v1, %v2971_v38  ;;  %v2954_v45 = vrot.slane %v2952_v40, 7  ;;  %v2977_v27 = vshrl.u32 %v6485_v0, 16  ;;  %v2010_v17 = vpop.permute.xlu1 %2009  ;;  %v6483_v47 = vpack.c.bf16 %v2704_v14, %v2704_v14  ;;  %6587 = vmatpush1.bf16.msra.mxu1 %v6764_v2  ;;  %4823 = vmatpush1.bf16.msra.mxu0 %v6764_v2 }
 0x257   : > { %v2980_v42 = vshll.u32 %v6485_v0, 16  ;;  %v2975_v50 = vrot.slane %v2971_v38, 4  ;;  %v2263_v20 = vsel %vm2231_vm7, %v2230_v25, %v1975_v3  ;;  %6579 = vmatprep.subr.bf16.mxu1 %v10562_v21  ;;  %4824 = vmatprep.subr.bf16.mxu0 %v10562_v21 }
 0x258   : > { %v3282_v11 = vsel %vm8407_vm5, %v2974_v52, %v3281_v35  ;;  %v2957_v63 = vor.u32 %v2955_v29, %v2954_v45  ;;  %v2979_v49 = vrot.slane %v2977_v27, 7  ;;  %v2960_v16 = vshrl.u32 %v6483_v47, 16 }
 0x259   : > { %3283 = vst [vmem:[#allocation3 + $0x18] sm:$0xf] %v3282_v11  ;;  %v2963_v12 = vshll.u32 %v6483_v47, 16  ;;  %v2958_v61 = vrot.slane %v2954_v45, 4  ;;  %v2296_v4 = vsel %vm2264_vm9, %v2263_v20, %v2010_v17  ;;  %vm10590_vm9 = vmmov %vm10583_vm0 }
 0x25a   : > { %v3275_v9 = vsel %vm8407_vm5, %v2957_v63, %v3274_v39  ;;  %v2982_v22 = vor.u32 %v2980_v42, %v2979_v49  ;;  %v2984_v37 = vrot.slane %v2979_v49, 4  ;;  %v2045_v46 = vpop.permute.xlu1 %2044  ;;  %v2962_v58 = vrot.slane %v2960_v16, 7 }
 0x25b   : > { %3276 = vst [vmem:[#allocation3 + $0xc] sm:$0xf] %v3275_v9  ;;  %v2329_v38 = vsel %vm2297_vm10, %v2296_v4, %v2045_v46  ;;  %v2783_v9 = vsel %vm8142_vm12, 0, %v2782_v24 }
 0x25c   : > { %v2983_v33 = vsel %vm7106_vm14, %v2975_v50, %v2982_v22  ;;  %v3286_v7 = vsel %vm8142_vm12, %v2984_v37, %v3285_v6  ;;  %v2965_v56 = vor.u32 %v2963_v12, %v2962_v58  ;;  %v2967_v8 = vrot.slane %v2962_v58, 4  ;;  %2784 = vst [vmem:[#allocation3 + $0x90] sm:$0x1] %v2783_v9  ;;  %v3295_v9 = vld [vmem:[#allocation3 + $0x30] sm:$0xf] }
 0x25d   : > { %3284 = vst.msk [vmem:[#allocation3 + $0x1c] sm:$0xf] %vm10582_vm4, %v2983_v33  ;;  %3287 = vst [vmem:[#allocation3 + $0x20] sm:$0x1] %v3286_v7 }
 0x25e   : > { %v2080_v48 = vpop.permute.xlu1 %2079  ;;  %v2966_v53 = vsel %vm7106_vm14, %v2958_v61, %v2965_v56  ;;  %v3279_v34 = vsel %vm8142_vm12, %v2967_v8, %v3278_v55  ;;  %vm10597_vm4 = vmmov %vm10583_vm0 }
 0x25f   : > { %3277 = vst.msk [vmem:[#allocation3 + $0x10] sm:$0xf] %vm10583_vm0, %v2966_v53  ;;  %3280 = vst [vmem:[#allocation3 + $0x14] sm:$0x1] %v3279_v34  ;;  %v2362_v1 = vsel %vm10584_vm3, %v2329_v38, %v2080_v48 }
 0x260   : > { %v3392_v5 = vld [vmem:[#allocation3 + $0x18] sm:$0xf]  ;;  %vm10606_vm3 = vmmov %vm10583_vm0 }
 0x261   : > { %v6349_v52 = vrot.slane %v3392_v5, 9  ;;  %v3489_v11 = vshrl.u32 %v3392_v5, 16  ;;  %v3492_v49 = vshll.u32 %v3392_v5, 16 }
 0x262   : > { %v2115_v40 = vpop.permute.xlu1 %2114  ;;  %v8466_v63 = vld [vmem:[#allocation3 + $0xc] sm:$0xf] }
 0x263   : > { %v2395_v0 = vsel %vm2363_vm13, %v2362_v1, %v2115_v40  ;;  %v3491_v12 = vrot.slane %v3489_v11, 4  ;;  %v3494_v7 = vrot.slane %v3492_v49, 5  ;;  %v3465_v25 = vshrl.u32 %v8466_v63, 16  ;;  %v2779_v40 = vld [vmem:[#allocation3 + $0x84] sm:$0x1] }
 0x264   : > { %6575 = vmatmul.mubr.msk.bf16.gmra.mxu0 %vm2433_vm15, %v2395_v0  ;;  %v3393_v3 = vld [vmem:[#allocation3 + $0x1c] sm:$0xf]  ;;  %v8447_v35 = vld [vmem:[#allocation3 + $0x20] sm:$0x1]  ;;  %v6348_v53 = vrot.slane %v8466_v63, 9  ;;  %vm10596_vm15 = vmmov %vm10583_vm0 }
 0x265   : > { %v8449_v14 = vcombine.low %v3392_v5, %v3393_v3  ;;  %v3888_v62 = vrot.slane %v3393_v3, 5  ;;  %v3891_v29 = vrot.slane %v8447_v35, 5  ;;  %v3502_v42 = vshrl.u32 %v3393_v3, 16  ;;  %v2837_v49 = vld [vmem:[#allocation3 + $0x98] sm:$0x1] }
 0x266   : > { %v8456_v27 = vld [vmem:[#allocation3 + $0x10] sm:$0xf]  ;;  %v3498_v16 = vshll.u32 %v3393_v3, 16  ;;  %v8473_v50 = vld [vmem:[#allocation3 + $0x14] sm:$0x1]  ;;  %v3495_v2 = vor.u32 %v3494_v7, %v3491_v12  ;;  %v3508_v5 = vshll.u32 %v8447_v35, 16 }
 0x267   : > { %4368 = vrot.lane.b32.xlu0 %v8449_v14, %s6862_s17  ;;  %v3890_v45 = vrot.slane %v3888_v62, 4  ;;  %v3889_v17 = vsel %vm7021_vm8, %v6349_v52, %v3888_v62  ;;  %v3881_v47 = vrot.slane %v8456_v27, 5  ;;  %v8470_v6 = vcombine.low %v8466_v63, %v8456_v27 }
 0x268   : > { %v3884_v33 = vrot.slane %v8473_v50, 5  ;;  %v8484_v55 = vrot.slane %v3498_v16, 5  ;;  %v3504_v57 = vrot.slane %v3502_v42, 4  ;;  %v2780_v3 = vsel %vm8142_vm12, 0, %v2779_v40  ;;  %v3299_v40 = vld [vmem:[#allocation3 + $0x38] sm:$0x1] }
 0x269   : > { %v3892_v10 = vsel %vm7021_vm8, %v3890_v45, %v3891_v29  ;;  %v3883_v37 = vrot.slane %v3881_v47, 4  ;;  %v3882_v29 = vsel %vm7021_vm8, %v6348_v53, %v3881_v47  ;;  %2781 = vst [vmem:[#allocation3 + $0x84] sm:$0x1] %v2780_v3  ;;  %v3474_v11 = vshll.u32 %v8456_v27, 16  ;;  %v6766_v53 = vld [vmem:[%s10480_s3 + $0x28] sm:$0xff]  }
 0x26a   : > { %v6399_v39 = vcombine.low %v3889_v17, %v3892_v10  ;;  %v3505_v0 = vor.u32 %v3504_v57, %v8484_v55  ;;  %v6765_v17 = vld [vmem:[%s10480_s3 + $0x30] sm:$0xff]   ;;  %v3478_v10 = vshrl.u32 %v8456_v27, 16  ;;  %v3468_v7 = vshll.u32 %v8466_v63, 16  ;;  %v3288_v57 = vld [vmem:[#allocation3 + $0x24] sm:$0xf] }
 0x26b   : > { %4265 = vrot.lane.b32.xlu0 %v8449_v14, %s6858_s26  ;;  %v3885_v34 = vsel %vm7021_vm8, %v3883_v37, %v3884_v33  ;;  %4825 = vmatpush1.bf16.msra.mxu0 %v6765_v17 }
 0x26c   : > { %6428 = vmatprep.mubr.msk.bf16.mxu0 %vm2165_vm2, %v6399_v39  ;;  %v6398_v35 = vcombine.low %v3882_v29, %v3885_v34  ;;  %6588 = vmatpush1.bf16.msra.mxu1 %v6765_v17  ;;  %v3506_v37 = vrot.slane %v3505_v0, 4 }
 0x26d   : > { %v6552_v15 = vpop.f32.mrf.mxu0  ;;  %4826 = vmatprep.subr.bf16.mxu0 %v10562_v21  ;;  %6580 = vmatprep.subr.bf16.mxu1 %v10562_v21 }
 0x26e   : > { %v2641_v18 = vmul.f32 %v6552_v15, %v8376_v59 }
 0x26f   : > { %4263 = vrot.lane.b32.xlu0 %v8470_v6, %s6858_s26  ;;  %v2520_v22 = vpop.f32.mrf.mxu0  ;;  %4827 = vmatpush1.bf16.msra.mxu0 %v6766_v53 }
 0x270   : > { %v8480_v46 = vadd.f32 %v8380_v36, %v2641_v18  ;;  %v2639_v58 = vmul.f32 %v8376_v59, %v2520_v22  ;;  %v2834_v18 = vld [vmem:[#allocation3 + $0x8c] sm:$0x1]  ;;  %6589 = vmatpush1.bf16.msra.mxu1 %v6766_v53  ;;  %4828 = vmatprep.subr.bf16.mxu0 %v10562_v21 }
 0x271   : > { %v6553_v60 = vpop.f32.mrf.mxu0  ;;  %v2835_v27 = vsel %vm8188_vm1, 0, %v2834_v18  ;;  %6581 = vmatprep.subr.bf16.mxu1 %v10562_v21  ;;  %v3470_v18 = vrot.slane %v3468_v7, 5 }
 0x272   : > { %10585 = vst [vmem:[#allocation7_spill] sm:$0xff] %v8480_v46  ;;  %v2709_v61 = vmax.f32 %v8480_v46, 0.0  ;;  %v8488_v56 = vadd.f32 %v8380_v36, %v2639_v58  ;;  %v2642_v8 = vmul.f32 %v6553_v60, %v8376_v59  ;;  %v2838_v58 = vsel %vm8188_vm1, 0, %v2837_v49  ;;  %2836 = vst [vmem:[#allocation3 + $0x8c] sm:$0x1] %v2835_v27 }
 0x273   : > { %4335 = vrot.lane.b32.xlu0 %v6399_v39, %s6863_s18  ;;  %v2523_v48 = vpop.f32.mrf.mxu0  ;;  %2839 = vst [vmem:[#allocation3 + $0x98] sm:$0x1] %v2838_v58 }
 0x274   : > { %10586 = vst [vmem:[#allocation13_spill] sm:$0xff] %v8488_v56  ;;  %v6488_v20 = vpack.c.bf16 %v2709_v61, %v2709_v61  ;;  %v2707_v4 = vmax.f32 %v8488_v56, 0.0  ;;  %v8498_v38 = vadd.f32 %v8380_v36, %v2642_v8  ;;  %v2640_v1 = vmul.f32 %v8376_v59, %v2523_v48 }
 0x275   : > { %v3496_v8 = vrot.slane %v3495_v2, 4  ;;  %v3510_v48 = vrot.slane %v3508_v5, 5  ;;  %v3480_v2 = vrot.slane %v3478_v10, 4  ;;  %v6767_v5 = vld [vmem:[%s10480_s3 + $0x20] sm:$0xff]   ;;  %v3467_v10 = vrot.slane %v3465_v25, 4  ;;  %v6768_v25 = vld [vmem:[%s10480_s3 + $0x18] sm:$0xff]  }
 0x276   : > { %10587 = vst [vmem:[#allocation14_spill] sm:$0xff] %v8498_v38  ;;  %v3003_v62 = vshrl.u32 %v6488_v20, 16  ;;  %v6486_v52 = vpack.c.bf16 %v2707_v4, %v2707_v4  ;;  %v2710_v45 = vmax.f32 %v8498_v38, 0.0  ;;  %v8513_v24 = vadd.f32 %v8380_v36, %v2640_v1  ;;  %4829 = vmatpush1.bf16.msra.mxu0 %v6767_v5  ;;  %6590 = vmatpush1.bf16.msra.mxu1 %v6767_v5 }
 0x277   : > { %4232 = vrot.lane.b32.xlu0 %v6399_v39, %s6859_s10  ;;  %v3006_v15 = vshll.u32 %v6488_v20, 16  ;;  %v3511_v3 = vsel %vm7077_vm11, %v3506_v37, %v3510_v48  ;;  %4830 = vmatprep.subr.bf16.mxu0 %v10562_v21  ;;  %v3471_v27 = vor.u32 %v3470_v18, %v3467_v10  ;;  %v6773_v10 = vld [vmem:[%s10480_s3 + $0x40] sm:$0xff]  }
 0x278   : > { %10588 = vst [vmem:[#allocation15_spill] sm:$0xff] %v8513_v24  ;;  %v3005_v42 = vrot.slane %v3003_v62, 7  ;;  %v2986_v16 = vshrl.u32 %v6486_v52, 16  ;;  %v6489_v47 = vpack.c.bf16 %v2710_v45, %v2710_v45  ;;  %v2708_v22 = vmax.f32 %v8513_v24, 0.0  ;;  %6582 = vmatprep.subr.bf16.mxu1 %v10562_v21 }
 0x279   : > { %v2989_v60 = vshll.u32 %v6486_v52, 16  ;;  %v8533_v62 = vrot.slane %v3474_v11, 5 }
 0x27a   : > { %v3008_v39 = vor.u32 %v3006_v15, %v3005_v42  ;;  %v2988_v12 = vrot.slane %v2986_v16, 7  ;;  %v3011_v33 = vshrl.u32 %v6489_v47, 16  ;;  %v6487_v61 = vpack.c.bf16 %v2708_v22, %v2708_v22  ;;  %v3292_v16 = vld [vmem:[#allocation3 + $0x2c] sm:$0x1]  ;;  %4831 = vmatpush1.bf16.msra.mxu0 %v6768_v25  ;;  %6591 = vmatpush1.bf16.msra.mxu1 %v6768_v25  ;;  %v3355_v43 = vld [vmem:[#allocation3 + $0x98] sm:$0x1] }
 0x27b   : > { %4333 = vrot.lane.b32.xlu0 %v6398_v35, %s6863_s18  ;;  %v3014_v1 = vshll.u32 %v6489_v47, 16  ;;  %v3009_v52 = vrot.slane %v3005_v42, 4  ;;  %v3501_v47 = vsel %vm7077_vm11, %v3496_v8, %v8484_v55  ;;  %v3481_v37 = vor.u32 %v3480_v2, %v8533_v62  ;;  %4832 = vmatprep.subr.bf16.mxu0 %v10562_v21 }
 0x27c   : > { %v3296_v34 = vsel %vm8407_vm5, %v3008_v39, %v3295_v9  ;;  %v2991_v20 = vor.u32 %v2989_v60, %v2988_v12  ;;  %v3013_v4 = vrot.slane %v3011_v33, 7  ;;  %v2994_v0 = vshrl.u32 %v6487_v61, 16  ;;  %6583 = vmatprep.subr.bf16.mxu1 %v10562_v21 }
 0x27d   : > { %3297 = vst [vmem:[#allocation3 + $0x30] sm:$0xf] %v3296_v34  ;;  %v2997_v49 = vshll.u32 %v6487_v61, 16  ;;  %v2992_v9 = vrot.slane %v2988_v12, 4  ;;  %v6383_v63 = vcombine.low %v3501_v47, %v3511_v3  ;;  %v3484_v39 = vshll.u32 %v8473_v50, 16  ;;  %v6770_v12 = vld [vmem:[%s10480_s3 + $0x10] sm:$0xff]  }
 0x27e   : > { %v3289_v45 = vsel %vm8407_vm5, %v2991_v20, %v3288_v57  ;;  %v3016_v29 = vor.u32 %v3014_v1, %v3013_v4  ;;  %v3018_v17 = vrot.slane %v3013_v4, 4  ;;  %v2996_v11 = vrot.slane %v2994_v0, 7  ;;  %4833 = vmatpush1.bf16.msra.mxu0 %v6770_v12  ;;  %v6771_v50 = vld [vmem:[%s10480_s3 + $0x8] sm:$0xff]   ;;  %6592 = vmatpush1.bf16.msra.mxu1 %v6770_v12  ;;  %v6772_v0 = vld [vmem:[%s10480_s3] sm:$0xff]  }
 0x27f   : > { %3290 = vst [vmem:[#allocation3 + $0x24] sm:$0xf] %v3289_v45  ;;  %4230 = vrot.lane.b32.xlu0 %v6398_v35, %s6859_s10  ;;  %v3482_v60 = vrot.slane %v3481_v37, 4  ;;  %v3472_v33 = vrot.slane %v3471_v27, 4  ;;  %v3486_v7 = vrot.slane %v3484_v39, 5  ;;  %4834 = vmatprep.subr.bf16.mxu0 %v10562_v21 }
 0x280   : > { %v3017_v42 = vsel %vm7106_vm14, %v3009_v52, %v3016_v29  ;;  %v3300_v15 = vsel %vm8142_vm12, %v3018_v17, %v3299_v40  ;;  %v2999_v35 = vor.u32 %v2997_v49, %v2996_v11  ;;  %v3001_v22 = vrot.slane %v2996_v11, 4  ;;  %6584 = vmatprep.subr.bf16.mxu1 %v10562_v21 }
 0x281   : > { %3298 = vst.msk [vmem:[#allocation3 + $0x34] sm:$0xf] %vm10589_vm6, %v3017_v42  ;;  %3301 = vst [vmem:[#allocation3 + $0x38] sm:$0x1] %v3300_v15  ;;  %v3487_v8 = vsel %vm7077_vm11, %v3482_v60, %v3486_v7  ;;  %v3477_v20 = vsel %vm7077_vm11, %v3472_v33, %v8533_v62 }
 0x282   : > { %v3000_v55 = vsel %vm7106_vm14, %v2992_v9, %v2999_v35  ;;  %v3293_v58 = vsel %vm8142_vm12, %v3001_v22, %v3292_v16  ;;  %v6382_v40 = vcombine.low %v3477_v20, %v3487_v8  ;;  %4835 = vmatpush1.bf16.msra.mxu0 %v6771_v50  ;;  %6593 = vmatpush1.bf16.msra.mxu1 %v6771_v50  ;;  %v3302_v50 = vld [vmem:[#allocation3 + $0x3c] sm:$0xf]  ;;  %vm10616_vm6 = vmmov %vm10583_vm0 }
 0x283   : > { %4403 = vrot.lane.b32.xlu0 %v6383_v63, %s6864_s20  ;;  %3291 = vst.msk [vmem:[#allocation3 + $0x28] sm:$0xf] %vm10590_vm9, %v3000_v55  ;;  %3294 = vst [vmem:[#allocation3 + $0x2c] sm:$0x1] %v3293_v58  ;;  %4836 = vmatprep.subr.bf16.mxu0 %v10562_v21  ;;  %v3309_v55 = vld [vmem:[#allocation3 + $0x48] sm:$0xf] }
 0x284   : > { %v8588_v4 = vld [vmem:[#allocation3 + $0x30] sm:$0xf]  ;;  %6585 = vmatprep.subr.bf16.mxu1 %v10562_v21  ;;  %vm10617_vm9 = vmmov %vm10583_vm0 }
 0x285   : > { %v3537_v52 = vshrl.u32 %v8588_v4, 16  ;;  %v3540_v45 = vshll.u32 %v8588_v4, 16 }
 0x286   : > { %4837 = vmatpush1.bf16.msra.mxu0 %v6772_v0  ;;  %6594 = vmatpush1.bf16.msra.mxu1 %v6772_v0  ;;  %v3313_v0 = vld [vmem:[#allocation3 + $0x50] sm:$0x1] }
 0x287   : > { %4300 = vrot.lane.b32.xlu0 %v6383_v63, %s6860_s12  ;;  %4852 = vmatprep.subr.bf16.mxu0 %v10562_v21  ;;  %v8620_v9 = vrot.slane %v3537_v52, 4  ;;  %v8622_v35 = vrot.slane %v3540_v45, 5 }
 0x288   : > { %v8612_v47 = vld [vmem:[#allocation3 + $0x34] sm:$0xf]  ;;  %6586 = vmatprep.subr.bf16.mxu1 %v10562_v21 }
 0x289   : > { %v6556_v57 = vpop.f32.mrf.mxu0  ;;  %v8627_v27 = vcombine.low %v8588_v4, %v8612_v47  ;;  %v3550_v21 = vshrl.u32 %v8612_v47, 16  ;;  %v3546_v39 = vshll.u32 %v8612_v47, 16  ;;  %v3902_v8 = vrot.slane %v8612_v47, 5 }
 0x28a   : > { %v2645_v61 = vmul.f32 %v6556_v57, %v8376_v59  ;;  %4853 = vmatpush2.bf16.msra.mxu0 %v6773_v10  ;;  %6595 = vmatpush2.bf16.msra.mxu1 %v6773_v10  ;;  %v8631_v57 = vld [vmem:[#allocation3 + $0x28] sm:$0xf] }
 0x28b   : > { %4152 = vrot.lane.b32.xlu0 %v6383_v63, %s6854_s22  ;;  %v2536_v48 = vpop.f32.mrf.mxu0  ;;  %10595 = vst [vmem:[#allocation20_spill] sm:$0xff] %v8627_v27  ;;  %v3895_v52 = vrot.slane %v8631_v57, 5  ;;  %v8643_v45 = vrot.slane %v3546_v39, 5 }
 0x28c   : > { %v8582_v53 = vadd.f32 %v8380_v36, %v2645_v61  ;;  %v2643_v34 = vmul.f32 %v8376_v59, %v2536_v48  ;;  %v3543_v48 = vor.u32 %v8622_v35, %v8620_v9  ;;  %v2843_v9 = vld [vmem:[#allocation3 + $0xb0] sm:$0x1] }
 0x28d   : > { %v6557_v1 = vpop.f32.mrf.mxu0 }
 0x28e   : > { %10591 = vst [vmem:[#allocation16_spill] sm:$0xff] %v8582_v53  ;;  %v2713_v3 = vmax.f32 %v8582_v53, 0.0  ;;  %v8595_v2 = vadd.f32 %v8380_v36, %v2643_v34  ;;  %v2646_v5 = vmul.f32 %v6557_v1, %v8376_v59 }
 0x28f   : > { %4298 = vrot.lane.b32.xlu0 %v6382_v40, %s6860_s12  ;;  %v2539_v62 = vpop.f32.mrf.mxu0 }
 0x290   : > { %10592 = vst [vmem:[#allocation17_spill] sm:$0xff] %v8595_v2  ;;  %v6492_v29 = vpack.c.bf16 %v2713_v3, %v2713_v3  ;;  %v2711_v17 = vmax.f32 %v8595_v2, 0.0  ;;  %v8605_v11 = vadd.f32 %v8380_v36, %v2646_v5  ;;  %v2644_v49 = vmul.f32 %v8376_v59, %v2539_v62  ;;  %v2788_v3 = vld [vmem:[#allocation3 + $0xa8] sm:$0x1]  ;;  %v8640_v62 = vld [vmem:[#allocation3 + $0x24] sm:$0xf] }
 0x291   : > { %v8659_v39 = vcombine.low %v8640_v62, %v8631_v57  ;;  %v10603_v46 = vshll.u32 %v8640_v62, 16 }
 0x292   : > { %10593 = vst [vmem:[#allocation18_spill] sm:$0xff] %v8605_v11  ;;  %v3037_v42 = vshrl.u32 %v6492_v29, 16  ;;  %v6490_v15 = vpack.c.bf16 %v2711_v17, %v2711_v17  ;;  %v2714_v16 = vmax.f32 %v8605_v11, 0.0  ;;  %v8617_v18 = vadd.f32 %v8380_v36, %v2644_v49  ;;  %v2785_v17 = vld [vmem:[#allocation3 + $0x9c] sm:$0x1] }
 0x293   : > { %4150 = vrot.lane.b32.xlu0 %v6382_v40, %s6854_s22  ;;  %v3040_v63 = vshll.u32 %v6492_v29, 16  ;;  %v3552_v29 = vrot.slane %v3550_v21, 4  ;;  %v3306_v21 = vld [vmem:[#allocation3 + $0x44] sm:$0x1] }
 0x294   : > { %10594 = vst [vmem:[#allocation19_spill] sm:$0xff] %v8617_v18  ;;  %v3039_v22 = vrot.slane %v3037_v42, 7  ;;  %v3020_v25 = vshrl.u32 %v6490_v15, 16  ;;  %v6493_v37 = vpack.c.bf16 %v2714_v16, %v2714_v16  ;;  %v2712_v58 = vmax.f32 %v8617_v18, 0.0  ;;  %v3400_v16 = vld [vmem:[#allocation3 + $0x38] sm:$0x1] }
 0x295   : > { %v3023_v33 = vshll.u32 %v6490_v15, 16 }
 0x296   : > { %v3042_v12 = vor.u32 %v3040_v63, %v3039_v22  ;;  %v3022_v60 = vrot.slane %v3020_v25, 7  ;;  %v3045_v7 = vshrl.u32 %v6493_v37, 16  ;;  %v6491_v61 = vpack.c.bf16 %v2712_v58, %v2712_v58 }
 0x297   : > { %4372 = vrot.lane.b32.xlu0 %v8627_v27, %s6862_s17  ;;  %v3048_v40 = vshll.u32 %v6493_v37, 16  ;;  %v3043_v49 = vrot.slane %v3039_v22, 4  ;;  %v3904_v25 = vrot.slane %v3902_v8, 4  ;;  %v2789_v37 = vsel %vm8142_vm12, 0, %v2788_v3  ;;  %v2840_v22 = vld [vmem:[#allocation3 + $0xa4] sm:$0x1] }
 0x298   : > { %v3310_v34 = vsel %vm8407_vm5, %v3042_v12, %v3309_v55  ;;  %v3025_v20 = vor.u32 %v3023_v33, %v3022_v60  ;;  %v3047_v1 = vrot.slane %v3045_v7, 7  ;;  %v3028_v5 = vshrl.u32 %v6491_v61, 16  ;;  %2790 = vst [vmem:[#allocation3 + $0xa8] sm:$0x1] %v2789_v37 }
 0x299   : > { %3311 = vst [vmem:[#allocation3 + $0x48] sm:$0xf] %v3310_v34  ;;  %v3031_v63 = vshll.u32 %v6491_v61, 16  ;;  %v2786_v12 = vsel %vm8142_vm12, 0, %v2785_v17  ;;  %v3026_v33 = vrot.slane %v3022_v60, 4  ;;  %v3553_v34 = vor.u32 %v3552_v29, %v8643_v45 }
 0x29a   : > { %v3303_v10 = vsel %vm8407_vm5, %v3025_v20, %v3302_v50  ;;  %v3050_v42 = vor.u32 %v3048_v40, %v3047_v1  ;;  %v3052_v15 = vrot.slane %v3047_v1, 4  ;;  %v3030_v35 = vrot.slane %v3028_v5, 7  ;;  %v8664_v61 = vld [vmem:[#allocation3 + $0x2c] sm:$0x1]  ;;  %2787 = vst [vmem:[#allocation3 + $0x9c] sm:$0x1] %v2786_v12 }
 0x29b   : > { %3304 = vst [vmem:[#allocation3 + $0x3c] sm:$0xf] %v3303_v10  ;;  %4269 = vrot.lane.b32.xlu0 %v8627_v27, %s6858_s26  ;;  %v3905_v20 = vrot.slane %v3400_v16, 5  ;;  %v3897_v1 = vrot.slane %v3895_v52, 4  ;;  %v2844_v40 = vsel %vm8188_vm1, 0, %v2843_v9  ;;  %v2841_v60 = vsel %vm8188_vm1, 0, %v2840_v22 }
 0x29c   : > { %v3051_v55 = vsel %vm7106_vm14, %v3043_v49, %v3050_v42  ;;  %v3314_v58 = vsel %vm8142_vm12, %v3052_v15, %v3313_v0  ;;  %v3033_v7 = vor.u32 %v3031_v63, %v3030_v35  ;;  %v3035_v50 = vrot.slane %v3030_v35, 4  ;;  %2845 = vst [vmem:[#allocation3 + $0xb0] sm:$0x1] %v2844_v40  ;;  %2842 = vst [vmem:[#allocation3 + $0xa4] sm:$0x1] %v2841_v60 }
 0x29d   : > { %3312 = vst.msk [vmem:[#allocation3 + $0x4c] sm:$0xf] %vm10596_vm15, %v3051_v55  ;;  %3315 = vst [vmem:[#allocation3 + $0x50] sm:$0x1] %v3314_v58  ;;  %v6351_v5 = vrot.slane %v8588_v4, 9  ;;  %v3556_v29 = vshll.u32 %v3400_v16, 16  ;;  %v3906_v49 = vsel %vm7021_vm8, %v3904_v25, %v3905_v20 }
 0x29e   : > { %v3034_v0 = vsel %vm7106_vm14, %v3026_v33, %v3033_v7  ;;  %v3307_v3 = vsel %vm8142_vm12, %v3035_v50, %v3306_v21  ;;  %v3513_v17 = vshrl.u32 %v8640_v62, 16  ;;  %v3898_v42 = vrot.slane %v8664_v61, 5  ;;  %vm10624_vm15 = vmmov %vm10583_vm0 }
 0x29f   : > { %4370 = vrot.lane.b32.xlu0 %v8659_v39, %s6862_s17  ;;  %3305 = vst.msk [vmem:[#allocation3 + $0x40] sm:$0xf] %vm10597_vm4, %v3034_v0  ;;  %3308 = vst [vmem:[#allocation3 + $0x44] sm:$0x1] %v3307_v3  ;;  %v8687_v15 = vrot.slane %v3543_v48, 4  ;;  %v6350_v9 = vrot.slane %v8640_v62, 9  ;;  %v3903_v16 = vsel %vm7021_vm8, %v6351_v5, %v3902_v8 }
 0x2a0   : > { %v8684_v10 = vld [vmem:[#allocation3 + $0x48] sm:$0xf]  ;;  %v8690_v4 = vrot.slane %v3553_v34, 4  ;;  %v3899_v35 = vsel %vm7021_vm8, %v3897_v1, %v3898_v42  ;;  %v3526_v48 = vshrl.u32 %v8631_v57, 16  ;;  %v8704_v22 = vcombine.low %v3903_v16, %v3906_v49  ;;  %vm10625_vm4 = vmmov %vm10583_vm0 }
 0x2a1   : > { %v3585_v63 = vshrl.u32 %v8684_v10, 16  ;;  %v3588_v25 = vshll.u32 %v8684_v10, 16  ;;  %v8706_v47 = vrot.slane %v3556_v29, 5  ;;  %v3896_v21 = vsel %vm7021_vm8, %v6350_v9, %v3895_v52 }
 0x2a2   : > { %v8720_v33 = vrot.slane %v3513_v17, 4  ;;  %v3522_v7 = vshll.u32 %v8631_v57, 16  ;;  %v8725_v20 = vcombine.low %v3896_v21, %v3899_v35  ;;  %v6353_v40 = vrot.slane %v8684_v10, 9 }
 0x2a3   : > { %4267 = vrot.lane.b32.xlu0 %v8659_v39, %s6858_s26  ;;  %v3587_v60 = vrot.slane %v3585_v63, 4  ;;  %v3590_v0 = vrot.slane %v3588_v25, 5  ;;  %v10605_v62 = vsel %vm7077_vm11, %v8687_v15, %v8643_v45  ;;  %v2849_v15 = vld [vmem:[#allocation3 + $0xc8] sm:$0x1] }
 0x2a4   : > { %v6560_v55 = vpop.f32.mrf.mxu0  ;;  %v8708_v8 = vld [vmem:[#allocation3 + $0x4c] sm:$0xf]  ;;  %v8710_v58 = vld [vmem:[#allocation3 + $0x50] sm:$0x1]  ;;  %v8746_v63 = vrot.slane %v3522_v7, 5 }
 0x2a5   : > { %v2649_v50 = vmul.f32 %v6560_v55, %v8376_v59  ;;  %v3916_v34 = vrot.slane %v8708_v8, 5  ;;  %v3594_v3 = vshll.u32 %v8708_v8, 16  ;;  %v3919_v17 = vrot.slane %v8710_v58, 5 }
 0x2a6   : > { %v2552_v1 = vpop.f32.mrf.mxu0  ;;  %v8740_v49 = vld [vmem:[#allocation3 + $0x40] sm:$0xf]  ;;  %v3598_v35 = vshrl.u32 %v8708_v8, 16  ;;  %v3591_v7 = vor.u32 %v3590_v0, %v3587_v60  ;;  %v3604_v60 = vshll.u32 %v8710_v58, 16  ;;  %v8772_v0 = vrot.slane %v3526_v48, 4 }
 0x2a7   : > { %v8734_v57 = vadd.f32 %v8380_v36, %v2649_v50  ;;  %v2647_v5 = vmul.f32 %v8376_v59, %v2552_v1  ;;  %4339 = vrot.lane.b32.xlu0 %v8704_v22, %s6863_s18  ;;  %v3918_v29 = vrot.slane %v3916_v34, 4  ;;  %v3917_v9 = vsel %vm7021_vm8, %v6353_v40, %v3916_v34  ;;  %v8755_v1 = vld [vmem:[#allocation3 + $0x44] sm:$0x1]  ;;  %v8759_v40 = vld [vmem:[#allocation3 + $0x3c] sm:$0xf] }
 0x2a8   : > { %v6561_v42 = vpop.f32.mrf.mxu0  ;;  %v3909_v16 = vrot.slane %v8740_v49, 5  ;;  %v3596_v12 = vrot.slane %v3594_v3, 5 }
 0x2a9   : > { %10598 = vst [vmem:[#allocation21_spill] sm:$0xff] %v8734_v57  ;;  %v2717_v25 = vmax.f32 %v8734_v57, 0.0  ;;  %v8750_v55 = vadd.f32 %v8380_v36, %v2647_v5  ;;  %v2650_v21 = vmul.f32 %v6561_v42, %v8376_v59  ;;  %v3920_v50 = vsel %vm7021_vm8, %v3918_v29, %v3919_v17 }
 0x2aa   : > { %v2555_v54 = vpop.f32.mrf.mxu0  ;;  %v8757_v34 = vcombine.low %v3917_v9, %v3920_v50  ;;  %v3911_v30 = vrot.slane %v3909_v16, 4  ;;  %v3912_v29 = vrot.slane %v8755_v1, 5  ;;  %v3600_v17 = vrot.slane %v3598_v35, 4 }
 0x2ab   : > { %10599 = vst [vmem:[#allocation22_spill] sm:$0xff] %v8750_v55  ;;  %v6496_v52 = vpack.c.bf16 %v2717_v25, %v2717_v25  ;;  %v2715_v37 = vmax.f32 %v8750_v55, 0.0  ;;  %v8763_v5 = vadd.f32 %v8380_v36, %v2650_v21  ;;  %v2648_v42 = vmul.f32 %v8376_v59, %v2555_v54  ;;  %4236 = vrot.lane.b32.xlu0 %v8704_v22, %s6859_s10 }
 0x2ac   : > { %10600 = vst [vmem:[#allocation23_spill] sm:$0xff] %v8757_v34  ;;  %4343 = vrot.lane.b32.xlu1 %v8757_v34, %s6863_s18  ;;  %v6352_v21 = vrot.slane %v8759_v40, 9  ;;  %v3913_v50 = vsel %vm7021_vm8, %v3911_v30, %v3912_v29  ;;  %v3592_v57 = vrot.slane %v3591_v7, 4  ;;  %v3601_v55 = vor.u32 %v3600_v17, %v3596_v12 }
 0x2ad   : > { %10601 = vst [vmem:[#allocation24_spill] sm:$0xff] %v8763_v5  ;;  %v3071_v3 = vshrl.u32 %v6496_v52, 16  ;;  %v6494_v9 = vpack.c.bf16 %v2715_v37, %v2715_v37  ;;  %v2718_v25 = vmax.f32 %v8763_v5, 0.0  ;;  %v8777_v54 = vadd.f32 %v8380_v36, %v2648_v42  ;;  %v3323_v37 = vld [vmem:[#allocation3 + $0x60] sm:$0xf] }
 0x2ae   : > { %v3074_v35 = vshll.u32 %v6496_v52, 16  ;;  %v3910_v42 = vsel %vm7021_vm8, %v6352_v21, %v3909_v16  ;;  %v3602_v5 = vrot.slane %v3601_v55, 4  ;;  %v3606_v30 = vrot.slane %v3604_v60, 5  ;;  %v2794_v16 = vld [vmem:[#allocation3 + $0xc0] sm:$0x1] }
 0x2af   : > { %10602 = vst [vmem:[#allocation25_spill] sm:$0xff] %v8777_v54  ;;  %v3073_v11 = vrot.slane %v3071_v3, 7  ;;  %v3054_v53 = vshrl.u32 %v6494_v9, 16  ;;  %v6497_v58 = vpack.c.bf16 %v2718_v25, %v2718_v25  ;;  %4337 = vrot.lane.b32.xlu0 %v8725_v20, %s6863_s18  ;;  %v2716_v48 = vmax.f32 %v8777_v54, 0.0  ;;  %v3316_v3 = vld [vmem:[#allocation3 + $0x54] sm:$0xf] }
 0x2b0   : > { %4240 = vrot.lane.b32.xlu1 %v8757_v34, %s6859_s10  ;;  %v3057_v17 = vshll.u32 %v6494_v9, 16  ;;  %v8788_v2 = vcombine.low %v3910_v42, %v3913_v50  ;;  %v3518_v54 = vrot.slane %v10603_v46, 5  ;;  %v3327_v55 = vld [vmem:[#allocation3 + $0x68] sm:$0x1]  ;;  %v10604_v46 = vsel %vm7077_vm11, %v8690_v4, %v8706_v47  ;;  %v2791_v21 = vld [vmem:[#allocation3 + $0xb4] sm:$0x1] }
 0x2b1   : > { %v3076_v7 = vor.u32 %v3074_v35, %v3073_v11  ;;  %v3056_v29 = vrot.slane %v3054_v53, 7  ;;  %v3079_v52 = vshrl.u32 %v6497_v58, 16  ;;  %v3082_v25 = vshll.u32 %v6497_v58, 16 }
 0x2b2   : > { %v6495_v18 = vpack.c.bf16 %v2716_v48, %v2716_v48  ;;  %v3607_v53 = vsel %vm7077_vm11, %v3602_v5, %v3606_v30  ;;  %v6385_v9 = vcombine.low %v10605_v62, %v10604_v46  ;;  %v3597_v5 = vsel %vm7077_vm11, %v3592_v57, %v3596_v12  ;;  %v3320_v57 = vld [vmem:[#allocation3 + $0x5c] sm:$0x1] }
 0x2b3   : > { %v3324_v38 = vsel %vm8407_vm5, %v3076_v7, %v3323_v37  ;;  %v3059_v56 = vor.u32 %v3057_v17, %v3056_v29  ;;  %v3081_v24 = vrot.slane %v3079_v52, 7  ;;  %4234 = vrot.lane.b32.xlu0 %v8725_v20, %s6859_s10  ;;  %v3077_v50 = vrot.slane %v3073_v11, 4  ;;  %v2846_v7 = vld [vmem:[#allocation3 + $0xbc] sm:$0x1] }
 0x2b4   : > { %3325 = vst [vmem:[#allocation3 + $0x60] sm:$0xf] %v3324_v38  ;;  %v3062_v60 = vshrl.u32 %v6495_v18, 16  ;;  %4238 = vrot.lane.b32.xlu1 %v8788_v2, %s6859_s10  ;;  %v3529_v38 = vor.u32 %v8772_v0, %v8746_v63  ;;  %v3065_v47 = vshll.u32 %v6495_v18, 16  ;;  %v8816_v48 = vcombine.low %v3597_v5, %v3607_v53 }
 0x2b5   : > { %v3317_v35 = vsel %vm8407_vm5, %v3059_v56, %v3316_v3  ;;  %v3084_v58 = vor.u32 %v3082_v25, %v3081_v24  ;;  %v3086_v37 = vrot.slane %v3081_v24, 4  ;;  %v2795_v45 = vsel %vm8142_vm12, 0, %v2794_v16 }
 0x2b6   : > { %3318 = vst [vmem:[#allocation3 + $0x54] sm:$0xf] %v3317_v35  ;;  %v3064_v4 = vrot.slane %v3062_v60, 7  ;;  %v3519_v56 = vor.u32 %v3518_v54, %v8720_v33  ;;  %2796 = vst [vmem:[#allocation3 + $0xc0] sm:$0x1] %v2795_v45  ;;  %v2792_v24 = vsel %vm8142_vm12, 0, %v2791_v21 }
 0x2b7   : > { %v3085_v12 = vsel %vm7106_vm14, %v3077_v50, %v3084_v58  ;;  %v3328_v11 = vsel %vm8142_vm12, %v3086_v37, %v3327_v55  ;;  %4407 = vrot.lane.b32.xlu0 %v6385_v9, %s6864_s20  ;;  %v3060_v18 = vrot.slane %v3056_v29, 4  ;;  %v3532_v30 = vshll.u32 %v8664_v61, 16  ;;  %2793 = vst [vmem:[#allocation3 + $0xb4] sm:$0x1] %v2792_v24 }
 0x2b8   : > { %3326 = vst.msk [vmem:[#allocation3 + $0x64] sm:$0xf] %vm10583_vm0, %v3085_v12  ;;  %3329 = vst [vmem:[#allocation3 + $0x68] sm:$0x1] %v3328_v11  ;;  %v3067_v0 = vor.u32 %v3065_v47, %v3064_v4  ;;  %v3069_v42 = vrot.slane %v3064_v4, 4  ;;  %4308 = vrot.lane.b32.xlu1 %v8816_v48, %s6860_s12  ;;  %v2850_v33 = vsel %vm8188_vm1, 0, %v2849_v15 }
 0x2b9   : > { %v2847_v54 = vsel %vm8188_vm1, 0, %v2846_v7  ;;  %v3530_v52 = vrot.slane %v3529_v38, 4  ;;  %2851 = vst [vmem:[#allocation3 + $0xc8] sm:$0x1] %v2850_v33  ;;  %v3520_v61 = vrot.slane %v3519_v56, 4  ;;  %v3534_v3 = vrot.slane %v3532_v30, 5 }
 0x2ba   : > { %v3068_v29 = vsel %vm7106_vm14, %v3060_v18, %v3067_v0  ;;  %v3321_v17 = vsel %vm8142_vm12, %v3069_v42, %v3320_v57  ;;  %2848 = vst [vmem:[#allocation3 + $0xbc] sm:$0x1] %v2847_v54  ;;  %vm4582_vm0 = vcmask 654336  }
 0x2bb   : > { %3319 = vst.msk [vmem:[#allocation3 + $0x58] sm:$0xf] %vm10606_vm3, %v3068_v29  ;;  %3322 = vst [vmem:[#allocation3 + $0x5c] sm:$0x1] %v3321_v17  ;;  %4304 = vrot.lane.b32.xlu0 %v6385_v9, %s6860_s12  ;;  %v3535_v25 = vsel %vm7077_vm11, %v3530_v52, %v3534_v3  ;;  %v8847_v53 = vld [vmem:[#allocation3 + $0x60] sm:$0xf]  ;;  %v3525_v60 = vsel %vm7077_vm11, %v3520_v61, %v8746_v63  ;;  %v8909_v61 = vcombine.low %v8684_v10, %v8708_v8 }
 0x2bc   : > { %4160 = vrot.lane.b32.xlu1 %v8816_v48, %s6854_s22  ;;  %v6384_v46 = vcombine.low %v3525_v60, %v3535_v25  ;;  %v6355_v3 = vrot.slane %v8847_v53, 9  ;;  %v3561_v25 = vshrl.u32 %v8759_v40, 16  ;;  %v3564_v60 = vshll.u32 %v8759_v40, 16 }
 0x2bd   : > { %v8858_v62 = vld [vmem:[#allocation3 + $0x54] sm:$0xf]  ;;  %10612 = vst [vmem:[#allocation31_spill] sm:$0xff] %v8909_v61  ;;  %v3570_v8 = vshll.u32 %v8740_v49, 16  ;;  %vm4615_vm3 = vcmask 785408  }
 0x2be   : > { %v6354_v50 = vrot.slane %v8858_v62, 9 }
 0x2bf   : > { %4156 = vrot.lane.b32.xlu0 %v6385_v9, %s6854_s22  ;;  %v8849_v16 = vld [vmem:[#allocation3 + $0x64] sm:$0xf]  ;;  %v8883_v11 = vld [vmem:[#allocation3 + $0x68] sm:$0x1] }
 0x2c0   : > { %v8853_v55 = vcombine.low %v8847_v53, %v8849_v16  ;;  %v3930_v37 = vrot.slane %v8849_v16, 5  ;;  %v3933_v33 = vrot.slane %v8883_v11, 5 }
 0x2c1   : > { %v3376_v28 = vld [vmem:[#allocation3 + $0xbc] sm:$0x1] }
 0x2c2   : > { %10607 = vst [vmem:[#allocation26_spill] sm:$0xff] %v8853_v55  ;;  %4380 = vrot.lane.b32.xlu1 %v8853_v55, %s6862_s17  ;;  %v8862_v5 = vld [vmem:[#allocation3 + $0x58] sm:$0xf]  ;;  %v8864_v9 = vld [vmem:[#allocation3 + $0x5c] sm:$0x1]  ;;  %v3932_v30 = vrot.slane %v3930_v37, 4  ;;  %v3931_v10 = vsel %vm7021_vm8, %v6355_v3, %v3930_v37 }
 0x2c3   : > { %4405 = vrot.lane.b32.xlu0 %v6384_v46, %s6864_s20  ;;  %v3923_v38 = vrot.slane %v8862_v5, 5  ;;  %v3926_v58 = vrot.slane %v8864_v9, 5  ;;  %v8889_v24 = vcombine.low %v8858_v62, %v8862_v5 }
 0x2c4   : > { %v6564_v21 = vpop.f32.mrf.mxu0 }
 0x2c5   : > { %v2653_v35 = vmul.f32 %v6564_v21, %v8376_v59  ;;  %v3925_v63 = vrot.slane %v3923_v38, 4  ;;  %v3924_v15 = vsel %vm7021_vm8, %v6354_v50, %v3923_v38  ;;  %10609 = vst [vmem:[#allocation28_spill] sm:$0xff] %v8889_v24 }
 0x2c6   : > { %4277 = vrot.lane.b32.xlu1 %v8853_v55, %s6858_s26  ;;  %v2568_v4 = vpop.f32.mrf.mxu0 }
 0x2c7   : > { %v8875_v47 = vadd.f32 %v8380_v36, %v2653_v35  ;;  %v2651_v45 = vmul.f32 %v8376_v59, %v2568_v4  ;;  %4302 = vrot.lane.b32.xlu0 %v6384_v46, %s6860_s12  ;;  %v3927_v12 = vsel %vm7021_vm8, %v3925_v63, %v3926_v58  ;;  %v8915_v35 = vpop.permute.xlu0 %4148  ;;  %v3934_v63 = vsel %vm7021_vm8, %v3932_v30, %v3933_v33 }
 0x2c8   : > { %v6565_v57 = vpop.f32.mrf.mxu0  ;;  %v8885_v56 = vcombine.low %v3924_v15, %v3927_v12  ;;  %v3574_v58 = vshrl.u32 %v8740_v49, 16  ;;  %v3563_v30 = vrot.slane %v3561_v25, 4 }
 0x2c9   : > { %10608 = vst [vmem:[#allocation27_spill] sm:$0xff] %v8875_v47  ;;  %v2721_v18 = vmax.f32 %v8875_v47, 0.0  ;;  %v8893_v0 = vadd.f32 %v8380_v36, %v2651_v45  ;;  %v2654_v42 = vmul.f32 %v6565_v57, %v8376_v59  ;;  %v3337_v57 = vld [vmem:[#allocation3 + $0x78] sm:$0xf] }
 0x2ca   : > { %6433 = vmatprep.mubr.msk.bf16.mxu1 %vm2165_vm2, %v8885_v56  ;;  %4378 = vrot.lane.b32.xlu1 %v8889_v24, %s6862_s17  ;;  %v2571_v7 = vpop.f32.mrf.mxu0 }
 0x2cb   : > { %10610 = vst [vmem:[#allocation29_spill] sm:$0xff] %v8893_v0  ;;  %v6500_v54 = vpack.c.bf16 %v2721_v18, %v2721_v18  ;;  %v2719_v29 = vmax.f32 %v8893_v0, 0.0  ;;  %v8903_v17 = vadd.f32 %v8380_v36, %v2654_v42  ;;  %v2652_v52 = vmul.f32 %v8376_v59, %v2571_v7  ;;  %4154 = vrot.lane.b32.xlu0 %v6384_v46, %s6854_s22  ;;  %v8941_v25 = vpop.permute.xlu0 %4228 }
 0x2cc   : > { %v8931_v42 = vcombine.low %v3931_v10, %v3934_v63  ;;  %v10654_v31 = vld [vmem:[#allocation28_spill] sm:$0xff] }
 0x2cd   : > { %10611 = vst [vmem:[#allocation30_spill] sm:$0xff] %v8903_v17  ;;  %v3105_v38 = vshrl.u32 %v6500_v54, 16  ;;  %v6498_v21 = vpack.c.bf16 %v2719_v29, %v2719_v29  ;;  %v2722_v50 = vmax.f32 %v8903_v17, 0.0  ;;  %v8920_v46 = vadd.f32 %v8380_v36, %v2652_v52  ;;  %v3330_v52 = vld [vmem:[#allocation3 + $0x6c] sm:$0xf] }
 0x2ce   : > { %4275 = vrot.lane.b32.xlu1 %v8889_v24, %s6858_s26  ;;  %v3108_v45 = vshll.u32 %v6500_v54, 16  ;;  %10614 = vst [vmem:[#allocation33_spill] sm:$0xff] %v8931_v42  ;;  %v3566_v54 = vrot.slane %v3564_v60, 5  ;;  %v8946_v60 = vcombine.low %v8759_v40, %v8740_v49  ;;  %v3633_v49 = vshrl.u32 %v8847_v53, 16 }
 0x2cf   : > { %10613 = vst [vmem:[#allocation32_spill] sm:$0xff] %v8920_v46  ;;  %v3107_v4 = vrot.slane %v3105_v38, 7  ;;  %v3088_v15 = vshrl.u32 %v6498_v21, 16  ;;  %v6501_v12 = vpack.c.bf16 %v2722_v50, %v2722_v50  ;;  %4273 = vrot.lane.b32.xlu0 %v8909_v61, %s6858_s26  ;;  %v2720_v18 = vmax.f32 %v8920_v46, 0.0 }
 0x2d0   : > { %v3091_v37 = vshll.u32 %v6498_v21, 16  ;;  %v8935_v38 = vrot.slane %v3570_v8, 5  ;;  %v3576_v50 = vrot.slane %v3574_v58, 4  ;;  %v3646_v21 = vshrl.u32 %v8849_v16, 16  ;;  %10615 = vst [vmem:[#allocation34_spill] sm:$0xff] %v8946_v60 }
 0x2d1   : > { %v3110_v7 = vor.u32 %v3108_v45, %v3107_v4  ;;  %v3090_v33 = vrot.slane %v3088_v15, 7  ;;  %v3113_v29 = vshrl.u32 %v6501_v12, 16  ;;  %v6499_v3 = vpack.c.bf16 %v2720_v18, %v2720_v18  ;;  %v3341_v45 = vld [vmem:[#allocation3 + $0x80] sm:$0x1] }
 0x2d2   : > { %4347 = vrot.lane.b32.xlu1 %v8931_v42, %s6863_s18  ;;  %v3116_v10 = vshll.u32 %v6501_v12, 16  ;;  %v3642_v8 = vshll.u32 %v8849_v16, 16  ;;  %v3111_v58 = vrot.slane %v3107_v4, 4  ;;  %v3636_v40 = vshll.u32 %v8847_v53, 16  ;;  %v3334_v4 = vld [vmem:[#allocation3 + $0x74] sm:$0x1] }
 0x2d3   : > { %v3338_v17 = vsel %vm8407_vm5, %v3110_v7, %v3337_v57  ;;  %v3093_v47 = vor.u32 %v3091_v37, %v3090_v33  ;;  %v3115_v63 = vrot.slane %v3113_v29, 7  ;;  %4376 = vrot.lane.b32.xlu0 %v8909_v61, %s6862_s17  ;;  %v3096_v15 = vshrl.u32 %v6499_v3, 16 }
 0x2d4   : > { %3339 = vst [vmem:[#allocation3 + $0x78] sm:$0xf] %v3338_v17  ;;  %v3099_v37 = vshll.u32 %v6499_v3, 16  ;;  %v3567_v17 = vor.u32 %v3566_v54, %v3563_v30  ;;  %v3577_v29 = vor.u32 %v3576_v50, %v8935_v38  ;;  %v3580_v54 = vshll.u32 %v8755_v1, 16 }
 0x2d5   : > { %v3331_v12 = vsel %vm8407_vm5, %v3093_v47, %v3330_v52  ;;  %v3118_v57 = vor.u32 %v3116_v10, %v3115_v63  ;;  %v3120_v18 = vrot.slane %v3115_v63, 4  ;;  %v3098_v7 = vrot.slane %v3096_v15, 7 }
 0x2d6   : > { %3332 = vst [vmem:[#allocation3 + $0x6c] sm:$0xf] %v3331_v12  ;;  %4244 = vrot.lane.b32.xlu1 %v8931_v42, %s6859_s10  ;;  %v3094_v52 = vrot.slane %v3090_v33, 4  ;;  %v3644_v53 = vrot.slane %v3642_v8, 5  ;;  %v3648_v63 = vrot.slane %v3646_v21, 4  ;;  %v3578_v33 = vrot.slane %v3577_v29, 4 }
 0x2d7   : > { %v3119_v16 = vsel %vm7106_vm14, %v3111_v58, %v3118_v57  ;;  %v3342_v47 = vsel %vm8142_vm12, %v3120_v18, %v3341_v45  ;;  %4374 = vrot.lane.b32.xlu0 %v8946_v60, %s6862_s17  ;;  %v3101_v30 = vor.u32 %v3099_v37, %v3098_v7  ;;  %v3103_v3 = vrot.slane %v3098_v7, 4 }
 0x2d8   : > { %3340 = vst.msk [vmem:[#allocation3 + $0x7c] sm:$0xf] %vm10616_vm6, %v3119_v16  ;;  %3343 = vst [vmem:[#allocation3 + $0x80] sm:$0x1] %v3342_v47  ;;  %v3635_v1 = vrot.slane %v3633_v49, 4  ;;  %v3638_v15 = vrot.slane %v3636_v40, 5  ;;  %v3649_v12 = vor.u32 %v3648_v63, %v3644_v53 }
 0x2d9   : > { %v8964_v50 = vpop.permute.xlu0 %4368  ;;  %v3102_v10 = vsel %vm7106_vm14, %v3094_v52, %v3101_v30  ;;  %v3335_v45 = vsel %vm8142_vm12, %v3103_v3, %v3334_v4  ;;  %v3568_v8 = vrot.slane %v3567_v17, 4  ;;  %v3582_v21 = vrot.slane %v3580_v54, 5 }
 0x2da   : > { %4345 = vrot.lane.b32.xlu1 %v8885_v56, %s6863_s18  ;;  %3333 = vst.msk [vmem:[#allocation3 + $0x70] sm:$0xf] %vm10617_vm9, %v3102_v10  ;;  %3336 = vst [vmem:[#allocation3 + $0x74] sm:$0x1] %v3335_v45  ;;  %v3639_v37 = vor.u32 %v3638_v15, %v3635_v1  ;;  %v3652_v17 = vshll.u32 %v8883_v11, 16  ;;  %v3650_v16 = vrot.slane %v3649_v12, 4 }
 0x2db   : > { %4271 = vrot.lane.b32.xlu0 %v8946_v60, %s6858_s26  ;;  %v3583_v57 = vsel %vm7077_vm11, %v3578_v33, %v3582_v21  ;;  %v8983_v18 = vld [vmem:[#allocation3 + $0x78] sm:$0xf]  ;;  %v3618_v1 = vshll.u32 %v8862_v5, 16  ;;  %v3622_v15 = vshrl.u32 %v8862_v5, 16  ;;  %vm4648_vm6 = vcmask 916480   ;;  %vm10635_vm9 = vmmov %vm10625_vm4 }
 0x2dc   : > { %v3640_v47 = vrot.slane %v3639_v37, 4  ;;  %v3654_v4 = vrot.slane %v3652_v17, 5  ;;  %v3612_v37 = vshll.u32 %v8858_v62, 16 }
 0x2dd   : > { %v8975_v58 = vpop.permute.xlu0 %4265 }
 0x2de   : > { %4242 = vrot.lane.b32.xlu1 %v8885_v56, %s6859_s10  ;;  %v3573_v56 = vsel %vm7077_vm11, %v3568_v8, %v8935_v38  ;;  %v3655_v3 = vsel %vm7077_vm11, %v3650_v16, %v3654_v4  ;;  %v3645_v10 = vsel %vm7077_vm11, %v3640_v47, %v3644_v53  ;;  %v3609_v53 = vshrl.u32 %v8858_v62, 16 }
 0x2df   : > { %4341 = vrot.lane.b32.xlu0 %v8788_v2, %s6863_s18  ;;  %v8985_v7 = vld [vmem:[#allocation3 + $0x7c] sm:$0xf]  ;;  %v6386_v40 = vcombine.low %v3573_v56, %v3583_v57  ;;  %v6389_v33 = vcombine.low %v3645_v10, %v3655_v3  ;;  %v9033_v47 = vrot.slane %v3618_v1, 5  ;;  %v3624_v4 = vrot.slane %v3622_v15, 4  ;;  %v3351_v1 = vld [vmem:[#allocation3 + $0x90] sm:$0xf] }
 0x2e0   : > { %v8990_v29 = vcombine.low %v8983_v18, %v8985_v7  ;;  %v3614_v10 = vrot.slane %v3612_v37, 5  ;;  %v3344_v37 = vld [vmem:[#allocation3 + $0x84] sm:$0xf] }
 0x2e1   : > { %v8995_v49 = vpop.permute.xlu0 %4263  ;;  %v9047_v0 = vld [vmem:[#allocation3 + $0x70] sm:$0xf] }
 0x2e2   : > { %10618 = vst [vmem:[#allocation35_spill] sm:$0xff] %v8990_v29  ;;  %4384 = vrot.lane.b32.xlu1 %v8990_v29, %s6862_s17 }
 0x2e3   : > { %4158 = vrot.lane.b32.xlu0 %v6386_v40, %s6854_s22 }
 0x2e4   : > { %v6568_v11 = vpop.f32.mrf.mxu0 }
 0x2e5   : > { %v2657_v52 = vmul.f32 %v6568_v11, %v8376_v59  ;;  %v9001_v30 = vpop.permute.xlu0 %4335 }
 0x2e6   : > { %4281 = vrot.lane.b32.xlu1 %v8990_v29, %s6858_s26  ;;  %v2584_v38 = vpop.f32.mrf.mxu0 }
 0x2e7   : > { %v9008_v54 = vadd.f32 %v8380_v36, %v2657_v52  ;;  %v2655_v63 = vmul.f32 %v8376_v59, %v2584_v38  ;;  %4411 = vrot.lane.b32.xlu0 %v8816_v48, %s6864_s20 }
 0x2e8   : > { %v6569_v45 = vpop.f32.mrf.mxu0 }
 0x2e9   : > { %10619 = vst [vmem:[#allocation36_spill] sm:$0xff] %v9008_v54  ;;  %v2725_v8 = vmax.f32 %v9008_v54, 0.0  ;;  %v9019_v21 = vadd.f32 %v8380_v36, %v2655_v63  ;;  %v2658_v12 = vmul.f32 %v6569_v45, %v8376_v59  ;;  %v9022_v57 = vpop.permute.xlu0 %4232  ;;  %v3611_v63 = vrot.slane %v3609_v53, 4 }
 0x2ea   : > { %4415 = vrot.lane.b32.xlu1 %v6389_v33, %s6864_s20  ;;  %v2587_v48 = vpop.f32.mrf.mxu0  ;;  %v3628_v53 = vshll.u32 %v8864_v9, 16 }
 0x2eb   : > { %10620 = vst [vmem:[#allocation37_spill] sm:$0xff] %v9019_v21  ;;  %v6504_v17 = vpack.c.bf16 %v2725_v8, %v2725_v8  ;;  %v2723_v56 = vmax.f32 %v9019_v21, 0.0  ;;  %v9029_v5 = vadd.f32 %v8380_v36, %v2658_v12  ;;  %v2656_v16 = vmul.f32 %v8376_v59, %v2587_v48  ;;  %4409 = vrot.lane.b32.xlu0 %v6386_v40, %s6864_s20 }
 0x2ed   : > { %10621 = vst [vmem:[#allocation38_spill] sm:$0xff] %v9029_v5  ;;  %v3139_v11 = vshrl.u32 %v6504_v17, 16  ;;  %v6502_v52 = vpack.c.bf16 %v2723_v56, %v2723_v56  ;;  %v2726_v3 = vmax.f32 %v9029_v5, 0.0  ;;  %v9036_v38 = vpop.permute.xlu0 %4333  ;;  %v9039_v62 = vadd.f32 %v8380_v36, %v2656_v16 }
 0x2ee   : > { %4312 = vrot.lane.b32.xlu1 %v6389_v33, %s6860_s12  ;;  %v3142_v8 = vshll.u32 %v6504_v17, 16  ;;  %v3625_v56 = vor.u32 %v3624_v4, %v9033_v47 }
 0x2ef   : > { %10622 = vst [vmem:[#allocation39_spill] sm:$0xff] %v9039_v62  ;;  %v3141_v45 = vrot.slane %v3139_v11, 7  ;;  %v3122_v12 = vshrl.u32 %v6502_v52, 16  ;;  %v6505_v48 = vpack.c.bf16 %v2726_v3, %v2726_v3  ;;  %4306 = vrot.lane.b32.xlu0 %v6386_v40, %s6860_s12  ;;  %v2724_v15 = vmax.f32 %v9039_v62, 0.0  ;;  %v6789_v62 = vld [vmem:[#allocation3] sm:$0xf] }
 0x2f0   : > { %v3125_v21 = vshll.u32 %v6502_v52, 16  ;;  %v3615_v40 = vor.u32 %v3614_v10, %v3611_v63  ;;  %v6788_v52 = vld [vmem:[#allocation3 + $0x4] sm:$0xf] }
 0x2f1   : > { %v3144_v5 = vor.u32 %v3142_v8, %v3141_v45  ;;  %v3124_v54 = vrot.slane %v3122_v12, 7  ;;  %v3147_v16 = vshrl.u32 %v6505_v48, 16  ;;  %v9045_v46 = vpop.permute.xlu0 %4230  ;;  %v6503_v17 = vpack.c.bf16 %v2724_v15, %v2724_v15  ;;  %v9053_v12 = vld [vmem:[#allocation3 + $0x6c] sm:$0xf] }
 0x2f2   : > { %4164 = vrot.lane.b32.xlu1 %v6389_v33, %s6854_s22  ;;  %v3150_v8 = vshll.u32 %v6505_v48, 16  ;;  %v6365_v41 = vcombine.low %v6789_v62, %v6788_v52  ;;  %v9057_v9 = vcombine.low %v9053_v12, %v9047_v0  ;;  %v3626_v33 = vrot.slane %v3625_v56, 4  ;;  %v3348_v56 = vld [vmem:[#allocation3 + $0x8c] sm:$0x1] }
 0x2f3   : > { %v3352_v11 = vsel %vm8407_vm5, %v3144_v5, %v3351_v1  ;;  %v3127_v3 = vor.u32 %v3125_v21, %v3124_v54  ;;  %v3149_v4 = vrot.slane %v3147_v16, 7  ;;  %v3130_v19 = vshrl.u32 %v6503_v17, 16 }
 0x2f4   : > { %3353 = vst [vmem:[#allocation3 + $0x90] sm:$0xf] %v3352_v11  ;;  %10623 = vst [vmem:[#allocation40_spill] sm:$0xff] %v9057_v9  ;;  %v3145_v63 = vrot.slane %v3141_v45, 4  ;;  %v3630_v1 = vrot.slane %v3628_v53, 5  ;;  %v3133_v62 = vshll.u32 %v6503_v17, 16 }
 0x2f5   : > { %v3345_v5 = vsel %vm8407_vm5, %v3127_v3, %v3344_v37  ;;  %v3152_v21 = vor.u32 %v3150_v8, %v3149_v4  ;;  %v3154_v10 = vrot.slane %v3149_v4, 4  ;;  %v9061_v48 = vpop.permute.xlu0 %4403  ;;  %v3132_v15 = vrot.slane %v3130_v19, 7 }
 0x2f6   : > { %3346 = vst [vmem:[#allocation3 + $0x84] sm:$0xf] %v3345_v5  ;;  %4382 = vrot.lane.b32.xlu1 %v9057_v9, %s6862_s17  ;;  %v3616_v11 = vrot.slane %v3615_v40, 4  ;;  %v3944_v37 = vrot.slane %v8985_v7, 5  ;;  %v4440_v3 = vsel %vm2165_vm2, %v6365_v41, %v8915_v35  ;;  %v3128_v53 = vrot.slane %v3124_v54, 4 }
 0x2f7   : > { %v3153_v16 = vsel %vm7106_vm14, %v3145_v63, %v3152_v21  ;;  %v3356_v45 = vsel %vm8142_vm12, %v3154_v10, %v3355_v43  ;;  %v3135_v19 = vor.u32 %v3133_v62, %v3132_v15  ;;  %v3137_v17 = vrot.slane %v3132_v15, 4  ;;  %v9084_v41 = vld [vmem:[#allocation3 + $0x80] sm:$0x1] }
 0x2f8   : > { %3354 = vst.msk [vmem:[#allocation3 + $0x94] sm:$0xf] %vm10624_vm15, %v3153_v16  ;;  %3357 = vst [vmem:[#allocation3 + $0x98] sm:$0x1] %v3356_v45  ;;  %v3631_v8 = vsel %vm7077_vm11, %v3626_v33, %v3630_v1  ;;  %v3681_v43 = vshrl.u32 %v8983_v18, 16  ;;  %v4487_v35 = vsel %vm2231_vm7, %v4440_v3, %v8941_v25  ;;  %v3684_v54 = vshll.u32 %v8983_v18, 16 }
 0x2f9   : > { %v9073_v4 = vpop.permute.xlu0 %4300  ;;  %v3136_v40 = vsel %vm7106_vm14, %v3128_v53, %v3135_v19  ;;  %v3349_v52 = vsel %vm8142_vm12, %v3137_v17, %v3348_v56  ;;  %v3621_v33 = vsel %vm7077_vm11, %v3616_v11, %v9033_v47  ;;  %v3946_v63 = vrot.slane %v3944_v37, 4  ;;  %v9104_v45 = vld [vmem:[#allocation3 + $0x74] sm:$0x1] }
 0x2fa   : > { %4279 = vrot.lane.b32.xlu1 %v9057_v9, %s6858_s26  ;;  %3347 = vst.msk [vmem:[#allocation3 + $0x88] sm:$0xf] %vm10625_vm4, %v3136_v40  ;;  %3350 = vst [vmem:[#allocation3 + $0x8c] sm:$0x1] %v3349_v52  ;;  %v6388_v21 = vcombine.low %v3621_v33, %v3631_v8  ;;  %v3694_v25 = vshrl.u32 %v8985_v7, 16  ;;  %v3947_v62 = vrot.slane %v9084_v41, 5 }
 0x2fb   : > { %v9093_v5 = vld [vmem:[#allocation3 + $0x90] sm:$0xf]  ;;  %v6357_v47 = vrot.slane %v8983_v18, 9  ;;  %v6356_v56 = vrot.slane %v9053_v12, 9  ;;  %v9107_v11 = vrot.slane %v3681_v43, 4  ;;  %v9115_v17 = vrot.slane %v3684_v54, 5 }
 0x2fc   : > { %v3729_v10 = vshrl.u32 %v9093_v5, 16  ;;  %v3732_v1 = vshll.u32 %v9093_v5, 16  ;;  %v3948_v53 = vsel %vm7021_vm8, %v3946_v63, %v3947_v62  ;;  %v3690_v8 = vshll.u32 %v8985_v7, 16 }
 0x2fd   : > { %v9098_v15 = vpop.permute.xlu0 %4152  ;;  %v9109_v3 = vld [vmem:[#allocation3 + $0x84] sm:$0xf]  ;;  %v4519_v43 = vsel %vm2297_vm10, %v4487_v35, %v8995_v49  ;;  %v10626_v63 = vrot.slane %v9047_v0, 5  ;;  %v3940_v54 = vrot.slane %v9104_v45, 5  ;;  %v9127_v29 = vrot.slane %v3694_v25, 4 }
 0x2fe   : > { %4413 = vrot.lane.b32.xlu1 %v6388_v21, %s6864_s20  ;;  %v3731_v40 = vrot.slane %v3729_v10, 4  ;;  %v3734_v52 = vrot.slane %v3732_v1, 5  ;;  %v3945_v49 = vsel %vm7021_vm8, %v6357_v47, %v3944_v37  ;;  %v3705_v13 = vshrl.u32 %v9109_v3, 16 }
 0x2ff   : > { %v9113_v19 = vld [vmem:[#allocation3 + $0x94] sm:$0xf]  ;;  %v9122_v51 = vld [vmem:[#allocation3 + $0x98] sm:$0x1]  ;;  %v3939_v62 = vrot.slane %v10626_v63, 4  ;;  %v9141_v9 = vcombine.low %v3945_v49, %v3948_v53  ;;  %v6358_v24 = vrot.slane %v9109_v3, 9 }
 0x300   : > { %v3738_v18 = vshll.u32 %v9113_v19, 16  ;;  %v3742_v33 = vshrl.u32 %v9113_v19, 16  ;;  %v3735_v42 = vor.u32 %v3734_v52, %v3731_v40  ;;  %v3748_v37 = vshll.u32 %v9122_v51, 16 }
 0x301   : > { %v4299_v16 = vpop.permute.xlu0 %4298  ;;  %v9131_v10 = vld [vmem:[#allocation3 + $0x88] sm:$0xf]  ;;  %v9133_v1 = vld [vmem:[#allocation3 + $0x8c] sm:$0x1]  ;;  %10627 = vst [vmem:[#allocation41_spill] sm:$0xff] %v9141_v9  ;;  %v3941_v40 = vsel %vm7021_vm8, %v3939_v62, %v3940_v54  ;;  %v3707_v52 = vrot.slane %v3705_v13, 4  ;;  %v9251_v23 = vcombine.low %v9093_v5, %v9113_v19 }
 0x302   : > { %v4551_v7 = vsel %vm2363_vm13, %v4519_v43, %v4299_v16  ;;  %4310 = vrot.lane.b32.xlu1 %v6388_v21, %s6860_s12  ;;  %v3740_v35 = vrot.slane %v3738_v18, 5  ;;  %v3951_v25 = vrot.slane %v9131_v10, 5  ;;  %v3744_v16 = vrot.slane %v3742_v33, 4 }
 0x303   : > { %v4584_v63 = vsel %vm4582_vm0, %v4551_v7, %v9036_v38  ;;  %v3954_v53 = vrot.slane %v9133_v1, 5  ;;  %v3708_v49 = vshll.u32 %v9109_v3, 16  ;;  %v3736_v13 = vrot.slane %v3735_v42, 4  ;;  %10636 = vst [vmem:[#allocation48_spill] sm:$0xff] %v9251_v23 }
 0x304   : > { %v4617_v43 = vsel %vm4615_vm3, %v4584_v63, %v8964_v50  ;;  %v6572_v55 = vpop.f32.mrf.mxu0  ;;  %v3953_v7 = vrot.slane %v3951_v25, 4  ;;  %v3745_v50 = vor.u32 %v3744_v16, %v3740_v35  ;;  %v3750_v54 = vrot.slane %v3748_v37, 5 }
 0x305   : > { %v2661_v47 = vmul.f32 %v6572_v55, %v8376_v59  ;;  %v9148_v18 = vpop.permute.xlu0 %4150  ;;  %v4650_v38 = vsel %vm4648_vm6, %v4617_v43, %v9061_v48  ;;  %v3952_v48 = vsel %vm7021_vm8, %v6358_v24, %v3951_v25  ;;  %v10631_v24 = vrot.slane %v9047_v0, 5 }
 0x306   : > { %4162 = vrot.lane.b32.xlu1 %v6388_v21, %s6854_s22  ;;  %v2600_v33 = vpop.f32.mrf.mxu0  ;;  %4855 = vmatmul.mubr.bf16.vlgmr.msra.gmra.mxu0 %v4650_v38  ;;  %v3955_v21 = vsel %vm7021_vm8, %v3953_v7, %v3954_v53  ;;  %v3746_v62 = vrot.slane %v3745_v50, 4  ;;  %v9188_v53 = vrot.slane %v3690_v8, 5  ;;  %v3710_v50 = vrot.slane %v3708_v49, 5 }
 0x307   : > { %v9158_v55 = vadd.f32 %v8380_v36, %v2661_v47  ;;  %v2659_v63 = vmul.f32 %v8376_v59, %v2600_v33  ;;  %6429 = vmatprep.mubr.msk.bf16.mxu0 %vm2165_vm2, %v8725_v20  ;;  %v9167_v43 = vcombine.low %v3952_v48, %v3955_v21  ;;  %v3938_v25 = vsel %vm7021_vm8, %v6356_v56, %v10631_v24 }
 0x308   : > { %v6573_v16 = vpop.f32.mrf.mxu0  ;;  %v3751_v37 = vsel %vm7077_vm11, %v3746_v62, %v3750_v54  ;;  %v9186_v7 = vcombine.low %v3938_v25, %v3941_v40  ;;  %v3711_v24 = vor.u32 %v3710_v50, %v3707_v52  ;;  %v3718_v40 = vshrl.u32 %v9131_v10, 16 }
 0x309   : > { %10628 = vst [vmem:[#allocation42_spill] sm:$0xff] %v9158_v55  ;;  %10629 = vst [vmem:[#allocation43_spill] sm:$0xff] %v9167_v43  ;;  %v2729_v47 = vmax.f32 %v9158_v55, 0.0  ;;  %v9171_v38 = vadd.f32 %v8380_v36, %v2659_v63  ;;  %v2662_v33 = vmul.f32 %v6573_v16, %v8376_v59  ;;  %v9174_v20 = vpop.permute.xlu0 %4372  ;;  %4353 = vrot.lane.b32.xlu0 %v9167_v43, %s6863_s18  ;;  %v3714_v55 = vshll.u32 %v9131_v10, 16 }
 0x30a   : > { %4351 = vrot.lane.b32.xlu1 %v9141_v9, %s6863_s18  ;;  %v2603_v42 = vpop.f32.mrf.mxu0  ;;  %10632 = vst [vmem:[#allocation45_spill] sm:$0xff] %v9186_v7  ;;  %v3741_v16 = vsel %vm7077_vm11, %v3736_v13, %v3740_v35  ;;  %v3712_v35 = vrot.slane %v3711_v24, 4  ;;  %v3720_v13 = vrot.slane %v3718_v40, 4  ;;  %v3358_v40 = vld [vmem:[#allocation3 + $0x9c] sm:$0xf] }
 0x30b   : > { %10630 = vst [vmem:[#allocation44_spill] sm:$0xff] %v9171_v38  ;;  %v6508_v63 = vpack.c.bf16 %v2729_v47, %v2729_v47  ;;  %v2727_v48 = vmax.f32 %v9171_v38, 0.0  ;;  %v9192_v56 = vadd.f32 %v8380_v36, %v2662_v33  ;;  %v2660_v21 = vmul.f32 %v8376_v59, %v2603_v42 }
 0x30c   : > { %v9202_v47 = vcombine.low %v3741_v16, %v3751_v37  ;;  %v3716_v52 = vrot.slane %v3714_v55, 5  ;;  %v3724_v38 = vshll.u32 %v9133_v1, 16  ;;  %v2797_v55 = vld [vmem:[#allocation3 + $0xcc] sm:$0x1]  ;;  %v3697_v1 = vor.u32 %v9127_v29, %v9188_v53 }
 0x30d   : > { %10633 = vst [vmem:[#allocation46_spill] sm:$0xff] %v9192_v56  ;;  %v3173_v62 = vshrl.u32 %v6508_v63, 16  ;;  %v6506_v8 = vpack.c.bf16 %v2727_v48, %v2727_v48  ;;  %v2730_v49 = vmax.f32 %v9192_v56, 0.0  ;;  %v9200_v54 = vpop.permute.xlu0 %4269  ;;  %v9205_v33 = vadd.f32 %v8380_v36, %v2660_v21  ;;  %4250 = vrot.lane.b32.xlu0 %v9167_v43, %s6859_s10  ;;  %v3365_v56 = vld [vmem:[#allocation3 + $0xa8] sm:$0xf] }
 0x30e   : > { %4248 = vrot.lane.b32.xlu1 %v9141_v9, %s6859_s10  ;;  %v3176_v42 = vshll.u32 %v6508_v63, 16  ;;  %v3717_v21 = vsel %vm7077_vm11, %v3712_v35, %v3716_v52  ;;  %v3721_v16 = vor.u32 %v3720_v13, %v3716_v52  ;;  %v3726_v34 = vrot.slane %v3724_v38, 5 }
 0x30f   : > { %10634 = vst [vmem:[#allocation47_spill] sm:$0xff] %v9205_v33  ;;  %v3175_v25 = vrot.slane %v3173_v62, 7  ;;  %v3156_v50 = vshrl.u32 %v6506_v8, 16  ;;  %v6509_v48 = vpack.c.bf16 %v2730_v49, %v2730_v49  ;;  %v2728_v37 = vmax.f32 %v9205_v33, 0.0 }
 0x310   : > { %v3159_v60 = vshll.u32 %v6506_v8, 16  ;;  %v3687_v62 = vor.u32 %v9115_v17, %v9107_v11  ;;  %v3722_v49 = vrot.slane %v3721_v16, 4  ;;  %v3700_v33 = vshll.u32 %v9084_v41, 16 }
 0x311   : > { %v3178_v43 = vor.u32 %v3176_v42, %v3175_v25  ;;  %v3158_v61 = vrot.slane %v3156_v50, 7  ;;  %v3181_v9 = vshrl.u32 %v6509_v48, 16  ;;  %v9215_v24 = vpop.permute.xlu0 %4370  ;;  %v6507_v63 = vpack.c.bf16 %v2728_v37, %v2728_v37  ;;  %4423 = vrot.lane.b32.xlu0 %v9202_v47, %s6864_s20  ;;  %v2852_v42 = vld [vmem:[#allocation3 + $0xd4] sm:$0x1]  ;;  %v3369_v50 = vld [vmem:[#allocation3 + $0xb0] sm:$0x1] }
 0x312   : > { %4349 = vrot.lane.b32.xlu1 %v9186_v7, %s6863_s18  ;;  %v3184_v13 = vshll.u32 %v6509_v48, 16  ;;  %v2798_v11 = vsel %vm8142_vm12, 0, %v2797_v55  ;;  %v3179_v17 = vrot.slane %v3175_v25, 4  ;;  %v3727_v41 = vsel %vm7077_vm11, %v3722_v49, %v3726_v34  ;;  %v3362_v48 = vld [vmem:[#allocation3 + $0xa4] sm:$0x1] }
 0x313   : > { %v3366_v8 = vsel %vm8407_vm5, %v3178_v43, %v3365_v56  ;;  %v3161_v35 = vor.u32 %v3159_v60, %v3158_v61  ;;  %v3183_v52 = vrot.slane %v3181_v9, 7  ;;  %v3164_v37 = vshrl.u32 %v6507_v63, 16  ;;  %2799 = vst [vmem:[#allocation3 + $0xcc] sm:$0x1] %v2798_v11 }
 0x314   : > { %3367 = vst [vmem:[#allocation3 + $0xa8] sm:$0xf] %v3366_v8  ;;  %v3167_v9 = vshll.u32 %v6507_v63, 16  ;;  %v2853_v38 = vsel %vm8188_vm1, 0, %v2852_v42  ;;  %v3698_v55 = vrot.slane %v3697_v1, 4  ;;  %v3162_v63 = vrot.slane %v3158_v61, 4  ;;  %vm10637_vm1 = vmmov %vm10625_vm4 }
 0x315   : > { %v3359_v29 = vsel %vm8407_vm5, %v3161_v35, %v3358_v40  ;;  %v3186_v16 = vor.u32 %v3184_v13, %v3183_v52  ;;  %v3188_v27 = vrot.slane %v3183_v52, 4  ;;  %v9232_v43 = vpop.permute.xlu0 %4267  ;;  %v3166_v60 = vrot.slane %v3164_v37, 7  ;;  %4320 = vrot.lane.b32.xlu0 %v9202_v47, %s6860_s12  ;;  %2854 = vst [vmem:[#allocation3 + $0xd4] sm:$0x1] %v2853_v38  ;;  %vm10644_vm15 = vmmov %vm10637_vm1 }
 0x316   : > { %3360 = vst [vmem:[#allocation3 + $0x9c] sm:$0xf] %v3359_v29  ;;  %4246 = vrot.lane.b32.xlu1 %v9186_v7, %s6859_s10  ;;  %v9246_v40 = vcombine.low %v3717_v21, %v3727_v41  ;;  %v3688_v61 = vrot.slane %v3687_v62, 4  ;;  %v3702_v1 = vrot.slane %v3700_v33, 5  ;;  %v3657_v35 = vshrl.u32 %v9053_v12, 16 }
 0x317   : > { %v3187_v56 = vsel %vm7106_vm14, %v3179_v17, %v3186_v16  ;;  %v3370_v25 = vsel %vm8142_vm12, %v3188_v27, %v3369_v50  ;;  %v3169_v8 = vor.u32 %v3167_v9, %v3166_v60  ;;  %v3171_v34 = vrot.slane %v3166_v60, 4 }
 0x318   : > { %3368 = vst.msk [vmem:[#allocation3 + $0xac] sm:$0xf] %vm10635_vm9, %v3187_v56  ;;  %3371 = vst [vmem:[#allocation3 + $0xb0] sm:$0x1] %v3370_v25  ;;  %v3660_v52 = vshll.u32 %v9053_v12, 16  ;;  %v3703_v13 = vsel %vm7077_vm11, %v3698_v55, %v3702_v1  ;;  %v3670_v42 = vshrl.u32 %v9047_v0, 16  ;;  %v3693_v12 = vsel %vm7077_vm11, %v3688_v61, %v9188_v53 }
 0x319   : > { %v9253_v49 = vpop.permute.xlu0 %4339  ;;  %v3170_v27 = vsel %vm7106_vm14, %v3162_v63, %v3169_v8  ;;  %v3363_v21 = vsel %vm8142_vm12, %v3171_v34, %v3362_v48  ;;  %4172 = vrot.lane.b32.xlu0 %v9202_v47, %s6854_s22  ;;  %v3666_v37 = vshll.u32 %v9047_v0, 16  ;;  %v6391_v62 = vcombine.low %v3693_v12, %v3703_v13 }
 0x31a   : > { %4388 = vrot.lane.b32.xlu1 %v9251_v23, %s6862_s17  ;;  %3361 = vst.msk [vmem:[#allocation3 + $0xa0] sm:$0xf] %vm10637_vm1, %v3170_v27  ;;  %3364 = vst [vmem:[#allocation3 + $0xa4] sm:$0x1] %v3363_v21  ;;  %v3659_v17 = vrot.slane %v3657_v35, 4  ;;  %v3662_v29 = vrot.slane %v3660_v52, 5  ;;  %v4443_v34 = vsel %vm2165_vm2, %v8470_v6, %v9148_v18 }
 0x31b   : > { %v9271_v47 = vld [vmem:[#allocation3 + $0xa8] sm:$0xf]  ;;  %v9291_v56 = vrot.slane %v3666_v37, 5  ;;  %v3672_v53 = vrot.slane %v3670_v42, 4  ;;  %v4489_v12 = vsel %vm2231_vm7, %v4443_v34, %v9045_v46 }
 0x31c   : > { %v3777_v16 = vshrl.u32 %v9271_v47, 16  ;;  %v3780_v60 = vshll.u32 %v9271_v47, 16  ;;  %v3663_v52 = vor.u32 %v3662_v29, %v3659_v17 }
 0x31d   : > { %v9269_v50 = vpop.permute.xlu0 %4236  ;;  %v9289_v38 = vld [vmem:[#allocation3 + $0x9c] sm:$0xf]  ;;  %v3673_v29 = vor.u32 %v3672_v53, %v9291_v56 }
 0x31e   : > { %4285 = vrot.lane.b32.xlu1 %v9251_v23, %s6858_s26  ;;  %v9276_v33 = vpop.permute.xlu1 %4343  ;;  %v3779_v1 = vrot.slane %v3777_v16, 4  ;;  %v3782_v35 = vrot.slane %v3780_v60, 5 }
 0x31f   : > { %10638 = vst [vmem:[#allocation49_spill] sm:$0xff] %v9276_v33  ;;  %v9281_v11 = vld [vmem:[#allocation3 + $0xac] sm:$0xf]  ;;  %v9316_v18 = vld [vmem:[#allocation3 + $0xb0] sm:$0x1]  ;;  %v3676_v33 = vshll.u32 %v9104_v45, 16 }
 0x320   : > { %v3786_v0 = vshll.u32 %v9281_v11, 16  ;;  %v3790_v9 = vshrl.u32 %v9281_v11, 16  ;;  %v3783_v34 = vor.u32 %v3782_v35, %v3779_v1  ;;  %v3796_v7 = vshll.u32 %v9316_v18, 16 }
 0x321   : > { %v9287_v41 = vpop.permute.xlu0 %4337  ;;  %v9296_v48 = vld [vmem:[#allocation3 + $0xa0] sm:$0xf]  ;;  %v9298_v55 = vld [vmem:[#allocation3 + $0xa4] sm:$0x1]  ;;  %v4521_v35 = vsel %vm2297_vm10, %v4489_v12, %v8975_v58  ;;  %v9359_v58 = vcombine.low %v9109_v3, %v9131_v10 }
 0x322   : > { %4419 = vrot.lane.b32.xlu1 %v6391_v62, %s6864_s20  ;;  %v9294_v25 = vpop.permute.xlu1 %4240  ;;  %v9300_v63 = vrot.slane %v3786_v0, 5  ;;  %v3792_v8 = vrot.slane %v3790_v9, 4  ;;  %v9307_v27 = vcombine.low %v9289_v38, %v9296_v48  ;;  %v3965_v21 = vrot.slane %v9296_v48, 5 }
 0x323   : > { %10639 = vst [vmem:[#allocation50_spill] sm:$0xff] %v9294_v25  ;;  %v3968_v6 = vrot.slane %v9298_v55, 5  ;;  %v3664_v25 = vrot.slane %v3663_v52, 4  ;;  %v3798_v12 = vrot.slane %v3796_v7, 5 }
 0x324   : > { %10640 = vst [vmem:[#allocation51_spill] sm:$0xff] %v9307_v27  ;;  %v6576_v61 = vpop.f32.mrf.mxu0  ;;  %4390 = vrot.lane.b32.xlu0 %v9307_v27, %s6862_s17  ;;  %v3967_v37 = vrot.slane %v3965_v21, 4  ;;  %v3793_v17 = vor.u32 %v3792_v8, %v9300_v63 }
 0x325   : > { %v2665_v13 = vmul.f32 %v6576_v61, %v8376_v59  ;;  %v9313_v42 = vpop.permute.xlu0 %4234  ;;  %v6360_v61 = vrot.slane %v9289_v38, 9 }
 0x326   : > { %4316 = vrot.lane.b32.xlu1 %v6391_v62, %s6860_s12  ;;  %v2616_v16 = vpop.f32.mrf.mxu0  ;;  %v9321_v60 = vpop.permute.xlu1 %4238  ;;  %v3969_v23 = vsel %vm7021_vm8, %v3967_v37, %v3968_v6  ;;  %v3794_v6 = vrot.slane %v3793_v17, 4 }
 0x327   : > { %v9326_v0 = vadd.f32 %v8380_v36, %v2665_v13  ;;  %v2663_v9 = vmul.f32 %v8376_v59, %v2616_v16  ;;  %v3966_v1 = vsel %vm7021_vm8, %v6360_v61, %v3965_v21  ;;  %v3678_v61 = vrot.slane %v3676_v33, 5 }
 0x328   : > { %v6577_v46 = vpop.f32.mrf.mxu0  ;;  %4287 = vrot.lane.b32.xlu0 %v9307_v27, %s6858_s26  ;;  %v9350_v37 = vcombine.low %v3966_v1, %v3969_v23  ;;  %v3799_v3 = vsel %vm7077_vm11, %v3794_v6, %v3798_v12  ;;  %v3379_v1 = vld [vmem:[#allocation3 + $0xc0] sm:$0xf]  ;;  %v3372_v12 = vld [vmem:[#allocation3 + $0xb4] sm:$0xf] }
 0x329   : > { %10641 = vst [vmem:[#allocation52_spill] sm:$0xff] %v9326_v0  ;;  %v2733_v8 = vmax.f32 %v9326_v0, 0.0  ;;  %v9336_v53 = vadd.f32 %v8380_v36, %v2663_v9  ;;  %v2666_v13 = vmul.f32 %v6577_v46, %v8376_v59  ;;  %v9341_v16 = vpop.permute.xlu0 %4407  ;;  %v3674_v9 = vrot.slane %v3673_v29, 4 }
 0x32a   : > { %4168 = vrot.lane.b32.xlu1 %v6391_v62, %s6854_s22  ;;  %v2619_v45 = vpop.f32.mrf.mxu0  ;;  %v9348_v52 = vpop.permute.xlu1 %4308  ;;  %v3784_v62 = vrot.slane %v3783_v34, 4 }
 0x32b   : > { %10642 = vst [vmem:[#allocation53_spill] sm:$0xff] %v9348_v52  ;;  %v6512_v0 = vpack.c.bf16 %v2733_v8, %v2733_v8  ;;  %v2731_v46 = vmax.f32 %v9336_v53, 0.0  ;;  %v9354_v27 = vadd.f32 %v8380_v36, %v2666_v13  ;;  %v2664_v21 = vmul.f32 %v8376_v59, %v2619_v45 }
 0x32c   : > { %4357 = vrot.lane.b32.xlu0 %v9350_v37, %s6863_s18  ;;  %v4553_v8 = vsel %vm2363_vm13, %v4521_v35, %v9073_v4  ;;  %v3679_v10 = vsel %vm7077_vm11, %v3674_v9, %v3678_v61  ;;  %v3669_v35 = vsel %vm7077_vm11, %v3664_v25, %v9291_v56 }
 0x32d   : > { %v3207_v52 = vshrl.u32 %v6512_v0, 16  ;;  %v6510_v23 = vpack.c.bf16 %v2731_v46, %v2731_v46  ;;  %v2734_v17 = vmax.f32 %v9354_v27, 0.0  ;;  %v9364_v29 = vpop.permute.xlu0 %4304  ;;  %v9369_v59 = vadd.f32 %v8380_v36, %v2664_v21 }
 0x32e   : > { %4386 = vrot.lane.b32.xlu1 %v9359_v58, %s6862_s17  ;;  %v3210_v33 = vshll.u32 %v6512_v0, 16  ;;  %v9378_v4 = vpop.permute.xlu1 %4160  ;;  %v3789_v36 = vsel %vm7077_vm11, %v3784_v62, %v9300_v63  ;;  %v4586_v21 = vsel %vm4582_vm0, %v4553_v8, %v9001_v30  ;;  %v6390_v62 = vcombine.low %v3669_v35, %v3679_v10  ;;  %v3383_v8 = vld [vmem:[#allocation3 + $0xc8] sm:$0x1] }
 0x32f   : > { %v3209_v7 = vrot.slane %v3207_v52, 7  ;;  %v3190_v34 = vshrl.u32 %v6510_v23, 16  ;;  %v6513_v13 = vpack.c.bf16 %v2734_v17, %v2734_v17  ;;  %v2732_v45 = vmax.f32 %v9369_v59, 0.0 }
 0x330   : > { %v3193_v9 = vshll.u32 %v6510_v23, 16  ;;  %4254 = vrot.lane.b32.xlu0 %v9350_v37, %s6859_s10  ;;  %v6395_v63 = vcombine.low %v3789_v36, %v3799_v3  ;;  %v4619_v30 = vsel %vm4615_vm3, %v4586_v21, %v9215_v24  ;;  %v3958_v3 = vrot.slane %v9113_v19, 5 }
 0x331   : > { %v3212_v6 = vor.u32 %v3210_v33, %v3209_v7  ;;  %v3192_v46 = vrot.slane %v3190_v34, 7  ;;  %v3215_v52 = vshrl.u32 %v6513_v13, 16  ;;  %v9388_v0 = vpop.permute.xlu0 %4156  ;;  %v6511_v61 = vpack.c.bf16 %v2732_v45, %v2732_v45 }
 0x332   : > { %4283 = vrot.lane.b32.xlu1 %v9359_v58, %s6858_s26  ;;  %v3218_v17 = vshll.u32 %v6513_v13, 16  ;;  %v4446_v33 = vsel %vm2165_vm2, %v8449_v14, %v9098_v15  ;;  %v3213_v10 = vrot.slane %v3209_v7, 4 }
 0x333   : > { %v3380_v56 = vsel %vm8407_vm5, %v3212_v6, %v3379_v1  ;;  %v3195_v25 = vor.u32 %v3193_v9, %v3192_v46  ;;  %v3217_v23 = vrot.slane %v3215_v52, 7  ;;  %v3198_v34 = vshrl.u32 %v6511_v61, 16 }
 0x334   : > { %3381 = vst [vmem:[#allocation3 + $0xc0] sm:$0xf] %v3380_v56  ;;  %v9401_v45 = vpop.permute.xlu1 %4380  ;;  %4427 = vrot.lane.b32.xlu0 %v6395_v63, %s6864_s20  ;;  %v3201_v15 = vshll.u32 %v6511_v61, 16  ;;  %v4491_v7 = vsel %vm2231_vm7, %v4446_v33, %v9022_v57  ;;  %v3196_v9 = vrot.slane %v3192_v46, 4 }
 0x335   : > { %v3373_v1 = vsel %vm8407_vm5, %v3195_v25, %v3372_v12  ;;  %v3220_v36 = vor.u32 %v3218_v17, %v3217_v23  ;;  %v3222_v13 = vrot.slane %v3217_v23, 4  ;;  %v4406_v35 = vpop.permute.xlu0 %4405  ;;  %v3200_v14 = vrot.slane %v3198_v34, 7  ;;  %vm10643_vm5 = vmmov %vm10637_vm1 }
 0x336   : > { %3374 = vst [vmem:[#allocation3 + $0xb4] sm:$0xf] %v3373_v1  ;;  %4417 = vrot.lane.b32.xlu1 %v6390_v62, %s6864_s20  ;;  %v4653_v24 = vsel %vm4648_vm6, %v4619_v30, %v4406_v35  ;;  %v4523_v61 = vsel %vm2297_vm10, %v4491_v7, %v9232_v43  ;;  %v3960_v25 = vrot.slane %v3958_v3, 4  ;;  %v3961_v43 = vrot.slane %v9122_v51, 5 }
 0x337   : > { %v3221_v6 = vsel %vm7106_vm14, %v3213_v10, %v3220_v36  ;;  %v3384_v19 = vsel %vm8142_vm12, %v3222_v13, %v3383_v8  ;;  %4863 = vmatmul.mubr.bf16.gmra.mxu0 %v4653_v24  ;;  %v3203_v52 = vor.u32 %v3201_v15, %v3200_v14  ;;  %v3205_v21 = vrot.slane %v3200_v14, 4 }
 0x338   : > { %3382 = vst.msk [vmem:[#allocation3 + $0xc4] sm:$0xf] %vm10643_vm5, %v3221_v6  ;;  %3385 = vst [vmem:[#allocation3 + $0xc8] sm:$0x1] %v3384_v19  ;;  %6430 = vmatprep.mubr.msk.bf16.mxu0 %vm2165_vm2, %v8704_v22  ;;  %v9418_v12 = vpop.permute.xlu1 %4277  ;;  %4324 = vrot.lane.b32.xlu0 %v6395_v63, %s6860_s12  ;;  %v6359_v30 = vrot.slane %v9093_v5, 9  ;;  %v3962_v8 = vsel %vm7021_vm8, %v3960_v25, %v3961_v43 }
 0x339   : > { %v4303_v56 = vpop.permute.xlu0 %4302  ;;  %v3204_v57 = vsel %vm7106_vm14, %v3196_v9, %v3203_v52  ;;  %v3377_v46 = vsel %vm8142_vm12, %v3205_v21, %v3376_v28 }
 0x33a   : > { %v4555_v23 = vsel %vm2363_vm13, %v4523_v61, %v4303_v56  ;;  %4314 = vrot.lane.b32.xlu1 %v6390_v62, %s6860_s12  ;;  %3375 = vst.msk [vmem:[#allocation3 + $0xb8] sm:$0xf] %vm10644_vm15, %v3204_v57  ;;  %3378 = vst [vmem:[#allocation3 + $0xbc] sm:$0x1] %v3377_v46  ;;  %v3959_v51 = vsel %vm7021_vm8, %v6359_v30, %v3958_v3  ;;  %v9490_v61 = vcombine.low %v9271_v47, %v9281_v11 }
 0x33b   : > { %v4588_v22 = vsel %vm4582_vm0, %v4555_v23, %v9287_v41  ;;  %v9446_v41 = vld [vmem:[#allocation3 + $0xc0] sm:$0xf] }
 0x33c   : > { %v9433_v17 = vpop.permute.xlu1 %4378  ;;  %v4621_v44 = vsel %vm4615_vm3, %v4588_v22, %v9174_v20  ;;  %4176 = vrot.lane.b32.xlu0 %v6395_v63, %s6854_s22  ;;  %v3985_v1 = vshrl.u32 %v9446_v41, 16 }
 0x33d   : > { %v4155_v26 = vpop.permute.xlu0 %4154  ;;  %v4656_v33 = vsel %vm4648_vm6, %v4621_v44, %v9341_v16  ;;  %v9454_v16 = vcombine.low %v3959_v51, %v3962_v8  ;;  %v9462_v3 = vld [vmem:[#allocation3 + $0xb4] sm:$0xf] }
 0x33e   : > { %4166 = vrot.lane.b32.xlu1 %v6390_v62, %s6854_s22  ;;  %v3987_v7 = vrot.slane %v3985_v1, 4  ;;  %v6362_v56 = vrot.slane %v9462_v3, 9 }
 0x33f   : > { %4871 = vmatmul.mubr.bf16.gmra.mxu0 %v4656_v33  ;;  %v9448_v20 = vld [vmem:[#allocation3 + $0xc4] sm:$0xf]  ;;  %v9484_v52 = vld [vmem:[#allocation3 + $0xc8] sm:$0x1] }
 0x340   : > { %6431 = vmatprep.mubr.msk.bf16.mxu0 %vm2165_vm2, %v8788_v2  ;;  %v9452_v63 = vpop.permute.xlu1 %4275  ;;  %v3994_v5 = vshll.u32 %v9448_v20, 16  ;;  %v3998_v34 = vshrl.u32 %v9448_v20, 16  ;;  %v3988_v2 = vshll.u32 %v9446_v41, 16  ;;  %v4004_v43 = vshll.u32 %v9484_v52, 16 }
 0x341   : > { %v9458_v62 = vpop.permute.xlu0 %4273  ;;  %v9464_v10 = vld [vmem:[#allocation3 + $0xb8] sm:$0xf]  ;;  %v9472_v13 = vld [vmem:[#allocation3 + $0xbc] sm:$0x1] }
 0x342   : > { %4355 = vrot.lane.b32.xlu1 %v9454_v16, %s6863_s18  ;;  %v9470_v36 = vcombine.low %v9462_v3, %v9464_v10  ;;  %v3979_v35 = vrot.slane %v9464_v10, 5  ;;  %v3996_v15 = vrot.slane %v3994_v5, 5  ;;  %v4000_v24 = vrot.slane %v3998_v34, 4 }
 0x343   : > { %v3982_v28 = vrot.slane %v9472_v13, 5  ;;  %v3990_v9 = vrot.slane %v3988_v2, 5  ;;  %v4006_v5 = vrot.slane %v4004_v43, 5  ;;  %v4449_v34 = vsel %vm2165_vm2, %v8659_v39, %v4155_v26 }
 0x344   : > { %v9475_v14 = vpop.permute.xlu1 %4347  ;;  %4394 = vrot.lane.b32.xlu0 %v9470_v36, %s6862_s17  ;;  %v3981_v19 = vrot.slane %v3979_v35, 4  ;;  %v4001_v57 = vor.u32 %v4000_v24, %v3996_v15  ;;  %v3980_v23 = vsel %vm7021_vm8, %v6362_v56, %v3979_v35  ;;  %v3972_v24 = vrot.slane %v9281_v11, 5 }
 0x345   : > { %v9479_v6 = vpop.permute.xlu0 %4376  ;;  %v3991_v22 = vor.u32 %v3990_v9, %v3987_v7  ;;  %v4493_v39 = vsel %vm2231_vm7, %v4449_v34, %v9313_v42  ;;  %v3766_v7 = vshrl.u32 %v9296_v48, 16  ;;  %v3762_v11 = vshll.u32 %v9296_v48, 16 }
 0x346   : > { %4252 = vrot.lane.b32.xlu1 %v9454_v16, %s6859_s10  ;;  %v3983_v25 = vsel %vm7021_vm8, %v3981_v19, %v3982_v28  ;;  %v4002_v30 = vrot.slane %v4001_v57, 4  ;;  %v3974_v56 = vrot.slane %v3972_v24, 4  ;;  %v3753_v42 = vshrl.u32 %v9289_v38, 16 }
 0x347   : > { %v9502_v44 = vcombine.low %v3980_v23, %v3983_v25  ;;  %v3992_v51 = vrot.slane %v3991_v22, 4  ;;  %v4525_v25 = vsel %vm2297_vm10, %v4493_v39, %v9200_v54  ;;  %v3756_v57 = vshll.u32 %v9289_v38, 16  ;;  %v9539_v22 = vld [vmem:[#allocation3 + $0xcc] sm:$0xf] }
 0x348   : > { %v9486_v21 = vpop.permute.xlu1 %4244  ;;  %4291 = vrot.lane.b32.xlu0 %v9470_v36, %s6858_s26  ;;  %v4007_v2 = vsel %vm7077_vm11, %v4002_v30, %v4006_v5  ;;  %v3975_v23 = vrot.slane %v9316_v18, 5  ;;  %v6361_v48 = vrot.slane %v9271_v47, 9  ;;  %v4557_v30 = vsel %vm2363_vm13, %v4525_v25, %v9364_v29 }
 0x349   : > { %v4375_v46 = vpop.permute.xlu0 %4374  ;;  %v3997_v19 = vsel %vm7077_vm11, %v3992_v51, %v3996_v15  ;;  %v9534_v15 = vld [vmem:[#allocation3 + $0xd0] sm:$0xf]  ;;  %v3764_v5 = vrot.slane %v3762_v11, 5  ;;  %v3768_v18 = vrot.slane %v3766_v7, 4  ;;  %v3755_v34 = vrot.slane %v3753_v42, 4 }
 0x34a   : > { %4392 = vrot.lane.b32.xlu1 %v9490_v61, %s6862_s17  ;;  %v6414_v26 = vcombine.low %v3997_v19, %v4007_v2  ;;  %v6416_v54 = vcombine.low %v9539_v22, %v9534_v15  ;;  %v3976_v38 = vsel %vm7021_vm8, %v3974_v56, %v3975_v23  ;;  %v3973_v47 = vsel %vm7021_vm8, %v6361_v48, %v3972_v24  ;;  %v10647_v23 = vld [vmem:[#allocation34_spill] sm:$0xff] }
 0x34b   : > { %v3758_v2 = vrot.slane %v3756_v57, 5  ;;  %v4590_v19 = vsel %vm4582_vm0, %v4557_v30, %v9253_v49  ;;  %v9559_v39 = vcombine.low %v3973_v47, %v3976_v38  ;;  %v3772_v25 = vshll.u32 %v9298_v55, 16  ;;  %v10646_v57 = vld [vmem:[#allocation23_spill] sm:$0xff] }
 0x34c   : > { %v9504_v33 = vpop.permute.xlu1 %4345  ;;  %4361 = vrot.lane.b32.xlu0 %v9502_v44, %s6863_s18  ;;  %v4623_v7 = vsel %vm4615_vm3, %v4590_v19, %v4375_v46 }
 0x34d   : > { %v4272_v8 = vpop.permute.xlu0 %4271  ;;  %v3759_v49 = vor.u32 %v3758_v2, %v3755_v34  ;;  %v3814_v2 = vshrl.u32 %v9464_v10, 16 }
 0x34e   : > { %4289 = vrot.lane.b32.xlu1 %v9490_v61, %s6858_s26 }
 0x350   : > { %v9512_v1 = vpop.permute.xlu1 %4242  ;;  %4258 = vrot.lane.b32.xlu0 %v9502_v44, %s6859_s10 }
 0x351   : > { %v4342_v35 = vpop.permute.xlu0 %4341 }
 0x352   : > { %4421 = vrot.lane.b32.xlu1 %v9246_v40, %s6864_s20 }
 0x354   : > { %v9525_v28 = vpop.permute.xlu1 %4384  ;;  %4431 = vrot.lane.b32.xlu0 %v6414_v26, %s6864_s20 }
 0x355   : > { %v4159_v9 = vpop.permute.xlu0 %4158 }
 0x356   : > { %4318 = vrot.lane.b32.xlu1 %v9246_v40, %s6860_s12  ;;  %v4455_v48 = vsel %vm2165_vm2, %v10647_v23, %v4159_v9  ;;  %v3820_v23 = vshll.u32 %v9472_v13, 16  ;;  %v4028_v13 = vshll.u32 %v9534_v15, 16 }
 0x357   : > { %v4497_v47 = vsel %vm2231_vm7, %v4455_v48, %v9321_v60  ;;  %v3801_v60 = vshrl.u32 %v9462_v3, 16  ;;  %v10650_v48 = vld [vmem:[#allocation31_spill] sm:$0xff] }
 0x358   : > { %v9541_v43 = vpop.permute.xlu1 %4281  ;;  %4328 = vrot.lane.b32.xlu0 %v6414_v26, %s6860_s12  ;;  %v10645_v26 = vld [vmem:[#allocation20_spill] sm:$0xff] }
 0x359   : > { %v4412_v51 = vpop.permute.xlu0 %4411  ;;  %v4452_v56 = vsel %vm2165_vm2, %v10645_v26, %v9388_v0  ;;  %v3810_v26 = vshll.u32 %v9464_v10, 16  ;;  %v10648_v10 = vld [vmem:[#allocation53_spill] sm:$0xff] }
 0x35a   : > { %4170 = vrot.lane.b32.xlu1 %v9246_v40, %s6854_s22  ;;  %v3769_v40 = vor.u32 %v3768_v18, %v3764_v5  ;;  %v4495_v42 = vsel %vm2231_vm7, %v4452_v56, %v9269_v50  ;;  %v3760_v50 = vrot.slane %v3759_v49, 4  ;;  %v3774_v18 = vrot.slane %v3772_v25, 5 }
 0x35b   : > { %v4527_v46 = vsel %vm2297_vm10, %v4495_v42, %v4272_v8  ;;  %v6413_v8 = vcombine.low %v9446_v41, %v9448_v20  ;;  %v3804_v56 = vshll.u32 %v9462_v3, 16  ;;  %v3803_v25 = vrot.slane %v3801_v60, 4 }
 0x35c   : > { %v9557_v29 = vpop.permute.xlu1 %4415  ;;  %4398 = vrot.lane.b32.xlu0 %v6416_v54, %s6862_s17  ;;  %v3770_v30 = vrot.slane %v3769_v40, 4  ;;  %v3812_v40 = vrot.slane %v3810_v26, 5 }
 0x35d   : > { %v4410_v11 = vpop.permute.xlu0 %4409  ;;  %v3806_v42 = vrot.slane %v3804_v56, 5 }
 0x35e   : > { %4359 = vrot.lane.b32.xlu1 %v9559_v39, %s6863_s18  ;;  %v4659_v24 = vsel %vm4648_vm6, %v4623_v7, %v4410_v11  ;;  %v4529_v7 = vsel %vm2297_vm10, %v4497_v47, %v9458_v62  ;;  %v4032_v47 = vshrl.u32 %v9534_v15, 16 }
 0x35f   : > { %4879 = vmatmul.mubr.bf16.gmra.mxu0 %v4659_v24  ;;  %v3816_v24 = vrot.slane %v3814_v2, 4  ;;  %v4561_v49 = vsel %vm2363_vm13, %v4529_v7, %v10648_v10 }
 0x360   : > { %6432 = vmatprep.mubr.msk.bf16.mxu0 %vm2165_vm2, %v10646_v57  ;;  %v9574_v0 = vpop.permute.xlu1 %4312  ;;  %v10649_v57 = vld [vmem:[#allocation49_spill] sm:$0xff] }
 0x361   : > { %v4307_v54 = vpop.permute.xlu0 %4306  ;;  %v4594_v62 = vsel %vm4582_vm0, %v4561_v49, %v10649_v57 }
 0x362   : > { %v4559_v38 = vsel %vm2363_vm13, %v4527_v46, %v4307_v54  ;;  %4256 = vrot.lane.b32.xlu1 %v9559_v39, %s6859_s10  ;;  %v3817_v46 = vor.u32 %v3816_v24, %v3812_v40  ;;  %v4458_v54 = vsel %vm2165_vm2, %v10650_v48, %v9378_v4  ;;  %v10652_v4 = vld [vmem:[#allocation33_spill] sm:$0xff]  ;;  %v4034_v24 = vrot.slane %v4032_v47, 4 }
 0x363   : > { %v4592_v55 = vsel %vm4582_vm0, %v4559_v38, %v4342_v35  ;;  %v3775_v35 = vsel %vm7077_vm11, %v3770_v30, %v3774_v18  ;;  %v4627_v38 = vsel %vm4615_vm3, %v4594_v62, %v9433_v17  ;;  %v4019_v18 = vshrl.u32 %v9539_v22, 16 }
 0x364   : > { %v9585_v34 = vpop.permute.xlu1 %4164  ;;  %v4625_v9 = vsel %vm4615_vm3, %v4592_v55, %v9479_v6  ;;  %v3765_v6 = vsel %vm7077_vm11, %v3760_v50, %v3764_v5  ;;  %v3807_v5 = vor.u32 %v3806_v42, %v3803_v25  ;;  %v3818_v50 = vrot.slane %v3817_v46, 4  ;;  %v9643_v46 = vld [vmem:[#allocation3 + $0xd4] sm:$0x1] }
 0x365   : > { %v4662_v19 = vsel %vm4648_vm6, %v4625_v9, %v4412_v51  ;;  %v6394_v51 = vcombine.low %v3765_v6, %v3775_v35  ;;  %v10651_v9 = vld [vmem:[#allocation50_spill] sm:$0xff]  ;;  %v3822_v17 = vrot.slane %v3820_v23, 5  ;;  %v4022_v35 = vshll.u32 %v9539_v22, 16 }
 0x366   : > { %4396 = vrot.lane.b32.xlu1 %v6413_v8, %s6862_s17  ;;  %v4499_v2 = vsel %vm2231_vm7, %v4458_v54, %v10651_v9 }
 0x367   : > { %4887 = vmatmul.mubr.bf16.gmra.mxu0 %v4662_v19  ;;  %v3808_v19 = vrot.slane %v3807_v5, 4  ;;  %v4531_v26 = vsel %vm2297_vm10, %v4499_v2, %v9452_v63  ;;  %v3823_v7 = vsel %vm7077_vm11, %v3818_v50, %v3822_v17  ;;  %v4021_v63 = vrot.slane %v4019_v18, 4 }
 0x368   : > { %v9603_v11 = vpop.permute.xlu1 %4382  ;;  %v4024_v25 = vrot.slane %v4022_v35, 5 }
 0x369   : > { %v3813_v10 = vsel %vm7077_vm11, %v3808_v19, %v3812_v40 }
 0x36a   : > { %4425 = vrot.lane.b32.xlu1 %v6394_v51, %s6864_s20  ;;  %v6396_v57 = vcombine.low %v3813_v10, %v3823_v7  ;;  %v4025_v40 = vor.u32 %v4024_v25, %v4021_v63 }
 0x36c   : > { %v9608_v3 = vpop.permute.xlu1 %4279  ;;  %v4026_v54 = vrot.slane %v4025_v40, 4  ;;  %v10656_v40 = vld [vmem:[#allocation41_spill] sm:$0xff] }
 0x36e   : > { %4322 = vrot.lane.b32.xlu1 %v6394_v51, %s6860_s12 }
 0x370   : > { %v4414_v30 = vpop.permute.xlu1 %4413 }
 0x371   : > { %v4665_v55 = vsel %vm4648_vm6, %v4627_v38, %v4414_v30 }
 0x372   : > { %4174 = vrot.lane.b32.xlu1 %v6394_v51, %s6854_s22  ;;  %4895 = vmatmul.mubr.bf16.vlgmr.msra.gmra.mxu1 %v4665_v55  ;;  %v4030_v51 = vrot.slane %v4028_v13, 5  ;;  %v6363_v55 = vrot.slane %v9446_v41, 9 }
 0x373   : > { %6434 = vmatprep.mubr.msk.bf16.mxu1 %vm2165_vm2, %v10652_v4 }
 0x374   : > { %v4311_v60 = vpop.permute.xlu1 %4310  ;;  %v4035_v5 = vor.u32 %v4034_v24, %v4030_v51  ;;  %v4031_v47 = vsel %vm7077_vm11, %v4026_v54, %v4030_v51  ;;  %v10657_v54 = vld [vmem:[#allocation43_spill] sm:$0xff] }
 0x375   : > { %v4563_v56 = vsel %vm2363_vm13, %v4531_v26, %v4311_v60 }
 0x376   : > { %v4596_v6 = vsel %vm4582_vm0, %v4563_v56, %v9504_v33  ;;  %4293 = vrot.lane.b32.xlu1 %v6413_v8, %s6858_s26  ;;  %v4013_v33 = vrot.slane %v9448_v20, 5  ;;  %v10653_v8 = vld [vmem:[#allocation45_spill] sm:$0xff]  ;;  %v4036_v30 = vrot.slane %v4035_v5, 4  ;;  %s6514_s26 = sshll.u32 %s6935_s9, 9  ;;  %s6867_s9 = smov [#allocation4]  }
 0x377   : > { %v4629_v49 = vsel %vm4615_vm3, %v4596_v6, %v9401_v45  ;;  %v4038_v45 = vshll.u32 %v9643_v46, 16  ;;  %s10434_s17 = scalar_lea.hbm %s10485_s8, %s6514_s26  ;;  %s6795_s25 = sshll.u32 %s6867_s9, 4  ;;  %s6796_s25 = int_to_ptr.vmem [resolvable:$false] %s6795_s25 }
 0x378   : > { %v4163_v42 = vpop.permute.xlu1 %4162  ;;  %v4668_v62 = vsel %vm4648_vm6, %v4629_v49, %v9557_v29  ;;  %v4015_v48 = vrot.slane %v4013_v33, 4  ;;  %v4016_v29 = vrot.slane %v9484_v52, 5  ;;  %v4014_v18 = vsel %vm7021_vm8, %v6363_v55, %v4013_v33  ;;  %s6797_s19 = scalar_lea.vmem %s6796_s25, 1024 }
 0x379   : > { %v4040_v20 = vrot.slane %v4038_v45, 5  ;;  %v4461_v60 = vsel %vm2165_vm2, %v10654_v31, %v4163_v42 }
 0x37a   : > { %4429 = vrot.lane.b32.xlu1 %v6396_v57, %s6864_s20  ;;  %4903 = vmatmul.mubr.bf16.gmra.mxu1 %v4668_v62  ;;  %v4017_v50 = vsel %vm7021_vm8, %v4015_v48, %v4016_v29  ;;  %v4501_v7 = vsel %vm2231_vm7, %v4461_v60, %v9512_v1  ;;  %v10659_v60 = vld [vmem:[#allocation8_spill] sm:$0xff] }
 0x37b   : > { %6435 = vmatprep.mubr.msk.bf16.mxu1 %vm2165_vm2, %v10653_v8  ;;  %v4041_v52 = vsel %vm7077_vm11, %v4036_v30, %v4040_v20  ;;  %v9666_v9 = vcombine.low %v4014_v18, %v4017_v50  ;;  %v9675_v17 = vpop.permute.xlu0 %4353  ;;  %v4533_v51 = vsel %vm2297_vm10, %v4501_v7, %v9418_v12  ;;  %v10660_v7 = vsub.s32 0, %v10659_v60 }
 0x37c   : > { %v9650_v23 = vpop.permute.xlu1 %4351  ;;  %v6417_v41 = vcombine.low %v4031_v47, %v4041_v52  ;;  %v4565_v49 = vsel %vm2363_vm13, %v4533_v51, %v9574_v0 }
 0x37d   : > { %v4598_v42 = vsel %vm4582_vm0, %v4565_v49, %v9475_v14  ;;  %v10661_v49 = vld [vmem:[#allocation35_spill] sm:$0xff] }
 0x37e   : > { %4326 = vrot.lane.b32.xlu1 %v6396_v57, %s6860_s12  ;;  %v4631_v12 = vsel %vm4615_vm3, %v4598_v42, %v9603_v11 }
 0x37f   : > { %v9679_v56 = vpop.permute.xlu0 %4250 }
 0x380   : > { %v9654_v38 = vpop.permute.xlu1 %4248 }
 0x382   : > { %4178 = vrot.lane.b32.xlu1 %v6396_v57, %s6854_s22  ;;  %v10655_v57 = vld [vmem:[#allocation26_spill] sm:$0xff] }
 0x383   : > { %v9685_v24 = vpop.permute.xlu0 %4423  ;;  %v4464_v1 = vsel %vm2165_vm2, %v10655_v57, %v9585_v34 }
 0x384   : > { %v4350_v13 = vpop.permute.xlu1 %4349  ;;  %v4503_v0 = vsel %vm2231_vm7, %v4464_v1, %v9486_v21  ;;  %v10662_v1 = vsub.s32 1, %v10659_v60 }
 0x385   : > { %v4535_v14 = vsel %vm2297_vm10, %v4503_v0, %v9608_v3  ;;  %v10658_v3 = vld [vmem:[#allocation40_spill] sm:$0xff] }
 0x386   : > { %4363 = vrot.lane.b32.xlu1 %v9666_v9, %s6863_s18  ;;  %s6865_s18 = smov 127  }
 0x387   : > { %v9689_v25 = vpop.permute.xlu0 %4320 }
 0x388   : > { %v4247_v2 = vpop.permute.xlu1 %4246 }
 0x38a   : > { %4433 = vrot.lane.b32.xlu1 %v6417_v41, %s6864_s20 }
 0x38b   : > { %v9701_v8 = vpop.permute.xlu0 %4172 }
 0x38c   : > { %v9671_v4 = vpop.permute.xlu1 %4388 }
 0x390   : > { %v9673_v19 = vpop.permute.xlu1 %4285 }
 0x394   : > { %v4420_v35 = vpop.permute.xlu1 %4419 }
 0x396   : > { %v9709_v11 = vpop.permute.xlu0 %4390 }
 0x398   : > { %v4317_v26 = vpop.permute.xlu1 %4316 }
 0x39a   : > { %v9716_v20 = vpop.permute.xlu0 %4287 }
 0x39c   : > { %v4169_v6 = vpop.permute.xlu1 %4168 }
 0x39e   : > { %v9721_v47 = vpop.permute.xlu0 %4357 }
 0x3a0   : > { %v4387_v10 = vpop.permute.xlu1 %4386 }
 0x3a2   : > { %v9733_v31 = vpop.permute.xlu0 %4254 }
 0x3a4   : > { %v4284_v63 = vpop.permute.xlu1 %4283 }
 0x3a6   : > { %v4428_v0 = vpop.permute.xlu0 %4427 }
 0x3a8   : > { %v4418_v62 = vpop.permute.xlu1 %4417 }
 0x3a9   : > { %v4671_v33 = vsel %vm4648_vm6, %v4631_v12, %v4418_v62 }
 0x3aa   : > { %4911 = vmatmul.mubr.bf16.gmra.mxu1 %v4671_v33 }
 0x3ab   : > { %6436 = vmatprep.mubr.msk.bf16.mxu1 %vm2165_vm2, %v10656_v40 }
 0x3ac   : > { %v4315_v5 = vpop.permute.xlu1 %4314 }
 0x3ad   : > { %v4567_v34 = vsel %vm2363_vm13, %v4535_v14, %v4315_v5 }
 0x3ae   : > { %v4600_v45 = vsel %vm4582_vm0, %v4567_v34, %v4350_v13 }
 0x3af   : > { %v4633_v48 = vsel %vm4615_vm3, %v4600_v45, %v9525_v28 }
 0x3b0   : > { %v4167_v29 = vpop.permute.xlu1 %4166  ;;  %v4674_v21 = vsel %vm4648_vm6, %v4633_v48, %v4420_v35  ;;  %v4697_v35 = vld [vmem:[%s10481_s4] sm:$0xf] }
 0x3b1   : > { %v4467_v55 = vsel %vm2165_vm2, %v10658_v3, %v4167_v29  ;;  %v9739_v51 = vrot.slane %v4697_v35, %v10660_v7  ;;  %v9747_v62 = vrot.slane %v4697_v35, %v10662_v1 }
 0x3b2   : > { %4919 = vmatmul.mubr.bf16.gmra.mxu1 %v4674_v21  ;;  %v4505_v50 = vsel %vm2231_vm7, %v4467_v55, %v4247_v2  ;;  %v4325_v55 = vpop.permute.xlu0 %4324 }
 0x3b3   : > { %6437 = vmatprep.mubr.msk.bf16.mxu1 %vm2165_vm2, %v10657_v54  ;;  %v4537_v28 = vsel %vm2297_vm10, %v4505_v50, %v9541_v43  ;;  %v5021_v43 = vsub.s32 2, %v10659_v60 }
 0x3b4   : > { %v4356_v30 = vpop.permute.xlu1 %4355  ;;  %v4569_v13 = vsel %vm2363_vm13, %v4537_v28, %v4317_v26  ;;  %v4470_v26 = vsel %vm2165_vm2, %v10661_v49, %v4169_v6 }
 0x3b5   : > { %v4602_v2 = vsel %vm4582_vm0, %v4569_v13, %v9650_v23  ;;  %v4507_v23 = vsel %vm2231_vm7, %v4470_v26, %v9654_v38  ;;  %v9753_v14 = vrot.slane %v4697_v35, %v5021_v43 }
 0x3b6   : > { %v4635_v57 = vsel %vm4615_vm3, %v4602_v2, %v4387_v10  ;;  %v4539_v6 = vsel %vm2297_vm10, %v4507_v23, %v4284_v63  ;;  %v4177_v2 = vpop.permute.xlu0 %4176 }
 0x3b8   : > { %v4253_v18 = vpop.permute.xlu1 %4252 }
 0x3ba   : > { %v4395_v49 = vpop.permute.xlu0 %4394 }
 0x3bc   : > { %v9725_v52 = vpop.permute.xlu1 %4392 }
 0x3c0   : > { %v9728_v41 = vpop.permute.xlu1 %4289 }
 0x3c4   : > { %v4422_v42 = vpop.permute.xlu1 %4421 }
 0x3c5   : > { %v4677_v12 = vsel %vm4648_vm6, %v4635_v57, %v4422_v42 }
 0x3c6   : > { %v4856_v33 = vpop.f32.mrf.mxu0  ;;  %4927 = vmatmul.mubr.bf16.gmra.mxu1 %v4677_v12  ;;  %v4292_v12 = vpop.permute.xlu0 %4291 }
 0x3c7   : > { %v4857_v40 = vadd.f32 %v4856_v33, %v9739_v51  ;;  %6438 = vmatprep.mubr.msk.bf16.mxu1 %vm2165_vm2, %v9454_v16 }
 0x3c8   : > { %v4858_v10 = vpop.f32.mrf.mxu0  ;;  %v4319_v5 = vpop.permute.xlu1 %4318 }
 0x3c9   : > { %v4987_v34 = vmul.f32 %v9747_v62, %v4857_v40  ;;  %v4571_v45 = vsel %vm2363_vm13, %v4539_v6, %v4319_v5  ;;  %v10664_v10 = vld [vmem:[#allocation51_spill] sm:$0xff] }
 0x3ca   : > { %v4604_v48 = vsel %vm4582_vm0, %v4571_v45, %v9675_v17  ;;  %v4859_v38 = vpop.f32.mrf.mxu0  ;;  %v4362_v40 = vpop.permute.xlu0 %4361 }
 0x3cb   : > { %v5023_v29 = vadd.f32 %v9753_v14, %v4987_v34  ;;  %v4860_v21 = vadd.f32 %v4859_v38, %v9739_v51  ;;  %v4637_v54 = vsel %vm4615_vm3, %v4604_v48, %v9671_v4  ;;  %v6364_v48 = vrot.slane %v9539_v22, 9 }
 0x3cc   : > { %v4861_v16 = vpop.f32.mrf.mxu0  ;;  %v4171_v3 = vpop.permute.xlu1 %4170  ;;  %v4680_v63 = vsel %vm4648_vm6, %v4637_v54, %v9685_v24 }
 0x3cd   : > { %v9768_v50 = vmax.f32 %v5023_v29, 0.0  ;;  %v4988_v28 = vmul.f32 %v9747_v62, %v4860_v21  ;;  %v4473_v17 = vsel %vm2165_vm2, %v9359_v58, %v4171_v3  ;;  %v4050_v21 = vrot.slane %v9643_v46, 5 }
 0x3ce   : > { %4935 = vmatmul.mubr.bf16.gmra.mxu1 %v4680_v63  ;;  %v4509_v4 = vsel %vm2231_vm7, %v4473_v17, %v9679_v56  ;;  %v10663_v56 = vld [vmem:[#allocation48_spill] sm:$0xff]  ;;  %v4259_v45 = vpop.permute.xlu0 %4258 }
 0x3cf   : > { %v5024_v13 = vadd.f32 %v9753_v14, %v4988_v28  ;;  %5119 = vrot.lane.b32.xlu0 %v9768_v50, %s6864_s20  ;;  %6439 = vmatprep.mubr.msk.bf16.mxu1 %vm2165_vm2, %v9350_v37  ;;  %v4541_v7 = vsel %vm2297_vm10, %v4509_v4, %v9673_v19  ;;  %v4476_v42 = vsel %vm2165_vm2, %v10663_v56, %v9701_v8 }
 0x3d0   : > { %v4360_v24 = vpop.permute.xlu1 %4359  ;;  %v4573_v43 = vsel %vm2363_vm13, %v4541_v7, %v9689_v25  ;;  %v4511_v19 = vsel %vm2231_vm7, %v4476_v42, %v4253_v18 }
 0x3d1   : > { %v9780_v35 = vmax.f32 %v5024_v13, 0.0  ;;  %v4606_v37 = vsel %vm4582_vm0, %v4573_v43, %v4356_v30  ;;  %v4543_v25 = vsel %vm2297_vm10, %v4511_v19, %v9716_v20 }
 0x3d2   : > { %v4639_v1 = vsel %vm4615_vm3, %v4606_v37, %v9709_v11 }
 0x3d3   : > { %5121 = vrot.lane.b32.xlu1 %v9780_v35, %s6864_s20 }
 0x3d4   : > { %v4257_v58 = vpop.permute.xlu1 %4256 }
 0x3d8   : > { %v4397_v26 = vpop.permute.xlu1 %4396 }
 0x3dc   : > { %v4426_v57 = vpop.permute.xlu1 %4425 }
 0x3dd   : > { %v4683_v33 = vsel %vm4648_vm6, %v4639_v1, %v4426_v57 }
 0x3de   : > { %4943 = vmatmul.mubr.bf16.gmra.mxu1 %v4683_v33 }
 0x3df   : > { %6440 = vmatprep.mubr.msk.bf16.mxu1 %vm2165_vm2, %v9559_v39 }
 0x3e0   : > { %v4323_v30 = vpop.permute.xlu1 %4322 }
 0x3e1   : > { %v4575_v23 = vsel %vm2363_vm13, %v4543_v25, %v4323_v30 }
 0x3e2   : > { %v4608_v8 = vsel %vm4582_vm0, %v4575_v23, %v9721_v47 }
 0x3e3   : > { %v4641_v11 = vsel %vm4615_vm3, %v4608_v8, %v9725_v52  ;;  %v4047_v52 = vrot.slane %v9534_v15, 5  ;;  %v4432_v15 = vpop.permute.xlu0 %4431 }
 0x3e4   : > { %v4175_v18 = vpop.permute.xlu1 %4174  ;;  %v4686_v6 = vsel %vm4648_vm6, %v4641_v11, %v4428_v0 }
 0x3e5   : > { %v4479_v5 = vsel %vm2165_vm2, %v10664_v10, %v4175_v18 }
 0x3e6   : > { %v4513_v39 = vsel %vm2231_vm7, %v4479_v5, %v9733_v31  ;;  %4951 = vmatmul.mubr.bf16.gmra.mxu1 %v4686_v6  ;;  %v4482_v31 = vsel %vm2165_vm2, %v9490_v61, %v4177_v2  ;;  %v4048_v61 = vsel %vm7021_vm8, %v6364_v48, %v4047_v52 }
 0x3e7   : > { %v4545_v20 = vsel %vm2297_vm10, %v4513_v39, %v9728_v41  ;;  %6441 = vmatprep.mubr.msk.bf16.mxu1 %vm2165_vm2, %v9502_v44  ;;  %v4049_v41 = vrot.slane %v4047_v52, 4  ;;  %v4515_v44 = vsel %vm2231_vm7, %v4482_v31, %v4257_v58 }
 0x3e8   : > { %v4294_v47 = vpop.permute.xlu1 %4293  ;;  %v4577_v34 = vsel %vm2363_vm13, %v4545_v20, %v4325_v55  ;;  %v4547_v22 = vsel %vm2297_vm10, %v4515_v44, %v4292_v12 }
 0x3e9   : > { %v4610_v0 = vsel %vm4582_vm0, %v4577_v34, %v4360_v24  ;;  %v4051_v3 = vsel %vm7021_vm8, %v4049_v41, %v4050_v21 }
 0x3ea   : > { %v4643_v29 = vsel %vm4615_vm3, %v4610_v0, %v4395_v49  ;;  %v6418_v28 = vcombine.low %v4048_v61, %v4051_v3 }
 0x3ec   : > { %v4430_v38 = vpop.permute.xlu1 %4429 }
 0x3ed   : > { %v4689_v54 = vsel %vm4648_vm6, %v4643_v29, %v4430_v38 }
 0x3ee   : > { %4959 = vmatmul.mubr.bf16.gmra.mxu1 %v4689_v54 }
 0x3ef   : > { %6442 = vmatprep.mubr.msk.bf16.mxu1 %vm2165_vm2, %v9666_v9  ;;  %v4329_v9 = vpop.permute.xlu0 %4328 }
 0x3f0   : > { %v4327_v16 = vpop.permute.xlu1 %4326 }
 0x3f1   : > { %v4579_v46 = vsel %vm2363_vm13, %v4547_v22, %v4327_v16 }
 0x3f2   : > { %v4612_v63 = vsel %vm4582_vm0, %v4579_v46, %v4362_v40 }
 0x3f3   : > { %v4645_v55 = vsel %vm4615_vm3, %v4612_v63, %v4397_v26  ;;  %v4399_v37 = vpop.permute.xlu0 %4398 }
 0x3f4   : > { %v4179_v17 = vpop.permute.xlu1 %4178  ;;  %v4692_v13 = vsel %vm4648_vm6, %v4645_v55, %v4432_v15 }
 0x3f5   : > { %v4485_v4 = vsel %vm2165_vm2, %v9470_v36, %v4179_v17 }
 0x3f6   : > { %v4517_v24 = vsel %vm2231_vm7, %v4485_v4, %v4259_v45  ;;  %4967 = vmatmul.mubr.bf16.gmra.mxu1 %v4692_v13 }
 0x3f7   : > { %v4864_v2 = vpop.f32.mrf.mxu0  ;;  %v4549_v32 = vsel %vm2297_vm10, %v4517_v24, %v4294_v47  ;;  %6443 = vmatprep.mubr.msk.bf16.mxu1 %vm2165_vm2, %v6418_v28 }
 0x3f8   : > { %v4865_v7 = vadd.f32 %v4864_v2, %v9739_v51  ;;  %v4581_v58 = vsel %vm2363_vm13, %v4549_v32, %v4329_v9  ;;  %v4364_v43 = vpop.permute.xlu1 %4363 }
 0x3f9   : > { %v4614_v49 = vsel %vm4582_vm0, %v4581_v58, %v4364_v43  ;;  %v4866_v26 = vpop.f32.mrf.mxu0 }
 0x3fa   : > { %v4989_v56 = vmul.f32 %v9747_v62, %v4865_v7  ;;  %v4647_v57 = vsel %vm4615_vm3, %v4614_v49, %v4399_v37 }
 0x3fb   : > { %v4867_v36 = vpop.f32.mrf.mxu0 }
 0x3fc   : > { %v5025_v42 = vadd.f32 %v9753_v14, %v4989_v56  ;;  %v4868_v1 = vadd.f32 %v4867_v36, %v9739_v51  ;;  %v4434_v19 = vpop.permute.xlu1 %4433 }
 0x3fd   : > { %v4869_v12 = vpop.f32.mrf.mxu0  ;;  %v4695_v33 = vsel %vm4648_vm6, %v4647_v57, %v4434_v19 }
 0x3fe   : > { %v9848_v25 = vmax.f32 %v5025_v42, 0.0  ;;  %v4990_v30 = vmul.f32 %v9747_v62, %v4868_v1  ;;  %4975 = vmatmul.mubr.bf16.gmra.mxu1 %v4695_v33 }
 0x3ff   : > { %v4872_v23 = vpop.f32.mrf.mxu0 }
 0x400   : > { %v5026_v8 = vadd.f32 %v9753_v14, %v4990_v30  ;;  %v4873_v40 = vadd.f32 %v4872_v23, %v9739_v51  ;;  %5123 = vrot.lane.b32.xlu0 %v9848_v25, %s6864_s20 }
 0x401   : > { %v4874_v11 = vpop.f32.mrf.mxu0 }
 0x402   : > { %v9855_v18 = vmax.f32 %v5026_v8, 0.0  ;;  %v4991_v6 = vmul.f32 %v9747_v62, %v4873_v40 }
 0x403   : > { %v4875_v10 = vpop.f32.mrf.mxu0 }
 0x404   : > { %v5027_v5 = vadd.f32 %v9753_v14, %v4991_v6  ;;  %v4876_v39 = vadd.f32 %v4875_v10, %v9739_v51  ;;  %5125 = vrot.lane.b32.xlu1 %v9855_v18, %s6864_s20 }
 0x405   : > { %v4877_v20 = vpop.f32.mrf.mxu0 }
 0x406   : > { %v9862_v47 = vmax.f32 %v5027_v5, 0.0  ;;  %v4992_v34 = vmul.f32 %v9747_v62, %v4876_v39 }
 0x408   : > { %v5028_v52 = vadd.f32 %v9753_v14, %v4992_v34  ;;  %5127 = vrot.lane.b32.xlu0 %v9862_v47, %s6864_s20 }
 0x40a   : > { %v9868_v45 = vmax.f32 %v5028_v52, 0.0 }
 0x40c   : > { %5129 = vrot.lane.b32.xlu1 %v9868_v45, %s6864_s20 }
 0x41f   : > { %v4880_v0 = vpop.f32.mrf.mxu0 }
 0x420   : > { %v4881_v48 = vadd.f32 %v4880_v0, %v9739_v51 }
 0x421   : > { %v4882_v31 = vpop.f32.mrf.mxu0 }
 0x422   : > { %v4993_v38 = vmul.f32 %v9747_v62, %v4881_v48 }
 0x423   : > { %v4883_v29 = vpop.f32.mrf.mxu0 }
 0x424   : > { %v5029_v41 = vadd.f32 %v9753_v14, %v4993_v38  ;;  %v4884_v21 = vadd.f32 %v4883_v29, %v9739_v51 }
 0x425   : > { %v4885_v44 = vpop.f32.mrf.mxu0 }
 0x426   : > { %v9876_v54 = vmax.f32 %v5029_v41, 0.0  ;;  %v4994_v15 = vmul.f32 %v9747_v62, %v4884_v21 }
 0x427   : > { %v4888_v22 = vpop.f32.mrf.mxu0 }
 0x428   : > { %v5030_v16 = vadd.f32 %v9753_v14, %v4994_v15  ;;  %v4889_v61 = vadd.f32 %v4888_v22, %v9739_v51  ;;  %5131 = vrot.lane.b32.xlu0 %v9876_v54, %s6864_s20 }
 0x429   : > { %v4890_v3 = vpop.f32.mrf.mxu0 }
 0x42a   : > { %v9883_v46 = vmax.f32 %v5030_v16, 0.0  ;;  %v4995_v63 = vmul.f32 %v9747_v62, %v4889_v61 }
 0x42b   : > { %v4891_v55 = vpop.f32.mrf.mxu0 }
 0x42c   : > { %v5031_v28 = vadd.f32 %v9753_v14, %v4995_v63  ;;  %v4892_v17 = vadd.f32 %v4891_v55, %v9739_v51  ;;  %5133 = vrot.lane.b32.xlu1 %v9883_v46, %s6864_s20 }
 0x42d   : > { %v4893_v13 = vpop.f32.mrf.mxu0 }
 0x42e   : > { %v9890_v9 = vmax.f32 %v5031_v28, 0.0  ;;  %v4996_v4 = vmul.f32 %v9747_v62, %v4892_v17 }
 0x430   : > { %v5032_v24 = vadd.f32 %v9753_v14, %v4996_v4  ;;  %5135 = vrot.lane.b32.xlu0 %v9890_v9, %s6864_s20 }
 0x432   : > { %v9896_v2 = vmax.f32 %v5032_v24, 0.0  ;;  %v4896_v32 = vpop.f32.mrf.mxu1 }
 0x433   : > { %v4897_v7 = vadd.f32 %v4896_v32, %v9739_v51 }
 0x434   : > { %5137 = vrot.lane.b32.xlu1 %v9896_v2, %s6864_s20  ;;  %v4898_v58 = vpop.f32.mrf.mxu1 }
 0x435   : > { %v4997_v43 = vmul.f32 %v9747_v62, %v4897_v7 }
 0x436   : > { %v4899_v49 = vpop.f32.mrf.mxu1 }
 0x437   : > { %v5033_v26 = vadd.f32 %v9753_v14, %v4997_v43  ;;  %v4900_v37 = vadd.f32 %v4899_v49, %v9739_v51 }
 0x438   : > { %v4901_v56 = vpop.f32.mrf.mxu1 }
 0x439   : > { %v9904_v36 = vmax.f32 %v5033_v26, 0.0  ;;  %v4998_v42 = vmul.f32 %v9747_v62, %v4900_v37 }
 0x43a   : > { %v4904_v57 = vpop.f32.mrf.mxu1 }
 0x43b   : > { %v5034_v1 = vadd.f32 %v9753_v14, %v4998_v42  ;;  %v4905_v19 = vadd.f32 %v4904_v57, %v9739_v51  ;;  %5139 = vrot.lane.b32.xlu0 %v9904_v36, %s6864_s20 }
 0x43c   : > { %v4906_v12 = vpop.f32.mrf.mxu1 }
 0x43d   : > { %v9911_v33 = vmax.f32 %v5034_v1, 0.0  ;;  %v4999_v30 = vmul.f32 %v9747_v62, %v4905_v19 }
 0x43e   : > { %v4907_v23 = vpop.f32.mrf.mxu1 }
 0x43f   : > { %v5035_v8 = vadd.f32 %v9753_v14, %v4999_v30  ;;  %v4908_v40 = vadd.f32 %v4907_v23, %v9739_v51  ;;  %5141 = vrot.lane.b32.xlu1 %v9911_v33, %s6864_s20 }
 0x440   : > { %v4909_v11 = vpop.f32.mrf.mxu1 }
 0x441   : > { %v9918_v6 = vmax.f32 %v5035_v8, 0.0  ;;  %v5000_v10 = vmul.f32 %v9747_v62, %v4908_v40 }
 0x443   : > { %v5036_v5 = vadd.f32 %v9753_v14, %v5000_v10  ;;  %5143 = vrot.lane.b32.xlu0 %v9918_v6, %s6864_s20 }
 0x445   : > { %v9924_v39 = vmax.f32 %v5036_v5, 0.0 }
 0x447   : > { %5145 = vrot.lane.b32.xlu1 %v9924_v39, %s6864_s20 }
 0x46a   : > { %v4912_v20 = vpop.f32.mrf.mxu1 }
 0x46b   : > { %v4913_v34 = vadd.f32 %v4912_v20, %v9739_v51 }
 0x46c   : > { %v4914_v52 = vpop.f32.mrf.mxu1 }
 0x46d   : > { %v5001_v0 = vmul.f32 %v9747_v62, %v4913_v34 }
 0x46e   : > { %v4915_v48 = vpop.f32.mrf.mxu1 }
 0x46f   : > { %v5037_v31 = vadd.f32 %v9753_v14, %v5001_v0  ;;  %v4916_v38 = vadd.f32 %v4915_v48, %v9739_v51 }
 0x470   : > { %v4917_v29 = vpop.f32.mrf.mxu1 }
 0x471   : > { %v9932_v41 = vmax.f32 %v5037_v31, 0.0  ;;  %v5002_v21 = vmul.f32 %v9747_v62, %v4916_v38 }
 0x472   : > { %v4920_v44 = vpop.f32.mrf.mxu1 }
 0x473   : > { %v5038_v15 = vadd.f32 %v9753_v14, %v5002_v21  ;;  %v4921_v22 = vadd.f32 %v4920_v44, %v9739_v51  ;;  %5147 = vrot.lane.b32.xlu0 %v9932_v41, %s6864_s20 }
 0x474   : > { %v4922_v16 = vpop.f32.mrf.mxu1 }
 0x475   : > { %v9939_v61 = vmax.f32 %v5038_v15, 0.0  ;;  %v5003_v3 = vmul.f32 %v9747_v62, %v4921_v22 }
 0x476   : > { %v4923_v63 = vpop.f32.mrf.mxu1 }
 0x477   : > { %v5039_v55 = vadd.f32 %v9753_v14, %v5003_v3  ;;  %v4924_v28 = vadd.f32 %v4923_v63, %v9739_v51  ;;  %5149 = vrot.lane.b32.xlu1 %v9939_v61, %s6864_s20 }
 0x478   : > { %v4925_v17 = vpop.f32.mrf.mxu1 }
 0x479   : > { %v9946_v13 = vmax.f32 %v5039_v55, 0.0  ;;  %v5004_v4 = vmul.f32 %v9747_v62, %v4924_v28 }
 0x47b   : > { %v5040_v24 = vadd.f32 %v9753_v14, %v5004_v4  ;;  %5151 = vrot.lane.b32.xlu0 %v9946_v13, %s6864_s20 }
 0x47d   : > { %v9952_v32 = vmax.f32 %v5040_v24, 0.0 }
 0x47f   : > { %5153 = vrot.lane.b32.xlu1 %v9952_v32, %s6864_s20 }
 0x486   : > { %v4928_v7 = vpop.f32.mrf.mxu1 }
 0x487   : > { %v4929_v58 = vadd.f32 %v4928_v7, %v9739_v51 }
 0x488   : > { %v4930_v43 = vpop.f32.mrf.mxu1 }
 0x489   : > { %v5005_v49 = vmul.f32 %v9747_v62, %v4929_v58 }
 0x48a   : > { %v4931_v26 = vpop.f32.mrf.mxu1 }
 0x48b   : > { %v5041_v37 = vadd.f32 %v9753_v14, %v5005_v49  ;;  %v4932_v56 = vadd.f32 %v4931_v26, %v9739_v51 }
 0x48c   : > { %v4933_v42 = vpop.f32.mrf.mxu1 }
 0x48d   : > { %v9960_v57 = vmax.f32 %v5041_v37, 0.0  ;;  %v5006_v1 = vmul.f32 %v9747_v62, %v4932_v56 }
 0x48e   : > { %v4936_v19 = vpop.f32.mrf.mxu1 }
 0x48f   : > { %v5042_v12 = vadd.f32 %v9753_v14, %v5006_v1  ;;  %v4937_v30 = vadd.f32 %v4936_v19, %v9739_v51  ;;  %5155 = vrot.lane.b32.xlu0 %v9960_v57, %s6864_s20 }
 0x490   : > { %v4938_v23 = vpop.f32.mrf.mxu1 }
 0x491   : > { %v9967_v8 = vmax.f32 %v5042_v12, 0.0  ;;  %v5007_v40 = vmul.f32 %v9747_v62, %v4937_v30 }
 0x492   : > { %v4939_v11 = vpop.f32.mrf.mxu1 }
 0x493   : > { %v5043_v10 = vadd.f32 %v9753_v14, %v5007_v40  ;;  %v4940_v5 = vadd.f32 %v4939_v11, %v9739_v51  ;;  %5157 = vrot.lane.b32.xlu1 %v9967_v8, %s6864_s20 }
 0x494   : > { %v4941_v20 = vpop.f32.mrf.mxu1 }
 0x495   : > { %v9974_v34 = vmax.f32 %v5043_v10, 0.0  ;;  %v5008_v52 = vmul.f32 %v9747_v62, %v4940_v5 }
 0x497   : > { %v5044_v0 = vadd.f32 %v9753_v14, %v5008_v52  ;;  %5159 = vrot.lane.b32.xlu0 %v9974_v34, %s6864_s20 }
 0x499   : > { %v9980_v48 = vmax.f32 %v5044_v0, 0.0 }
 0x49b   : > { %5161 = vrot.lane.b32.xlu1 %v9980_v48, %s6864_s20 }
 0x49e   : > { %v4944_v31 = vpop.f32.mrf.mxu1 }
 0x49f   : > { %v4945_v38 = vadd.f32 %v4944_v31, %v9739_v51 }
 0x4a0   : > { %v4946_v29 = vpop.f32.mrf.mxu1 }
 0x4a1   : > { %v5009_v21 = vmul.f32 %v9747_v62, %v4945_v38 }
 0x4a2   : > { %v4947_v44 = vpop.f32.mrf.mxu1 }
 0x4a3   : > { %v5045_v15 = vadd.f32 %v9753_v14, %v5009_v21  ;;  %v4948_v22 = vadd.f32 %v4947_v44, %v9739_v51 }
 0x4a4   : > { %v4949_v16 = vpop.f32.mrf.mxu1 }
 0x4a5   : > { %v9988_v3 = vmax.f32 %v5045_v15, 0.0  ;;  %v5010_v63 = vmul.f32 %v9747_v62, %v4948_v22 }
 0x4a6   : > { %v4952_v55 = vpop.f32.mrf.mxu1 }
 0x4a7   : > { %v5046_v28 = vadd.f32 %v9753_v14, %v5010_v63  ;;  %v4953_v17 = vadd.f32 %v4952_v55, %v9739_v51  ;;  %5163 = vrot.lane.b32.xlu0 %v9988_v3, %s6864_s20 }
 0x4a8   : > { %v4954_v4 = vpop.f32.mrf.mxu1 }
 0x4a9   : > { %v9995_v24 = vmax.f32 %v5046_v28, 0.0  ;;  %v5011_v7 = vmul.f32 %v9747_v62, %v4953_v17 }
 0x4aa   : > { %v4955_v58 = vpop.f32.mrf.mxu1 }
 0x4ab   : > { %v5047_v43 = vadd.f32 %v9753_v14, %v5011_v7  ;;  %v4956_v49 = vadd.f32 %v4955_v58, %v9739_v51  ;;  %5165 = vrot.lane.b32.xlu1 %v9995_v24, %s6864_s20 }
 0x4ac   : > { %v4957_v26 = vpop.f32.mrf.mxu1 }
 0x4ad   : > { %v10002_v37 = vmax.f32 %v5047_v43, 0.0  ;;  %v5012_v56 = vmul.f32 %v9747_v62, %v4956_v49 }
 0x4ae   : > { %v4960_v42 = vpop.f32.mrf.mxu1 }
 0x4af   : > { %v5048_v1 = vadd.f32 %v9753_v14, %v5012_v56  ;;  %v4961_v19 = vadd.f32 %v4960_v42, %v9739_v51  ;;  %5167 = vrot.lane.b32.xlu0 %v10002_v37, %s6864_s20 }
 0x4b0   : > { %v4962_v12 = vpop.f32.mrf.mxu1 }
 0x4b1   : > { %v10009_v30 = vmax.f32 %v5048_v1, 0.0  ;;  %v5013_v23 = vmul.f32 %v9747_v62, %v4961_v19 }
 0x4b2   : > { %v4963_v40 = vpop.f32.mrf.mxu1 }
 0x4b3   : > { %v5049_v11 = vadd.f32 %v9753_v14, %v5013_v23  ;;  %v4964_v10 = vadd.f32 %v4963_v40, %v9739_v51  ;;  %5169 = vrot.lane.b32.xlu1 %v10009_v30, %s6864_s20 }
 0x4b4   : > { %v4965_v5 = vpop.f32.mrf.mxu1 }
 0x4b5   : > { %v10016_v20 = vmax.f32 %v5049_v11, 0.0  ;;  %v5014_v52 = vmul.f32 %v9747_v62, %v4964_v10  ;;  %v10055_v11 = vld [vmem:[%s10483_s6] sm:$0xff]  ;;  %v5120_v10 = vpop.permute.xlu0 %5119  ;;  %v5122_v5 = vpop.permute.xlu1 %5121 }
 0x4b6   : > { %v4968_v0 = vpop.f32.mrf.mxu1 }
 0x4b7   : > { %v5050_v31 = vadd.f32 %v9753_v14, %v5014_v52  ;;  %v4969_v38 = vadd.f32 %v4968_v0, %v9739_v51  ;;  %5171 = vrot.lane.b32.xlu0 %v10016_v20, %s6864_s20  ;;  %v5216_v0 = vadd.f32 %v5122_v5, %v9780_v35 }
 0x4b8   : > { %v4970_v29 = vpop.f32.mrf.mxu1 }
 0x4b9   : > { %v10023_v21 = vmax.f32 %v5050_v31, 0.0  ;;  %v5015_v44 = vmul.f32 %v9747_v62, %v4969_v38  ;;  %v5124_v52 = vpop.permute.xlu0 %5123  ;;  %v5126_v31 = vpop.permute.xlu1 %5125  ;;  %v5215_v38 = vadd.f32 %v5120_v10, %v9768_v50 }
 0x4ba   : > { %v4971_v15 = vpop.f32.mrf.mxu1  ;;  %v5217_v29 = vadd.f32 %v5124_v52, %v9848_v25 }
 0x4bb   : > { %v5051_v22 = vadd.f32 %v9753_v14, %v5015_v44  ;;  %v4972_v16 = vadd.f32 %v4971_v15, %v9739_v51  ;;  %5173 = vrot.lane.b32.xlu1 %v10023_v21, %s6864_s20  ;;  %v5248_v15 = vsel %vm2165_vm2, %v5216_v0, 0.0 }
 0x4bc   : > { %v4973_v63 = vpop.f32.mrf.mxu1 }
 0x4bd   : > { %v10030_v55 = vmax.f32 %v5051_v22, 0.0  ;;  %v5016_v28 = vmul.f32 %v9747_v62, %v4972_v16  ;;  %v5128_v44 = vpop.permute.xlu0 %5127  ;;  %v5218_v22 = vadd.f32 %v5126_v31, %v9855_v18  ;;  %v5130_v16 = vpop.permute.xlu1 %5129  ;;  %v5247_v63 = vsel %vm2165_vm2, %v5215_v38, 0.0 }
 0x4be   : > { %v4976_v17 = vpop.f32.mrf.mxu1 }
 0x4bf   : > { %v5052_v4 = vadd.f32 %v9753_v14, %v5016_v28  ;;  %v4977_v7 = vadd.f32 %v4976_v17, %v9739_v51  ;;  %5175 = vrot.lane.b32.xlu0 %v10030_v55, %s6864_s20  ;;  %v5250_v28 = vsel %vm2165_vm2, %v5217_v29, 0.0  ;;  %v5219_v17 = vadd.f32 %v5128_v44, %v9862_v47 }
 0x4c0   : > { %v4978_v58 = vpop.f32.mrf.mxu1 }
 0x4c1   : > { %v10037_v43 = vmax.f32 %v5052_v4, 0.0  ;;  %v5017_v49 = vmul.f32 %v9747_v62, %v4977_v7  ;;  %v5249_v4 = vadd.f32 %v5248_v15, %v5247_v63  ;;  %v5132_v7 = vpop.permute.xlu0 %5131  ;;  %v5252_v58 = vsel %vm2165_vm2, %v5218_v22, 0.0 }
 0x4c2   : > { %v4979_v26 = vpop.f32.mrf.mxu1 }
 0x4c3   : > { %v5053_v56 = vadd.f32 %v9753_v14, %v5017_v49  ;;  %v4980_v42 = vadd.f32 %v4979_v26, %v9739_v51  ;;  %5177 = vrot.lane.b32.xlu1 %v10037_v43, %s6864_s20  ;;  %v10063_v51 = vld [vmem:[%s10483_s6 + $0x8] sm:$0xff]  ;;  %v5220_v49 = vadd.f32 %v5130_v16, %v9868_v45  ;;  %v5251_v26 = vadd.f32 %v5250_v28, %v5249_v4 }
 0x4c4   : > { %v4981_v1 = vpop.f32.mrf.mxu1 }
 0x4c5   : > { %v10044_v19 = vmax.f32 %v5053_v56, 0.0  ;;  %v5018_v12 = vmul.f32 %v9747_v62, %v4980_v42  ;;  %v10071_v62 = vld [vmem:[%s10483_s6 + $0x10] sm:$0xff]  ;;  %v5134_v56 = vpop.permute.xlu1 %5133  ;;  %v5254_v42 = vsel %vm2165_vm2, %v5219_v17, 0.0  ;;  %v5221_v1 = vadd.f32 %v5132_v7, %v9876_v54 }
 0x4c6   : > { %v5256_v10 = vsel %vm2165_vm2, %v5220_v49, 0.0  ;;  %v5222_v5 = vadd.f32 %v5134_v56, %v9883_v46 }
 0x4c7   : > { %v5054_v23 = vadd.f32 %v9753_v14, %v5018_v12  ;;  %5179 = vrot.lane.b32.xlu0 %v10044_v19, %s6864_s20  ;;  %v10079_v14 = vld [vmem:[%s10483_s6 + $0x18] sm:$0xff]  ;;  %v5253_v12 = vadd.f32 %v5252_v58, %v5251_v26  ;;  %v5258_v31 = vsel %vm2165_vm2, %v5221_v1, 0.0 }
 0x4c8   : > { %v5260_v15 = vsel %vm2165_vm2, %v5222_v5, 0.0 }
 0x4c9   : > { %v10050_v40 = vmax.f32 %v5054_v23, 0.0  ;;  %v5136_v23 = vpop.permute.xlu0 %5135  ;;  %v5255_v52 = vadd.f32 %v5254_v42, %v5253_v12  ;;  %v5138_v0 = vpop.permute.xlu1 %5137 }
 0x4ca   : > { %v5223_v38 = vadd.f32 %v5136_v23, %v9890_v9  ;;  %v5224_v22 = vadd.f32 %v5138_v0, %v9896_v2 }
 0x4cb   : > { %5181 = vrot.lane.b32.xlu1 %v10050_v40, %s6864_s20  ;;  %5350 = vrot.lane.b32.xlu0 %v10055_v11, %s6865_s18  ;;  %v5257_v29 = vadd.f32 %v5256_v10, %v5255_v52 }
 0x4cc   : > { %v5262_v28 = vsel %vm2165_vm2, %v5223_v38, 0.0  ;;  %v5264_v58 = vsel %vm2165_vm2, %v5224_v22, 0.0 }
 0x4cd   : > { %v5140_v44 = vpop.permute.xlu0 %5139  ;;  %v5259_v16 = vadd.f32 %v5258_v31, %v5257_v29  ;;  %v5142_v63 = vpop.permute.xlu1 %5141 }
 0x4ce   : > { %v5225_v17 = vadd.f32 %v5140_v44, %v9904_v36  ;;  %v5226_v49 = vadd.f32 %v5142_v63, %v9911_v33 }
 0x4cf   : > { %5352 = vrot.lane.b32.xlu1 %v10063_v51, %s6865_s18  ;;  %5368 = vrot.lane.b32.xlu0 %v10063_v51, %s6866_s13  ;;  %v5261_v4 = vadd.f32 %v5260_v15, %v5259_v16 }
 0x4d0   : > { %v5266_v42 = vsel %vm2165_vm2, %v5225_v17, 0.0  ;;  %v5268_v10 = vsel %vm2165_vm2, %v5226_v49, 0.0 }
 0x4d1   : > { %v5144_v7 = vpop.permute.xlu0 %5143  ;;  %v5263_v26 = vadd.f32 %v5262_v28, %v5261_v4  ;;  %v5146_v56 = vpop.permute.xlu1 %5145 }
 0x4d2   : > { %v5227_v1 = vadd.f32 %v5144_v7, %v9918_v6  ;;  %v5228_v5 = vadd.f32 %v5146_v56, %v9924_v39 }
 0x4d3   : > { %5354 = vrot.lane.b32.xlu1 %v10071_v62, %s6865_s18  ;;  %v5265_v12 = vadd.f32 %v5264_v58, %v5263_v26 }
 0x4d4   : > { %v5270_v31 = vsel %vm2165_vm2, %v5227_v1, 0.0  ;;  %v5272_v15 = vsel %vm2165_vm2, %v5228_v5, 0.0 }
 0x4d5   : > { %v5267_v52 = vadd.f32 %v5266_v42, %v5265_v12 }
 0x4d7   : > { %5366 = vrot.lane.b32.xlu1 %v10055_v11, %s6866_s13  ;;  %v5269_v29 = vadd.f32 %v5268_v10, %v5267_v52 }
 0x4d9   : > { %v5271_v16 = vadd.f32 %v5270_v31, %v5269_v29 }
 0x4db   : > { %5356 = vrot.lane.b32.xlu1 %v10079_v14, %s6865_s18  ;;  %v5273_v4 = vadd.f32 %v5272_v15, %v5271_v16 }
 0x4e5   : > { %v5148_v23 = vpop.permute.xlu0 %5147 }
 0x4e6   : > { %v5229_v38 = vadd.f32 %v5148_v23, %v9932_v41 }
 0x4e8   : > { %v5274_v28 = vsel %vm2165_vm2, %v5229_v38, 0.0 }
 0x4e9   : > { %v5150_v0 = vpop.permute.xlu1 %5149  ;;  %v5275_v26 = vadd.f32 %v5274_v28, %v5273_v4 }
 0x4ea   : > { %v5230_v22 = vadd.f32 %v5150_v0, %v9939_v61 }
 0x4ec   : > { %v5276_v58 = vsel %vm2165_vm2, %v5230_v22, 0.0 }
 0x4ed   : > { %v5152_v44 = vpop.permute.xlu0 %5151  ;;  %v5277_v12 = vadd.f32 %v5276_v58, %v5275_v26 }
 0x4ee   : > { %v5231_v17 = vadd.f32 %v5152_v44, %v9946_v13 }
 0x4f0   : > { %v5278_v42 = vsel %vm2165_vm2, %v5231_v17, 0.0 }
 0x4f1   : > { %v5154_v63 = vpop.permute.xlu1 %5153  ;;  %v5279_v52 = vadd.f32 %v5278_v42, %v5277_v12 }
 0x4f2   : > { %v5232_v49 = vadd.f32 %v5154_v63, %v9952_v32 }
 0x4f4   : > { %v5280_v10 = vsel %vm2165_vm2, %v5232_v49, 0.0 }
 0x4f5   : > { %v5281_v29 = vadd.f32 %v5280_v10, %v5279_v52 }
 0x501   : > { %v5156_v7 = vpop.permute.xlu0 %5155 }
 0x502   : > { %v5233_v1 = vadd.f32 %v5156_v7, %v9960_v57 }
 0x504   : > { %v5282_v31 = vsel %vm2165_vm2, %v5233_v1, 0.0 }
 0x505   : > { %v5158_v56 = vpop.permute.xlu1 %5157  ;;  %v5283_v16 = vadd.f32 %v5282_v31, %v5281_v29 }
 0x506   : > { %v5234_v5 = vadd.f32 %v5158_v56, %v9967_v8 }
 0x508   : > { %v5284_v15 = vsel %vm2165_vm2, %v5234_v5, 0.0 }
 0x509   : > { %v5160_v23 = vpop.permute.xlu0 %5159  ;;  %v5285_v4 = vadd.f32 %v5284_v15, %v5283_v16 }
 0x50a   : > { %v5235_v38 = vadd.f32 %v5160_v23, %v9974_v34 }
 0x50c   : > { %v5286_v28 = vsel %vm2165_vm2, %v5235_v38, 0.0 }
 0x50d   : > { %v5162_v0 = vpop.permute.xlu1 %5161  ;;  %v5287_v26 = vadd.f32 %v5286_v28, %v5285_v4 }
 0x50e   : > { %v5236_v22 = vadd.f32 %v5162_v0, %v9980_v48 }
 0x510   : > { %v5288_v58 = vsel %vm2165_vm2, %v5236_v22, 0.0 }
 0x511   : > { %v5289_v12 = vadd.f32 %v5288_v58, %v5287_v26 }
 0x519   : > { %v5164_v44 = vpop.permute.xlu0 %5163 }
 0x51a   : > { %v5237_v17 = vadd.f32 %v5164_v44, %v9988_v3 }
 0x51c   : > { %v5290_v42 = vsel %vm2165_vm2, %v5237_v17, 0.0 }
 0x51d   : > { %v5166_v63 = vpop.permute.xlu1 %5165  ;;  %v5291_v52 = vadd.f32 %v5290_v42, %v5289_v12 }
 0x51e   : > { %v5238_v49 = vadd.f32 %v5166_v63, %v9995_v24 }
 0x520   : > { %v5292_v10 = vsel %vm2165_vm2, %v5238_v49, 0.0 }
 0x521   : > { %v5168_v7 = vpop.permute.xlu0 %5167  ;;  %v5293_v29 = vadd.f32 %v5292_v10, %v5291_v52 }
 0x522   : > { %v5239_v1 = vadd.f32 %v5168_v7, %v10002_v37 }
 0x524   : > { %v5294_v31 = vsel %vm2165_vm2, %v5239_v1, 0.0 }
 0x525   : > { %v5170_v56 = vpop.permute.xlu1 %5169  ;;  %v5295_v16 = vadd.f32 %v5294_v31, %v5293_v29 }
 0x526   : > { %v5240_v5 = vadd.f32 %v5170_v56, %v10009_v30 }
 0x528   : > { %v5296_v15 = vsel %vm2165_vm2, %v5240_v5, 0.0 }
 0x529   : > { %v5172_v23 = vpop.permute.xlu0 %5171  ;;  %v5297_v17 = vadd.f32 %v5296_v15, %v5295_v16 }
 0x52a   : > { %v5241_v38 = vadd.f32 %v5172_v23, %v10016_v20 }
 0x52c   : > { %v5298_v63 = vsel %vm2165_vm2, %v5241_v38, 0.0 }
 0x52d   : > { %v5174_v0 = vpop.permute.xlu1 %5173  ;;  %v5299_v49 = vadd.f32 %v5298_v63, %v5297_v17  ;;  %v5323_v17 = vld [vmem:[%s10482_s5 + $0x8] sm:$0xff] }
 0x52e   : > { %v5242_v22 = vadd.f32 %v5174_v0, %v10023_v21 }
 0x530   : > { %v5300_v7 = vsel %vm2165_vm2, %v5242_v22, 0.0 }
 0x531   : > { %v5176_v44 = vpop.permute.xlu0 %5175  ;;  %v5301_v56 = vadd.f32 %v5300_v7, %v5299_v49 }
 0x532   : > { %v5243_v28 = vadd.f32 %v5176_v44, %v10030_v55 }
 0x534   : > { %v5302_v26 = vsel %vm2165_vm2, %v5243_v28, 0.0 }
 0x535   : > { %v5178_v4 = vpop.permute.xlu1 %5177  ;;  %v5303_v23 = vadd.f32 %v5302_v26, %v5301_v56 }
 0x536   : > { %v5244_v58 = vadd.f32 %v5178_v4, %v10037_v43  ;;  %v5322_v4 = vld [vmem:[%s10482_s5] sm:$0xff] }
 0x538   : > { %v5304_v1 = vsel %vm2165_vm2, %v5244_v58, 0.0  ;;  %v5324_v58 = vld [vmem:[%s10482_s5 + $0x10] sm:$0xff] }
 0x539   : > { %v5180_v42 = vpop.permute.xlu0 %5179  ;;  %v5305_v5 = vadd.f32 %v5304_v1, %v5303_v23 }
 0x53a   : > { %v5245_v12 = vadd.f32 %v5180_v42, %v10044_v19 }
 0x53c   : > { %v5306_v10 = vsel %vm2165_vm2, %v5245_v12, 0.0  ;;  %v5325_v12 = vld [vmem:[%s10482_s5 + $0x18] sm:$0xff] }
 0x53d   : > { %v5182_v52 = vpop.permute.xlu1 %5181  ;;  %v5307_v31 = vadd.f32 %v5306_v10, %v5305_v5 }
 0x53e   : > { %v5246_v0 = vadd.f32 %v5182_v52, %v10050_v40 }
 0x540   : > { %v5308_v38 = vsel %vm2165_vm2, %v5246_v0, 0.0 }
 0x541   : > { %v5309_v29 = vadd.f32 %v5308_v38, %v5307_v31  ;;  %v5353_v52 = vpop.permute.xlu1 %5352  ;;  %v5351_v38 = vpop.permute.xlu0 %5350 }
 0x543   : > { %v5310_v44 = vrot.slane %v5309_v29, 4 }
 0x545   : > { %v5311_v15 = vadd.f32 %v5310_v44, %v5309_v29  ;;  %v5355_v0 = vpop.permute.xlu1 %5354  ;;  %v5369_v44 = vpop.permute.xlu0 %5368 }
 0x547   : > { %v5312_v22 = vrot.slane %v5311_v15, 2 }
 0x549   : > { %v5313_v16 = vadd.f32 %v5312_v22, %v5311_v15  ;;  %v5367_v31 = vpop.permute.xlu1 %5366 }
 0x54b   : > { %v5314_v63 = vrot.slane %v5313_v16, 1 }
 0x54d   : > { %v5315_v28 = vadd.f32 %v5314_v63, %v5313_v16  ;;  %v5357_v29 = vpop.permute.xlu1 %5356 }
 0x54f   : > { %v5317_v7 = vmul.f32 0.00390625, %v5315_v28 }
 0x551   : > { %v5327_v49 = vmul.f32 %v5323_v17, %v5317_v7  ;;  %v5326_v26 = vmul.f32 %v5322_v4, %v5317_v7  ;;  %v5328_v1 = vmul.f32 %v5324_v58, %v5317_v7  ;;  %v5329_v10 = vmul.f32 %v5325_v12, %v5317_v7 }
 0x553   : > { %v5333_v56 = vsel %vm2165_vm2, %v5327_v49, 0.0  ;;  %v5330_v42 = vsel %vm2165_vm2, %v5326_v26, 0.0  ;;  %v5336_v23 = vsel %vm2165_vm2, %v5328_v1, 0.0  ;;  %v5339_v5 = vsel %vm2165_vm2, %v5329_v10, 0.0 }
 0x554   : > { %5334 = vadd.xlane.f32.xlu1 %v5333_v56  ;;  %5331 = vadd.xlane.f32.xlu0 %v5330_v42 }
 0x558   : > { %5337 = vadd.xlane.f32.xlu0 %v5336_v23 }
 0x55c   : > { %5340 = vadd.xlane.f32.xlu0 %v5339_v5 }
 0x565   : > { %5372 = vrot.lane.b32.xlu1 %v10079_v14, %s6866_s13 }
 0x572   : > { %5370 = vrot.lane.b32.xlu0 %v10071_v62, %s6866_s13 }
 0x5dd   : > { %v5332_v15 = vpop.xlane.xlu0 %5331  ;;  %v5335_v22 = vpop.xlane.xlu1 %5334 }
 0x5de   : > { %v5342_v16 = vadd.f32 %v5332_v15, %v10055_v11  ;;  %v5343_v63 = vadd.f32 %v5335_v22, %v10063_v51  ;;  %v5388_v22 = vld [vmem:[%s10484_s7 + $0x10] sm:$0xff] }
 0x5e0   : > { %v5362_v28 = vmul.f32 %v5351_v38, %v5342_v16  ;;  %v5363_v17 = vmul.f32 %v5353_v52, %v5343_v63 }
 0x5e1   : > { %v5338_v4 = vpop.xlane.xlu0 %5337  ;;  %v5373_v12 = vpop.permute.xlu1 %5372 }
 0x5e2   : > { %v5378_v7 = vadd.f32 %v5367_v31, %v5362_v28  ;;  %v5379_v58 = vadd.f32 %v5369_v44, %v5363_v17  ;;  %v5344_v56 = vadd.f32 %v5338_v4, %v10071_v62  ;;  %v5386_v31 = vld [vmem:[%s10484_s7] sm:$0xff] }
 0x5e4   : > { %v5382_v49 = vmax.f32 %v5378_v7, 0.0  ;;  %v5383_v26 = vmax.f32 %v5379_v58, 0.0  ;;  %v5364_v23 = vmul.f32 %v5355_v0, %v5344_v56 }
 0x5e5   : > { %v5341_v42 = vpop.xlane.xlu0 %5340 }
 0x5e6   : > { %v5345_v1 = vadd.f32 %v5341_v42, %v10079_v14  ;;  %5392 = vperm.xlu0 %6734, %v5382_v49   ;;  %5397 = vperm.xlu1 %6735, %v5383_v26   ;;  %v5387_v14 = vld [vmem:[%s10484_s7 + $0x8] sm:$0xff] }
 0x5e8   : > { %v5365_v10 = vmul.f32 %v5357_v29, %v5345_v1  ;;  %v5389_v29 = vld [vmem:[%s10484_s7 + $0x18] sm:$0xff] }
 0x5e9   : > { %v5371_v11 = vpop.permute.xlu0 %5370 }
 0x5ea   : > { %v5380_v5 = vadd.f32 %v5371_v11, %v5364_v23  ;;  %v5381_v51 = vadd.f32 %v5373_v12, %v5365_v10 }
 0x5ec   : > { %v5384_v38 = vmax.f32 %v5380_v5, 0.0  ;;  %v5385_v52 = vmax.f32 %v5381_v51, 0.0  ;;  %v6790_v51 = vld [vmem:[%s10481_s4] sm:$0xf] }
 0x5ee   : > { %5402 = vperm.xlu1 %6735, %v5384_v38   ;;  %5407 = vperm.xlu0 %6734, %v5385_v52  }
 0x661   : > { %v5393_v62 = vpop.permute.xlu0 %5392  ;;  %v5398_v44 = vpop.permute.xlu1 %5397 }
 0x662   : > { %v5410_v15 = vmul.f32 %v5393_v62, %v5386_v31  ;;  %v5411_v0 = vmul.f32 %v5398_v44, %v5387_v14 }
 0x664   : > { %v5414_v16 = vsel %vm2231_vm7, %v5410_v15, 0.0  ;;  %v5415_v63 = vsel %vm2231_vm7, %v5411_v0, 0.0 }
 0x665   : > { %v5416_v58 = vadd.f32 %v5415_v63, %v5414_v16 }
 0x669   : > { %v5408_v28 = vpop.permute.xlu0 %5407  ;;  %v5403_v17 = vpop.permute.xlu1 %5402 }
 0x66a   : > { %v5413_v4 = vmul.f32 %v5408_v28, %v5389_v29  ;;  %v5412_v7 = vmul.f32 %v5403_v17, %v5388_v22 }
 0x66c   : > { %v5417_v49 = vsel %vm2231_vm7, %v5412_v7, 0.0  ;;  %v5419_v56 = vsel %vm2231_vm7, %v5413_v4, 0.0  ;;  %v5452_v7 = vsub.s32 3, %v10659_v60 }
 0x66d   : > { %v5418_v26 = vadd.f32 %v5417_v49, %v5416_v58 }
 0x66f   : > { %v5420_v42 = vadd.f32 %v5419_v56, %v5418_v26 }
 0x671   : > { %v5421_v1 = vrot.slane %v5420_v42, 4 }
 0x673   : > { %v5422_v12 = vadd.f32 %v5421_v1, %v5420_v42 }
 0x675   : > { %v5423_v23 = vrot.slane %v5422_v12, 2 }
 0x677   : > { %v5424_v10 = vadd.f32 %v5423_v23, %v5422_v12 }
 0x679   : > { %v5425_v11 = vrot.slane %v5424_v10, 1 }
 0x67b   : > { %v5426_v5 = vadd.f32 %v5425_v11, %v5424_v10 }
 0x67d   : > { %v5427_v38 = vadd.f32 %v6790_v51, %v5426_v5 }
 0x67f   : > { %5429 = vrot.lane.b32.xlu1 %v5427_v38, %s6864_s20 }
 0x6f1   : > { %v5430_v52 = vpop.permute.xlu1 %5429 }
 0x6f2   : > { %v5432_v31 = vmax.f32 %v5427_v38, %v5430_v52 }
 0x6f4   : > { %5437 = vrot.lane.b32.xlu0 %v5432_v31, %s6854_s22  ;;  %v5433_v0 = vsub.f32 %v5427_v38, %v5432_v31 }
 0x6f6   : > { %v5434_v29 = vmul.f32 1.442695, %v5433_v0 }
 0x766   : > { %v5438_v62 = vpop.permute.xlu0 %5437 }
 0x767   : > { %v5440_v14 = vsub.f32 %v5427_v38, %v5438_v62 }
 0x769   : > { %v5441_v44 = vmul.f32 1.442695, %v5440_v14 }
 0x76b   : > { %6780 = vpow2.f32 %v5441_v44 }
 0x76c   : > { %6782 = vpow2.f32 %v5434_v29 }
 0x778   : > { %v6781_v15 = vpop.eup %6780 }
 0x779   : > { %5444 = vrot.lane.b32.xlu1 %v6781_v15, %s6864_s20  ;;  %v6783_v22 = vpop.eup %6782 }
 0x7eb   : > { %v5445_v16 = vpop.permute.xlu1 %5444 }
 0x7ec   : > { %v5447_v63 = vadd.f32 %v6783_v22, %v5445_v16 }
 0x7ee   : > { %6784 = vrcp.f32 %v5447_v63 }
 0x7fb   : > { %v6785_v28 = vpop.eup %6784 }
 0x7fc   : > { %v10192_v17 = vmul.f32 %v6785_v28, %v6783_v22  ;;  %5487 = vrot.lane.b32.xlu0 %v6785_v28, %s6854_s22 }
 0x86e   : > { %v5488_v4 = vpop.permute.xlu0 %5487 }
 0x86f   : > { %v5490_v58 = vmul.f32 %v6781_v15, %v5488_v4 }
 0x871   : > { %v5494_v49 = vrot.slane %v5490_v58, %v5452_v7 }
 0x873   : > { %v5496_v26 = vmul.f32 %v5494_v49, %v9780_v35  ;;  %v5495_v56 = vmul.f32 %v5494_v49, %v9768_v50  ;;  %v5498_v42 = vmul.f32 %v5494_v49, %v9855_v18  ;;  %v5497_v1 = vmul.f32 %v5494_v49, %v9848_v25 }
 0x874   : > { %v5500_v12 = vmul.f32 %v5494_v49, %v9868_v45  ;;  %v5499_v23 = vmul.f32 %v5494_v49, %v9862_v47  ;;  %v5502_v10 = vmul.f32 %v5494_v49, %v9883_v46  ;;  %v5501_v11 = vmul.f32 %v5494_v49, %v9876_v54 }
 0x875   : > { %5561 = vrot.lane.b32.xlu0 %v5496_v26, %s6864_s20  ;;  %5559 = vrot.lane.b32.xlu1 %v5495_v56, %s6864_s20  ;;  %v5504_v5 = vmul.f32 %v5494_v49, %v9896_v2  ;;  %v5503_v51 = vmul.f32 %v5494_v49, %v9890_v9  ;;  %v5511_v38 = vmul.f32 %v5494_v49, %v9946_v13 }
 0x876   : > { %v5505_v52 = vmul.f32 %v5494_v49, %v9904_v36  ;;  %v5513_v31 = vmul.f32 %v5494_v49, %v9960_v57  ;;  %v5512_v62 = vmul.f32 %v5494_v49, %v9952_v32  ;;  %v5515_v14 = vmul.f32 %v5494_v49, %v9974_v34 }
 0x877   : > { %v5514_v44 = vmul.f32 %v5494_v49, %v9967_v8  ;;  %v5517_v15 = vmul.f32 %v5494_v49, %v9988_v3  ;;  %v5516_v0 = vmul.f32 %v5494_v49, %v9980_v48  ;;  %v5519_v29 = vmul.f32 %v5494_v49, %v10002_v37 }
 0x878   : > { %v5518_v22 = vmul.f32 %v5494_v49, %v9995_v24  ;;  %v5521_v16 = vmul.f32 %v5494_v49, %v10016_v20  ;;  %v5520_v63 = vmul.f32 %v5494_v49, %v10009_v30  ;;  %v5522_v28 = vmul.f32 %v5494_v49, %v10023_v21 }
 0x879   : > { %5565 = vrot.lane.b32.xlu0 %v5498_v42, %s6864_s20  ;;  %5563 = vrot.lane.b32.xlu1 %v5497_v1, %s6864_s20  ;;  %v5506_v4 = vmul.f32 %v5494_v49, %v9911_v33  ;;  %v5523_v58 = vmul.f32 %v5494_v49, %v10030_v55  ;;  %v5507_v26 = vmul.f32 %v5494_v49, %v9918_v6 }
 0x87a   : > { %v5524_v56 = vmul.f32 %v5494_v49, %v10037_v43  ;;  %v5508_v42 = vmul.f32 %v5494_v49, %v9924_v39  ;;  %v5525_v1 = vmul.f32 %v5494_v49, %v10044_v19 }
 0x87d   : > { %5569 = vrot.lane.b32.xlu0 %v5500_v12, %s6864_s20  ;;  %5567 = vrot.lane.b32.xlu1 %v5499_v23, %s6864_s20  ;;  %v5509_v12 = vmul.f32 %v5494_v49, %v9932_v41  ;;  %v5526_v23 = vmul.f32 %v5494_v49, %v10050_v40 }
 0x881   : > { %5573 = vrot.lane.b32.xlu0 %v5502_v10, %s6864_s20  ;;  %5571 = vrot.lane.b32.xlu1 %v5501_v11, %s6864_s20  ;;  %v5510_v10 = vmul.f32 %v5494_v49, %v9939_v61  ;;  %v10265_v11 = vrot.slane %v10192_v17, %v5452_v7 }
 0x883   : > { %v5456_v60 = vmul.f32 %v10265_v11, %v9848_v25 }
 0x885   : > { %5577 = vrot.lane.b32.xlu0 %v5504_v5, %s6864_s20  ;;  %5575 = vrot.lane.b32.xlu1 %v5503_v51, %s6864_s20  ;;  %v5455_v5 = vmul.f32 %v10265_v11, %v9780_v35  ;;  %v5454_v51 = vmul.f32 %v10265_v11, %v9768_v50 }
 0x889   : > { %5591 = vrot.lane.b32.xlu0 %v5511_v38, %s6864_s20  ;;  %5579 = vrot.lane.b32.xlu1 %v5505_v52, %s6864_s20 }
 0x88d   : > { %5595 = vrot.lane.b32.xlu0 %v5513_v31, %s6864_s20  ;;  %5593 = vrot.lane.b32.xlu1 %v5512_v62, %s6864_s20 }
 0x891   : > { %5599 = vrot.lane.b32.xlu0 %v5515_v14, %s6864_s20  ;;  %5597 = vrot.lane.b32.xlu1 %v5514_v44, %s6864_s20  ;;  %v5457_v44 = vmul.f32 %v10265_v11, %v9855_v18 }
 0x895   : > { %5603 = vrot.lane.b32.xlu0 %v5517_v15, %s6864_s20  ;;  %5601 = vrot.lane.b32.xlu1 %v5516_v0, %s6864_s20 }
 0x899   : > { %5607 = vrot.lane.b32.xlu0 %v5519_v29, %s6864_s20  ;;  %5605 = vrot.lane.b32.xlu1 %v5518_v22, %s6864_s20  ;;  %v5459_v29 = vmul.f32 %v10265_v11, %v9868_v45  ;;  %v5458_v22 = vmul.f32 %v10265_v11, %v9862_v47 }
 0x89d   : > { %5611 = vrot.lane.b32.xlu0 %v5521_v16, %s6864_s20  ;;  %5609 = vrot.lane.b32.xlu1 %v5520_v63, %s6864_s20 }
 0x8a1   : > { %5613 = vrot.lane.b32.xlu0 %v5522_v28, %s6864_s20  ;;  %5581 = vrot.lane.b32.xlu1 %v5506_v4, %s6864_s20 }
 0x8a5   : > { %5615 = vrot.lane.b32.xlu0 %v5523_v58, %s6864_s20  ;;  %5583 = vrot.lane.b32.xlu1 %v5507_v26, %s6864_s20  ;;  %v5461_v58 = vmul.f32 %v10265_v11, %v9883_v46  ;;  %v5460_v26 = vmul.f32 %v10265_v11, %v9876_v54 }
 0x8a9   : > { %5617 = vrot.lane.b32.xlu0 %v5524_v56, %s6864_s20  ;;  %5585 = vrot.lane.b32.xlu1 %v5508_v42, %s6864_s20 }
 0x8ad   : > { %5619 = vrot.lane.b32.xlu0 %v5525_v1, %s6864_s20  ;;  %5587 = vrot.lane.b32.xlu1 %v5509_v12, %s6864_s20 }
 0x8b1   : > { %5621 = vrot.lane.b32.xlu0 %v5526_v23, %s6864_s20  ;;  %5589 = vrot.lane.b32.xlu1 %v5510_v10, %s6864_s20  ;;  %v5463_v23 = vmul.f32 %v10265_v11, %v9896_v2  ;;  %v5462_v10 = vmul.f32 %v10265_v11, %v9890_v9  ;;  %v5472_v2 = vmul.f32 %v10265_v11, %v9960_v57 }
 0x8e7   : > { %v5562_v38 = vpop.permute.xlu0 %5561  ;;  %v5560_v52 = vpop.permute.xlu1 %5559 }
 0x8e8   : > { %v5656_v31 = vadd.f32 %v5562_v38, %v5455_v5  ;;  %v5655_v62 = vadd.f32 %v5560_v52, %v5454_v51 }
 0x8ea   : > { %v5688_v49 = vmax.f32 %v5656_v31, 0.0  ;;  %v5687_v14 = vmax.f32 %v5655_v62, 0.0  ;;  %v5470_v31 = vmul.f32 %v10265_v11, %v9946_v13 }
 0x8eb   : > { %v5566_v17 = vpop.permute.xlu0 %5565  ;;  %v5564_v7 = vpop.permute.xlu1 %5563 }
 0x8ec   : > { %v5658_v15 = vadd.f32 %v5566_v17, %v5457_v44  ;;  %v5657_v0 = vadd.f32 %v5564_v7, %v5456_v60  ;;  %5753 = vrot.lane.b32.xlu0 %v5688_v49, %s6854_s22  ;;  %5751 = vrot.lane.b32.xlu1 %v5687_v14, %s6854_s22  ;;  %v5471_v44 = vmul.f32 %v10265_v11, %v9952_v32 }
 0x8ee   : > { %v5690_v50 = vmax.f32 %v5658_v15, 0.0  ;;  %v5689_v35 = vmax.f32 %v5657_v0, 0.0 }
 0x8ef   : > { %v5570_v18 = vpop.permute.xlu0 %5569  ;;  %v5568_v16 = vpop.permute.xlu1 %5567 }
 0x8f0   : > { %v5660_v63 = vadd.f32 %v5570_v18, %v5459_v29  ;;  %v5659_v25 = vadd.f32 %v5568_v16, %v5458_v22  ;;  %5757 = vrot.lane.b32.xlu0 %v5690_v50, %s6854_s22  ;;  %5755 = vrot.lane.b32.xlu1 %v5689_v35, %s6854_s22  ;;  %v5474_v50 = vmul.f32 %v10265_v11, %v9974_v34 }
 0x8f1   : > { %v5473_v35 = vmul.f32 %v10265_v11, %v9967_v8 }
 0x8f2   : > { %v5692_v28 = vmax.f32 %v5660_v63, 0.0  ;;  %v5691_v4 = vmax.f32 %v5659_v25, 0.0  ;;  %v5476_v63 = vmul.f32 %v10265_v11, %v9988_v3  ;;  %v5475_v25 = vmul.f32 %v10265_v11, %v9980_v48 }
 0x8f3   : > { %v5574_v45 = vpop.permute.xlu0 %5573  ;;  %v5572_v56 = vpop.permute.xlu1 %5571  ;;  %v5464_v48 = vmul.f32 %v10265_v11, %v9904_v36 }
 0x8f4   : > { %v5662_v42 = vadd.f32 %v5574_v45, %v5461_v58  ;;  %v5661_v47 = vadd.f32 %v5572_v56, %v5460_v26  ;;  %5761 = vrot.lane.b32.xlu0 %v5692_v28, %s6854_s22  ;;  %5759 = vrot.lane.b32.xlu1 %v5691_v4, %s6854_s22  ;;  %v5478_v45 = vmul.f32 %v10265_v11, %v10002_v37 }
 0x8f5   : > { %v5477_v56 = vmul.f32 %v10265_v11, %v9995_v24  ;;  %v5479_v37 = vmul.f32 %v10265_v11, %v10009_v30  ;;  %v5480_v24 = vmul.f32 %v10265_v11, %v10016_v20  ;;  %v5481_v30 = vmul.f32 %v10265_v11, %v10023_v21 }
 0x8f6   : > { %v5694_v1 = vmax.f32 %v5662_v42, 0.0  ;;  %v5693_v12 = vmax.f32 %v5661_v47, 0.0 }
 0x8f7   : > { %v5578_v46 = vpop.permute.xlu0 %5577  ;;  %v5576_v5 = vpop.permute.xlu1 %5575 }
 0x8f8   : > { %v5664_v51 = vadd.f32 %v5578_v46, %v5463_v23  ;;  %v5663_v54 = vadd.f32 %v5576_v5, %v5462_v10  ;;  %5765 = vrot.lane.b32.xlu0 %v5694_v1, %s6854_s22  ;;  %5763 = vrot.lane.b32.xlu1 %v5693_v12, %s6854_s22 }
 0x8fa   : > { %v5696_v38 = vmax.f32 %v5664_v51, 0.0  ;;  %v5695_v52 = vmax.f32 %v5663_v54, 0.0 }
 0x8fb   : > { %v5592_v62 = vpop.permute.xlu0 %5591  ;;  %v5580_v49 = vpop.permute.xlu1 %5579 }
 0x8fc   : > { %v5671_v14 = vadd.f32 %v5592_v62, %v5470_v31  ;;  %5769 = vrot.lane.b32.xlu0 %v5696_v38, %s6854_s22  ;;  %5767 = vrot.lane.b32.xlu1 %v5695_v52, %s6854_s22  ;;  %v5665_v12 = vadd.f32 %v5580_v49, %v5464_v48  ;;  %v5465_v52 = vmul.f32 %v10265_v11, %v9911_v33 }
 0x8fd   : > { %v5482_v33 = vmul.f32 %v10265_v11, %v10030_v55 }
 0x8fe   : > { %v5703_v9 = vmax.f32 %v5671_v14, 0.0  ;;  %v5697_v36 = vmax.f32 %v5665_v12, 0.0 }
 0x8ff   : > { %v5596_v60 = vpop.permute.xlu0 %5595  ;;  %v5594_v17 = vpop.permute.xlu1 %5593 }
 0x900   : > { %v5673_v7 = vadd.f32 %v5596_v60, %v5472_v2  ;;  %v5672_v15 = vadd.f32 %v5594_v17, %v5471_v44  ;;  %5783 = vrot.lane.b32.xlu1 %v5703_v9, %s6854_s22  ;;  %v5466_v2 = vmul.f32 %v10265_v11, %v9918_v6  ;;  %v5483_v6 = vmul.f32 %v10265_v11, %v10037_v43 }
 0x902   : > { %v5705_v13 = vmax.f32 %v5673_v7, 0.0  ;;  %v5704_v0 = vmax.f32 %v5672_v15, 0.0 }
 0x903   : > { %v5600_v29 = vpop.permute.xlu0 %5599  ;;  %v5598_v22 = vpop.permute.xlu1 %5597 }
 0x904   : > { %v5675_v57 = vadd.f32 %v5600_v29, %v5474_v50  ;;  %v5674_v18 = vadd.f32 %v5598_v22, %v5473_v35  ;;  %5785 = vrot.lane.b32.xlu0 %v5704_v0, %s6854_s22  ;;  %5787 = vrot.lane.b32.xlu1 %v5705_v13, %s6854_s22  ;;  %v5467_v13 = vmul.f32 %v10265_v11, %v9924_v39 }
 0x905   : > { %v5484_v39 = vmul.f32 %v10265_v11, %v10044_v19 }
 0x906   : > { %v5707_v32 = vmax.f32 %v5675_v57, 0.0  ;;  %v5706_v16 = vmax.f32 %v5674_v18, 0.0  ;;  %v5468_v57 = vmul.f32 %v10265_v11, %v9932_v41  ;;  %v5485_v41 = vmul.f32 %v10265_v11, %v10050_v40  ;;  %v10666_v40 = vld [vmem:[#allocation10_spill] sm:$0xff] }
 0x907   : > { %v5604_v34 = vpop.permute.xlu0 %5603  ;;  %v5602_v28 = vpop.permute.xlu1 %5601 }
 0x908   : > { %v5677_v4 = vadd.f32 %v5604_v34, %v5476_v63  ;;  %v5676_v8 = vadd.f32 %v5602_v28, %v5475_v25  ;;  %5789 = vrot.lane.b32.xlu0 %v5706_v16, %s6854_s22  ;;  %5791 = vrot.lane.b32.xlu1 %v5707_v32, %s6854_s22  ;;  %v5469_v34 = vmul.f32 %v10265_v11, %v9939_v61 }
 0x90a   : > { %v5709_v58 = vmax.f32 %v5677_v4, 0.0  ;;  %v5708_v26 = vmax.f32 %v5676_v8, 0.0 }
 0x90b   : > { %v5608_v3 = vpop.permute.xlu0 %5607  ;;  %v5606_v42 = vpop.permute.xlu1 %5605 }
 0x90c   : > { %v5679_v47 = vadd.f32 %v5608_v3, %v5478_v45  ;;  %v5678_v1 = vadd.f32 %v5606_v42, %v5477_v56  ;;  %5793 = vrot.lane.b32.xlu0 %v5708_v26, %s6854_s22  ;;  %5795 = vrot.lane.b32.xlu1 %v5709_v58, %s6854_s22  ;;  %v10665_v3 = vld [vmem:[#allocation12_spill] sm:$0xff] }
 0x90e   : > { %v5711_v23 = vmax.f32 %v5679_v47, 0.0  ;;  %v5710_v10 = vmax.f32 %v5678_v1, 0.0 }
 0x90f   : > { %v5612_v46 = vpop.permute.xlu0 %5611  ;;  %v5610_v5 = vpop.permute.xlu1 %5609 }
 0x910   : > { %v5680_v51 = vadd.f32 %v5610_v5, %v5479_v37  ;;  %5797 = vrot.lane.b32.xlu0 %v5710_v10, %s6854_s22  ;;  %5799 = vrot.lane.b32.xlu1 %v5711_v23, %s6854_s22  ;;  %v5681_v54 = vadd.f32 %v5612_v46, %v5480_v24  ;;  %v10667_v23 = vld [vmem:[#allocation11_spill] sm:$0xff]  ;;  %v10668_v37 = vld [vmem:[#allocation9_spill] sm:$0xff] }
 0x912   : > { %v5712_v38 = vmax.f32 %v5680_v51, 0.0  ;;  %v5713_v20 = vmax.f32 %v5681_v54, 0.0  ;;  %v10669_v54 = vld [vmem:[#allocation15_spill] sm:$0xff] }
 0x913   : > { %v5614_v31 = vpop.permute.xlu0 %5613  ;;  %v5582_v62 = vpop.permute.xlu1 %5581 }
 0x914   : > { %v5666_v49 = vadd.f32 %v5582_v62, %v5465_v52  ;;  %5801 = vrot.lane.b32.xlu0 %v5712_v38, %s6854_s22  ;;  %5771 = vrot.lane.b32.xlu1 %v5697_v36, %s6854_s22  ;;  %v5682_v14 = vadd.f32 %v5614_v31, %v5481_v30  ;;  %v10670_v52 = vld [vmem:[#allocation13_spill] sm:$0xff] }
 0x916   : > { %v5698_v9 = vmax.f32 %v5666_v49, 0.0  ;;  %v5714_v21 = vmax.f32 %v5682_v14, 0.0  ;;  %v10671_v14 = vld [vmem:[#allocation14_spill] sm:$0xff] }
 0x917   : > { %v5616_v44 = vpop.permute.xlu0 %5615  ;;  %v5584_v60 = vpop.permute.xlu1 %5583 }
 0x918   : > { %v5667_v17 = vadd.f32 %v5584_v60, %v5466_v2  ;;  %5803 = vrot.lane.b32.xlu0 %v5713_v20, %s6854_s22  ;;  %5773 = vrot.lane.b32.xlu1 %v5698_v9, %s6854_s22  ;;  %v5683_v7 = vadd.f32 %v5616_v44, %v5482_v33  ;;  %v10672_v2 = vld [vmem:[#allocation7_spill] sm:$0xff] }
 0x91a   : > { %v5699_v15 = vmax.f32 %v5667_v17, 0.0  ;;  %v5715_v55 = vmax.f32 %v5683_v7, 0.0 }
 0x91b   : > { %v5618_v0 = vpop.permute.xlu0 %5617  ;;  %v5586_v50 = vpop.permute.xlu1 %5585 }
 0x91c   : > { %v5668_v35 = vadd.f32 %v5586_v50, %v5467_v13  ;;  %5805 = vrot.lane.b32.xlu0 %v5714_v21, %s6854_s22  ;;  %5775 = vrot.lane.b32.xlu1 %v5699_v15, %s6854_s22  ;;  %v5684_v29 = vadd.f32 %v5618_v0, %v5483_v6  ;;  %v10673_v21 = vld [vmem:[#allocation17_spill] sm:$0xff] }
 0x91d   : > { %v10674_v50 = vld [vmem:[#allocation29_spill] sm:$0xff] }
 0x91e   : > { %v5700_v22 = vmax.f32 %v5668_v35, 0.0  ;;  %v5716_v43 = vmax.f32 %v5684_v29, 0.0 }
 0x91f   : > { %v5620_v18 = vpop.permute.xlu0 %5619  ;;  %v5588_v32 = vpop.permute.xlu1 %5587 }
 0x920   : > { %v5669_v16 = vadd.f32 %v5588_v32, %v5468_v57  ;;  %5807 = vrot.lane.b32.xlu0 %v5715_v55, %s6854_s22  ;;  %5777 = vrot.lane.b32.xlu1 %v5700_v22, %s6854_s22  ;;  %v5685_v63 = vadd.f32 %v5620_v18, %v5484_v39  ;;  %v10675_v22 = vld [vmem:[#allocation32_spill] sm:$0xff]  ;;  %v10676_v18 = vld [vmem:[#allocation27_spill] sm:$0xff] }
 0x922   : > { %v5701_v25 = vmax.f32 %v5669_v16, 0.0  ;;  %v5717_v19 = vmax.f32 %v5685_v63, 0.0 }
 0x923   : > { %v5622_v28 = vpop.permute.xlu0 %5621  ;;  %v5590_v4 = vpop.permute.xlu1 %5589 }
 0x924   : > { %v5670_v8 = vadd.f32 %v5590_v4, %v5469_v34  ;;  %5809 = vrot.lane.b32.xlu0 %v5716_v43, %s6854_s22  ;;  %5779 = vrot.lane.b32.xlu1 %v5701_v25, %s6854_s22  ;;  %v5686_v58 = vadd.f32 %v5622_v28, %v5485_v41  ;;  %v10677_v25 = vld [vmem:[#allocation30_spill] sm:$0xff]  ;;  %v10678_v28 = vld [vmem:[#allocation37_spill] sm:$0xff] }
 0x926   : > { %v5702_v26 = vmax.f32 %v5670_v8, 0.0  ;;  %v5718_v45 = vmax.f32 %v5686_v58, 0.0 }
 0x928   : > { %5811 = vrot.lane.b32.xlu0 %v5717_v19, %s6854_s22  ;;  %5781 = vrot.lane.b32.xlu1 %v5702_v26, %s6854_s22  ;;  %v10679_v26 = vld [vmem:[#allocation39_spill] sm:$0xff] }
 0x92c   : > { %5813 = vrot.lane.b32.xlu0 %v5718_v45, %s6854_s22 }
 0x95e   : > { %v5754_v61 = vpop.permute.xlu0 %5753  ;;  %v5752_v56 = vpop.permute.xlu1 %5751 }
 0x95f   : > { %v5848_v42 = vadd.f32 %v5754_v61, %v10665_v3  ;;  %v5847_v11 = vadd.f32 %v5752_v56, %v10666_v40  ;;  %v10680_v61 = vld [vmem:[#allocation36_spill] sm:$0xff] }
 0x961   : > { %v5880_v48 = vmax.f32 %v5848_v42, 0.0  ;;  %v5879_v47 = vmax.f32 %v5847_v11, 0.0 }
 0x962   : > { %v5758_v1 = vpop.permute.xlu0 %5757  ;;  %v5756_v12 = vpop.permute.xlu1 %5755 }
 0x963   : > { %v5850_v10 = vadd.f32 %v5758_v1, %v10667_v23  ;;  %v5849_v46 = vadd.f32 %v5756_v12, %v10668_v37  ;;  %5945 = vrot.lane.b32.xlu0 %v5880_v48, %s6864_s20  ;;  %5943 = vrot.lane.b32.xlu1 %v5879_v47, %s6864_s20  ;;  %v10681_v48 = vld [vmem:[#allocation38_spill] sm:$0xff]  ;;  %v10682_v1 = vld [vmem:[#allocation44_spill] sm:$0xff]  ;;  %v10683_v23 = vld [vmem:[#allocation19_spill] sm:$0xff] }
 0x965   : > { %v5882_v5 = vmax.f32 %v5850_v10, 0.0  ;;  %v5881_v24 = vmax.f32 %v5849_v46, 0.0 }
 0x966   : > { %v5762_v51 = vpop.permute.xlu0 %5761  ;;  %v5760_v36 = vpop.permute.xlu1 %5759 }
 0x967   : > { %v5852_v38 = vadd.f32 %v5762_v51, %v10669_v54  ;;  %v5851_v31 = vadd.f32 %v5760_v36, %v10670_v52  ;;  %5949 = vrot.lane.b32.xlu0 %v5882_v5, %s6864_s20  ;;  %5947 = vrot.lane.b32.xlu1 %v5881_v24, %s6864_s20  ;;  %v10684_v51 = vld [vmem:[#allocation47_spill] sm:$0xff]  ;;  %v10685_v52 = vld [vmem:[#allocation16_spill] sm:$0xff] }
 0x969   : > { %v5884_v62 = vmax.f32 %v5852_v38, 0.0  ;;  %v5883_v30 = vmax.f32 %v5851_v31, 0.0 }
 0x96a   : > { %v5766_v49 = vpop.permute.xlu0 %5765  ;;  %v5764_v20 = vpop.permute.xlu1 %5763 }
 0x96b   : > { %v5854_v9 = vadd.f32 %v5766_v49, %v10671_v14  ;;  %v5853_v44 = vadd.f32 %v5764_v20, %v10672_v2  ;;  %5953 = vrot.lane.b32.xlu0 %v5884_v62, %s6864_s20  ;;  %5951 = vrot.lane.b32.xlu1 %v5883_v30, %s6864_s20  ;;  %v10686_v49 = vld [vmem:[#allocation42_spill] sm:$0xff] }
 0x96c   : > { %v10687_v2 = vld [vmem:[#allocation18_spill] sm:$0xff] }
 0x96d   : > { %v5886_v60 = vmax.f32 %v5854_v9, 0.0  ;;  %v5885_v33 = vmax.f32 %v5853_v44, 0.0 }
 0x96e   : > { %v5768_v17 = vpop.permute.xlu1 %5767  ;;  %v5770_v13 = vpop.permute.xlu0 %5769 }
 0x96f   : > { %v5855_v7 = vadd.f32 %v5768_v17, %v10673_v21  ;;  %5957 = vrot.lane.b32.xlu0 %v5886_v60, %s6864_s20  ;;  %5955 = vrot.lane.b32.xlu1 %v5885_v33, %s6864_s20  ;;  %v5856_v10 = vadd.f32 %v5770_v13, %v10683_v23  ;;  %v10688_v17 = vld [vmem:[#allocation46_spill] sm:$0xff] }
 0x970   : > { %v10689_v13 = vld [vmem:[#allocation22_spill] sm:$0xff] }
 0x971   : > { %v5887_v15 = vmax.f32 %v5855_v7, 0.0  ;;  %v5888_v54 = vmax.f32 %v5856_v10, 0.0 }
 0x972   : > { %v5784_v0 = vpop.permute.xlu1 %5783 }
 0x973   : > { %v5863_v6 = vadd.f32 %v5784_v0, %v10674_v50  ;;  %5959 = vrot.lane.b32.xlu1 %v5887_v15, %s6864_s20 }
 0x975   : > { %v5895_v35 = vmax.f32 %v5863_v6, 0.0 }
 0x976   : > { %v5786_v55 = vpop.permute.xlu0 %5785  ;;  %v5788_v29 = vpop.permute.xlu1 %5787 }
 0x977   : > { %v5864_v57 = vadd.f32 %v5786_v55, %v10675_v22  ;;  %v5865_v32 = vadd.f32 %v5788_v29, %v10676_v18  ;;  %5975 = vrot.lane.b32.xlu0 %v5895_v35, %s6864_s20  ;;  %v10690_v22 = vld [vmem:[#allocation25_spill] sm:$0xff] }
 0x979   : > { %v5896_v39 = vmax.f32 %v5864_v57, 0.0  ;;  %v5897_v16 = vmax.f32 %v5865_v32, 0.0 }
 0x97a   : > { %v5790_v43 = vpop.permute.xlu0 %5789  ;;  %v5792_v63 = vpop.permute.xlu1 %5791 }
 0x97b   : > { %v5866_v34 = vadd.f32 %v5790_v43, %v10677_v25  ;;  %v5867_v4 = vadd.f32 %v5792_v63, %v10678_v28  ;;  %5977 = vrot.lane.b32.xlu1 %v5896_v39, %s6864_s20  ;;  %5979 = vrot.lane.b32.xlu0 %v5897_v16, %s6864_s20  ;;  %v10691_v63 = vld [vmem:[#allocation21_spill] sm:$0xff]  ;;  %v10692_v28 = vld [vmem:[#allocation52_spill] sm:$0xff] }
 0x97d   : > { %v5898_v41 = vmax.f32 %v5866_v34, 0.0  ;;  %v5899_v8 = vmax.f32 %v5867_v4, 0.0 }
 0x97e   : > { %v5794_v19 = vpop.permute.xlu0 %5793  ;;  %v5796_v58 = vpop.permute.xlu1 %5795 }
 0x97f   : > { %v5868_v45 = vadd.f32 %v5794_v19, %v10679_v26  ;;  %v5869_v56 = vadd.f32 %v5796_v58, %v10680_v61  ;;  %5981 = vrot.lane.b32.xlu1 %v5898_v41, %s6864_s20  ;;  %5983 = vrot.lane.b32.xlu0 %v5899_v8, %s6864_s20  ;;  %v10693_v19 = vld [vmem:[#allocation24_spill] sm:$0xff] }
 0x981   : > { %v5900_v3 = vmax.f32 %v5868_v45, 0.0  ;;  %v5901_v42 = vmax.f32 %v5869_v56, 0.0 }
 0x982   : > { %v5798_v40 = vpop.permute.xlu0 %5797  ;;  %v5800_v11 = vpop.permute.xlu1 %5799 }
 0x983   : > { %v5870_v47 = vadd.f32 %v5798_v40, %v10681_v48  ;;  %v5871_v12 = vadd.f32 %v5800_v11, %v10682_v1  ;;  %5985 = vrot.lane.b32.xlu1 %v5900_v3, %s6864_s20  ;;  %5987 = vrot.lane.b32.xlu0 %v5901_v42, %s6864_s20 }
 0x985   : > { %v5902_v37 = vmax.f32 %v5870_v47, 0.0  ;;  %v5903_v46 = vmax.f32 %v5871_v12, 0.0 }
 0x986   : > { %v5802_v5 = vpop.permute.xlu0 %5801  ;;  %v5772_v24 = vpop.permute.xlu1 %5771 }
 0x987   : > { %v5872_v36 = vadd.f32 %v5802_v5, %v10684_v51  ;;  %5989 = vrot.lane.b32.xlu1 %v5902_v37, %s6864_s20  ;;  %5991 = vrot.lane.b32.xlu0 %v5903_v46, %s6864_s20  ;;  %v5857_v31 = vadd.f32 %v5772_v24, %v10685_v52 }
 0x989   : > { %v5904_v38 = vmax.f32 %v5872_v36, 0.0  ;;  %v5889_v14 = vmax.f32 %v5857_v31, 0.0 }
 0x98a   : > { %v5804_v62 = vpop.permute.xlu0 %5803  ;;  %v5774_v30 = vpop.permute.xlu1 %5773 }
 0x98b   : > { %v5873_v20 = vadd.f32 %v5804_v62, %v10686_v49  ;;  %5961 = vrot.lane.b32.xlu1 %v5888_v54, %s6864_s20  ;;  %5993 = vrot.lane.b32.xlu0 %v5904_v38, %s6864_s20  ;;  %v5858_v44 = vadd.f32 %v5774_v30, %v10687_v2 }
 0x98d   : > { %v5905_v9 = vmax.f32 %v5873_v20, 0.0  ;;  %v5890_v7 = vmax.f32 %v5858_v44, 0.0 }
 0x98e   : > { %v5806_v60 = vpop.permute.xlu0 %5805  ;;  %v5776_v33 = vpop.permute.xlu1 %5775 }
 0x98f   : > { %v5874_v21 = vadd.f32 %v5806_v60, %v10688_v17  ;;  %5995 = vrot.lane.b32.xlu0 %v5905_v9, %s6864_s20  ;;  %5963 = vrot.lane.b32.xlu1 %v5889_v14, %s6864_s20  ;;  %v5859_v0 = vadd.f32 %v5776_v33, %v10689_v13 }
 0x991   : > { %v5906_v15 = vmax.f32 %v5874_v21, 0.0  ;;  %v5891_v55 = vmax.f32 %v5859_v0, 0.0 }
 0x992   : > { %v5808_v50 = vpop.permute.xlu0 %5807  ;;  %v5778_v6 = vpop.permute.xlu1 %5777 }
 0x993   : > { %v5875_v35 = vadd.f32 %v5808_v50, %v9336_v53  ;;  %5997 = vrot.lane.b32.xlu0 %v5906_v15, %s6864_s20  ;;  %5965 = vrot.lane.b32.xlu1 %v5890_v7, %s6864_s20  ;;  %v5860_v57 = vadd.f32 %v5778_v6, %v10690_v22 }
 0x995   : > { %v5907_v29 = vmax.f32 %v5875_v35, 0.0  ;;  %v5892_v16 = vmax.f32 %v5860_v57, 0.0 }
 0x996   : > { %v5810_v18 = vpop.permute.xlu0 %5809  ;;  %v5780_v32 = vpop.permute.xlu1 %5779 }
 0x997   : > { %v5876_v39 = vadd.f32 %v5810_v18, %v9369_v59  ;;  %5999 = vrot.lane.b32.xlu0 %v5907_v29, %s6864_s20  ;;  %5967 = vrot.lane.b32.xlu1 %v5891_v55, %s6864_s20  ;;  %v5861_v53 = vadd.f32 %v5780_v32, %v10691_v63 }
 0x999   : > { %v5908_v43 = vmax.f32 %v5876_v39, 0.0  ;;  %v5893_v41 = vmax.f32 %v5861_v53, 0.0 }
 0x99a   : > { %v5812_v25 = vpop.permute.xlu0 %5811  ;;  %v5782_v34 = vpop.permute.xlu1 %5781 }
 0x99b   : > { %v5877_v4 = vadd.f32 %v5812_v25, %v10692_v28  ;;  %6001 = vrot.lane.b32.xlu0 %v5908_v43, %s6864_s20  ;;  %5969 = vrot.lane.b32.xlu1 %v5892_v16, %s6864_s20  ;;  %v5862_v59 = vadd.f32 %v5782_v34, %v10693_v19 }
 0x99d   : > { %v5909_v8 = vmax.f32 %v5877_v4, 0.0  ;;  %v5894_v45 = vmax.f32 %v5862_v59, 0.0 }
 0x99e   : > { %v5814_v58 = vpop.permute.xlu0 %5813 }
 0x99f   : > { %v5878_v26 = vadd.f32 %v5814_v58, %v9354_v27  ;;  %6003 = vrot.lane.b32.xlu0 %v5909_v8, %s6864_s20  ;;  %5971 = vrot.lane.b32.xlu1 %v5893_v41, %s6864_s20 }
 0x9a1   : > { %v5910_v61 = vmax.f32 %v5878_v26, 0.0 }
 0x9a3   : > { %6005 = vrot.lane.b32.xlu0 %v5910_v61, %s6864_s20  ;;  %5973 = vrot.lane.b32.xlu1 %v5894_v45, %s6864_s20  ;;  %s296_s20 = sand.u32 1, %s6843_s28  }
 0x9a4   : > { %s6187_s21 = sshll.u32 %s296_s20, 5  ;;  %s10436_s18 = scalar_lea.sflag [#allocation5], %s296_s20 }
 0x9a5   : > { %s298_s13 = scalar_lea.vmem [#allocation4], %s6187_s21 }
 0x9a6   : > { %s6121_s23 = sshll.u32 %s298_s13, 4  ;;  %s10429_s23 = int_to_ptr.vmem [resolvable:$true] %s6121_s23 }
 0x9a7   : > { %s6791_s24 = scalar_lea.vmem %s10429_s23, 512  ;;  %p6798_p0 = scmp.lt.s32.totalorder %s10429_s23, %s6796_s25 }
 0x9a8   : > { %p6792_p11 = scmp.ne.s32.totalorder %s10429_s23, %s6791_s24  ;;  %p6799_p1 = scmp.lt.s32.totalorder %s6797_s19, %s6791_s24 }
 0x9aa   : > { %p6793_p12 = pnand %p6792_p11, %p6952_p5  ;;  %p6800_p2 = por %p6799_p1, %p6798_p0 }
 0x9ac   : > { %p6794_p13 = pneg %p6793_p12 }
 0x9ae   : > { %p6801_p3 = pnand %p6800_p2, %p6794_p13 }
 0x9d5   : > { %v5946_v56 = vpop.permute.xlu0 %5945  ;;  %v5944_v3 = vpop.permute.xlu1 %5943 }
 0x9d6   : > { %6039 = vxpose.xlu1.b32.start [1/16] (narrow) %v5944_v3, 16 }
 0x9d9   : > { %v5950_v42 = vpop.permute.xlu0 %5949  ;;  %v5948_v40 = vpop.permute.xlu1 %5947 }
 0x9da   : > { %6040 = vxpose.xlu1.b32.cont [2/16] (narrow) %v5946_v56, 16 }
 0x9dd   : > { %v5952_v11 = vpop.permute.xlu1 %5951  ;;  %v5954_v48 = vpop.permute.xlu0 %5953 }
 0x9de   : > { %6041 = vxpose.xlu1.b32.cont [3/16] (narrow) %v5948_v40, 16 }
 0x9e1   : > { %v5956_v27 = vpop.permute.xlu1 %5955  ;;  %v5958_v47 = vpop.permute.xlu0 %5957 }
 0x9e2   : > { %6042 = vxpose.xlu1.b32.cont [4/16] (narrow) %v5950_v42, 16 }
 0x9e5   : > { %v5960_v1 = vpop.permute.xlu1 %5959 }
 0x9e6   : > { %6043 = vxpose.xlu1.b32.cont [5/16] (narrow) %v5952_v11, 16 }
 0x9e9   : > { %v5976_v12 = vpop.permute.xlu0 %5975 }
 0x9ea   : > { %6071 = vxpose.xlu0.b32.start [1/16] (narrow) %v5976_v12, 16  ;;  %6044 = vxpose.xlu1.b32.cont [6/16] (narrow) %v5954_v48, 16 }
 0x9ed   : > { %v5980_v23 = vpop.permute.xlu0 %5979  ;;  %v5978_v10 = vpop.permute.xlu1 %5977 }
 0x9ee   : > { %6045 = vxpose.xlu1.b32.cont [7/16] (narrow) %v5956_v27, 16  ;;  %6072 = vxpose.xlu0.b32.cont [2/16] (narrow) %v5978_v10, 16 }
 0x9f1   : > { %v5984_v37 = vpop.permute.xlu0 %5983  ;;  %v5982_v46 = vpop.permute.xlu1 %5981 }
 0x9f2   : > { %6046 = vxpose.xlu1.b32.cont [8/16] (narrow) %v5958_v47, 16  ;;  %6073 = vxpose.xlu0.b32.cont [3/16] (narrow) %v5980_v23, 16 }
 0x9f5   : > { %v5988_v5 = vpop.permute.xlu0 %5987  ;;  %v5986_v24 = vpop.permute.xlu1 %5985 }
 0x9f6   : > { %6047 = vxpose.xlu1.b32.cont [9/16] (narrow) %v5960_v1, 16  ;;  %6074 = vxpose.xlu0.b32.cont [4/16] (narrow) %v5982_v46, 16 }
 0x9f9   : > { %v5990_v51 = vpop.permute.xlu1 %5989  ;;  %v5992_v36 = vpop.permute.xlu0 %5991 }
 0x9fa   : > { %6075 = vxpose.xlu0.b32.cont [5/16] (narrow) %v5984_v37, 16 }
 0x9fd   : > { %v5962_v54 = vpop.permute.xlu1 %5961  ;;  %v5994_v38 = vpop.permute.xlu0 %5993 }
 0x9fe   : > { %6076 = vxpose.xlu0.b32.cont [6/16] (narrow) %v5986_v24, 16  ;;  %6048 = vxpose.xlu1.b32.cont [10/16] (narrow) %v5962_v54, 16 }
 0xa01   : > { %v5964_v52 = vpop.permute.xlu1 %5963  ;;  %v5996_v62 = vpop.permute.xlu0 %5995 }
 0xa02   : > { %6077 = vxpose.xlu0.b32.cont [7/16] (narrow) %v5988_v5, 16  ;;  %6049 = vxpose.xlu1.b32.cont [11/16] (narrow) %v5964_v52, 16 }
 0xa05   : > { %v5966_v31 = vpop.permute.xlu1 %5965  ;;  %v5998_v49 = vpop.permute.xlu0 %5997 }
 0xa06   : > { %6078 = vxpose.xlu0.b32.cont [8/16] (narrow) %v5990_v51, 16  ;;  %6050 = vxpose.xlu1.b32.cont [12/16] (narrow) %v5966_v31, 16 }
 0xa09   : > { %v5968_v30 = vpop.permute.xlu1 %5967  ;;  %v6000_v9 = vpop.permute.xlu0 %5999 }
 0xa0a   : > { %6079 = vxpose.xlu0.b32.cont [9/16] (narrow) %v5992_v36, 16  ;;  %6051 = vxpose.xlu1.b32.cont [13/16] (narrow) %v5968_v30, 16 }
 0xa0d   : > { %v5970_v20 = vpop.permute.xlu1 %5969  ;;  %v6002_v44 = vpop.permute.xlu0 %6001 }
 0xa0e   : > { %6080 = vxpose.xlu0.b32.cont [10/16] (narrow) %v5994_v38, 16  ;;  %6052 = vxpose.xlu1.b32.cont [14/16] (narrow) %v5970_v20, 16 }
 0xa11   : > { %v5972_v14 = vpop.permute.xlu1 %5971  ;;  %v6004_v60 = vpop.permute.xlu0 %6003 }
 0xa12   : > { %6081 = vxpose.xlu0.b32.cont [11/16] (narrow) %v5996_v62, 16  ;;  %6053 = vxpose.xlu1.b32.cont [15/16] (narrow) %v5972_v14, 16 }
 0xa15   : > { %v5974_v2 = vpop.permute.xlu1 %5973  ;;  %v6006_v33 = vpop.permute.xlu0 %6005 }
 0xa16   : > { %6082 = vxpose.xlu0.b32.cont [12/16] (narrow) %v5998_v49, 16  ;;  %6054 = vxpose.xlu1.b32.end [16/16] (narrow) %v5974_v2, 16 }
 0xa1a   : > { %6083 = vxpose.xlu0.b32.cont [13/16] (narrow) %v6000_v9, 16 }
 0xa1e   : > { %6084 = vxpose.xlu0.b32.cont [14/16] (narrow) %v6002_v44, 16 }
 0xa22   : > { %6085 = vxpose.xlu0.b32.cont [15/16] (narrow) %v6004_v60, 16 }
 0xa26   : > { %6086 = vxpose.xlu0.b32.end [16/16] (narrow) %v6006_v33, 16 }
 0xa56   : > { %v6055_v17 = vpop.trf.xlu1 }
 0xa57   : > { %6103 = vst [vmem:[%s298_s13] sm:$0xff] %v6055_v17 }
 0xa5a   : > { %v6056_v21 = vpop.trf.xlu1 }
 0xa5b   : > { %6105 = vst [vmem:[%s298_s13 + $0x10] sm:$0xff] %v6056_v21 }
 0xa66   : > { %v6087_v7 = vpop.trf.xlu0 }
 0xa67   : > { %6104 = vst [vmem:[%s298_s13 + $0x8] sm:$0xff] %v6087_v7 }
 0xa6a   : > { %v6088_v15 = vpop.trf.xlu0 }
 0xa6b   : > { %6106 = vst [vmem:[%s298_s13 + $0x18] sm:$0xff] %v6088_v15 }
 0xa6c   : > { %6804 = shalt.err (!%p6801_p3)
}
 0xa6d   : > { %s6805_s20 = scalar_lea.hbm %s10434_s17, 512  ;;  %s6809_s26 = scalar_lea.hbm %s10485_s8, 1024 }
 0xa6e   : > { %p6806_p4 = scmp.ne.s32.totalorder %s10434_s17, %s6805_s20  ;;  %p6810_p9 = scmp.lt.s32.totalorder %s10434_s17, %s10485_s8 }
 0xa6f   : > { %p6811_p10 = scmp.lt.s32.totalorder %s6809_s26, %s6805_s20 }
 0xa70   : > { %p6807_p7 = pnand %p6806_p4, %p6952_p5 }
 0xa71   : > { %p6812_p11 = por %p6811_p10, %p6810_p9 }
 0xa72   : > { %p6808_p8 = pneg %p6807_p7 }
 0xa74   : > { %p6813_p12 = pnand %p6812_p11, %p6808_p8 }
 0xa76   : > { %6816 = shalt.err (!%p6813_p12)
}
 0xa77   : > { %s6868_s24 = smov 256  }
 0xa78   : > { %6597 = dma.vmem_to_hbm [thread:$0]  (%p6952_p5), %s10429_s23, 512, %s10434_s17, %s10436_s18, %s6868_s24, %s6868_s24, %s6854_s22  }
 0xa79 PF: > { %p6603_p13 = scmp.ge.s32.totalorder %s6851_s30, 2  ;;  %s6136_s9 = sand.u32 1, %s6839_s27  }
 0xa7a   : > { %s6137_s25 = scalar_lea.sflag [#allocation5], %s6136_s9 }
 0xa7b   : > { %p6600_p0 = pnand %p6603_p13, %p6956_p6 }
 0xa7d   : > { %p6601_p1 = pneg %p6600_p0 }
 0xa7f   : > { %6834 = dma.done.wait (%p6601_p1), %s6137_s25, 512  }
 0xa80   : > { %6836 = vsyncadd (%p6601_p1), %s6137_s25, 4294966784  ;;  %p18_p2 = scmp.ge.s32.totalorder %s6939_s11, 4   ;;  %s10694_s27 = smov %s6843_s28 }
 0xa81   : > { %s10695_s28 = smov %s6847_s29  ;;  %s10696_s29 = smov %s6950_s14 }
 0xa82   : > { %s10697_s30 = smov %s6939_s11  ;;  %20 = sbr.rel (!%p18_p2) target bundleno = 3 (0x3), region = 91 }
 0xa87   :  { %6142 = vsyncpa [#allocation5], 1 }
 0xa88   :  { %6144 = vsyncpa [#allocation5 + $0x1], 1 }

</bundles_post_ra>
